<compile_context>
chip_gen: v7x
topology: tpu7x:2x2x1
jax: 0.10.0
libtpu: 0.0.40
codegen_flags: <defaults>
</compile_context>

<pallas_src>
import functools

import jax
import jax.numpy as jnp
from jax.experimental import pallas as pl
from jax.experimental.pallas import tpu as pltpu

EPS = 1e-5     # nn.BatchNorm2d default eps
LANE = 128     # TPU lane width


def _round_up(x, m):
    return (x + m - 1) // m * m


def _parallel_params():
    return pltpu.CompilerParams(dimension_semantics=("parallel",))


# ----------------------------- Pallas kernel bodies ------------------------ #

def _matmul_stats_kernel(x_ref, w_ref, y_ref, sum_ref, sq_ref):
    """y = x @ w (bf16 operands, f32 accumulate) + per-tile channel sum/sumsq."""
    x = x_ref[...].astype(jnp.bfloat16)
    y = jnp.dot(x, w_ref[...], preferred_element_type=jnp.float32)
    y_ref[...] = y
    s = jnp.sum(y, axis=0, keepdims=True)
    q = jnp.sum(y * y, axis=0, keepdims=True)
    sum_ref[...] = jnp.broadcast_to(s, sum_ref.shape)
    sq_ref[...] = jnp.broadcast_to(q, sq_ref.shape)


def _bn_relu_kernel(y_ref, sc_ref, sh_ref, o_ref):
    """out = relu(y * scale + shift), tiled over rows."""
    a = jnp.maximum(y_ref[...] * sc_ref[...] + sh_ref[...], 0.0)
    o_ref[...] = a.astype(o_ref.dtype)


def _conv3x3_stats_kernel(x_ref, w_ref, y_ref, sum_ref, sq_ref, acc_ref,
                          *, hout, wout, cw):
    """3x3 conv (stride 1) as 9 shifted matmuls accumulated in VMEM + stats."""
    for t in range(9):
        dh, dw = divmod(t, 3)
        win = x_ref[0, dh:dh + hout, dw:dw + wout, :]           # haloed slice
        win2d = win.reshape(hout * wout, cw)
        contrib = jnp.dot(win2d, w_ref[t], preferred_element_type=jnp.float32)
        if t == 0:
            acc_ref[...] = contrib
        else:
            acc_ref[...] += contrib
    y = acc_ref[...]
    y_ref[...] = y.reshape(1, hout, wout, cw)
    s = jnp.sum(y, axis=0, keepdims=True)
    q = jnp.sum(y * y, axis=0, keepdims=True)
    sum_ref[...] = jnp.broadcast_to(s, sum_ref.shape)
    sq_ref[...] = jnp.broadcast_to(q, sq_ref.shape)


def _bn_relu_matmul_stats_kernel(y_ref, sc_ref, sh_ref, w_ref,
                                 o_ref, sum_ref, sq_ref,
                                 *, rows_valid, tile_rows):
    """out = relu(y*scale+shift) @ w, with bn-stats of the output (fused conv3)."""
    a = jnp.maximum(y_ref[...] * sc_ref[...] + sh_ref[...], 0.0)
    if rows_valid is not None:  # mask row padding so BN stats stay exact
        rid = pl.program_id(0) * tile_rows + jax.lax.broadcasted_iota(
            jnp.int32, a.shape, 0)
        a = jnp.where(rid < rows_valid, a, 0.0)
    y = jnp.dot(a.astype(jnp.bfloat16), w_ref[...],
                preferred_element_type=jnp.float32)
    o_ref[...] = y
    s = jnp.sum(y, axis=0, keepdims=True)
    q = jnp.sum(y * y, axis=0, keepdims=True)
    sum_ref[...] = jnp.broadcast_to(s, sum_ref.shape)
    sq_ref[...] = jnp.broadcast_to(q, sq_ref.shape)


def _bn_residual_kernel(y_ref, sc_ref, sh_ref, res_ref, o_ref, *, nonlin):
    """out = [relu](y*scale + shift + residual)."""
    out = y_ref[...] * sc_ref[...] + sh_ref[...] + res_ref[...]
    if nonlin:
        out = jnp.maximum(out, 0.0)
    o_ref[...] = out.astype(o_ref.dtype)


# ------------------------------ pallas_call wrappers ----------------------- #

def _conv1x1_bn_stats(x2d, w, *, tile_rows):
    mp, kdim = x2d.shape
    cout = w.shape[1]
    tiles = mp // tile_rows
    return pl.pallas_call(
        _matmul_stats_kernel,
        grid=(tiles,),
        in_specs=[pl.BlockSpec((tile_rows, kdim), lambda i: (i, 0)),
                  pl.BlockSpec((kdim, cout), lambda i: (0, 0))],
        out_specs=[pl.BlockSpec((tile_rows, cout), lambda i: (i, 0)),
                   pl.BlockSpec((8, cout), lambda i: (i, 0)),
                   pl.BlockSpec((8, cout), lambda i: (i, 0))],
        out_shape=[jax.ShapeDtypeStruct((mp, cout), jnp.float32),
                   jax.ShapeDtypeStruct((tiles * 8, cout), jnp.float32),
                   jax.ShapeDtypeStruct((tiles * 8, cout), jnp.float32)],
        compiler_params=_parallel_params(),
        cost_estimate=pl.CostEstimate(
            flops=2 * mp * kdim * cout, transcendentals=0,
            bytes_accessed=mp * kdim * 4 + kdim * cout * 2 + mp * cout * 4),
    )(x2d, w)


def _bn_relu_apply(y, scale, shift, *, tile_rows, out_dtype):
    mp, c = y.shape
    tiles = mp // tile_rows
    return pl.pallas_call(
        _bn_relu_kernel,
        grid=(tiles,),
        in_specs=[pl.BlockSpec((tile_rows, c), lambda i: (i, 0)),
                  pl.BlockSpec((1, c), lambda i: (0, 0)),
                  pl.BlockSpec((1, c), lambda i: (0, 0))],
        out_specs=pl.BlockSpec((tile_rows, c), lambda i: (i, 0)),
        out_shape=jax.ShapeDtypeStruct((mp, c), out_dtype),
        compiler_params=_parallel_params(),
    )(y, scale, shift)


def _conv3x3_bn_stats(ap, w_taps, *, hout, wout):
    n, hp, wp, cw = ap.shape
    kern = functools.partial(_conv3x3_stats_kernel, hout=hout, wout=wout, cw=cw)
    return pl.pallas_call(
        kern,
        grid=(n,),
        in_specs=[pl.BlockSpec((1, hp, wp, cw), lambda b: (b, 0, 0, 0)),
                  pl.BlockSpec((9, cw, cw), lambda b: (0, 0, 0))],
        out_specs=[pl.BlockSpec((1, hout, wout, cw), lambda b: (b, 0, 0, 0)),
                   pl.BlockSpec((8, cw), lambda b: (b, 0)),
                   pl.BlockSpec((8, cw), lambda b: (b, 0))],
        out_shape=[jax.ShapeDtypeStruct((n, hout, wout, cw), jnp.float32),
                   jax.ShapeDtypeStruct((n * 8, cw), jnp.float32),
                   jax.ShapeDtypeStruct((n * 8, cw), jnp.float32)],
        scratch_shapes=[pltpu.VMEM((hout * wout, cw), jnp.float32)],
        compiler_params=_parallel_params(),
        cost_estimate=pl.CostEstimate(
            flops=2 * 9 * n * hout * wout * cw * cw, transcendentals=0,
            bytes_accessed=(n * hp * wp * cw * 2 + 9 * cw * cw * 2
                            + n * hout * wout * cw * 4)),
    )(ap, w_taps)


def _bn_relu_conv1x1_stats(y_in, scale, shift, w, *, tile_rows, rows_valid):
    mp, cin = y_in.shape
    cout = w.shape[1]
    tiles = mp // tile_rows
    kern = functools.partial(_bn_relu_matmul_stats_kernel,
                             rows_valid=rows_valid, tile_rows=tile_rows)
    return pl.pallas_call(
        kern,
        grid=(tiles,),
        in_specs=[pl.BlockSpec((tile_rows, cin), lambda i: (i, 0)),
                  pl.BlockSpec((1, cin), lambda i: (0, 0)),
                  pl.BlockSpec((1, cin), lambda i: (0, 0)),
                  pl.BlockSpec((cin, cout), lambda i: (0, 0))],
        out_specs=[pl.BlockSpec((tile_rows, cout), lambda i: (i, 0)),
                   pl.BlockSpec((8, cout), lambda i: (i, 0)),
                   pl.BlockSpec((8, cout), lambda i: (i, 0))],
        out_shape=[jax.ShapeDtypeStruct((mp, cout), jnp.float32),
                   jax.ShapeDtypeStruct((tiles * 8, cout), jnp.float32),
                   jax.ShapeDtypeStruct((tiles * 8, cout), jnp.float32)],
        compiler_params=_parallel_params(),
        cost_estimate=pl.CostEstimate(
            flops=2 * mp * cin * cout, transcendentals=0,
            bytes_accessed=mp * cin * 4 + cin * cout * 2 + mp * cout * 4),
    )(y_in, scale, shift, w)


def _bn_residual_apply(y, scale, shift, res, *, tile_rows, nonlin):
    mp, c = y.shape
    tiles = mp // tile_rows
    kern = functools.partial(_bn_residual_kernel, nonlin=nonlin)
    return pl.pallas_call(
        kern,
        grid=(tiles,),
        in_specs=[pl.BlockSpec((tile_rows, c), lambda i: (i, 0)),
                  pl.BlockSpec((1, c), lambda i: (0, 0)),
                  pl.BlockSpec((1, c), lambda i: (0, 0)),
                  pl.BlockSpec((tile_rows, c), lambda i: (i, 0))],
        out_specs=pl.BlockSpec((tile_rows, c), lambda i: (i, 0)),
        out_shape=jax.ShapeDtypeStruct((mp, c), jnp.float32),
        compiler_params=_parallel_params(),
    )(y, scale, shift, res)


# ------------------------------- BN finalize ------------------------------- #

def _finalize_bn(sum_out, sq_out, count, gamma, beta):
    """Reduce per-tile partials -> per-channel (scale, shift) for training-mode BN."""
    c = sum_out.shape[-1]
    ssum = jnp.sum(sum_out.reshape(-1, 8, c)[:, 0, :], axis=0)
    ssq = jnp.sum(sq_out.reshape(-1, 8, c)[:, 0, :], axis=0)
    mean = ssum / count
    var = jnp.maximum(ssq / count - mean * mean, 0.0)   # biased variance
    inv = jax.lax.rsqrt(var + EPS)
    g = gamma.reshape(-1)
    b = beta.reshape(-1)
    scale = (g * inv).reshape(1, c).astype(jnp.float32)
    shift = (b - mean * g * inv).reshape(1, c).astype(jnp.float32)
    return scale, shift


# ------------------------------ module wrapper ------------------------------ #

def init_bottleneck_params(key, inplanes, planes, base_width=64,
                           embedding_dim=None):
    """Deterministic synthetic parameters matching the PyTorch __init__ shapes."""
    width = int(planes * base_width / 64)
    out_dim = embedding_dim if embedding_dim is not None else planes * 4
    ks = jax.random.split(key, 9)
    p = {
        "w1": 0.1 * jax.random.normal(ks[0], (inplanes, width), jnp.float32),
        "w2": 0.1 * jax.random.normal(ks[1], (3, 3, width, width), jnp.float32),
        "w3": 0.1 * jax.random.normal(ks[2], (width, out_dim), jnp.float32),
        "g1": 1.0 + 0.1 * jax.random.normal(ks[3], (1, width), jnp.float32),
        "b1": 0.1 * jax.random.normal(ks[4], (1, width), jnp.float32),
        "g2": 1.0 + 0.1 * jax.random.normal(ks[5], (1, width), jnp.float32),
        "b2": 0.1 * jax.random.normal(ks[6], (1, width), jnp.float32),
        "g3": 1.0 + 0.1 * jax.random.normal(ks[7], (1, out_dim), jnp.float32),
        "b3": 0.1 * jax.random.normal(ks[8], (1, out_dim), jnp.float32),
    }
    return p, width, out_dim


def bottleneck_forward(x_nchw, params, *, stride=1, nonlin=True, row_tile=512):
    """Bottleneck forward (downsample=None -> identity residual, training-mode BN)."""
    # TODO(synk): stride > 1 and the optional `downsample` module are not
    # implemented; identity residual requires stride == 1 and out_dim == inplanes.
    assert stride == 1
    n, cin, h, w = x_nchw.shape
    width = params["w1"].shape[1]
    out_dim = params["w3"].shape[1]
    assert out_dim == cin, "identity residual needs out_dim == inplanes"

    cin_p = _round_up(cin, LANE)
    cw = _round_up(width, LANE)
    cout_p = _round_up(out_dim, LANE)

    m = n * h * w
    tm = min(row_tile, _round_up(m, 8))
    mp = _round_up(m, tm)

    # channels-last 2-D slab, padded to lane-dense channels and full row tiles
    x_nhwc = jnp.transpose(x_nchw, (0, 2, 3, 1)).astype(jnp.float32)
    x2d = jnp.pad(x_nhwc.reshape(m, cin), ((0, mp - m), (0, cin_p - cin)))

    # padded, bf16 weights (resident blocks) and padded BN affine params
    w1 = jnp.pad(params["w1"], ((0, cin_p - cin), (0, cw - width))).astype(jnp.bfloat16)
    w2 = jnp.pad(params["w2"], ((0, 0), (0, 0), (0, cw - width), (0, cw - width)))
    w2 = w2.reshape(9, cw, cw).astype(jnp.bfloat16)
    w3 = jnp.pad(params["w3"], ((0, cw - width), (0, cout_p - out_dim))).astype(jnp.bfloat16)
    g1 = jnp.pad(params["g1"], ((0, 0), (0, cw - width)))
    b1 = jnp.pad(params["b1"], ((0, 0), (0, cw - width)))
    g2 = jnp.pad(params["g2"], ((0, 0), (0, cw - width)))
    b2 = jnp.pad(params["b2"], ((0, 0), (0, cw - width)))
    g3 = jnp.pad(params["g3"], ((0, 0), (0, cout_p - out_dim)))
    b3 = jnp.pad(params["b3"], ((0, 0), (0, cout_p - out_dim)))

    # ---- conv1 (1x1) -> bn1 stats -> apply bn1+relu --------------------------
    y1, s1, q1 = _conv1x1_bn_stats(x2d, w1, tile_rows=tm)
    scale1, shift1 = _finalize_bn(s1, q1, m, g1, b1)
    a1 = _bn_relu_apply(y1, scale1, shift1, tile_rows=tm, out_dtype=jnp.bfloat16)

    # ---- conv2 (3x3, pad=1, stride=1): 9 in-kernel taps over a haloed tile ----
    a1_img = a1[:m].reshape(n, h, w, cw)
    ap = jnp.pad(a1_img, ((0, 0), (1, 1), (1, 1), (0, 0)))     # spatial zero halo
    hout, wout = h, w
    y2, s2, q2 = _conv3x3_bn_stats(ap, w2, hout=hout, wout=wout)
    scale2, shift2 = _finalize_bn(s2, q2, n * hout * wout, g2, b2)

    # ---- conv3 (1x1) with fused bn2-apply+relu; bn3 stats ---------------------
    m2 = n * hout * wout
    tm2 = min(row_tile, _round_up(m2, 8))
    mp2 = _round_up(m2, tm2)
    y2_2d = jnp.pad(y2.reshape(m2, cw), ((0, mp2 - m2), (0, 0)))
    rows_valid = None if mp2 == m2 else m2
    y3, s3, q3 = _bn_relu_conv1x1_stats(y2_2d, scale2, shift2, w3,
                                        tile_rows=tm2, rows_valid=rows_valid)
    scale3, shift3 = _finalize_bn(s3, q3, m2, g3, b3)

    # ---- bn3-apply + identity residual + optional relu ------------------------
    # stride==1 and out_dim==cin  =>  mp == mp2 and cin_p == cout_p, reuse x2d.
    out2d = _bn_residual_apply(y3, scale3, shift3, x2d,
                               tile_rows=tm2, nonlin=nonlin)

    out = out2d[:m2, :out_dim].reshape(n, hout, wout, out_dim)
    return jnp.transpose(out, (0, 3, 1, 2))   # back to NCHW


# ---------------------------------- main ------------------------------------ #

if __name__ == "__main__":
    # inplanes == planes * expansion so the identity residual (downsample=None)
    # adds cleanly; stride=1, nonlin=True.  M = 4*16*16 = 1024 -> 2 row tiles.
    N, INPLANES, PLANES, H, W = 4, 16, 4, 16, 16

    key = jax.random.PRNGKey(0)
    k_param, k_x = jax.random.split(key)
    params, width, out_dim = init_bottleneck_params(k_param, INPLANES, PLANES)

    x = jax.random.normal(k_x, (N, INPLANES, H, W), jnp.float32)

    fwd = jax.jit(functools.partial(bottleneck_forward, stride=1, nonlin=True))
    out = jax.block_until_ready(fwd(x, params))

    assert out.shape == (N, out_dim, H, W), out.shape
    assert bool(jnp.all(jnp.isfinite(out)))
    print("KERNEL_OK")
</pallas_src>

<mosaic_0001>
module attributes {stable_mosaic.version = 11 : i64} {
  func.func @_bn_relu_kernel(%arg0: i32, %arg1: memref<512x128xf32, #tpu.memory_space<vmem>>, %arg2: memref<1x128xf32, #tpu.memory_space<vmem>>, %arg3: memref<1x128xf32, #tpu.memory_space<vmem>>, %arg4: memref<512x128xbf16, #tpu.memory_space<vmem>>) attributes {dimension_semantics = [#tpu.dimension_semantics<parallel>], iteration_bounds = array<i64: 2>, scalar_prefetch = 0 : i64, scratch_operands = 0 : i64, tpu.core_type = #tpu.core_type<tc>, window_params = [{transform_indices = @transform_0, window_bounds = array<i64: 512, 128>}, {pipeline_mode = #tpu.pipeline_mode<synchronous>, transform_indices = @transform_1, window_bounds = array<i64: 1, 128>}, {pipeline_mode = #tpu.pipeline_mode<synchronous>, transform_indices = @transform_2, window_bounds = array<i64: 1, 128>}, {transform_indices = @transform_3, window_bounds = array<i64: 512, 128>}]} {
    %c0 = arith.constant 0 : index
    %c0_0 = arith.constant 0 : index
    %0 = vector.load %arg1[%c0, %c0_0] : memref<512x128xf32, #tpu.memory_space<vmem>>, vector<512x128xf32>
    %c0_1 = arith.constant 0 : index
    %c0_2 = arith.constant 0 : index
    %1 = vector.load %arg2[%c0_1, %c0_2] : memref<1x128xf32, #tpu.memory_space<vmem>>, vector<1x128xf32>
    %2 = vector.broadcast %1 : vector<1x128xf32> to vector<512x128xf32>
    %3 = arith.mulf %0, %2 : vector<512x128xf32>
    %c0_3 = arith.constant 0 : index
    %c0_4 = arith.constant 0 : index
    %4 = vector.load %arg3[%c0_3, %c0_4] : memref<1x128xf32, #tpu.memory_space<vmem>>, vector<1x128xf32>
    %5 = vector.broadcast %4 : vector<1x128xf32> to vector<512x128xf32>
    %6 = arith.addf %3, %5 : vector<512x128xf32>
    %cst = arith.constant 0.000000e+00 : f32
    %7 = vector.broadcast %cst : f32 to vector<512x128xf32>
    %8 = arith.maximumf %6, %7 : vector<512x128xf32>
    %9 = arith.truncf %8 : vector<512x128xf32> to vector<512x128xbf16>
    %c0_5 = arith.constant 0 : index
    %c0_6 = arith.constant 0 : index
    %10 = vector.load %arg4[%c0_5, %c0_6] : memref<512x128xbf16, #tpu.memory_space<vmem>>, vector<512x128xbf16>
    tpu.vector_store %arg4[%c0_5, %c0_6], %9 {strides = array<i32>} : memref<512x128xbf16, #tpu.memory_space<vmem>>, vector<512x128xbf16>,
    return
  }
  func.func @transform_0(%arg0: i32) -> (i32, i32) {
    %c0_i32 = arith.constant 0 : i32
    %c0_i32_0 = arith.constant 0 : i32
    return %arg0, %c0_i32 : i32, i32
  }
  func.func @transform_1(%arg0: i32) -> (i32, i32) {
    %c0_i32 = arith.constant 0 : i32
    %c0_i32_0 = arith.constant 0 : i32
    %c0_i32_1 = arith.constant 0 : i32
    return %c0_i32, %c0_i32_0 : i32, i32
  }
  func.func @transform_2(%arg0: i32) -> (i32, i32) {
    %c0_i32 = arith.constant 0 : i32
    %c0_i32_0 = arith.constant 0 : i32
    %c0_i32_1 = arith.constant 0 : i32
    return %c0_i32, %c0_i32_0 : i32, i32
  }
  func.func @transform_3(%arg0: i32) -> (i32, i32) {
    %c0_i32 = arith.constant 0 : i32
    %c0_i32_0 = arith.constant 0 : i32
    return %arg0, %c0_i32 : i32, i32
  }
}

module attributes {stable_mosaic.version = 11 : i64} {
  func.func @_matmul_stats_kernel(%arg0: i32, %arg1: memref<512x128xf32, #tpu.memory_space<vmem>>, %arg2: memref<128x128xbf16, #tpu.memory_space<vmem>>, %arg3: memref<512x128xf32, #tpu.memory_space<vmem>>, %arg4: memref<8x128xf32, #tpu.memory_space<vmem>>, %arg5: memref<8x128xf32, #tpu.memory_space<vmem>>) attributes {dimension_semantics = [#tpu.dimension_semantics<parallel>], iteration_bounds = array<i64: 2>, scalar_prefetch = 0 : i64, scratch_operands = 0 : i64, tpu.core_type = #tpu.core_type<tc>, window_params = [{transform_indices = @transform_0, window_bounds = array<i64: 512, 128>}, {pipeline_mode = #tpu.pipeline_mode<synchronous>, transform_indices = @transform_1, window_bounds = array<i64: 128, 128>}, {transform_indices = @transform_2, window_bounds = array<i64: 512, 128>}, {transform_indices = @transform_3, window_bounds = array<i64: 8, 128>}, {transform_indices = @transform_4, window_bounds = array<i64: 8, 128>}]} {
    %c0 = arith.constant 0 : index
    %c0_0 = arith.constant 0 : index
    %0 = vector.load %arg1[%c0, %c0_0] : memref<512x128xf32, #tpu.memory_space<vmem>>, vector<512x128xf32>
    %1 = arith.truncf %0 : vector<512x128xf32> to vector<512x128xbf16>
    %c0_1 = arith.constant 0 : index
    %c0_2 = arith.constant 0 : index
    %2 = vector.load %arg2[%c0_1, %c0_2] : memref<128x128xbf16, #tpu.memory_space<vmem>>, vector<128x128xbf16>
    %cst = arith.constant dense<0.000000e+00> : vector<512x128xf32>
    %3 = tpu.matmul %1, %2, %cst {dimension_numbers = #tpu.dot_dimension_numbers<[1], [0], [0], [1], [0, 0, 1, 1], [], []>} : vector<512x128xbf16>, vector<128x128xbf16>, vector<512x128xf32> -> vector<512x128xf32>
    %c0_3 = arith.constant 0 : index
    %c0_4 = arith.constant 0 : index
    %4 = vector.load %arg3[%c0_3, %c0_4] : memref<512x128xf32, #tpu.memory_space<vmem>>, vector<512x128xf32>
    tpu.vector_store %arg3[%c0_3, %c0_4], %3 {strides = array<i32>} : memref<512x128xf32, #tpu.memory_space<vmem>>, vector<512x128xf32>,
    %cst_5 = arith.constant dense<0.000000e+00> : vector<128xf32>
    %5 = vector.multi_reduction <add>, %3, %cst_5 [0] : vector<512x128xf32> to vector<128xf32>
    %6 = vector.shape_cast %5 : vector<128xf32> to vector<1x128xf32>
    %7 = arith.mulf %3, %3 : vector<512x128xf32>
    %cst_6 = arith.constant dense<0.000000e+00> : vector<128xf32>
    %8 = vector.multi_reduction <add>, %7, %cst_6 [0] : vector<512x128xf32> to vector<128xf32>
    %9 = vector.shape_cast %8 : vector<128xf32> to vector<1x128xf32>
    %10 = vector.shape_cast %6 : vector<1x128xf32> to vector<1x128xf32>
    %11 = vector.broadcast %10 : vector<1x128xf32> to vector<8x128xf32>
    %c0_7 = arith.constant 0 : index
    %c0_8 = arith.constant 0 : index
    %12 = vector.load %arg4[%c0_7, %c0_8] : memref<8x128xf32, #tpu.memory_space<vmem>>, vector<8x128xf32>
    tpu.vector_store %arg4[%c0_7, %c0_8], %11 {strides = array<i32>} : memref<8x128xf32, #tpu.memory_space<vmem>>, vector<8x128xf32>,
    %13 = vector.shape_cast %9 : vector<1x128xf32> to vector<1x128xf32>
    %14 = vector.broadcast %13 : vector<1x128xf32> to vector<8x128xf32>
    %c0_9 = arith.constant 0 : index
    %c0_10 = arith.constant 0 : index
    %15 = vector.load %arg5[%c0_9, %c0_10] : memref<8x128xf32, #tpu.memory_space<vmem>>, vector<8x128xf32>
    tpu.vector_store %arg5[%c0_9, %c0_10], %14 {strides = array<i32>} : memref<8x128xf32, #tpu.memory_space<vmem>>, vector<8x128xf32>,
    return
  }
  func.func @transform_0(%arg0: i32) -> (i32, i32) {
    %c0_i32 = arith.constant 0 : i32
    %c0_i32_0 = arith.constant 0 : i32
    return %arg0, %c0_i32 : i32, i32
  }
  func.func @transform_1(%arg0: i32) -> (i32, i32) {
    %c0_i32 = arith.constant 0 : i32
    %c0_i32_0 = arith.constant 0 : i32
    %c0_i32_1 = arith.constant 0 : i32
    return %c0_i32, %c0_i32_0 : i32, i32
  }
  func.func @transform_2(%arg0: i32) -> (i32, i32) {
    %c0_i32 = arith.constant 0 : i32
    %c0_i32_0 = arith.constant 0 : i32
    return %arg0, %c0_i32 : i32, i32
  }
  func.func @transform_3(%arg0: i32) -> (i32, i32) {
    %c0_i32 = arith.constant 0 : i32
    %c0_i32_0 = arith.constant 0 : i32
    return %arg0, %c0_i32 : i32, i32
  }
  func.func @transform_4(%arg0: i32) -> (i32, i32) {
    %c0_i32 = arith.constant 0 : i32
    %c0_i32_0 = arith.constant 0 : i32
    return %arg0, %c0_i32 : i32, i32
  }
}

module attributes {stable_mosaic.version = 11 : i64} {
  func.func @_conv3x3_stats_kernel(%arg0: i32, %arg1: memref<1x18x18x128xbf16, #tpu.memory_space<vmem>>, %arg2: memref<9x128x128xbf16, #tpu.memory_space<vmem>>, %arg3: memref<1x16x16x128xf32, #tpu.memory_space<vmem>>, %arg4: memref<8x128xf32, #tpu.memory_space<vmem>>, %arg5: memref<8x128xf32, #tpu.memory_space<vmem>>, %arg6: memref<256x128xf32, #tpu.memory_space<vmem>>) attributes {dimension_semantics = [#tpu.dimension_semantics<parallel>], iteration_bounds = array<i64: 4>, scalar_prefetch = 0 : i64, scratch_operands = 1 : i64, tpu.core_type = #tpu.core_type<tc>, window_params = [{transform_indices = @transform_0, window_bounds = array<i64: 1, 18, 18, 128>}, {pipeline_mode = #tpu.pipeline_mode<synchronous>, transform_indices = @transform_1, window_bounds = array<i64: 9, 128, 128>}, {transform_indices = @transform_2, window_bounds = array<i64: 1, 16, 16, 128>}, {transform_indices = @transform_3, window_bounds = array<i64: 8, 128>}, {transform_indices = @transform_4, window_bounds = array<i64: 8, 128>}]} {
    %c0 = arith.constant 0 : index
    %c0_0 = arith.constant 0 : index
    %c0_1 = arith.constant 0 : index
    %c0_2 = arith.constant 0 : index
    %0 = vector.load %arg1[%c0, %c0_0, %c0_1, %c0_2] : memref<1x18x18x128xbf16, #tpu.memory_space<vmem>>, vector<1x16x16x128xbf16>
    %1 = vector.shape_cast %0 : vector<1x16x16x128xbf16> to vector<16x16x128xbf16>
    %2 = vector.shape_cast %1 : vector<16x16x128xbf16> to vector<256x128xbf16>
    %c0_3 = arith.constant 0 : index
    %c0_4 = arith.constant 0 : index
    %c0_5 = arith.constant 0 : index
    %3 = vector.load %arg2[%c0_3, %c0_4, %c0_5] : memref<9x128x128xbf16, #tpu.memory_space<vmem>>, vector<1x128x128xbf16>
    %4 = vector.shape_cast %3 : vector<1x128x128xbf16> to vector<128x128xbf16>
    %cst = arith.constant dense<0.000000e+00> : vector<256x128xf32>
    %5 = tpu.matmul %2, %4, %cst {dimension_numbers = #tpu.dot_dimension_numbers<[1], [0], [0], [1], [0, 0, 1, 1], [], []>} : vector<256x128xbf16>, vector<128x128xbf16>, vector<256x128xf32> -> vector<256x128xf32>
    %c0_6 = arith.constant 0 : index
    %c0_7 = arith.constant 0 : index
    %6 = vector.load %arg6[%c0_6, %c0_7] : memref<256x128xf32, #tpu.memory_space<vmem>>, vector<256x128xf32>
    tpu.vector_store %arg6[%c0_6, %c0_7], %5 {strides = array<i32>} : memref<256x128xf32, #tpu.memory_space<vmem>>, vector<256x128xf32>,
    %c0_8 = arith.constant 0 : index
    %c0_9 = arith.constant 0 : index
    %c1 = arith.constant 1 : index
    %c0_10 = arith.constant 0 : index
    %7 = vector.load %arg1[%c0_8, %c0_9, %c1, %c0_10] : memref<1x18x18x128xbf16, #tpu.memory_space<vmem>>, vector<1x16x16x128xbf16>
    %8 = vector.shape_cast %7 : vector<1x16x16x128xbf16> to vector<16x16x128xbf16>
    %9 = vector.shape_cast %8 : vector<16x16x128xbf16> to vector<256x128xbf16>
    %c1_11 = arith.constant 1 : index
    %c0_12 = arith.constant 0 : index
    %c0_13 = arith.constant 0 : index
    %10 = vector.load %arg2[%c1_11, %c0_12, %c0_13] : memref<9x128x128xbf16, #tpu.memory_space<vmem>>, vector<1x128x128xbf16>
    %11 = vector.shape_cast %10 : vector<1x128x128xbf16> to vector<128x128xbf16>
    %cst_14 = arith.constant dense<0.000000e+00> : vector<256x128xf32>
    %12 = tpu.matmul %9, %11, %cst_14 {dimension_numbers = #tpu.dot_dimension_numbers<[1], [0], [0], [1], [0, 0, 1, 1], [], []>} : vector<256x128xbf16>, vector<128x128xbf16>, vector<256x128xf32> -> vector<256x128xf32>
    %c0_15 = arith.constant 0 : index
    %c0_16 = arith.constant 0 : index
    %13 = vector.load %arg6[%c0_15, %c0_16] : memref<256x128xf32, #tpu.memory_space<vmem>>, vector<256x128xf32>
    %14 = arith.addf %13, %12 : vector<256x128xf32>
    %c0_17 = arith.constant 0 : index
    %c0_18 = arith.constant 0 : index
    %15 = vector.load %arg6[%c0_17, %c0_18] : memref<256x128xf32, #tpu.memory_space<vmem>>, vector<256x128xf32>
    tpu.vector_store %arg6[%c0_17, %c0_18], %14 {strides = array<i32>} : memref<256x128xf32, #tpu.memory_space<vmem>>, vector<256x128xf32>,
    %c0_19 = arith.constant 0 : index
    %c0_20 = arith.constant 0 : index
    %c2 = arith.constant 2 : index
    %c0_21 = arith.constant 0 : index
    %16 = vector.load %arg1[%c0_19, %c0_20, %c2, %c0_21] : memref<1x18x18x128xbf16, #tpu.memory_space<vmem>>, vector<1x16x16x128xbf16>
    %17 = vector.shape_cast %16 : vector<1x16x16x128xbf16> to vector<16x16x128xbf16>
    %18 = vector.shape_cast %17 : vector<16x16x128xbf16> to vector<256x128xbf16>
    %c2_22 = arith.constant 2 : index
    %c0_23 = arith.constant 0 : index
    %c0_24 = arith.constant 0 : index
    %19 = vector.load %arg2[%c2_22, %c0_23, %c0_24] : memref<9x128x128xbf16, #tpu.memory_space<vmem>>, vector<1x128x128xbf16>
    %20 = vector.shape_cast %19 : vector<1x128x128xbf16> to vector<128x128xbf16>
    %cst_25 = arith.constant dense<0.000000e+00> : vector<256x128xf32>
    %21 = tpu.matmul %18, %20, %cst_25 {dimension_numbers = #tpu.dot_dimension_numbers<[1], [0], [0], [1], [0, 0, 1, 1], [], []>} : vector<256x128xbf16>, vector<128x128xbf16>, vector<256x128xf32> -> vector<256x128xf32>
    %c0_26 = arith.constant 0 : index
    %c0_27 = arith.constant 0 : index
    %22 = vector.load %arg6[%c0_26, %c0_27] : memref<256x128xf32, #tpu.memory_space<vmem>>, vector<256x128xf32>
    %23 = arith.addf %22, %21 : vector<256x128xf32>
    %c0_28 = arith.constant 0 : index
    %c0_29 = arith.constant 0 : index
    %24 = vector.load %arg6[%c0_28, %c0_29] : memref<256x128xf32, #tpu.memory_space<vmem>>, vector<256x128xf32>
    tpu.vector_store %arg6[%c0_28, %c0_29], %23 {strides = array<i32>} : memref<256x128xf32, #tpu.memory_space<vmem>>, vector<256x128xf32>,
    %c0_30 = arith.constant 0 : index
    %c1_31 = arith.constant 1 : index
    %c0_32 = arith.constant 0 : index
    %c0_33 = arith.constant 0 : index
    %25 = vector.load %arg1[%c0_30, %c1_31, %c0_32, %c0_33] : memref<1x18x18x128xbf16, #tpu.memory_space<vmem>>, vector<1x16x16x128xbf16>
    %26 = vector.shape_cast %25 : vector<1x16x16x128xbf16> to vector<16x16x128xbf16>
    %27 = vector.shape_cast %26 : vector<16x16x128xbf16> to vector<256x128xbf16>
    %c3 = arith.constant 3 : index
    %c0_34 = arith.constant 0 : index
    %c0_35 = arith.constant 0 : index
    %28 = vector.load %arg2[%c3, %c0_34, %c0_35] : memref<9x128x128xbf16, #tpu.memory_space<vmem>>, vector<1x128x128xbf16>
    %29 = vector.shape_cast %28 : vector<1x128x128xbf16> to vector<128x128xbf16>
    %cst_36 = arith.constant dense<0.000000e+00> : vector<256x128xf32>
    %30 = tpu.matmul %27, %29, %cst_36 {dimension_numbers = #tpu.dot_dimension_numbers<[1], [0], [0], [1], [0, 0, 1, 1], [], []>} : vector<256x128xbf16>, vector<128x128xbf16>, vector<256x128xf32> -> vector<256x128xf32>
    %c0_37 = arith.constant 0 : index
    %c0_38 = arith.constant 0 : index
    %31 = vector.load %arg6[%c0_37, %c0_38] : memref<256x128xf32, #tpu.memory_space<vmem>>, vector<256x128xf32>
    %32 = arith.addf %31, %30 : vector<256x128xf32>
    %c0_39 = arith.constant 0 : index
    %c0_40 = arith.constant 0 : index
    %33 = vector.load %arg6[%c0_39, %c0_40] : memref<256x128xf32, #tpu.memory_space<vmem>>, vector<256x128xf32>
    tpu.vector_store %arg6[%c0_39, %c0_40], %32 {strides = array<i32>} : memref<256x128xf32, #tpu.memory_space<vmem>>, vector<256x128xf32>,
    %c0_41 = arith.constant 0 : index
    %c1_42 = arith.constant 1 : index
    %c1_43 = arith.constant 1 : index
    %c0_44 = arith.constant 0 : index
    %34 = vector.load %arg1[%c0_41, %c1_42, %c1_43, %c0_44] : memref<1x18x18x128xbf16, #tpu.memory_space<vmem>>, vector<1x16x16x128xbf16>
    %35 = vector.shape_cast %34 : vector<1x16x16x128xbf16> to vector<16x16x128xbf16>
    %36 = vector.shape_cast %35 : vector<16x16x128xbf16> to vector<256x128xbf16>
    %c4 = arith.constant 4 : index
    %c0_45 = arith.constant 0 : index
    %c0_46 = arith.constant 0 : index
    %37 = vector.load %arg2[%c4, %c0_45, %c0_46] : memref<9x128x128xbf16, #tpu.memory_space<vmem>>, vector<1x128x128xbf16>
    %38 = vector.shape_cast %37 : vector<1x128x128xbf16> to vector<128x128xbf16>
    %cst_47 = arith.constant dense<0.000000e+00> : vector<256x128xf32>
    %39 = tpu.matmul %36, %38, %cst_47 {dimension_numbers = #tpu.dot_dimension_numbers<[1], [0], [0], [1], [0, 0, 1, 1], [], []>} : vector<256x128xbf16>, vector<128x128xbf16>, vector<256x128xf32> -> vector<256x128xf32>
    %c0_48 = arith.constant 0 : index
    %c0_49 = arith.constant 0 : index
    %40 = vector.load %arg6[%c0_48, %c0_49] : memref<256x128xf32, #tpu.memory_space<vmem>>, vector<256x128xf32>
    %41 = arith.addf %40, %39 : vector<256x128xf32>
    %c0_50 = arith.constant 0 : index
    %c0_51 = arith.constant 0 : index
    %42 = vector.load %arg6[%c0_50, %c0_51] : memref<256x128xf32, #tpu.memory_space<vmem>>, vector<256x128xf32>
    tpu.vector_store %arg6[%c0_50, %c0_51], %41 {strides = array<i32>} : memref<256x128xf32, #tpu.memory_space<vmem>>, vector<256x128xf32>,
    %c0_52 = arith.constant 0 : index
    %c1_53 = arith.constant 1 : index
    %c2_54 = arith.constant 2 : index
    %c0_55 = arith.constant 0 : index
    %43 = vector.load %arg1[%c0_52, %c1_53, %c2_54, %c0_55] : memref<1x18x18x128xbf16, #tpu.memory_space<vmem>>, vector<1x16x16x128xbf16>
    %44 = vector.shape_cast %43 : vector<1x16x16x128xbf16> to vector<16x16x128xbf16>
    %45 = vector.shape_cast %44 : vector<16x16x128xbf16> to vector<256x128xbf16>
    %c5 = arith.constant 5 : index
    %c0_56 = arith.constant 0 : index
    %c0_57 = arith.constant 0 : index
    %46 = vector.load %arg2[%c5, %c0_56, %c0_57] : memref<9x128x128xbf16, #tpu.memory_space<vmem>>, vector<1x128x128xbf16>
    %47 = vector.shape_cast %46 : vector<1x128x128xbf16> to vector<128x128xbf16>
    %cst_58 = arith.constant dense<0.000000e+00> : vector<256x128xf32>
    %48 = tpu.matmul %45, %47, %cst_58 {dimension_numbers = #tpu.dot_dimension_numbers<[1], [0], [0], [1], [0, 0, 1, 1], [], []>} : vector<256x128xbf16>, vector<128x128xbf16>, vector<256x128xf32> -> vector<256x128xf32>
    %c0_59 = arith.constant 0 : index
    %c0_60 = arith.constant 0 : index
    %49 = vector.load %arg6[%c0_59, %c0_60] : memref<256x128xf32, #tpu.memory_space<vmem>>, vector<256x128xf32>
    %50 = arith.addf %49, %48 : vector<256x128xf32>
    %c0_61 = arith.constant 0 : index
    %c0_62 = arith.constant 0 : index
    %51 = vector.load %arg6[%c0_61, %c0_62] : memref<256x128xf32, #tpu.memory_space<vmem>>, vector<256x128xf32>
    tpu.vector_store %arg6[%c0_61, %c0_62], %50 {strides = array<i32>} : memref<256x128xf32, #tpu.memory_space<vmem>>, vector<256x128xf32>,
    %c0_63 = arith.constant 0 : index
    %c2_64 = arith.constant 2 : index
    %c0_65 = arith.constant 0 : index
    %c0_66 = arith.constant 0 : index
    %52 = vector.load %arg1[%c0_63, %c2_64, %c0_65, %c0_66] : memref<1x18x18x128xbf16, #tpu.memory_space<vmem>>, vector<1x16x16x128xbf16>
    %53 = vector.shape_cast %52 : vector<1x16x16x128xbf16> to vector<16x16x128xbf16>
    %54 = vector.shape_cast %53 : vector<16x16x128xbf16> to vector<256x128xbf16>
    %c6 = arith.constant 6 : index
    %c0_67 = arith.constant 0 : index
    %c0_68 = arith.constant 0 : index
    %55 = vector.load %arg2[%c6, %c0_67, %c0_68] : memref<9x128x128xbf16, #tpu.memory_space<vmem>>, vector<1x128x128xbf16>
    %56 = vector.shape_cast %55 : vector<1x128x128xbf16> to vector<128x128xbf16>
    %cst_69 = arith.constant dense<0.000000e+00> : vector<256x128xf32>
    %57 = tpu.matmul %54, %56, %cst_69 {dimension_numbers = #tpu.dot_dimension_numbers<[1], [0], [0], [1], [0, 0, 1, 1], [], []>} : vector<256x128xbf16>, vector<128x128xbf16>, vector<256x128xf32> -> vector<256x128xf32>
    %c0_70 = arith.constant 0 : index
    %c0_71 = arith.constant 0 : index
    %58 = vector.load %arg6[%c0_70, %c0_71] : memref<256x128xf32, #tpu.memory_space<vmem>>, vector<256x128xf32>
    %59 = arith.addf %58, %57 : vector<256x128xf32>
    %c0_72 = arith.constant 0 : index
    %c0_73 = arith.constant 0 : index
    %60 = vector.load %arg6[%c0_72, %c0_73] : memref<256x128xf32, #tpu.memory_space<vmem>>, vector<256x128xf32>
    tpu.vector_store %arg6[%c0_72, %c0_73], %59 {strides = array<i32>} : memref<256x128xf32, #tpu.memory_space<vmem>>, vector<256x128xf32>,
    %c0_74 = arith.constant 0 : index
    %c2_75 = arith.constant 2 : index
    %c1_76 = arith.constant 1 : index
    %c0_77 = arith.constant 0 : index
    %61 = vector.load %arg1[%c0_74, %c2_75, %c1_76, %c0_77] : memref<1x18x18x128xbf16, #tpu.memory_space<vmem>>, vector<1x16x16x128xbf16>
    %62 = vector.shape_cast %61 : vector<1x16x16x128xbf16> to vector<16x16x128xbf16>
    %63 = vector.shape_cast %62 : vector<16x16x128xbf16> to vector<256x128xbf16>
    %c7 = arith.constant 7 : index
    %c0_78 = arith.constant 0 : index
    %c0_79 = arith.constant 0 : index
    %64 = vector.load %arg2[%c7, %c0_78, %c0_79] : memref<9x128x128xbf16, #tpu.memory_space<vmem>>, vector<1x128x128xbf16>
    %65 = vector.shape_cast %64 : vector<1x128x128xbf16> to vector<128x128xbf16>
    %cst_80 = arith.constant dense<0.000000e+00> : vector<256x128xf32>
    %66 = tpu.matmul %63, %65, %cst_80 {dimension_numbers = #tpu.dot_dimension_numbers<[1], [0], [0], [1], [0, 0, 1, 1], [], []>} : vector<256x128xbf16>, vector<128x128xbf16>, vector<256x128xf32> -> vector<256x128xf32>
    %c0_81 = arith.constant 0 : index
    %c0_82 = arith.constant 0 : index
    %67 = vector.load %arg6[%c0_81, %c0_82] : memref<256x128xf32, #tpu.memory_space<vmem>>, vector<256x128xf32>
    %68 = arith.addf %67, %66 : vector<256x128xf32>
    %c0_83 = arith.constant 0 : index
    %c0_84 = arith.constant 0 : index
    %69 = vector.load %arg6[%c0_83, %c0_84] : memref<256x128xf32, #tpu.memory_space<vmem>>, vector<256x128xf32>
    tpu.vector_store %arg6[%c0_83, %c0_84], %68 {strides = array<i32>} : memref<256x128xf32, #tpu.memory_space<vmem>>, vector<256x128xf32>,
    %c0_85 = arith.constant 0 : index
    %c2_86 = arith.constant 2 : index
    %c2_87 = arith.constant 2 : index
    %c0_88 = arith.constant 0 : index
    %70 = vector.load %arg1[%c0_85, %c2_86, %c2_87, %c0_88] : memref<1x18x18x128xbf16, #tpu.memory_space<vmem>>, vector<1x16x16x128xbf16>
    %71 = vector.shape_cast %70 : vector<1x16x16x128xbf16> to vector<16x16x128xbf16>
    %72 = vector.shape_cast %71 : vector<16x16x128xbf16> to vector<256x128xbf16>
    %c8 = arith.constant 8 : index
    %c0_89 = arith.constant 0 : index
    %c0_90 = arith.constant 0 : index
    %73 = vector.load %arg2[%c8, %c0_89, %c0_90] : memref<9x128x128xbf16, #tpu.memory_space<vmem>>, vector<1x128x128xbf16>
    %74 = vector.shape_cast %73 : vector<1x128x128xbf16> to vector<128x128xbf16>
    %cst_91 = arith.constant dense<0.000000e+00> : vector<256x128xf32>
    %75 = tpu.matmul %72, %74, %cst_91 {dimension_numbers = #tpu.dot_dimension_numbers<[1], [0], [0], [1], [0, 0, 1, 1], [], []>} : vector<256x128xbf16>, vector<128x128xbf16>, vector<256x128xf32> -> vector<256x128xf32>
    %c0_92 = arith.constant 0 : index
    %c0_93 = arith.constant 0 : index
    %76 = vector.load %arg6[%c0_92, %c0_93] : memref<256x128xf32, #tpu.memory_space<vmem>>, vector<256x128xf32>
    %77 = arith.addf %76, %75 : vector<256x128xf32>
    %c0_94 = arith.constant 0 : index
    %c0_95 = arith.constant 0 : index
    %78 = vector.load %arg6[%c0_94, %c0_95] : memref<256x128xf32, #tpu.memory_space<vmem>>, vector<256x128xf32>
    tpu.vector_store %arg6[%c0_94, %c0_95], %77 {strides = array<i32>} : memref<256x128xf32, #tpu.memory_space<vmem>>, vector<256x128xf32>,
    %c0_96 = arith.constant 0 : index
    %c0_97 = arith.constant 0 : index
    %79 = vector.load %arg6[%c0_96, %c0_97] : memref<256x128xf32, #tpu.memory_space<vmem>>, vector<256x128xf32>
    %80 = vector.shape_cast %79 : vector<256x128xf32> to vector<1x16x16x128xf32>
    %c0_98 = arith.constant 0 : index
    %c0_99 = arith.constant 0 : index
    %c0_100 = arith.constant 0 : index
    %c0_101 = arith.constant 0 : index
    %81 = vector.load %arg3[%c0_98, %c0_99, %c0_100, %c0_101] : memref<1x16x16x128xf32, #tpu.memory_space<vmem>>, vector<1x16x16x128xf32>
    tpu.vector_store %arg3[%c0_98, %c0_99, %c0_100, %c0_101], %80 {strides = array<i32>} : memref<1x16x16x128xf32, #tpu.memory_space<vmem>>, vector<1x16x16x128xf32>,
    %cst_102 = arith.constant dense<0.000000e+00> : vector<128xf32>
    %82 = vector.multi_reduction <add>, %79, %cst_102 [0] : vector<256x128xf32> to vector<128xf32>
    %83 = vector.shape_cast %82 : vector<128xf32> to vector<1x128xf32>
    %84 = arith.mulf %79, %79 : vector<256x128xf32>
    %cst_103 = arith.constant dense<0.000000e+00> : vector<128xf32>
    %85 = vector.multi_reduction <add>, %84, %cst_103 [0] : vector<256x128xf32> to vector<128xf32>
    %86 = vector.shape_cast %85 : vector<128xf32> to vector<1x128xf32>
    %87 = vector.shape_cast %83 : vector<1x128xf32> to vector<1x128xf32>
    %88 = vector.broadcast %87 : vector<1x128xf32> to vector<8x128xf32>
    %c0_104 = arith.constant 0 : index
    %c0_105 = arith.constant 0 : index
    %89 = vector.load %arg4[%c0_104, %c0_105] : memref<8x128xf32, #tpu.memory_space<vmem>>, vector<8x128xf32>
    tpu.vector_store %arg4[%c0_104, %c0_105], %88 {strides = array<i32>} : memref<8x128xf32, #tpu.memory_space<vmem>>, vector<8x128xf32>,
    %90 = vector.shape_cast %86 : vector<1x128xf32> to vector<1x128xf32>
    %91 = vector.broadcast %90 : vector<1x128xf32> to vector<8x128xf32>
    %c0_106 = arith.constant 0 : index
    %c0_107 = arith.constant 0 : index
    %92 = vector.load %arg5[%c0_106, %c0_107] : memref<8x128xf32, #tpu.memory_space<vmem>>, vector<8x128xf32>
    tpu.vector_store %arg5[%c0_106, %c0_107], %91 {strides = array<i32>} : memref<8x128xf32, #tpu.memory_space<vmem>>, vector<8x128xf32>,
    return
  }
  func.func @transform_0(%arg0: i32) -> (i32, i32, i32, i32) {
    %c0_i32 = arith.constant 0 : i32
    %c0_i32_0 = arith.constant 0 : i32
    %c0_i32_1 = arith.constant 0 : i32
    %c0_i32_2 = arith.constant 0 : i32
    return %arg0, %c0_i32, %c0_i32_0, %c0_i32_1 : i32, i32, i32, i32
  }
  func.func @transform_1(%arg0: i32) -> (i32, i32, i32) {
    %c0_i32 = arith.constant 0 : i32
    %c0_i32_0 = arith.constant 0 : i32
    %c0_i32_1 = arith.constant 0 : i32
    %c0_i32_2 = arith.constant 0 : i32
    return %c0_i32, %c0_i32_0, %c0_i32_1 : i32, i32, i32
  }
  func.func @transform_2(%arg0: i32) -> (i32, i32, i32, i32) {
    %c0_i32 = arith.constant 0 : i32
    %c0_i32_0 = arith.constant 0 : i32
    %c0_i32_1 = arith.constant 0 : i32
    %c0_i32_2 = arith.constant 0 : i32
    return %arg0, %c0_i32, %c0_i32_0, %c0_i32_1 : i32, i32, i32, i32
  }
  func.func @transform_3(%arg0: i32) -> (i32, i32) {
    %c0_i32 = arith.constant 0 : i32
    %c0_i32_0 = arith.constant 0 : i32
    return %arg0, %c0_i32 : i32, i32
  }
  func.func @transform_4(%arg0: i32) -> (i32, i32) {
    %c0_i32 = arith.constant 0 : i32
    %c0_i32_0 = arith.constant 0 : i32
    return %arg0, %c0_i32 : i32, i32
  }
}

module attributes {stable_mosaic.version = 11 : i64} {
  func.func @_bn_relu_matmul_stats_kernel(%arg0: i32, %arg1: memref<512x128xf32, #tpu.memory_space<vmem>>, %arg2: memref<1x128xf32, #tpu.memory_space<vmem>>, %arg3: memref<1x128xf32, #tpu.memory_space<vmem>>, %arg4: memref<128x128xbf16, #tpu.memory_space<vmem>>, %arg5: memref<512x128xf32, #tpu.memory_space<vmem>>, %arg6: memref<8x128xf32, #tpu.memory_space<vmem>>, %arg7: memref<8x128xf32, #tpu.memory_space<vmem>>) attributes {dimension_semantics = [#tpu.dimension_semantics<parallel>], iteration_bounds = array<i64: 2>, scalar_prefetch = 0 : i64, scratch_operands = 0 : i64, tpu.core_type = #tpu.core_type<tc>, window_params = [{transform_indices = @transform_0, window_bounds = array<i64: 512, 128>}, {pipeline_mode = #tpu.pipeline_mode<synchronous>, transform_indices = @transform_1, window_bounds = array<i64: 1, 128>}, {pipeline_mode = #tpu.pipeline_mode<synchronous>, transform_indices = @transform_2, window_bounds = array<i64: 1, 128>}, {pipeline_mode = #tpu.pipeline_mode<synchronous>, transform_indices = @transform_3, window_bounds = array<i64: 128, 128>}, {transform_indices = @transform_4, window_bounds = array<i64: 512, 128>}, {transform_indices = @transform_5, window_bounds = array<i64: 8, 128>}, {transform_indices = @transform_6, window_bounds = array<i64: 8, 128>}]} {
    %c0 = arith.constant 0 : index
    %c0_0 = arith.constant 0 : index
    %0 = vector.load %arg1[%c0, %c0_0] : memref<512x128xf32, #tpu.memory_space<vmem>>, vector<512x128xf32>
    %c0_1 = arith.constant 0 : index
    %c0_2 = arith.constant 0 : index
    %1 = vector.load %arg2[%c0_1, %c0_2] : memref<1x128xf32, #tpu.memory_space<vmem>>, vector<1x128xf32>
    %2 = vector.broadcast %1 : vector<1x128xf32> to vector<512x128xf32>
    %3 = arith.mulf %0, %2 : vector<512x128xf32>
    %c0_3 = arith.constant 0 : index
    %c0_4 = arith.constant 0 : index
    %4 = vector.load %arg3[%c0_3, %c0_4] : memref<1x128xf32, #tpu.memory_space<vmem>>, vector<1x128xf32>
    %5 = vector.broadcast %4 : vector<1x128xf32> to vector<512x128xf32>
    %6 = arith.addf %3, %5 : vector<512x128xf32>
    %cst = arith.constant 0.000000e+00 : f32
    %7 = vector.broadcast %cst : f32 to vector<512x128xf32>
    %8 = arith.maximumf %6, %7 : vector<512x128xf32>
    %9 = arith.truncf %8 : vector<512x128xf32> to vector<512x128xbf16>
    %c0_5 = arith.constant 0 : index
    %c0_6 = arith.constant 0 : index
    %10 = vector.load %arg4[%c0_5, %c0_6] : memref<128x128xbf16, #tpu.memory_space<vmem>>, vector<128x128xbf16>
    %cst_7 = arith.constant dense<0.000000e+00> : vector<512x128xf32>
    %11 = tpu.matmul %9, %10, %cst_7 {dimension_numbers = #tpu.dot_dimension_numbers<[1], [0], [0], [1], [0, 0, 1, 1], [], []>} : vector<512x128xbf16>, vector<128x128xbf16>, vector<512x128xf32> -> vector<512x128xf32>
    %c0_8 = arith.constant 0 : index
    %c0_9 = arith.constant 0 : index
    %12 = vector.load %arg5[%c0_8, %c0_9] : memref<512x128xf32, #tpu.memory_space<vmem>>, vector<512x128xf32>
    tpu.vector_store %arg5[%c0_8, %c0_9], %11 {strides = array<i32>} : memref<512x128xf32, #tpu.memory_space<vmem>>, vector<512x128xf32>,
    %cst_10 = arith.constant dense<0.000000e+00> : vector<128xf32>
    %13 = vector.multi_reduction <add>, %11, %cst_10 [0] : vector<512x128xf32> to vector<128xf32>
    %14 = vector.shape_cast %13 : vector<128xf32> to vector<1x128xf32>
    %15 = arith.mulf %11, %11 : vector<512x128xf32>
    %cst_11 = arith.constant dense<0.000000e+00> : vector<128xf32>
    %16 = vector.multi_reduction <add>, %15, %cst_11 [0] : vector<512x128xf32> to vector<128xf32>
    %17 = vector.shape_cast %16 : vector<128xf32> to vector<1x128xf32>
    %18 = vector.shape_cast %14 : vector<1x128xf32> to vector<1x128xf32>
    %19 = vector.broadcast %18 : vector<1x128xf32> to vector<8x128xf32>
    %c0_12 = arith.constant 0 : index
    %c0_13 = arith.constant 0 : index
    %20 = vector.load %arg6[%c0_12, %c0_13] : memref<8x128xf32, #tpu.memory_space<vmem>>, vector<8x128xf32>
    tpu.vector_store %arg6[%c0_12, %c0_13], %19 {strides = array<i32>} : memref<8x128xf32, #tpu.memory_space<vmem>>, vector<8x128xf32>,
    %21 = vector.shape_cast %17 : vector<1x128xf32> to vector<1x128xf32>
    %22 = vector.broadcast %21 : vector<1x128xf32> to vector<8x128xf32>
    %c0_14 = arith.constant 0 : index
    %c0_15 = arith.constant 0 : index
    %23 = vector.load %arg7[%c0_14, %c0_15] : memref<8x128xf32, #tpu.memory_space<vmem>>, vector<8x128xf32>
    tpu.vector_store %arg7[%c0_14, %c0_15], %22 {strides = array<i32>} : memref<8x128xf32, #tpu.memory_space<vmem>>, vector<8x128xf32>,
    return
  }
  func.func @transform_0(%arg0: i32) -> (i32, i32) {
    %c0_i32 = arith.constant 0 : i32
    %c0_i32_0 = arith.constant 0 : i32
    return %arg0, %c0_i32 : i32, i32
  }
  func.func @transform_1(%arg0: i32) -> (i32, i32) {
    %c0_i32 = arith.constant 0 : i32
    %c0_i32_0 = arith.constant 0 : i32
    %c0_i32_1 = arith.constant 0 : i32
    return %c0_i32, %c0_i32_0 : i32, i32
  }
  func.func @transform_2(%arg0: i32) -> (i32, i32) {
    %c0_i32 = arith.constant 0 : i32
    %c0_i32_0 = arith.constant 0 : i32
    %c0_i32_1 = arith.constant 0 : i32
    return %c0_i32, %c0_i32_0 : i32, i32
  }
  func.func @transform_3(%arg0: i32) -> (i32, i32) {
    %c0_i32 = arith.constant 0 : i32
    %c0_i32_0 = arith.constant 0 : i32
    %c0_i32_1 = arith.constant 0 : i32
    return %c0_i32, %c0_i32_0 : i32, i32
  }
  func.func @transform_4(%arg0: i32) -> (i32, i32) {
    %c0_i32 = arith.constant 0 : i32
    %c0_i32_0 = arith.constant 0 : i32
    return %arg0, %c0_i32 : i32, i32
  }
  func.func @transform_5(%arg0: i32) -> (i32, i32) {
    %c0_i32 = arith.constant 0 : i32
    %c0_i32_0 = arith.constant 0 : i32
    return %arg0, %c0_i32 : i32, i32
  }
  func.func @transform_6(%arg0: i32) -> (i32, i32) {
    %c0_i32 = arith.constant 0 : i32
    %c0_i32_0 = arith.constant 0 : i32
    return %arg0, %c0_i32 : i32, i32
  }
}

module attributes {stable_mosaic.version = 11 : i64} {
  func.func @_bn_residual_kernel(%arg0: i32, %arg1: memref<512x128xf32, #tpu.memory_space<vmem>>, %arg2: memref<1x128xf32, #tpu.memory_space<vmem>>, %arg3: memref<1x128xf32, #tpu.memory_space<vmem>>, %arg4: memref<512x128xf32, #tpu.memory_space<vmem>>, %arg5: memref<512x128xf32, #tpu.memory_space<vmem>>) attributes {dimension_semantics = [#tpu.dimension_semantics<parallel>], iteration_bounds = array<i64: 2>, scalar_prefetch = 0 : i64, scratch_operands = 0 : i64, tpu.core_type = #tpu.core_type<tc>, window_params = [{transform_indices = @transform_0, window_bounds = array<i64: 512, 128>}, {pipeline_mode = #tpu.pipeline_mode<synchronous>, transform_indices = @transform_1, window_bounds = array<i64: 1, 128>}, {pipeline_mode = #tpu.pipeline_mode<synchronous>, transform_indices = @transform_2, window_bounds = array<i64: 1, 128>}, {transform_indices = @transform_3, window_bounds = array<i64: 512, 128>}, {transform_indices = @transform_4, window_bounds = array<i64: 512, 128>}]} {
    %c0 = arith.constant 0 : index
    %c0_0 = arith.constant 0 : index
    %0 = vector.load %arg1[%c0, %c0_0] : memref<512x128xf32, #tpu.memory_space<vmem>>, vector<512x128xf32>
    %c0_1 = arith.constant 0 : index
    %c0_2 = arith.constant 0 : index
    %1 = vector.load %arg2[%c0_1, %c0_2] : memref<1x128xf32, #tpu.memory_space<vmem>>, vector<1x128xf32>
    %2 = vector.broadcast %1 : vector<1x128xf32> to vector<512x128xf32>
    %3 = arith.mulf %0, %2 : vector<512x128xf32>
    %c0_3 = arith.constant 0 : index
    %c0_4 = arith.constant 0 : index
    %4 = vector.load %arg3[%c0_3, %c0_4] : memref<1x128xf32, #tpu.memory_space<vmem>>, vector<1x128xf32>
    %5 = vector.broadcast %4 : vector<1x128xf32> to vector<512x128xf32>
    %6 = arith.addf %3, %5 : vector<512x128xf32>
    %c0_5 = arith.constant 0 : index
    %c0_6 = arith.constant 0 : index
    %7 = vector.load %arg4[%c0_5, %c0_6] : memref<512x128xf32, #tpu.memory_space<vmem>>, vector<512x128xf32>
    %8 = arith.addf %6, %7 : vector<512x128xf32>
    %cst = arith.constant 0.000000e+00 : f32
    %9 = vector.broadcast %cst : f32 to vector<512x128xf32>
    %10 = arith.maximumf %8, %9 : vector<512x128xf32>
    %c0_7 = arith.constant 0 : index
    %c0_8 = arith.constant 0 : index
    %11 = vector.load %arg5[%c0_7, %c0_8] : memref<512x128xf32, #tpu.memory_space<vmem>>, vector<512x128xf32>
    tpu.vector_store %arg5[%c0_7, %c0_8], %10 {strides = array<i32>} : memref<512x128xf32, #tpu.memory_space<vmem>>, vector<512x128xf32>,
    return
  }
  func.func @transform_0(%arg0: i32) -> (i32, i32) {
    %c0_i32 = arith.constant 0 : i32
    %c0_i32_0 = arith.constant 0 : i32
    return %arg0, %c0_i32 : i32, i32
  }
  func.func @transform_1(%arg0: i32) -> (i32, i32) {
    %c0_i32 = arith.constant 0 : i32
    %c0_i32_0 = arith.constant 0 : i32
    %c0_i32_1 = arith.constant 0 : i32
    return %c0_i32, %c0_i32_0 : i32, i32
  }
  func.func @transform_2(%arg0: i32) -> (i32, i32) {
    %c0_i32 = arith.constant 0 : i32
    %c0_i32_0 = arith.constant 0 : i32
    %c0_i32_1 = arith.constant 0 : i32
    return %c0_i32, %c0_i32_0 : i32, i32
  }
  func.func @transform_3(%arg0: i32) -> (i32, i32) {
    %c0_i32 = arith.constant 0 : i32
    %c0_i32_0 = arith.constant 0 : i32
    return %arg0, %c0_i32 : i32, i32
  }
  func.func @transform_4(%arg0: i32) -> (i32, i32) {
    %c0_i32 = arith.constant 0 : i32
    %c0_i32_0 = arith.constant 0 : i32
    return %arg0, %c0_i32 : i32, i32
  }
}

</mosaic_0001>

<bundles_post_ra>
// kernel: bottleneck_forward.6
= control target key start
LH: loop header
LB: loop body
LE: loop exit
PB: predicated region body
PF: predicated region fallthrough
CT: control target
= control target key end

     0   :  { %s1188_s12 = smov 0   ;;  %s1447_s0 = inlined_call_operand.vmem [shape: f32[1024,128], index: 0, kind: input, shape index: {}]   ;;  %s1448_s1 = inlined_call_operand.vmem [shape: f32[1,128], index: 1, kind: input, shape index: {}]   ;;  %s1449_s2 = inlined_call_operand.vmem [shape: f32[1,128], index: 2, kind: input, shape index: {}]   ;;  %s1450_s3 = inlined_call_operand.vmem [shape: bf16[1024,128], index: 3, kind: output, shape index: {}]  }
   0x1 LB: > { %s820_s13 = sadd.s32 4294967295, %s1166_s12   ;;  %p824_p0 = scmp.ge.s32.totalorder %s1166_s12, 1  ;;  %s1166_s12 = sphi %s1188_s12, %s13_s12  }
   0x2   : > { %p138_p1 = scmp.lt.s32.totalorder %s1166_s12, 3 }
   0x4   : > { %p139_p2 = pnand %p824_p0, %p138_p1 }
   0x5   : > { %s825_s14 = sshll.u32 (!%p139_p2), %s820_s13, 6  ;;  %v1202_v0 = vld [vmem:[%s1448_s1] ss:$0 sm:$0xff] (!%p139_p2) }
   0x6   : > { %142 = sbr.rel (%p139_p2) target bundleno = 79 (0x4f), region = 32  ;;  %p163_p3 = scmp.lt.s32.totalorder (!%p139_p2), %s825_s14, 127  ;;  %v1212_v1 = vld [vmem:[%s1449_s2] ss:$0 sm:$0xff] (!%p139_p2) }
   0xd   : > { %s1452_s14 = smov (!%p163_p3, %s825_s14), 127 }
   0xe   : > { %s826_s15 = sshll.u32 %s1452_s14, 3  ;;  %s828_s23 = sshll.u32 %s1452_s14, 2 }
   0xf   : > { %s1207_s20 = scalar_lea.vmem %s1447_s0, %s826_s15  ;;  %s1244_s26 = scalar_lea.vmem %s1450_s3, %s828_s23 }
  0x10   : > { %v174_v2 = vld [vmem:[%s1207_s20] sm:$0xff]  ;;  %v175_v3 = vld [vmem:[%s1207_s20 + $0x8] sm:$0xff]  ;;  %v176_v4 = vld [vmem:[%s1207_s20 + $0x10] sm:$0xff] }
  0x11   : > { %v245_v5 = vmul.f32 %v1202_v0, %v174_v2  ;;  %v246_v6 = vmul.f32 %v1202_v0, %v175_v3  ;;  %v177_v7 = vld [vmem:[%s1207_s20 + $0x18] sm:$0xff]  ;;  %v247_v8 = vmul.f32 %v1202_v0, %v176_v4  ;;  %v178_v9 = vld [vmem:[%s1207_s20 + $0x20] sm:$0xff]  ;;  %v179_v10 = vld [vmem:[%s1207_s20 + $0x28] sm:$0xff] }
  0x12   : > { %v248_v11 = vmul.f32 %v1202_v0, %v177_v7  ;;  %v249_v12 = vmul.f32 %v1202_v0, %v178_v9  ;;  %v250_v13 = vmul.f32 %v1202_v0, %v179_v10  ;;  %v180_v14 = vld [vmem:[%s1207_s20 + $0x30] sm:$0xff]  ;;  %v181_v15 = vld [vmem:[%s1207_s20 + $0x38] sm:$0xff]  ;;  %v182_v24 = vld [vmem:[%s1207_s20 + $0x40] sm:$0xff] }
  0x13   : > { %v316_v16 = vadd.f32 %v1212_v1, %v245_v5  ;;  %v317_v17 = vadd.f32 %v1212_v1, %v246_v6  ;;  %v318_v18 = vadd.f32 %v1212_v1, %v247_v8  ;;  %v251_v19 = vmul.f32 %v1202_v0, %v180_v14  ;;  %v183_v25 = vld [vmem:[%s1207_s20 + $0x48] sm:$0xff]  ;;  %v184_v30 = vld [vmem:[%s1207_s20 + $0x50] sm:$0xff]  ;;  %v185_v35 = vld [vmem:[%s1207_s20 + $0x58] sm:$0xff] }
  0x14   : > { %v319_v20 = vadd.f32 %v1212_v1, %v248_v11  ;;  %v320_v21 = vadd.f32 %v1212_v1, %v249_v12  ;;  %v321_v22 = vadd.f32 %v1212_v1, %v250_v13  ;;  %v252_v23 = vmul.f32 %v1202_v0, %v181_v15  ;;  %v186_v36 = vld [vmem:[%s1207_s20 + $0x60] sm:$0xff]  ;;  %v187_v41 = vld [vmem:[%s1207_s20 + $0x68] sm:$0xff]  ;;  %v188_v42 = vld [vmem:[%s1207_s20 + $0x70] sm:$0xff] }
  0x15   : > { %v380_v26 = vmax.f32 %v316_v16, 0.0  ;;  %v381_v27 = vmax.f32 %v317_v17, 0.0  ;;  %v382_v28 = vmax.f32 %v318_v18, 0.0  ;;  %v322_v29 = vadd.f32 %v1212_v1, %v251_v19  ;;  %v189_v51 = vld [vmem:[%s1207_s20 + $0x78] sm:$0xff]  ;;  %v190_v56 = vld [vmem:[%s1207_s20 + $0x80] sm:$0xff]  ;;  %v191_v61 = vld [vmem:[%s1207_s20 + $0x88] sm:$0xff] }
  0x16   : > { %v383_v31 = vmax.f32 %v319_v20, 0.0  ;;  %v384_v32 = vmax.f32 %v320_v21, 0.0  ;;  %v385_v33 = vmax.f32 %v321_v22, 0.0  ;;  %v323_v34 = vadd.f32 %v1212_v1, %v252_v23  ;;  %v192_v4 = vld [vmem:[%s1207_s20 + $0x90] sm:$0xff]  ;;  %v193_v5 = vld [vmem:[%s1207_s20 + $0x98] sm:$0xff]  ;;  %v194_v10 = vld [vmem:[%s1207_s20 + $0xa0] sm:$0xff] }
  0x17   : > { %v964_v37 = vpack.c.bf16 %v381_v27, %v380_v26  ;;  %v386_v38 = vmax.f32 %v322_v29, 0.0  ;;  %v253_v39 = vmul.f32 %v1202_v0, %v182_v24  ;;  %v254_v40 = vmul.f32 %v1202_v0, %v183_v25  ;;  %v195_v15 = vld [vmem:[%s1207_s20 + $0xa8] sm:$0xff]  ;;  %v196_v20 = vld [vmem:[%s1207_s20 + $0xb0] sm:$0xff]  ;;  %v197_v25 = vld [vmem:[%s1207_s20 + $0xb8] sm:$0xff] }
  0x18   : > { %v969_v43 = vpack.c.bf16 %v383_v31, %v382_v28  ;;  %v974_v44 = vpack.c.bf16 %v385_v33, %v384_v32  ;;  %v387_v45 = vmax.f32 %v323_v34, 0.0  ;;  %v255_v46 = vmul.f32 %v1202_v0, %v184_v30  ;;  %v198_v30 = vld [vmem:[%s1207_s20 + $0xc0] sm:$0xff] }
  0x19   : > { %965 = vst [vmem:[%s1244_s26] sm:$0xff] %v964_v37   ;;  %v324_v47 = vadd.f32 %v1212_v1, %v253_v39  ;;  %v325_v48 = vadd.f32 %v1212_v1, %v254_v40  ;;  %v256_v49 = vmul.f32 %v1202_v0, %v185_v35  ;;  %v257_v50 = vmul.f32 %v1202_v0, %v186_v36  ;;  %v199_v35 = vld [vmem:[%s1207_s20 + $0xc8] sm:$0xff]  ;;  %v200_v40 = vld [vmem:[%s1207_s20 + $0xd0] sm:$0xff] }
  0x1a   : > { %1121 = vst [vmem:[%s1244_s26 + $0x8] sm:$0xff] %v969_v43   ;;  %1122 = vst [vmem:[%s1244_s26 + $0x10] sm:$0xff] %v974_v44   ;;  %v979_v52 = vpack.c.bf16 %v387_v45, %v386_v38  ;;  %v326_v53 = vadd.f32 %v1212_v1, %v255_v46  ;;  %v258_v54 = vmul.f32 %v1202_v0, %v187_v41  ;;  %v201_v41 = vld [vmem:[%s1207_s20 + $0xd8] sm:$0xff]  ;;  %v202_v46 = vld [vmem:[%s1207_s20 + $0xe0] sm:$0xff] }
  0x1b   : > { %v259_v55 = vmul.f32 %v1202_v0, %v188_v42  ;;  %v388_v57 = vmax.f32 %v324_v47, 0.0  ;;  %v389_v58 = vmax.f32 %v325_v48, 0.0  ;;  %v327_v59 = vadd.f32 %v1212_v1, %v256_v49 }
  0x1c   : > { %v328_v60 = vadd.f32 %v1212_v1, %v257_v50  ;;  %1123 = vst [vmem:[%s1244_s26 + $0x18] sm:$0xff] %v979_v52   ;;  %v390_v62 = vmax.f32 %v326_v53, 0.0  ;;  %v329_v63 = vadd.f32 %v1212_v1, %v258_v54  ;;  %v260_v2 = vmul.f32 %v1202_v0, %v189_v51  ;;  %v203_v51 = vld [vmem:[%s1207_s20 + $0xe8] sm:$0xff] }
  0x1d   : > { %v330_v3 = vadd.f32 %v1212_v1, %v259_v55  ;;  %v984_v6 = vpack.c.bf16 %v389_v58, %v388_v57  ;;  %v391_v7 = vmax.f32 %v327_v59, 0.0  ;;  %v261_v9 = vmul.f32 %v1202_v0, %v190_v56  ;;  %v204_v56 = vld [vmem:[%s1207_s20 + $0xf0] sm:$0xff] }
  0x1e   : > { %v392_v8 = vmax.f32 %v328_v60, 0.0  ;;  %v393_v11 = vmax.f32 %v329_v63, 0.0  ;;  %v331_v12 = vadd.f32 %v1212_v1, %v260_v2  ;;  %v262_v14 = vmul.f32 %v1202_v0, %v191_v61  ;;  %v205_v61 = vld [vmem:[%s1207_s20 + $0xf8] sm:$0xff] }
  0x1f   : > { %v394_v13 = vmax.f32 %v330_v3, 0.0  ;;  %1124 = vst [vmem:[%s1244_s26 + $0x20] sm:$0xff] %v984_v6   ;;  %v989_v16 = vpack.c.bf16 %v391_v7, %v390_v62  ;;  %v332_v17 = vadd.f32 %v1212_v1, %v261_v9  ;;  %v263_v18 = vmul.f32 %v1202_v0, %v192_v4  ;;  %v206_v4 = vld [vmem:[%s1207_s20 + $0x100] sm:$0xff]  ;;  %v207_v9 = vld [vmem:[%s1207_s20 + $0x108] sm:$0xff] }
  0x20   : > { %v264_v19 = vmul.f32 %v1202_v0, %v193_v5  ;;  %v994_v21 = vpack.c.bf16 %v393_v11, %v392_v8  ;;  %v395_v22 = vmax.f32 %v331_v12, 0.0  ;;  %v333_v23 = vadd.f32 %v1212_v1, %v262_v14  ;;  %v208_v14 = vld [vmem:[%s1207_s20 + $0x110] sm:$0xff] }
  0x21   : > { %v265_v24 = vmul.f32 %v1202_v0, %v194_v10  ;;  %1125 = vst [vmem:[%s1244_s26 + $0x28] sm:$0xff] %v989_v16   ;;  %v396_v26 = vmax.f32 %v332_v17, 0.0  ;;  %v334_v27 = vadd.f32 %v1212_v1, %v263_v18  ;;  %v266_v29 = vmul.f32 %v1202_v0, %v195_v15  ;;  %v209_v15 = vld [vmem:[%s1207_s20 + $0x118] sm:$0xff] }
  0x22   : > { %v335_v28 = vadd.f32 %v1212_v1, %v264_v19  ;;  %1126 = vst [vmem:[%s1244_s26 + $0x30] sm:$0xff] %v994_v21   ;;  %v999_v31 = vpack.c.bf16 %v395_v22, %v394_v13  ;;  %v397_v32 = vmax.f32 %v333_v23, 0.0  ;;  %v267_v34 = vmul.f32 %v1202_v0, %v196_v20  ;;  %v210_v20 = vld [vmem:[%s1207_s20 + $0x120] sm:$0xff] }
  0x23   : > { %v336_v33 = vadd.f32 %v1212_v1, %v265_v24  ;;  %v398_v36 = vmax.f32 %v334_v27, 0.0  ;;  %v337_v38 = vadd.f32 %v1212_v1, %v266_v29  ;;  %v268_v39 = vmul.f32 %v1202_v0, %v197_v25  ;;  %v211_v25 = vld [vmem:[%s1207_s20 + $0x128] sm:$0xff] }
  0x24   : > { %v399_v37 = vmax.f32 %v335_v28, 0.0  ;;  %1127 = vst [vmem:[%s1244_s26 + $0x38] sm:$0xff] %v999_v31   ;;  %v1004_v42 = vpack.c.bf16 %v397_v32, %v396_v26  ;;  %v338_v44 = vadd.f32 %v1212_v1, %v267_v34  ;;  %v269_v45 = vmul.f32 %v1202_v0, %v198_v30  ;;  %v212_v30 = vld [vmem:[%s1207_s20 + $0x130] sm:$0xff] }
  0x25   : > { %v400_v43 = vmax.f32 %v336_v33, 0.0  ;;  %v401_v48 = vmax.f32 %v337_v38, 0.0  ;;  %v339_v49 = vadd.f32 %v1212_v1, %v268_v39  ;;  %v270_v50 = vmul.f32 %v1202_v0, %v199_v35  ;;  %v213_v35 = vld [vmem:[%s1207_s20 + $0x138] sm:$0xff] }
  0x26   : > { %v1009_v47 = vpack.c.bf16 %v399_v37, %v398_v36  ;;  %1128 = vst [vmem:[%s1244_s26 + $0x40] sm:$0xff] %v1004_v42   ;;  %v402_v52 = vmax.f32 %v338_v44, 0.0  ;;  %v340_v53 = vadd.f32 %v1212_v1, %v269_v45  ;;  %v271_v54 = vmul.f32 %v1202_v0, %v200_v40  ;;  %v214_v40 = vld [vmem:[%s1207_s20 + $0x140] sm:$0xff]  ;;  %v215_v45 = vld [vmem:[%s1207_s20 + $0x148] sm:$0xff] }
  0x27   : > { %v272_v55 = vmul.f32 %v1202_v0, %v201_v41  ;;  %v1014_v57 = vpack.c.bf16 %v401_v48, %v400_v43  ;;  %v403_v58 = vmax.f32 %v339_v49, 0.0  ;;  %v341_v59 = vadd.f32 %v1212_v1, %v270_v50  ;;  %v216_v50 = vld [vmem:[%s1207_s20 + $0x150] sm:$0xff] }
  0x28   : > { %1129 = vst [vmem:[%s1244_s26 + $0x48] sm:$0xff] %v1009_v47   ;;  %v273_v60 = vmul.f32 %v1202_v0, %v202_v46  ;;  %v404_v62 = vmax.f32 %v340_v53, 0.0  ;;  %v342_v63 = vadd.f32 %v1212_v1, %v271_v54  ;;  %v274_v3 = vmul.f32 %v1202_v0, %v203_v51  ;;  %v217_v51 = vld [vmem:[%s1207_s20 + $0x158] sm:$0xff] }
  0x29   : > { %v343_v2 = vadd.f32 %v1212_v1, %v272_v55  ;;  %1130 = vst [vmem:[%s1244_s26 + $0x50] sm:$0xff] %v1014_v57   ;;  %v1019_v5 = vpack.c.bf16 %v403_v58, %v402_v52  ;;  %v405_v6 = vmax.f32 %v341_v59, 0.0  ;;  %v275_v8 = vmul.f32 %v1202_v0, %v204_v56  ;;  %v218_v56 = vld [vmem:[%s1207_s20 + $0x160] sm:$0xff] }
  0x2a   : > { %v344_v7 = vadd.f32 %v1212_v1, %v273_v60  ;;  %v406_v10 = vmax.f32 %v342_v63, 0.0  ;;  %v345_v12 = vadd.f32 %v1212_v1, %v274_v3  ;;  %v276_v13 = vmul.f32 %v1202_v0, %v205_v61  ;;  %v219_v61 = vld [vmem:[%s1207_s20 + $0x168] sm:$0xff] }
  0x2b   : > { %v407_v11 = vmax.f32 %v343_v2, 0.0  ;;  %1131 = vst [vmem:[%s1244_s26 + $0x58] sm:$0xff] %v1019_v5   ;;  %v1024_v16 = vpack.c.bf16 %v405_v6, %v404_v62  ;;  %v346_v18 = vadd.f32 %v1212_v1, %v275_v8  ;;  %v277_v19 = vmul.f32 %v1202_v0, %v206_v4  ;;  %v220_v4 = vld [vmem:[%s1207_s20 + $0x170] sm:$0xff] }
  0x2c   : > { %v408_v17 = vmax.f32 %v344_v7, 0.0  ;;  %v409_v22 = vmax.f32 %v345_v12, 0.0  ;;  %v347_v23 = vadd.f32 %v1212_v1, %v276_v13  ;;  %v278_v24 = vmul.f32 %v1202_v0, %v207_v9  ;;  %v221_v9 = vld [vmem:[%s1207_s20 + $0x178] sm:$0xff] }
  0x2d   : > { %v1029_v21 = vpack.c.bf16 %v407_v11, %v406_v10  ;;  %1132 = vst [vmem:[%s1244_s26 + $0x60] sm:$0xff] %v1024_v16   ;;  %v410_v26 = vmax.f32 %v346_v18, 0.0  ;;  %v348_v27 = vadd.f32 %v1212_v1, %v277_v19  ;;  %v279_v28 = vmul.f32 %v1202_v0, %v208_v14  ;;  %v222_v14 = vld [vmem:[%s1207_s20 + $0x180] sm:$0xff]  ;;  %v223_v19 = vld [vmem:[%s1207_s20 + $0x188] sm:$0xff] }
  0x2e   : > { %v280_v29 = vmul.f32 %v1202_v0, %v209_v15  ;;  %v1034_v31 = vpack.c.bf16 %v409_v22, %v408_v17  ;;  %v411_v32 = vmax.f32 %v347_v23, 0.0  ;;  %v349_v33 = vadd.f32 %v1212_v1, %v278_v24  ;;  %v224_v24 = vld [vmem:[%s1207_s20 + $0x190] sm:$0xff] }
  0x2f   : > { %1133 = vst [vmem:[%s1244_s26 + $0x68] sm:$0xff] %v1029_v21   ;;  %v281_v34 = vmul.f32 %v1202_v0, %v210_v20  ;;  %v412_v36 = vmax.f32 %v348_v27, 0.0  ;;  %v350_v37 = vadd.f32 %v1212_v1, %v279_v28  ;;  %v282_v39 = vmul.f32 %v1202_v0, %v211_v25  ;;  %v225_v25 = vld [vmem:[%s1207_s20 + $0x198] sm:$0xff] }
  0x30   : > { %v351_v38 = vadd.f32 %v1212_v1, %v280_v29  ;;  %1134 = vst [vmem:[%s1244_s26 + $0x70] sm:$0xff] %v1034_v31   ;;  %v1039_v41 = vpack.c.bf16 %v411_v32, %v410_v26  ;;  %v413_v42 = vmax.f32 %v349_v33, 0.0  ;;  %v283_v44 = vmul.f32 %v1202_v0, %v212_v30  ;;  %v226_v30 = vld [vmem:[%s1207_s20 + $0x1a0] sm:$0xff] }
  0x31   : > { %v352_v43 = vadd.f32 %v1212_v1, %v281_v34  ;;  %v414_v46 = vmax.f32 %v350_v37, 0.0  ;;  %v353_v48 = vadd.f32 %v1212_v1, %v282_v39  ;;  %v284_v49 = vmul.f32 %v1202_v0, %v213_v35  ;;  %v227_v35 = vld [vmem:[%s1207_s20 + $0x1a8] sm:$0xff] }
  0x32   : > { %v415_v47 = vmax.f32 %v351_v38, 0.0  ;;  %1135 = vst [vmem:[%s1244_s26 + $0x78] sm:$0xff] %v1039_v41   ;;  %v1044_v52 = vpack.c.bf16 %v413_v42, %v412_v36  ;;  %v354_v54 = vadd.f32 %v1212_v1, %v283_v44  ;;  %v285_v55 = vmul.f32 %v1202_v0, %v214_v40  ;;  %v228_v40 = vld [vmem:[%s1207_s20 + $0x1b0] sm:$0xff] }
  0x33   : > { %v416_v53 = vmax.f32 %v352_v43, 0.0  ;;  %v417_v58 = vmax.f32 %v353_v48, 0.0  ;;  %v355_v59 = vadd.f32 %v1212_v1, %v284_v49  ;;  %v286_v60 = vmul.f32 %v1202_v0, %v215_v45  ;;  %v229_v45 = vld [vmem:[%s1207_s20 + $0x1b8] sm:$0xff] }
  0x34   : > { %v1049_v57 = vpack.c.bf16 %v415_v47, %v414_v46  ;;  %1136 = vst [vmem:[%s1244_s26 + $0x80] sm:$0xff] %v1044_v52   ;;  %v418_v62 = vmax.f32 %v354_v54, 0.0  ;;  %v356_v63 = vadd.f32 %v1212_v1, %v285_v55  ;;  %v287_v2 = vmul.f32 %v1202_v0, %v216_v50  ;;  %v230_v50 = vld [vmem:[%s1207_s20 + $0x1c0] sm:$0xff]  ;;  %v231_v55 = vld [vmem:[%s1207_s20 + $0x1c8] sm:$0xff] }
  0x35   : > { %v288_v3 = vmul.f32 %v1202_v0, %v217_v51  ;;  %v1054_v5 = vpack.c.bf16 %v417_v58, %v416_v53  ;;  %v419_v6 = vmax.f32 %v355_v59, 0.0  ;;  %v357_v7 = vadd.f32 %v1212_v1, %v286_v60  ;;  %v232_v60 = vld [vmem:[%s1207_s20 + $0x1d0] sm:$0xff] }
  0x36   : > { %1137 = vst [vmem:[%s1244_s26 + $0x88] sm:$0xff] %v1049_v57   ;;  %v289_v8 = vmul.f32 %v1202_v0, %v218_v56  ;;  %v420_v10 = vmax.f32 %v356_v63, 0.0  ;;  %v358_v11 = vadd.f32 %v1212_v1, %v287_v2  ;;  %v290_v13 = vmul.f32 %v1202_v0, %v219_v61  ;;  %v233_v61 = vld [vmem:[%s1207_s20 + $0x1d8] sm:$0xff] }
  0x37   : > { %v359_v12 = vadd.f32 %v1212_v1, %v288_v3  ;;  %1138 = vst [vmem:[%s1244_s26 + $0x90] sm:$0xff] %v1054_v5   ;;  %v1059_v15 = vpack.c.bf16 %v419_v6, %v418_v62  ;;  %v421_v16 = vmax.f32 %v357_v7, 0.0  ;;  %v291_v18 = vmul.f32 %v1202_v0, %v220_v4  ;;  %v234_v4 = vld [vmem:[%s1207_s20 + $0x1e0] sm:$0xff] }
  0x38   : > { %v360_v17 = vadd.f32 %v1212_v1, %v289_v8  ;;  %v422_v20 = vmax.f32 %v358_v11, 0.0  ;;  %v361_v22 = vadd.f32 %v1212_v1, %v290_v13  ;;  %v292_v23 = vmul.f32 %v1202_v0, %v221_v9  ;;  %v235_v9 = vld [vmem:[%s1207_s20 + $0x1e8] sm:$0xff] }
  0x39   : > { %v423_v21 = vmax.f32 %v359_v12, 0.0  ;;  %1139 = vst [vmem:[%s1244_s26 + $0x98] sm:$0xff] %v1059_v15   ;;  %v1064_v26 = vpack.c.bf16 %v421_v16, %v420_v10  ;;  %v362_v28 = vadd.f32 %v1212_v1, %v291_v18  ;;  %v293_v29 = vmul.f32 %v1202_v0, %v222_v14  ;;  %v236_v14 = vld [vmem:[%s1207_s20 + $0x1f0] sm:$0xff] }
  0x3a   : > { %v424_v27 = vmax.f32 %v360_v17, 0.0  ;;  %v425_v32 = vmax.f32 %v361_v22, 0.0  ;;  %v363_v33 = vadd.f32 %v1212_v1, %v292_v23  ;;  %v294_v34 = vmul.f32 %v1202_v0, %v223_v19  ;;  %v237_v19 = vld [vmem:[%s1207_s20 + $0x1f8] sm:$0xff] }
  0x3b   : > { %v1069_v31 = vpack.c.bf16 %v423_v21, %v422_v20  ;;  %1140 = vst [vmem:[%s1244_s26 + $0xa0] sm:$0xff] %v1064_v26   ;;  %v426_v36 = vmax.f32 %v362_v28, 0.0  ;;  %v364_v37 = vadd.f32 %v1212_v1, %v293_v29  ;;  %v295_v38 = vmul.f32 %v1202_v0, %v224_v24 }
  0x3c   : > { %v296_v39 = vmul.f32 %v1202_v0, %v225_v25  ;;  %v1074_v41 = vpack.c.bf16 %v425_v32, %v424_v27  ;;  %v427_v42 = vmax.f32 %v363_v33, 0.0  ;;  %v365_v43 = vadd.f32 %v1212_v1, %v294_v34 }
  0x3d   : > { %1141 = vst [vmem:[%s1244_s26 + $0xa8] sm:$0xff] %v1069_v31   ;;  %v297_v44 = vmul.f32 %v1202_v0, %v226_v30  ;;  %v428_v46 = vmax.f32 %v364_v37, 0.0  ;;  %v366_v47 = vadd.f32 %v1212_v1, %v295_v38  ;;  %v298_v49 = vmul.f32 %v1202_v0, %v227_v35 }
  0x3e   : > { %v367_v48 = vadd.f32 %v1212_v1, %v296_v39  ;;  %1142 = vst [vmem:[%s1244_s26 + $0xb0] sm:$0xff] %v1074_v41   ;;  %v1079_v51 = vpack.c.bf16 %v427_v42, %v426_v36  ;;  %v429_v52 = vmax.f32 %v365_v43, 0.0  ;;  %v299_v54 = vmul.f32 %v1202_v0, %v228_v40 }
  0x3f   : > { %v368_v53 = vadd.f32 %v1212_v1, %v297_v44  ;;  %v430_v56 = vmax.f32 %v366_v47, 0.0  ;;  %v369_v58 = vadd.f32 %v1212_v1, %v298_v49  ;;  %v300_v59 = vmul.f32 %v1202_v0, %v229_v45 }
  0x40   : > { %v431_v57 = vmax.f32 %v367_v48, 0.0  ;;  %1143 = vst [vmem:[%s1244_s26 + $0xb8] sm:$0xff] %v1079_v51   ;;  %v1084_v62 = vpack.c.bf16 %v429_v52, %v428_v46  ;;  %v370_v2 = vadd.f32 %v1212_v1, %v299_v54  ;;  %v301_v3 = vmul.f32 %v1202_v0, %v230_v50 }
  0x41   : > { %v432_v63 = vmax.f32 %v368_v53, 0.0  ;;  %v433_v6 = vmax.f32 %v369_v58, 0.0  ;;  %v371_v7 = vadd.f32 %v1212_v1, %v300_v59  ;;  %v302_v8 = vmul.f32 %v1202_v0, %v231_v55 }
  0x42   : > { %v1089_v5 = vpack.c.bf16 %v431_v57, %v430_v56  ;;  %1144 = vst [vmem:[%s1244_s26 + $0xc0] sm:$0xff] %v1084_v62   ;;  %v434_v10 = vmax.f32 %v370_v2, 0.0  ;;  %v372_v11 = vadd.f32 %v1212_v1, %v301_v3  ;;  %v303_v12 = vmul.f32 %v1202_v0, %v232_v60 }
  0x43   : > { %v304_v13 = vmul.f32 %v1202_v0, %v233_v61  ;;  %v1094_v15 = vpack.c.bf16 %v433_v6, %v432_v63  ;;  %v435_v16 = vmax.f32 %v371_v7, 0.0  ;;  %v373_v17 = vadd.f32 %v1212_v1, %v302_v8 }
  0x44   : > { %1145 = vst [vmem:[%s1244_s26 + $0xc8] sm:$0xff] %v1089_v5   ;;  %v305_v18 = vmul.f32 %v1202_v0, %v234_v4  ;;  %v436_v20 = vmax.f32 %v372_v11, 0.0  ;;  %v374_v21 = vadd.f32 %v1212_v1, %v303_v12  ;;  %v306_v23 = vmul.f32 %v1202_v0, %v235_v9 }
  0x45   : > { %v375_v22 = vadd.f32 %v1212_v1, %v304_v13  ;;  %1146 = vst [vmem:[%s1244_s26 + $0xd0] sm:$0xff] %v1094_v15   ;;  %v1099_v24 = vpack.c.bf16 %v435_v16, %v434_v10  ;;  %v437_v25 = vmax.f32 %v373_v17, 0.0  ;;  %v307_v27 = vmul.f32 %v1202_v0, %v236_v14 }
  0x46   : > { %v376_v26 = vadd.f32 %v1212_v1, %v305_v18  ;;  %v438_v28 = vmax.f32 %v374_v21, 0.0  ;;  %v377_v30 = vadd.f32 %v1212_v1, %v306_v23  ;;  %v308_v31 = vmul.f32 %v1202_v0, %v237_v19 }
  0x47   : > { %v439_v29 = vmax.f32 %v375_v22, 0.0  ;;  %1147 = vst [vmem:[%s1244_s26 + $0xd8] sm:$0xff] %v1099_v24   ;;  %v1104_v32 = vpack.c.bf16 %v437_v25, %v436_v20  ;;  %v378_v34 = vadd.f32 %v1212_v1, %v307_v27 }
  0x48   : > { %v440_v33 = vmax.f32 %v376_v26, 0.0  ;;  %v441_v36 = vmax.f32 %v377_v30, 0.0  ;;  %v379_v37 = vadd.f32 %v1212_v1, %v308_v31 }
  0x49   : > { %v1109_v35 = vpack.c.bf16 %v439_v29, %v438_v28  ;;  %1148 = vst [vmem:[%s1244_s26 + $0xe0] sm:$0xff] %v1104_v32   ;;  %v442_v38 = vmax.f32 %v378_v34, 0.0 }
  0x4a   : > { %v1114_v39 = vpack.c.bf16 %v441_v36, %v440_v33  ;;  %v443_v40 = vmax.f32 %v379_v37, 0.0 }
  0x4b   : > { %1149 = vst [vmem:[%s1244_s26 + $0xe8] sm:$0xff] %v1109_v35  }
  0x4c   : > { %1150 = vst [vmem:[%s1244_s26 + $0xf0] sm:$0xff] %v1114_v39   ;;  %v1119_v41 = vpack.c.bf16 %v443_v40, %v442_v38 }
  0x4e   : > { %1151 = vst [vmem:[%s1244_s26 + $0xf8] sm:$0xff] %v1119_v41  }
  0x4f PF: > { %s13_s12 = sadd.s32 1, %s1166_s12  }
  0x50   : > { %p10_p4 = scmp.ge.s32.totalorder %s13_s12, 4  }
  0x52   :  { %12 = sbr.rel (!%p10_p4) target bundleno = 1 (0x1), region = 62 }

// kernel: bottleneck_forward.5
= control target key start
LH: loop header
LB: loop body
LE: loop exit
PB: predicated region body
PF: predicated region fallthrough
CT: control target
= control target key end

     0   :  { %s1264_s15 = smov 0   ;;  %s1647_s0 = inlined_call_operand.vmem [shape: f32[1024,128], index: 0, kind: input, shape index: {}]   ;;  %s1648_s1 = inlined_call_operand.vmem [shape: bf16[128,128], index: 1, kind: input, shape index: {}]   ;;  %s1649_s2 = inlined_call_operand.vmem [shape: f32[1024,128], index: 2, kind: output, shape index: {0}]   ;;  %s1650_s3 = inlined_call_operand.vmem [shape: f32[16,128], index: 3, kind: output, shape index: {1}]   ;;  %s1651_s4 = inlined_call_operand.vmem [shape: f32[16,128], index: 4, kind: output, shape index: {2}]  }
   0x1 LB: > { %s1270_s16 = sadd.s32 4294967295, %s1237_s15   ;;  %p1062_p0 = scmp.ge.s32.totalorder %s1237_s15, 1  ;;  %s1237_s15 = sphi %s1264_s15, %s15_s15  }
   0x2   : > { %p168_p1 = scmp.lt.s32.totalorder %s1237_s15, 3 }
   0x4   : > { %p169_p2 = pnand %p1062_p0, %p168_p1 }
   0x5   : > { %v1223_v0 = vld [vmem:[%s1648_s1] sm:$0xff] (!%p169_p2)   ;;  %s1063_s19 = sshll.u32 (!%p169_p2), %s1270_s16, 6  ;;  %v1224_v1 = vld [vmem:[%s1648_s1 + $0x8] sm:$0xff] (!%p169_p2)   ;;  %v1225_v2 = vld [vmem:[%s1648_s1 + $0x10] sm:$0xff] (!%p169_p2)   ;;  %p214_p4 = scmp.lt.s32.totalorder (!%p169_p2), %s1270_s16, 1 }
   0x6   : > { %172 = sbr.rel (%p169_p2) target bundleno = 394 (0x18a), region = 28  ;;  %p203_p3 = scmp.lt.s32.totalorder (!%p169_p2), %s1063_s19, 127  ;;  %1119 = vmatprep.subr.bf16.mxu0 (!%p169_p2), %v1223_v0  ;;  %1199 = vmatprep.subr.bf16.mxu1 (!%p169_p2), %v1223_v0  ;;  %v1226_v3 = vld [vmem:[%s1648_s1 + $0x18] sm:$0xff] (!%p169_p2)   ;;  %v1227_v7 = vld [vmem:[%s1648_s1 + $0x20] sm:$0xff] (!%p169_p2)   ;;  %v1228_v8 = vld [vmem:[%s1648_s1 + $0x28] sm:$0xff] (!%p169_p2)  }
   0x7   : > { %1120 = vmatpush3.bf16.msra.mxu0 (!%p169_p2), %v1223_v0  ;;  %1207 = vmatpush3.bf16.msra.mxu1 (!%p169_p2), %v1223_v0  ;;  %v1229_v11 = vld [vmem:[%s1648_s1 + $0x30] sm:$0xff] (!%p169_p2)   ;;  %v1230_v13 = vld [vmem:[%s1648_s1 + $0x38] sm:$0xff] (!%p169_p2)  }
   0x8   : > { %1121 = vmatprep.subr.bf16.mxu0 (!%p169_p2), %v1224_v1  ;;  %1200 = vmatprep.subr.bf16.mxu1 (!%p169_p2), %v1224_v1 }
   0xb   : > { %1122 = vmatpush3.bf16.msra.mxu0 (!%p169_p2), %v1224_v1  ;;  %1208 = vmatpush3.bf16.msra.mxu1 (!%p169_p2), %v1224_v1 }
   0xc   : > { %1123 = vmatprep.subr.bf16.mxu0 (!%p169_p2), %v1225_v2  ;;  %1201 = vmatprep.subr.bf16.mxu1 (!%p169_p2), %v1225_v2 }
   0xd   : > { %s1653_s19 = smov (!%p203_p3, %s1063_s19), 127  ;;  %s1655_s16 = smov (!%p214_p4, %s1270_s16), 1 }
   0xe   : > { %s1064_s24 = sshll.u32 %s1653_s19, 3  ;;  %s1067_s17 = sshll.u32 %s1655_s16, 3 }
   0xf   : > { %s1292_s27 = scalar_lea.vmem %s1647_s0, %s1064_s24  ;;  %1124 = vmatpush3.bf16.msra.mxu0 %v1225_v2  ;;  %1209 = vmatpush3.bf16.msra.mxu1 %v1225_v2  ;;  %s1378_s14 = scalar_lea.vmem %s1649_s2, %s1064_s24 }
  0x10   : > { %v223_v4 = vld [vmem:[%s1292_s27] sm:$0xff]  ;;  %v224_v5 = vld [vmem:[%s1292_s27 + $0x8] sm:$0xff]  ;;  %1125 = vmatprep.subr.bf16.mxu0 %v1226_v3  ;;  %1202 = vmatprep.subr.bf16.mxu1 %v1226_v3  ;;  %v225_v14 = vld [vmem:[%s1292_s27 + $0x10] sm:$0xff]  ;;  %s217_s20 = scalar_lea.vmem %s1650_s3, %s1067_s17  ;;  %s221_s23 = scalar_lea.vmem %s1651_s4, %s1067_s17 }
  0x11   : > { %v287_v6 = vpack.c.bf16 %v224_v5, %v223_v4  ;;  %v255_v9 = vld [vmem:[%s1292_s27 + $0x100] sm:$0xff]  ;;  %v256_v10 = vld [vmem:[%s1292_s27 + $0x108] sm:$0xff]  ;;  %v226_v15 = vld [vmem:[%s1292_s27 + $0x18] sm:$0xff] }
  0x12   : > { %v303_v12 = vpack.c.bf16 %v256_v10, %v255_v9  ;;  %v227_v16 = vld [vmem:[%s1292_s27 + $0x20] sm:$0xff]  ;;  %v228_v17 = vld [vmem:[%s1292_s27 + $0x28] sm:$0xff]  ;;  %v257_v18 = vld [vmem:[%s1292_s27 + $0x110] sm:$0xff]  ;;  %v288_v22 = vpack.c.bf16 %v226_v15, %v225_v14 }
  0x13   : > { %1135 = vmatprep.mubr.bf16.mxu0 %v287_v6  ;;  %1126 = vmatpush3.bf16.msra.mxu0 %v1226_v3  ;;  %v258_v19 = vld [vmem:[%s1292_s27 + $0x118] sm:$0xff]  ;;  %v259_v20 = vld [vmem:[%s1292_s27 + $0x120] sm:$0xff]  ;;  %v260_v21 = vld [vmem:[%s1292_s27 + $0x128] sm:$0xff]  ;;  %v289_v23 = vpack.c.bf16 %v228_v17, %v227_v16 }
  0x14   : > { %1127 = vmatprep.subr.bf16.mxu0 %v1227_v7  ;;  %1210 = vmatpush3.bf16.msra.mxu1 %v1226_v3  ;;  %v304_v24 = vpack.c.bf16 %v258_v19, %v257_v18  ;;  %v305_v25 = vpack.c.bf16 %v260_v21, %v259_v20  ;;  %v229_v26 = vld [vmem:[%s1292_s27 + $0x30] sm:$0xff]  ;;  %v230_v27 = vld [vmem:[%s1292_s27 + $0x38] sm:$0xff]  ;;  %v231_v28 = vld [vmem:[%s1292_s27 + $0x40] sm:$0xff] }
  0x15   : > { %1203 = vmatprep.subr.bf16.mxu1 %v1227_v7  ;;  %1167 = vmatprep.mubr.bf16.mxu1 %v303_v12  ;;  %v232_v29 = vld [vmem:[%s1292_s27 + $0x48] sm:$0xff]  ;;  %v261_v30 = vld [vmem:[%s1292_s27 + $0x130] sm:$0xff]  ;;  %v262_v31 = vld [vmem:[%s1292_s27 + $0x138] sm:$0xff]  ;;  %v290_v34 = vpack.c.bf16 %v230_v27, %v229_v26 }
  0x16   : > { %v263_v32 = vld [vmem:[%s1292_s27 + $0x140] sm:$0xff]  ;;  %v264_v33 = vld [vmem:[%s1292_s27 + $0x148] sm:$0xff]  ;;  %v291_v35 = vpack.c.bf16 %v232_v29, %v231_v28  ;;  %v306_v36 = vpack.c.bf16 %v262_v31, %v261_v30  ;;  %v233_v38 = vld [vmem:[%s1292_s27 + $0x50] sm:$0xff] }
  0x17   : > { %1128 = vmatpush3.bf16.msra.mxu0 %v1227_v7  ;;  %v307_v37 = vpack.c.bf16 %v264_v33, %v263_v32  ;;  %v234_v39 = vld [vmem:[%s1292_s27 + $0x58] sm:$0xff]  ;;  %v235_v40 = vld [vmem:[%s1292_s27 + $0x60] sm:$0xff]  ;;  %v236_v41 = vld [vmem:[%s1292_s27 + $0x68] sm:$0xff] }
  0x18   : > { %1129 = vmatprep.subr.bf16.mxu0 %v1228_v8  ;;  %1211 = vmatpush3.bf16.msra.mxu1 %v1227_v7  ;;  %v265_v42 = vld [vmem:[%s1292_s27 + $0x150] sm:$0xff]  ;;  %v266_v43 = vld [vmem:[%s1292_s27 + $0x158] sm:$0xff]  ;;  %v267_v44 = vld [vmem:[%s1292_s27 + $0x160] sm:$0xff]  ;;  %v292_v46 = vpack.c.bf16 %v234_v39, %v233_v38  ;;  %v293_v47 = vpack.c.bf16 %v236_v41, %v235_v40 }
  0x19   : > { %1204 = vmatprep.subr.bf16.mxu1 %v1228_v8  ;;  %v268_v45 = vld [vmem:[%s1292_s27 + $0x168] sm:$0xff]  ;;  %v308_v48 = vpack.c.bf16 %v266_v43, %v265_v42  ;;  %v237_v50 = vld [vmem:[%s1292_s27 + $0x70] sm:$0xff]  ;;  %v238_v51 = vld [vmem:[%s1292_s27 + $0x78] sm:$0xff] }
  0x1a   : > { %v309_v49 = vpack.c.bf16 %v268_v45, %v267_v44  ;;  %v239_v52 = vld [vmem:[%s1292_s27 + $0x80] sm:$0xff]  ;;  %v240_v53 = vld [vmem:[%s1292_s27 + $0x88] sm:$0xff]  ;;  %v269_v54 = vld [vmem:[%s1292_s27 + $0x170] sm:$0xff]  ;;  %v294_v58 = vpack.c.bf16 %v238_v51, %v237_v50 }
  0x1b   : > { %1130 = vmatpush3.bf16.msra.mxu0 %v1228_v8  ;;  %v270_v55 = vld [vmem:[%s1292_s27 + $0x178] sm:$0xff]  ;;  %v271_v56 = vld [vmem:[%s1292_s27 + $0x180] sm:$0xff]  ;;  %v272_v57 = vld [vmem:[%s1292_s27 + $0x188] sm:$0xff]  ;;  %v295_v59 = vpack.c.bf16 %v240_v53, %v239_v52 }
  0x1c   : > { %1131 = vmatprep.subr.bf16.mxu0 %v1229_v11  ;;  %1212 = vmatpush3.bf16.msra.mxu1 %v1228_v8  ;;  %v310_v60 = vpack.c.bf16 %v270_v55, %v269_v54  ;;  %v311_v61 = vpack.c.bf16 %v272_v57, %v271_v56  ;;  %v241_v62 = vld [vmem:[%s1292_s27 + $0x90] sm:$0xff]  ;;  %v242_v63 = vld [vmem:[%s1292_s27 + $0x98] sm:$0xff]  ;;  %v243_v0 = vld [vmem:[%s1292_s27 + $0xa0] sm:$0xff] }
  0x1d   : > { %1205 = vmatprep.subr.bf16.mxu1 %v1229_v11  ;;  %v244_v1 = vld [vmem:[%s1292_s27 + $0xa8] sm:$0xff]  ;;  %v273_v2 = vld [vmem:[%s1292_s27 + $0x190] sm:$0xff]  ;;  %v274_v3 = vld [vmem:[%s1292_s27 + $0x198] sm:$0xff]  ;;  %v296_v6 = vpack.c.bf16 %v242_v63, %v241_v62 }
  0x1e   : > { %v275_v4 = vld [vmem:[%s1292_s27 + $0x1a0] sm:$0xff]  ;;  %v276_v5 = vld [vmem:[%s1292_s27 + $0x1a8] sm:$0xff]  ;;  %v297_v7 = vpack.c.bf16 %v244_v1, %v243_v0  ;;  %v312_v8 = vpack.c.bf16 %v274_v3, %v273_v2  ;;  %v245_v10 = vld [vmem:[%s1292_s27 + $0xb0] sm:$0xff] }
  0x1f   : > { %1132 = vmatpush3.bf16.msra.mxu0 %v1229_v11  ;;  %v313_v9 = vpack.c.bf16 %v276_v5, %v275_v4  ;;  %v247_v12 = vld [vmem:[%s1292_s27 + $0xc0] sm:$0xff]  ;;  %v277_v14 = vld [vmem:[%s1292_s27 + $0x1b0] sm:$0xff]  ;;  %v278_v15 = vld [vmem:[%s1292_s27 + $0x1b8] sm:$0xff] }
  0x20   : > { %1133 = vmatprep.subr.bf16.mxu0 %v1230_v13  ;;  %1213 = vmatpush3.bf16.msra.mxu1 %v1229_v11  ;;  %v246_v11 = vld [vmem:[%s1292_s27 + $0xb8] sm:$0xff]  ;;  %v279_v16 = vld [vmem:[%s1292_s27 + $0x1c0] sm:$0xff]  ;;  %v280_v17 = vld [vmem:[%s1292_s27 + $0x1c8] sm:$0xff]  ;;  %v314_v20 = vpack.c.bf16 %v278_v15, %v277_v14 }
  0x21   : > { %1206 = vmatprep.subr.bf16.mxu1 %v1230_v13  ;;  %v298_v18 = vpack.c.bf16 %v246_v11, %v245_v10  ;;  %v315_v21 = vpack.c.bf16 %v280_v17, %v279_v16  ;;  %v281_v26 = vld [vmem:[%s1292_s27 + $0x1d0] sm:$0xff]  ;;  %v282_v27 = vld [vmem:[%s1292_s27 + $0x1d8] sm:$0xff]  ;;  %v283_v28 = vld [vmem:[%s1292_s27 + $0x1e0] sm:$0xff] }
  0x22   : > { %v284_v29 = vld [vmem:[%s1292_s27 + $0x1e8] sm:$0xff]  ;;  %v316_v32 = vpack.c.bf16 %v282_v27, %v281_v26 }
  0x23   : > { %1134 = vmatpush3.bf16.msra.mxu0 %v1230_v13  ;;  %v317_v33 = vpack.c.bf16 %v284_v29, %v283_v28 }
  0x24   : > { %1214 = vmatpush3.bf16.msra.mxu1 %v1230_v13  ;;  %v248_v13 = vld [vmem:[%s1292_s27 + $0xc8] sm:$0xff] }
  0x25   : > { %v299_v19 = vpack.c.bf16 %v248_v13, %v247_v12 }
  0x26   : > { %1136 = vmatmul.mubr.bf16.vlgmr.msra.gmra.mrb[0].mxu0 %v288_v22  ;;  %v249_v22 = vld [vmem:[%s1292_s27 + $0xd0] sm:$0xff] }
  0x27   : > { %1139 = vmatprep.mubr.bf16.mxu0 %v289_v23  ;;  %1168 = vmatmul.mubr.bf16.vlgmr.msra.gmra.mrb[0].mxu1 %v304_v24  ;;  %v250_v23 = vld [vmem:[%s1292_s27 + $0xd8] sm:$0xff]  ;;  %v251_v24 = vld [vmem:[%s1292_s27 + $0xe0] sm:$0xff] }
  0x28   : > { %1171 = vmatprep.mubr.bf16.mxu1 %v305_v25  ;;  %v252_v25 = vld [vmem:[%s1292_s27 + $0xe8] sm:$0xff]  ;;  %v300_v30 = vpack.c.bf16 %v250_v23, %v249_v22 }
  0x29   : > { %v301_v31 = vpack.c.bf16 %v252_v25, %v251_v24 }
  0x2e   : > { %1140 = vmatmul.mubr.bf16.gmra.mrb[4].mxu0 %v290_v34  ;;  %v253_v34 = vld [vmem:[%s1292_s27 + $0xf0] sm:$0xff] }
  0x2f   : > { %1143 = vmatprep.mubr.bf16.mxu0 %v291_v35  ;;  %1172 = vmatmul.mubr.bf16.gmra.mrb[4].mxu1 %v306_v36  ;;  %v254_v35 = vld [vmem:[%s1292_s27 + $0xf8] sm:$0xff]  ;;  %v285_v36 = vld [vmem:[%s1292_s27 + $0x1f0] sm:$0xff] }
  0x30   : > { %1175 = vmatprep.mubr.bf16.mxu1 %v307_v37  ;;  %v286_v37 = vld [vmem:[%s1292_s27 + $0x1f8] sm:$0xff]  ;;  %v302_v38 = vpack.c.bf16 %v254_v35, %v253_v34 }
  0x31   : > { %v318_v39 = vpack.c.bf16 %v286_v37, %v285_v36 }
  0x36   : > { %1144 = vmatmul.mubr.bf16.gmra.mrb[8].mxu0 %v292_v46 }
  0x37   : > { %1147 = vmatprep.mubr.bf16.mxu0 %v293_v47  ;;  %1176 = vmatmul.mubr.bf16.gmra.mrb[8].mxu1 %v308_v48 }
  0x38   : > { %1179 = vmatprep.mubr.bf16.mxu1 %v309_v49 }
  0x3e   : > { %1148 = vmatmul.mubr.bf16.gmra.mrb[12].mxu0 %v294_v58 }
  0x3f   : > { %1151 = vmatprep.mubr.bf16.mxu0 %v295_v59  ;;  %1180 = vmatmul.mubr.bf16.gmra.mrb[12].mxu1 %v310_v60 }
  0x40   : > { %1183 = vmatprep.mubr.bf16.mxu1 %v311_v61 }
  0x46   : > { %1152 = vmatmul.mubr.bf16.gmra.mrb[16].mxu0 %v296_v6 }
  0x47   : > { %1155 = vmatprep.mubr.bf16.mxu0 %v297_v7  ;;  %1184 = vmatmul.mubr.bf16.gmra.mrb[16].mxu1 %v312_v8 }
  0x48   : > { %1187 = vmatprep.mubr.bf16.mxu1 %v313_v9 }
  0x4e   : > { %1156 = vmatmul.mubr.bf16.gmra.mrb[20].mxu0 %v298_v18 }
  0x4f   : > { %1159 = vmatprep.mubr.bf16.mxu0 %v299_v19  ;;  %1188 = vmatmul.mubr.bf16.gmra.mrb[20].mxu1 %v314_v20 }
  0x50   : > { %1191 = vmatprep.mubr.bf16.mxu1 %v315_v21 }
  0x56   : > { %1160 = vmatmul.mubr.bf16.gmra.mrb[24].mxu0 %v300_v30 }
  0x57   : > { %1163 = vmatprep.mubr.bf16.mxu0 %v301_v31  ;;  %1192 = vmatmul.mubr.bf16.gmra.mrb[24].mxu1 %v316_v32 }
  0x58   : > { %1195 = vmatprep.mubr.bf16.mxu1 %v317_v33 }
  0x5e   : > { %1164 = vmatmul.mubr.bf16.gmra.mrb[28].mxu0 %v302_v38 }
  0x5f   : > { %1196 = vmatmul.mubr.bf16.gmra.mrb[28].mxu1 %v318_v39 }
  0xf9   : > { %v1137_v40 = vpop.f32.mrb[0].mxu0 }
  0xfa   : > { %674 = vst [vmem:[%s1378_s14 + $0x10] sm:$0xff] %v1137_v40  ;;  %v417_v41 = vpop.f32.mrb[1].mxu0  ;;  %v1381_v42 = vpop.f32.mrb[0].mxu1  ;;  %v807_v51 = vmul.f32 %v1137_v40, %v1137_v40 }
  0xfb   : > { %672 = vst [vmem:[%s1378_s14] sm:$0xff] %v417_v41  ;;  %v1138_v43 = vpop.f32.mrb[2].mxu0  ;;  %706 = vst [vmem:[%s1378_s14 + $0x110] sm:$0xff] %v1381_v42  ;;  %v1386_v44 = vpop.f32.mrb[1].mxu1  ;;  %v805_v47 = vmul.f32 %v417_v41, %v417_v41 }
  0xfc   : > { %675 = vst [vmem:[%s1378_s14 + $0x18] sm:$0xff] %v1138_v43  ;;  %v420_v45 = vpop.f32.mrb[3].mxu0  ;;  %704 = vst [vmem:[%s1378_s14 + $0x100] sm:$0xff] %v1386_v44  ;;  %v1391_v46 = vpop.f32.mrb[2].mxu1  ;;  %v808_v54 = vmul.f32 %v1138_v43, %v1138_v43 }
  0xfd   : > { %673 = vst [vmem:[%s1378_s14 + $0x8] sm:$0xff] %v420_v45  ;;  %v736_v48 = vadd.f32 %v420_v45, %v417_v41  ;;  %v806_v49 = vmul.f32 %v420_v45, %v420_v45  ;;  %707 = vst [vmem:[%s1378_s14 + $0x118] sm:$0xff] %v1391_v46  ;;  %v1396_v50 = vpop.f32.mrb[3].mxu1 }
  0xfe   : > { %705 = vst [vmem:[%s1378_s14 + $0x108] sm:$0xff] %v1396_v50 }
  0xff   : > { %v737_v52 = vadd.f32 %v1137_v40, %v736_v48  ;;  %v869_v53 = vadd.f32 %v806_v49, %v805_v47 }
 0x101   : > { %v870_v55 = vadd.f32 %v869_v53, %v807_v51  ;;  %v1141_v56 = vpop.f32.mrb[4].mxu0  ;;  %v738_v57 = vadd.f32 %v1138_v43, %v737_v52 }
 0x102   : > { %678 = vst [vmem:[%s1378_s14 + $0x30] sm:$0xff] %v1141_v56  ;;  %v433_v58 = vpop.f32.mrb[5].mxu0  ;;  %v1401_v59 = vpop.f32.mrb[4].mxu1  ;;  %v811_v7 = vmul.f32 %v1141_v56, %v1141_v56 }
 0x103   : > { %676 = vst [vmem:[%s1378_s14 + $0x20] sm:$0xff] %v433_v58  ;;  %v739_v60 = vadd.f32 %v738_v57, %v433_v58  ;;  %v809_v61 = vmul.f32 %v433_v58, %v433_v58  ;;  %v871_v62 = vadd.f32 %v870_v55, %v808_v54  ;;  %v1142_v63 = vpop.f32.mrb[6].mxu0  ;;  %710 = vst [vmem:[%s1378_s14 + $0x130] sm:$0xff] %v1401_v59  ;;  %v1406_v0 = vpop.f32.mrb[5].mxu1 }
 0x104   : > { %679 = vst [vmem:[%s1378_s14 + $0x38] sm:$0xff] %v1142_v63  ;;  %v436_v1 = vpop.f32.mrb[7].mxu0  ;;  %708 = vst [vmem:[%s1378_s14 + $0x120] sm:$0xff] %v1406_v0  ;;  %v1411_v2 = vpop.f32.mrb[6].mxu1  ;;  %v812_v10 = vmul.f32 %v1142_v63, %v1142_v63 }
 0x105   : > { %v872_v3 = vadd.f32 %v871_v62, %v809_v61  ;;  %677 = vst [vmem:[%s1378_s14 + $0x28] sm:$0xff] %v436_v1  ;;  %v740_v4 = vadd.f32 %v739_v60, %v436_v1  ;;  %v810_v5 = vmul.f32 %v436_v1, %v436_v1  ;;  %711 = vst [vmem:[%s1378_s14 + $0x138] sm:$0xff] %v1411_v2  ;;  %v1416_v6 = vpop.f32.mrb[7].mxu1 }
 0x106   : > { %709 = vst [vmem:[%s1378_s14 + $0x128] sm:$0xff] %v1416_v6 }
 0x107   : > { %v741_v8 = vadd.f32 %v1141_v56, %v740_v4  ;;  %v873_v9 = vadd.f32 %v872_v3, %v810_v5 }
 0x109   : > { %v874_v11 = vadd.f32 %v873_v9, %v811_v7  ;;  %v1145_v12 = vpop.f32.mrb[8].mxu0  ;;  %v742_v13 = vadd.f32 %v1142_v63, %v741_v8 }
 0x10a   : > { %682 = vst [vmem:[%s1378_s14 + $0x50] sm:$0xff] %v1145_v12  ;;  %v449_v14 = vpop.f32.mrb[9].mxu0  ;;  %v1421_v15 = vpop.f32.mrb[8].mxu1  ;;  %v815_v27 = vmul.f32 %v1145_v12, %v1145_v12 }
 0x10b   : > { %680 = vst [vmem:[%s1378_s14 + $0x40] sm:$0xff] %v449_v14  ;;  %v743_v16 = vadd.f32 %v742_v13, %v449_v14  ;;  %v813_v17 = vmul.f32 %v449_v14, %v449_v14  ;;  %v875_v18 = vadd.f32 %v874_v11, %v812_v10  ;;  %v1146_v19 = vpop.f32.mrb[10].mxu0  ;;  %714 = vst [vmem:[%s1378_s14 + $0x150] sm:$0xff] %v1421_v15  ;;  %v1426_v20 = vpop.f32.mrb[9].mxu1 }
 0x10c   : > { %683 = vst [vmem:[%s1378_s14 + $0x58] sm:$0xff] %v1146_v19  ;;  %v452_v21 = vpop.f32.mrb[11].mxu0  ;;  %712 = vst [vmem:[%s1378_s14 + $0x140] sm:$0xff] %v1426_v20  ;;  %v1431_v22 = vpop.f32.mrb[10].mxu1  ;;  %v816_v30 = vmul.f32 %v1146_v19, %v1146_v19 }
 0x10d   : > { %v876_v23 = vadd.f32 %v875_v18, %v813_v17  ;;  %681 = vst [vmem:[%s1378_s14 + $0x48] sm:$0xff] %v452_v21  ;;  %v744_v24 = vadd.f32 %v743_v16, %v452_v21  ;;  %v814_v25 = vmul.f32 %v452_v21, %v452_v21  ;;  %715 = vst [vmem:[%s1378_s14 + $0x158] sm:$0xff] %v1431_v22  ;;  %v1436_v26 = vpop.f32.mrb[11].mxu1 }
 0x10e   : > { %713 = vst [vmem:[%s1378_s14 + $0x148] sm:$0xff] %v1436_v26 }
 0x10f   : > { %v745_v28 = vadd.f32 %v1145_v12, %v744_v24  ;;  %v877_v29 = vadd.f32 %v876_v23, %v814_v25 }
 0x111   : > { %v878_v31 = vadd.f32 %v877_v29, %v815_v27  ;;  %v1149_v32 = vpop.f32.mrb[12].mxu0  ;;  %v746_v33 = vadd.f32 %v1146_v19, %v745_v28 }
 0x112   : > { %686 = vst [vmem:[%s1378_s14 + $0x70] sm:$0xff] %v1149_v32  ;;  %v465_v34 = vpop.f32.mrb[13].mxu0  ;;  %v1441_v35 = vpop.f32.mrb[12].mxu1  ;;  %v819_v51 = vmul.f32 %v1149_v32, %v1149_v32 }
 0x113   : > { %684 = vst [vmem:[%s1378_s14 + $0x60] sm:$0xff] %v465_v34  ;;  %v747_v36 = vadd.f32 %v746_v33, %v465_v34  ;;  %v817_v37 = vmul.f32 %v465_v34, %v465_v34  ;;  %v879_v38 = vadd.f32 %v878_v31, %v816_v30  ;;  %v1150_v39 = vpop.f32.mrb[14].mxu0  ;;  %718 = vst [vmem:[%s1378_s14 + $0x170] sm:$0xff] %v1441_v35  ;;  %v1446_v40 = vpop.f32.mrb[13].mxu1 }
 0x114   : > { %687 = vst [vmem:[%s1378_s14 + $0x78] sm:$0xff] %v1150_v39  ;;  %v468_v41 = vpop.f32.mrb[15].mxu0  ;;  %716 = vst [vmem:[%s1378_s14 + $0x160] sm:$0xff] %v1446_v40  ;;  %v1451_v43 = vpop.f32.mrb[14].mxu1  ;;  %v820_v54 = vmul.f32 %v1150_v39, %v1150_v39 }
 0x115   : > { %v880_v45 = vadd.f32 %v879_v38, %v817_v37  ;;  %685 = vst [vmem:[%s1378_s14 + $0x68] sm:$0xff] %v468_v41  ;;  %v748_v47 = vadd.f32 %v747_v36, %v468_v41  ;;  %v818_v48 = vmul.f32 %v468_v41, %v468_v41  ;;  %719 = vst [vmem:[%s1378_s14 + $0x178] sm:$0xff] %v1451_v43  ;;  %v1456_v49 = vpop.f32.mrb[15].mxu1 }
 0x116   : > { %717 = vst [vmem:[%s1378_s14 + $0x168] sm:$0xff] %v1456_v49 }
 0x117   : > { %v749_v52 = vadd.f32 %v1149_v32, %v748_v47  ;;  %v881_v53 = vadd.f32 %v880_v45, %v818_v48 }
 0x119   : > { %v882_v55 = vadd.f32 %v881_v53, %v819_v51  ;;  %v1153_v56 = vpop.f32.mrb[16].mxu0  ;;  %v750_v57 = vadd.f32 %v1150_v39, %v749_v52 }
 0x11a   : > { %690 = vst [vmem:[%s1378_s14 + $0x90] sm:$0xff] %v1153_v56  ;;  %v481_v58 = vpop.f32.mrb[17].mxu0  ;;  %v1461_v60 = vpop.f32.mrb[16].mxu1  ;;  %v823_v11 = vmul.f32 %v1153_v56, %v1153_v56 }
 0x11b   : > { %688 = vst [vmem:[%s1378_s14 + $0x80] sm:$0xff] %v481_v58  ;;  %v751_v61 = vadd.f32 %v750_v57, %v481_v58  ;;  %v821_v62 = vmul.f32 %v481_v58, %v481_v58  ;;  %v883_v63 = vadd.f32 %v882_v55, %v820_v54  ;;  %v1154_v1 = vpop.f32.mrb[18].mxu0  ;;  %722 = vst [vmem:[%s1378_s14 + $0x190] sm:$0xff] %v1461_v60  ;;  %v1466_v3 = vpop.f32.mrb[17].mxu1 }
 0x11c   : > { %691 = vst [vmem:[%s1378_s14 + $0x98] sm:$0xff] %v1154_v1  ;;  %v484_v4 = vpop.f32.mrb[19].mxu0  ;;  %720 = vst [vmem:[%s1378_s14 + $0x180] sm:$0xff] %v1466_v3  ;;  %v1471_v5 = vpop.f32.mrb[18].mxu1  ;;  %v824_v14 = vmul.f32 %v1154_v1, %v1154_v1 }
 0x11d   : > { %v884_v7 = vadd.f32 %v883_v63, %v821_v62  ;;  %689 = vst [vmem:[%s1378_s14 + $0x88] sm:$0xff] %v484_v4  ;;  %v752_v8 = vadd.f32 %v751_v61, %v484_v4  ;;  %v822_v9 = vmul.f32 %v484_v4, %v484_v4  ;;  %723 = vst [vmem:[%s1378_s14 + $0x198] sm:$0xff] %v1471_v5  ;;  %v1476_v10 = vpop.f32.mrb[19].mxu1 }
 0x11e   : > { %721 = vst [vmem:[%s1378_s14 + $0x188] sm:$0xff] %v1476_v10 }
 0x11f   : > { %v753_v12 = vadd.f32 %v1153_v56, %v752_v8  ;;  %v885_v13 = vadd.f32 %v884_v7, %v822_v9 }
 0x121   : > { %v886_v16 = vadd.f32 %v885_v13, %v823_v11  ;;  %v1157_v17 = vpop.f32.mrb[20].mxu0  ;;  %v754_v18 = vadd.f32 %v1154_v1, %v753_v12 }
 0x122   : > { %694 = vst [vmem:[%s1378_s14 + $0xb0] sm:$0xff] %v1157_v17  ;;  %v497_v19 = vpop.f32.mrb[21].mxu0  ;;  %v1481_v21 = vpop.f32.mrb[20].mxu1  ;;  %v827_v36 = vmul.f32 %v1157_v17, %v1157_v17 }
 0x123   : > { %692 = vst [vmem:[%s1378_s14 + $0xa0] sm:$0xff] %v497_v19  ;;  %v755_v23 = vadd.f32 %v754_v18, %v497_v19  ;;  %v825_v24 = vmul.f32 %v497_v19, %v497_v19  ;;  %v887_v25 = vadd.f32 %v886_v16, %v824_v14  ;;  %v1158_v27 = vpop.f32.mrb[22].mxu0  ;;  %726 = vst [vmem:[%s1378_s14 + $0x1b0] sm:$0xff] %v1481_v21  ;;  %v1486_v28 = vpop.f32.mrb[21].mxu1 }
 0x124   : > { %695 = vst [vmem:[%s1378_s14 + $0xb8] sm:$0xff] %v1158_v27  ;;  %v500_v29 = vpop.f32.mrb[23].mxu0  ;;  %724 = vst [vmem:[%s1378_s14 + $0x1a0] sm:$0xff] %v1486_v28  ;;  %v1491_v30 = vpop.f32.mrb[22].mxu1  ;;  %v828_v39 = vmul.f32 %v1158_v27, %v1158_v27 }
 0x125   : > { %v888_v31 = vadd.f32 %v887_v25, %v825_v24  ;;  %693 = vst [vmem:[%s1378_s14 + $0xa8] sm:$0xff] %v500_v29  ;;  %v756_v32 = vadd.f32 %v755_v23, %v500_v29  ;;  %v826_v33 = vmul.f32 %v500_v29, %v500_v29  ;;  %727 = vst [vmem:[%s1378_s14 + $0x1b8] sm:$0xff] %v1491_v30  ;;  %v1496_v34 = vpop.f32.mrb[23].mxu1 }
 0x126   : > { %725 = vst [vmem:[%s1378_s14 + $0x1a8] sm:$0xff] %v1496_v34 }
 0x127   : > { %v757_v37 = vadd.f32 %v1157_v17, %v756_v32  ;;  %v889_v38 = vadd.f32 %v888_v31, %v826_v33 }
 0x129   : > { %v890_v41 = vadd.f32 %v889_v38, %v827_v36  ;;  %v1161_v45 = vpop.f32.mrb[24].mxu0  ;;  %v758_v47 = vadd.f32 %v1158_v27, %v757_v37 }
 0x12a   : > { %698 = vst [vmem:[%s1378_s14 + $0xd0] sm:$0xff] %v1161_v45  ;;  %v513_v48 = vpop.f32.mrb[25].mxu0  ;;  %v1501_v51 = vpop.f32.mrb[24].mxu1  ;;  %v831_v4 = vmul.f32 %v1161_v45, %v1161_v45 }
 0x12b   : > { %696 = vst [vmem:[%s1378_s14 + $0xc0] sm:$0xff] %v513_v48  ;;  %v759_v52 = vadd.f32 %v758_v47, %v513_v48  ;;  %v829_v53 = vmul.f32 %v513_v48, %v513_v48  ;;  %v891_v54 = vadd.f32 %v890_v41, %v828_v39  ;;  %v1162_v55 = vpop.f32.mrb[26].mxu0  ;;  %730 = vst [vmem:[%s1378_s14 + $0x1d0] sm:$0xff] %v1501_v51  ;;  %v1506_v56 = vpop.f32.mrb[25].mxu1 }
 0x12c   : > { %699 = vst [vmem:[%s1378_s14 + $0xd8] sm:$0xff] %v1162_v55  ;;  %v516_v57 = vpop.f32.mrb[27].mxu0  ;;  %728 = vst [vmem:[%s1378_s14 + $0x1c0] sm:$0xff] %v1506_v56  ;;  %v1511_v58 = vpop.f32.mrb[26].mxu1  ;;  %v832_v9 = vmul.f32 %v1162_v55, %v1162_v55  ;;  %v837_v47 = vmul.f32 %v1386_v44, %v1386_v44 }
 0x12d   : > { %v892_v61 = vadd.f32 %v891_v54, %v829_v53  ;;  %697 = vst [vmem:[%s1378_s14 + $0xc8] sm:$0xff] %v516_v57  ;;  %v760_v62 = vadd.f32 %v759_v52, %v516_v57  ;;  %v830_v63 = vmul.f32 %v516_v57, %v516_v57  ;;  %731 = vst [vmem:[%s1378_s14 + $0x1d8] sm:$0xff] %v1511_v58  ;;  %v1516_v1 = vpop.f32.mrb[27].mxu1 }
 0x12e   : > { %729 = vst [vmem:[%s1378_s14 + $0x1c8] sm:$0xff] %v1516_v1  ;;  %v839_v57 = vmul.f32 %v1381_v42, %v1381_v42 }
 0x12f   : > { %v761_v7 = vadd.f32 %v1161_v45, %v760_v62  ;;  %v893_v8 = vadd.f32 %v892_v61, %v830_v63  ;;  %v840_v63 = vmul.f32 %v1391_v46, %v1391_v46 }
 0x131   : > { %v894_v11 = vadd.f32 %v893_v8, %v831_v4  ;;  %v1165_v12 = vpop.f32.mrb[28].mxu0  ;;  %v762_v13 = vadd.f32 %v1162_v55, %v761_v7  ;;  %v838_v55 = vmul.f32 %v1396_v50, %v1396_v50 }
 0x132   : > { %702 = vst [vmem:[%s1378_s14 + $0xf0] sm:$0xff] %v1165_v12  ;;  %v529_v14 = vpop.f32.mrb[29].mxu0  ;;  %v1521_v16 = vpop.f32.mrb[28].mxu1  ;;  %v835_v36 = vmul.f32 %v1165_v12, %v1165_v12 }
 0x133   : > { %700 = vst [vmem:[%s1378_s14 + $0xe0] sm:$0xff] %v529_v14  ;;  %v763_v17 = vadd.f32 %v762_v13, %v529_v14  ;;  %v833_v18 = vmul.f32 %v529_v14, %v529_v14  ;;  %v895_v19 = vadd.f32 %v894_v11, %v832_v9  ;;  %v1166_v23 = vpop.f32.mrb[30].mxu0  ;;  %734 = vst [vmem:[%s1378_s14 + $0x1f0] sm:$0xff] %v1521_v16  ;;  %v1526_v24 = vpop.f32.mrb[29].mxu1 }
 0x134   : > { %703 = vst [vmem:[%s1378_s14 + $0xf8] sm:$0xff] %v1166_v23  ;;  %v532_v25 = vpop.f32.mrb[31].mxu0  ;;  %732 = vst [vmem:[%s1378_s14 + $0x1e0] sm:$0xff] %v1526_v24  ;;  %v1531_v27 = vpop.f32.mrb[30].mxu1  ;;  %v836_v39 = vmul.f32 %v1166_v23, %v1166_v23 }
 0x135   : > { %v896_v29 = vadd.f32 %v895_v19, %v833_v18  ;;  %701 = vst [vmem:[%s1378_s14 + $0xe8] sm:$0xff] %v532_v25  ;;  %v764_v31 = vadd.f32 %v763_v17, %v532_v25  ;;  %v834_v32 = vmul.f32 %v532_v25, %v532_v25  ;;  %735 = vst [vmem:[%s1378_s14 + $0x1f8] sm:$0xff] %v1531_v27  ;;  %v1536_v33 = vpop.f32.mrb[31].mxu1 }
 0x136   : > { %733 = vst [vmem:[%s1378_s14 + $0x1e8] sm:$0xff] %v1536_v33 }
 0x137   : > { %v765_v37 = vadd.f32 %v1165_v12, %v764_v31  ;;  %v897_v38 = vadd.f32 %v896_v29, %v834_v32  ;;  %v842_v12 = vmul.f32 %v1416_v6, %v1416_v6  ;;  %v846_v29 = vmul.f32 %v1436_v26, %v1436_v26 }
 0x139   : > { %v898_v41 = vadd.f32 %v897_v38, %v835_v36  ;;  %v766_v45 = vadd.f32 %v1166_v23, %v765_v37 }
 0x13b   : > { %v767_v48 = vadd.f32 %v766_v45, %v1386_v44  ;;  %v899_v52 = vadd.f32 %v898_v41, %v836_v39  ;;  %v841_v44 = vmul.f32 %v1406_v0, %v1406_v0  ;;  %v850_v45 = vmul.f32 %v1456_v49, %v1456_v49 }
 0x13d   : > { %v900_v53 = vadd.f32 %v899_v52, %v837_v47  ;;  %v768_v54 = vadd.f32 %v767_v48, %v1396_v50 }
 0x13f   : > { %v769_v61 = vadd.f32 %v1381_v42, %v768_v54  ;;  %v901_v62 = vadd.f32 %v900_v53, %v838_v55  ;;  %v843_v42 = vmul.f32 %v1401_v59, %v1401_v59 }
 0x141   : > { %v902_v4 = vadd.f32 %v901_v62, %v839_v57  ;;  %v770_v7 = vadd.f32 %v1391_v46, %v769_v61  ;;  %v844_v46 = vmul.f32 %v1411_v2, %v1411_v2  ;;  %v854_v61 = vmul.f32 %v1476_v10, %v1476_v10 }
 0x143   : > { %v771_v8 = vadd.f32 %v770_v7, %v1406_v0  ;;  %v903_v9 = vadd.f32 %v902_v4, %v840_v63  ;;  %v845_v0 = vmul.f32 %v1426_v20, %v1426_v20 }
 0x145   : > { %v904_v11 = vadd.f32 %v903_v9, %v841_v44  ;;  %v772_v50 = vadd.f32 %v771_v8, %v1416_v6 }
 0x147   : > { %v773_v13 = vadd.f32 %v1401_v59, %v772_v50  ;;  %v905_v14 = vadd.f32 %v904_v11, %v842_v12  ;;  %v847_v59 = vmul.f32 %v1421_v15, %v1421_v15  ;;  %v858_v11 = vmul.f32 %v1496_v34, %v1496_v34 }
 0x149   : > { %v906_v17 = vadd.f32 %v905_v14, %v843_v42  ;;  %v774_v18 = vadd.f32 %v1411_v2, %v773_v13  ;;  %v848_v2 = vmul.f32 %v1431_v22, %v1431_v22 }
 0x14b   : > { %v775_v19 = vadd.f32 %v774_v18, %v1426_v20  ;;  %v907_v23 = vadd.f32 %v906_v17, %v844_v46  ;;  %v849_v20 = vmul.f32 %v1446_v40, %v1446_v40  ;;  %v862_v18 = vmul.f32 %v1516_v1, %v1516_v1 }
 0x14d   : > { %v908_v25 = vadd.f32 %v907_v23, %v845_v0  ;;  %v776_v6 = vadd.f32 %v775_v19, %v1436_v26 }
 0x14f   : > { %v777_v31 = vadd.f32 %v1421_v15, %v776_v6  ;;  %v909_v32 = vadd.f32 %v908_v25, %v846_v29  ;;  %v851_v15 = vmul.f32 %v1441_v35, %v1441_v35  ;;  %v865_v25 = vmul.f32 %v1526_v24, %v1526_v24 }
 0x151   : > { %v910_v36 = vadd.f32 %v909_v32, %v847_v59  ;;  %v778_v37 = vadd.f32 %v1431_v22, %v777_v31  ;;  %v852_v22 = vmul.f32 %v1451_v43, %v1451_v43  ;;  %v867_v31 = vmul.f32 %v1521_v16, %v1521_v16 }
 0x153   : > { %v779_v38 = vadd.f32 %v778_v37, %v1446_v40  ;;  %v911_v39 = vadd.f32 %v910_v36, %v848_v2  ;;  %v853_v40 = vmul.f32 %v1466_v3, %v1466_v3 }
 0x155   : > { %v912_v41 = vadd.f32 %v911_v39, %v849_v20  ;;  %v780_v26 = vadd.f32 %v779_v38, %v1456_v49 }
 0x157   : > { %v781_v47 = vadd.f32 %v1441_v35, %v780_v26  ;;  %v913_v48 = vadd.f32 %v912_v41, %v850_v45  ;;  %v855_v35 = vmul.f32 %v1461_v60, %v1461_v60 }
 0x159   : > { %v914_v52 = vadd.f32 %v913_v48, %v851_v15  ;;  %v782_v53 = vadd.f32 %v1451_v43, %v781_v47  ;;  %v856_v43 = vmul.f32 %v1471_v5, %v1471_v5 }
 0x15b   : > { %v783_v54 = vadd.f32 %v782_v53, %v1466_v3  ;;  %v915_v55 = vadd.f32 %v914_v52, %v852_v22  ;;  %v857_v3 = vmul.f32 %v1486_v28, %v1486_v28 }
 0x15d   : > { %v916_v57 = vadd.f32 %v915_v55, %v853_v40  ;;  %v784_v49 = vadd.f32 %v783_v54, %v1476_v10 }
 0x15f   : > { %v785_v62 = vadd.f32 %v1461_v60, %v784_v49  ;;  %v917_v63 = vadd.f32 %v916_v57, %v854_v61  ;;  %v859_v60 = vmul.f32 %v1481_v21, %v1481_v21 }
 0x161   : > { %v918_v4 = vadd.f32 %v917_v63, %v855_v35  ;;  %v786_v7 = vadd.f32 %v1471_v5, %v785_v62  ;;  %v860_v5 = vmul.f32 %v1491_v30, %v1491_v30 }
 0x163   : > { %v787_v44 = vadd.f32 %v786_v7, %v1486_v28  ;;  %v919_v8 = vadd.f32 %v918_v4, %v856_v43  ;;  %v861_v28 = vmul.f32 %v1506_v56, %v1506_v56 }
 0x165   : > { %v920_v9 = vadd.f32 %v919_v8, %v857_v3  ;;  %v788_v10 = vadd.f32 %v787_v44, %v1496_v34 }
 0x167   : > { %v789_v50 = vadd.f32 %v1481_v21, %v788_v10  ;;  %v921_v12 = vadd.f32 %v920_v9, %v858_v11  ;;  %v863_v21 = vmul.f32 %v1501_v51, %v1501_v51 }
 0x169   : > { %v922_v42 = vadd.f32 %v921_v12, %v859_v60  ;;  %v790_v13 = vadd.f32 %v1491_v30, %v789_v50  ;;  %v864_v30 = vmul.f32 %v1511_v58, %v1511_v58 }
 0x16b   : > { %v791_v14 = vadd.f32 %v790_v13, %v1506_v56  ;;  %v923_v46 = vadd.f32 %v922_v42, %v860_v5 }
 0x16d   : > { %v924_v17 = vadd.f32 %v923_v46, %v861_v28  ;;  %v792_v34 = vadd.f32 %v791_v14, %v1516_v1 }
 0x16f   : > { %v793_v0 = vadd.f32 %v1501_v51, %v792_v34  ;;  %v925_v19 = vadd.f32 %v924_v17, %v862_v18  ;;  %v866_v51 = vmul.f32 %v1536_v33, %v1536_v33 }
 0x171   : > { %v926_v23 = vadd.f32 %v925_v19, %v863_v21  ;;  %v794_v56 = vadd.f32 %v1511_v58, %v793_v0  ;;  %v868_v58 = vmul.f32 %v1531_v27, %v1531_v27 }
 0x173   : > { %v795_v6 = vadd.f32 %v794_v56, %v1526_v24  ;;  %v927_v1 = vadd.f32 %v926_v23, %v864_v30 }
 0x175   : > { %v928_v29 = vadd.f32 %v927_v1, %v865_v25  ;;  %v796_v59 = vadd.f32 %v795_v6, %v1536_v33 }
 0x177   : > { %v797_v32 = vadd.f32 %v1521_v16, %v796_v59  ;;  %v929_v2 = vadd.f32 %v928_v29, %v866_v51 }
 0x179   : > { %v798_v36 = vadd.f32 %v1531_v27, %v797_v32  ;;  %v930_v24 = vadd.f32 %v929_v2, %v867_v31 }
 0x17b   : > { %v799_v37 = vrot.slane %v798_v36, 4  ;;  %v931_v20 = vadd.f32 %v930_v24, %v868_v58 }
 0x17d   : > { %v800_v38 = vadd.f32 %v799_v37, %v798_v36  ;;  %v932_v39 = vrot.slane %v931_v20, 4 }
 0x17f   : > { %v801_v41 = vrot.slane %v800_v38, 2  ;;  %v933_v33 = vadd.f32 %v932_v39, %v931_v20 }
 0x181   : > { %v802_v26 = vadd.f32 %v801_v41, %v800_v38  ;;  %v934_v45 = vrot.slane %v933_v33, 2 }
 0x183   : > { %v803_v15 = vrot.slane %v802_v26, 1  ;;  %v935_v16 = vadd.f32 %v934_v45, %v933_v33 }
 0x185   : > { %v804_v47 = vadd.f32 %v803_v15, %v802_v26  ;;  %v936_v48 = vrot.slane %v935_v16, 1 }
 0x187   : > { %v937_v27 = vadd.f32 %v936_v48, %v935_v16  ;;  %938 = vst [vmem:[%s217_s20] sm:$0xff] %v804_v47 }
 0x189   : > { %939 = vst [vmem:[%s221_s23] sm:$0xff] %v937_v27 }
 0x18a PF: > { %s15_s15 = sadd.s32 1, %s1237_s15  }
 0x18b   : > { %p12_p5 = scmp.ge.s32.totalorder %s15_s15, 4  }
 0x18d   :  { %14 = sbr.rel (!%p12_p5) target bundleno = 1 (0x1), region = 82 }

// kernel: bottleneck_forward.8
= control target key start
LH: loop header
LB: loop body
LE: loop exit
PB: predicated region body
PF: predicated region fallthrough
CT: control target
= control target key end

     0   :  { %s1536_s21 = smov 0   ;;  %s2160_s0 = inlined_call_operand.vmem [shape: f32[1024,128], index: 0, kind: input, shape index: {}]   ;;  %s2161_s1 = inlined_call_operand.vmem [shape: f32[1,128], index: 1, kind: input, shape index: {}]   ;;  %s2162_s2 = inlined_call_operand.vmem [shape: f32[1,128], index: 2, kind: input, shape index: {}]   ;;  %s2163_s3 = inlined_call_operand.vmem [shape: bf16[128,128], index: 3, kind: input, shape index: {}]   ;;  %s2164_s4 = inlined_call_operand.vmem [shape: f32[1024,128], index: 4, kind: output, shape index: {0}]   ;;  %s2165_s5 = inlined_call_operand.vmem [shape: f32[16,128], index: 5, kind: output, shape index: {1}]   ;;  %s2166_s6 = inlined_call_operand.vmem [shape: f32[16,128], index: 6, kind: output, shape index: {2}]  }
   0x1 LB: > { %s1542_s22 = sadd.s32 4294967295, %s1499_s21   ;;  %p1322_p0 = scmp.ge.s32.totalorder %s1499_s21, 1  ;;  %s1499_s21 = sphi %s1536_s21, %s17_s21  }
   0x2   : > { %p218_p1 = scmp.lt.s32.totalorder %s1499_s21, 3 }
   0x4   : > { %p219_p2 = pnand %p1322_p0, %p218_p1 }
   0x5   : > { %v1485_v0 = vld [vmem:[%s2163_s3] sm:$0xff] (!%p219_p2)   ;;  %s1323_s25 = sshll.u32 (!%p219_p2), %s1542_s22, 6  ;;  %v1486_v1 = vld [vmem:[%s2163_s3 + $0x8] sm:$0xff] (!%p219_p2)   ;;  %v1487_v2 = vld [vmem:[%s2163_s3 + $0x10] sm:$0xff] (!%p219_p2)   ;;  %p268_p4 = scmp.lt.s32.totalorder (!%p219_p2), %s1542_s22, 1 }
   0x6   : > { %222 = sbr.rel (%p219_p2) target bundleno = 394 (0x18a), region = 36  ;;  %p257_p3 = scmp.lt.s32.totalorder (!%p219_p2), %s1323_s25, 127  ;;  %1381 = vmatprep.subr.bf16.mxu0 (!%p219_p2), %v1485_v0  ;;  %1461 = vmatprep.subr.bf16.mxu1 (!%p219_p2), %v1485_v0  ;;  %v1488_v3 = vld [vmem:[%s2163_s3 + $0x18] sm:$0xff] (!%p219_p2)   ;;  %v1574_v6 = vld [vmem:[%s2161_s1] ss:$0 sm:$0xff] (!%p219_p2)  ;;  %v1490_v34 = vld [vmem:[%s2163_s3 + $0x28] sm:$0xff] (!%p219_p2)  }
   0x7   : > { %1382 = vmatpush3.bf16.msra.mxu0 (!%p219_p2), %v1485_v0  ;;  %1469 = vmatpush3.bf16.msra.mxu1 (!%p219_p2), %v1485_v0  ;;  %v1581_v9 = vld [vmem:[%s2162_s2] ss:$0 sm:$0xff] (!%p219_p2)  ;;  %v1632_v50 = vld [vmem:[%s2163_s3 + $0x30] sm:$0xff] (!%p219_p2)  }
   0x8   : > { %1383 = vmatprep.subr.bf16.mxu0 (!%p219_p2), %v1486_v1  ;;  %1462 = vmatprep.subr.bf16.mxu1 (!%p219_p2), %v1486_v1  ;;  %v1587_v11 = vld [vmem:[%s2163_s3 + $0x20] sm:$0xff] (!%p219_p2)  }
   0xb   : > { %1384 = vmatpush3.bf16.msra.mxu0 (!%p219_p2), %v1486_v1  ;;  %1470 = vmatpush3.bf16.msra.mxu1 (!%p219_p2), %v1486_v1 }
   0xc   : > { %1385 = vmatprep.subr.bf16.mxu0 (!%p219_p2), %v1487_v2  ;;  %1463 = vmatprep.subr.bf16.mxu1 (!%p219_p2), %v1487_v2 }
   0xd   : > { %s2168_s25 = smov (!%p257_p3, %s1323_s25), 127  ;;  %s2170_s22 = smov (!%p268_p4, %s1542_s22), 1 }
   0xe   : > { %s1324_s30 = sshll.u32 %s2168_s25, 3  ;;  %s1327_s25 = sshll.u32 %s2170_s22, 3 }
   0xf   : > { %s1564_s9 = scalar_lea.vmem %s2160_s0, %s1324_s30  ;;  %1386 = vmatpush3.bf16.msra.mxu0 %v1487_v2  ;;  %1471 = vmatpush3.bf16.msra.mxu1 %v1487_v2  ;;  %s1891_s29 = scalar_lea.vmem %s2164_s4, %s1324_s30 }
  0x10   : > { %v277_v4 = vld [vmem:[%s1564_s9] sm:$0xff]  ;;  %v278_v5 = vld [vmem:[%s1564_s9 + $0x8] sm:$0xff]  ;;  %v279_v10 = vld [vmem:[%s1564_s9 + $0x10] sm:$0xff]  ;;  %1387 = vmatprep.subr.bf16.mxu0 %v1488_v3  ;;  %1464 = vmatprep.subr.bf16.mxu1 %v1488_v3  ;;  %s271_s8 = scalar_lea.vmem %s2165_s5, %s1327_s25  ;;  %s275_s11 = scalar_lea.vmem %s2166_s6, %s1327_s25 }
  0x11   : > { %v348_v7 = vmul.f32 %v1574_v6, %v277_v4  ;;  %v349_v8 = vmul.f32 %v1574_v6, %v278_v5  ;;  %v280_v14 = vld [vmem:[%s1564_s9 + $0x18] sm:$0xff]  ;;  %v281_v15 = vld [vmem:[%s1564_s9 + $0x20] sm:$0xff]  ;;  %v282_v16 = vld [vmem:[%s1564_s9 + $0x28] sm:$0xff]  ;;  %v350_v21 = vmul.f32 %v1574_v6, %v279_v10 }
  0x12   : > { %v283_v17 = vld [vmem:[%s1564_s9 + $0x30] sm:$0xff]  ;;  %v284_v18 = vld [vmem:[%s1564_s9 + $0x38] sm:$0xff]  ;;  %v285_v22 = vld [vmem:[%s1564_s9 + $0x40] sm:$0xff]  ;;  %v351_v24 = vmul.f32 %v1574_v6, %v280_v14  ;;  %v352_v25 = vmul.f32 %v1574_v6, %v281_v15  ;;  %v353_v29 = vmul.f32 %v1574_v6, %v282_v16 }
  0x13   : > { %v419_v12 = vadd.f32 %v1581_v9, %v348_v7  ;;  %v420_v13 = vadd.f32 %v1581_v9, %v349_v8  ;;  %v286_v23 = vld [vmem:[%s1564_s9 + $0x48] sm:$0xff]  ;;  %v287_v26 = vld [vmem:[%s1564_s9 + $0x50] sm:$0xff]  ;;  %v288_v27 = vld [vmem:[%s1564_s9 + $0x58] sm:$0xff]  ;;  %1388 = vmatpush3.bf16.msra.mxu0 %v1488_v3  ;;  %v354_v30 = vmul.f32 %v1574_v6, %v283_v17  ;;  %v355_v31 = vmul.f32 %v1574_v6, %v284_v18 }
  0x14   : > { %v289_v32 = vld [vmem:[%s1564_s9 + $0x60] sm:$0xff]  ;;  %v290_v33 = vld [vmem:[%s1564_s9 + $0x68] sm:$0xff]  ;;  %1389 = vmatprep.subr.bf16.mxu0 %v1587_v11  ;;  %v356_v35 = vmul.f32 %v1574_v6, %v285_v22  ;;  %v357_v36 = vmul.f32 %v1574_v6, %v286_v23  ;;  %v421_v37 = vadd.f32 %v1581_v9, %v350_v21  ;;  %v358_v38 = vmul.f32 %v1574_v6, %v287_v26  ;;  %v291_v44 = vld [vmem:[%s1564_s9 + $0x70] sm:$0xff] }
  0x15   : > { %v483_v19 = vmax.f32 %v419_v12, 0.0  ;;  %v484_v20 = vmax.f32 %v420_v13, 0.0  ;;  %v359_v39 = vmul.f32 %v1574_v6, %v288_v27  ;;  %v422_v40 = vadd.f32 %v1581_v9, %v351_v24  ;;  %1472 = vmatpush3.bf16.msra.mxu1 %v1488_v3  ;;  %v292_v48 = vld [vmem:[%s1564_s9 + $0x78] sm:$0xff]  ;;  %v293_v49 = vld [vmem:[%s1564_s9 + $0x80] sm:$0xff]  ;;  %v294_v55 = vld [vmem:[%s1564_s9 + $0x88] sm:$0xff] }
  0x16   : > { %v423_v41 = vadd.f32 %v1581_v9, %v352_v25  ;;  %v360_v42 = vmul.f32 %v1574_v6, %v289_v32  ;;  %v361_v43 = vmul.f32 %v1574_v6, %v290_v33  ;;  %v424_v45 = vadd.f32 %v1581_v9, %v353_v29  ;;  %1465 = vmatprep.subr.bf16.mxu1 %v1587_v11  ;;  %v295_v0 = vld [vmem:[%s1564_s9 + $0x90] sm:$0xff]  ;;  %v296_v5 = vld [vmem:[%s1564_s9 + $0x98] sm:$0xff]  ;;  %v297_v13 = vld [vmem:[%s1564_s9 + $0xa0] sm:$0xff] }
  0x17   : > { %v547_v28 = vpack.c.bf16 %v484_v20, %v483_v19  ;;  %1390 = vmatpush3.bf16.msra.mxu0 %v1587_v11  ;;  %v425_v46 = vadd.f32 %v1581_v9, %v354_v30  ;;  %v426_v47 = vadd.f32 %v1581_v9, %v355_v31  ;;  %v427_v51 = vadd.f32 %v1581_v9, %v356_v35  ;;  %v1492_v7 = vld [vmem:[%s2163_s3 + $0x38] sm:$0xff]   ;;  %v298_v18 = vld [vmem:[%s1564_s9 + $0xa8] sm:$0xff]  ;;  %v299_v25 = vld [vmem:[%s1564_s9 + $0xb0] sm:$0xff] }
  0x18   : > { %1391 = vmatprep.subr.bf16.mxu0 %v1490_v34  ;;  %v428_v52 = vadd.f32 %v1581_v9, %v357_v36  ;;  %v429_v53 = vadd.f32 %v1581_v9, %v358_v38  ;;  %v430_v54 = vadd.f32 %v1581_v9, %v359_v39  ;;  %v485_v56 = vmax.f32 %v421_v37, 0.0  ;;  %v303_v30 = vld [vmem:[%s1564_s9 + $0xd0] sm:$0xff]  ;;  %v304_v31 = vld [vmem:[%s1564_s9 + $0xd8] sm:$0xff]  ;;  %v305_v37 = vld [vmem:[%s1564_s9 + $0xe0] sm:$0xff] }
  0x19   : > { %1397 = vmatprep.mubr.bf16.mxu0 %v547_v28  ;;  %v431_v57 = vadd.f32 %v1581_v9, %v360_v42  ;;  %v432_v58 = vadd.f32 %v1581_v9, %v361_v43  ;;  %v362_v59 = vmul.f32 %v1574_v6, %v291_v44  ;;  %v486_v60 = vmax.f32 %v422_v40, 0.0  ;;  %1473 = vmatpush3.bf16.msra.mxu1 %v1587_v11  ;;  %v300_v36 = vld [vmem:[%s1564_s9 + $0xb8] sm:$0xff]  ;;  %v306_v38 = vld [vmem:[%s1564_s9 + $0xe8] sm:$0xff]  ;;  %v307_v43 = vld [vmem:[%s1564_s9 + $0xf0] sm:$0xff] }
  0x1a   : > { %v487_v61 = vmax.f32 %v423_v41, 0.0  ;;  %v363_v62 = vmul.f32 %v1574_v6, %v292_v48  ;;  %v364_v63 = vmul.f32 %v1574_v6, %v293_v49  ;;  %v488_v1 = vmax.f32 %v424_v45, 0.0  ;;  %1466 = vmatprep.subr.bf16.mxu1 %v1490_v34  ;;  %v308_v48 = vld [vmem:[%s1564_s9 + $0xf8] sm:$0xff] }
  0x1b   : > { %1392 = vmatpush3.bf16.msra.mxu0 %v1490_v34  ;;  %v489_v2 = vmax.f32 %v425_v46, 0.0  ;;  %v490_v3 = vmax.f32 %v426_v47, 0.0  ;;  %v365_v4 = vmul.f32 %v1574_v6, %v294_v55  ;;  %v491_v8 = vmax.f32 %v427_v51, 0.0 }
  0x1c   : > { %1393 = vmatprep.subr.bf16.mxu0 %v1632_v50  ;;  %v492_v10 = vmax.f32 %v428_v52, 0.0  ;;  %v493_v12 = vmax.f32 %v429_v53, 0.0  ;;  %v494_v11 = vmax.f32 %v430_v54, 0.0  ;;  %v495_v14 = vmax.f32 %v431_v57, 0.0  ;;  %v309_v53 = vld [vmem:[%s1564_s9 + $0x100] sm:$0xff] }
  0x1d   : > { %v496_v15 = vmax.f32 %v432_v58, 0.0  ;;  %v1654_v16 = vadd.f32 %v1581_v9, %v362_v59  ;;  %v366_v17 = vmul.f32 %v1574_v6, %v295_v0  ;;  %v1659_v19 = vadd.f32 %v1581_v9, %v363_v62  ;;  %1474 = vmatpush3.bf16.msra.mxu1 %v1490_v34  ;;  %v310_v62 = vld [vmem:[%s1564_s9 + $0x108] sm:$0xff] }
  0x1e   : > { %v1662_v20 = vadd.f32 %v1581_v9, %v364_v63  ;;  %v367_v21 = vmul.f32 %v1574_v6, %v296_v5  ;;  %v548_v22 = vpack.c.bf16 %v486_v60, %v485_v56  ;;  %v1667_v23 = vadd.f32 %v1581_v9, %v365_v4  ;;  %1467 = vmatprep.subr.bf16.mxu1 %v1632_v50  ;;  %v312_v4 = vld [vmem:[%s1564_s9 + $0x118] sm:$0xff] }
  0x1f   : > { %1394 = vmatpush3.bf16.msra.mxu0 %v1632_v50  ;;  %v368_v24 = vmul.f32 %v1574_v6, %v297_v13  ;;  %v549_v26 = vpack.c.bf16 %v488_v1, %v487_v61  ;;  %v1672_v27 = vpack.c.bf16 %v490_v3, %v489_v2  ;;  %v1674_v28 = vpack.c.bf16 %v492_v10, %v491_v8  ;;  %v311_v3 = vld [vmem:[%s1564_s9 + $0x110] sm:$0xff] }
  0x20   : > { %1395 = vmatprep.subr.bf16.mxu0 %v1492_v7  ;;  %v369_v29 = vmul.f32 %v1574_v6, %v298_v18  ;;  %v1679_v32 = vpack.c.bf16 %v494_v11, %v493_v12  ;;  %v1681_v33 = vpack.c.bf16 %v496_v15, %v495_v14  ;;  %v497_v34 = vmax.f32 %v1654_v16, 0.0  ;;  %v314_v11 = vld [vmem:[%s1564_s9 + $0x128] sm:$0xff]  ;;  %v315_v18 = vld [vmem:[%s1564_s9 + $0x130] sm:$0xff] }
  0x21   : > { %v1685_v35 = vadd.f32 %v1581_v9, %v366_v17  ;;  %v498_v39 = vmax.f32 %v1659_v19, 0.0  ;;  %v499_v40 = vmax.f32 %v1662_v20, 0.0  ;;  %v1693_v41 = vadd.f32 %v1581_v9, %v367_v21  ;;  %1475 = vmatpush3.bf16.msra.mxu1 %v1632_v50 }
  0x22   : > { %v370_v42 = vmul.f32 %v1574_v6, %v299_v25  ;;  %v500_v44 = vmax.f32 %v1667_v23, 0.0  ;;  %v1700_v45 = vadd.f32 %v1581_v9, %v368_v24  ;;  %v374_v46 = vmul.f32 %v1574_v6, %v303_v30  ;;  %1468 = vmatprep.subr.bf16.mxu1 %v1492_v7 }
  0x23   : > { %1396 = vmatpush3.bf16.msra.mxu0 %v1492_v7  ;;  %v375_v47 = vmul.f32 %v1574_v6, %v304_v31  ;;  %v1706_v49 = vadd.f32 %v1581_v9, %v369_v29  ;;  %v1709_v51 = vmul.f32 %v1574_v6, %v300_v36  ;;  %v376_v50 = vmul.f32 %v1574_v6, %v305_v37  ;;  %v317_v37 = vld [vmem:[%s1564_s9 + $0x140] sm:$0xff] }
  0x24   : > { %v377_v52 = vmul.f32 %v1574_v6, %v306_v38  ;;  %v501_v54 = vmax.f32 %v1685_v35, 0.0  ;;  %v445_v55 = vadd.f32 %v1581_v9, %v374_v46  ;;  %v378_v57 = vmul.f32 %v1574_v6, %v307_v43  ;;  %v333_v35 = vld [vmem:[%s1564_s9 + $0x1c0] sm:$0xff] }
  0x25   : > { %v446_v56 = vadd.f32 %v1581_v9, %v375_v47  ;;  %v502_v58 = vmax.f32 %v1693_v41, 0.0  ;;  %v447_v59 = vadd.f32 %v1581_v9, %v376_v50  ;;  %v379_v61 = vmul.f32 %v1574_v6, %v308_v48  ;;  %1476 = vmatpush3.bf16.msra.mxu1 %v1492_v7  ;;  %v313_v7 = vld [vmem:[%s1564_s9 + $0x120] sm:$0xff] }
  0x26   : > { %1398 = vmatmul.mubr.bf16.vlgmr.msra.gmra.mrb[0].mxu0 %v548_v22  ;;  %v448_v60 = vadd.f32 %v1581_v9, %v377_v52  ;;  %v509_v63 = vmax.f32 %v445_v55, 0.0  ;;  %v449_v1 = vadd.f32 %v1581_v9, %v378_v57  ;;  %v380_v2 = vmul.f32 %v1574_v6, %v309_v53  ;;  %v301_v47 = vld [vmem:[%s1564_s9 + $0xc0] sm:$0xff]  ;;  %v318_v55 = vld [vmem:[%s1564_s9 + $0x148] sm:$0xff] }
  0x27   : > { %1401 = vmatprep.mubr.bf16.mxu0 %v549_v26  ;;  %v510_v0 = vmax.f32 %v446_v56, 0.0  ;;  %v1728_v5 = vadd.f32 %v1581_v9, %v370_v42  ;;  %v511_v8 = vmax.f32 %v447_v59, 0.0  ;;  %v450_v12 = vadd.f32 %v1581_v9, %v379_v61  ;;  %v316_v26 = vld [vmem:[%s1564_s9 + $0x138] sm:$0xff]  ;;  %v319_v61 = vld [vmem:[%s1564_s9 + $0x150] sm:$0xff] }
  0x28   : > { %v512_v10 = vmax.f32 %v448_v60, 0.0  ;;  %v513_v14 = vmax.f32 %v449_v1, 0.0  ;;  %v381_v15 = vmul.f32 %v1574_v6, %v310_v62  ;;  %v451_v17 = vadd.f32 %v1581_v9, %v380_v2  ;;  %v320_v62 = vld [vmem:[%s1564_s9 + $0x158] sm:$0xff] }
  0x29   : > { %v1733_v13 = vpack.c.bf16 %v510_v0, %v509_v63  ;;  %v514_v22 = vmax.f32 %v450_v12, 0.0  ;;  %v382_v24 = vmul.f32 %v1574_v6, %v311_v3  ;;  %v383_v25 = vmul.f32 %v1574_v6, %v312_v4  ;;  %v321_v3 = vld [vmem:[%s1564_s9 + $0x160] sm:$0xff]  ;;  %v322_v4 = vld [vmem:[%s1564_s9 + $0x168] sm:$0xff] }
  0x2a   : > { %v1738_v21 = vpack.c.bf16 %v512_v10, %v511_v8  ;;  %v452_v29 = vadd.f32 %v1581_v9, %v381_v15  ;;  %v515_v30 = vmax.f32 %v451_v17, 0.0  ;;  %v384_v31 = vmul.f32 %v1574_v6, %v313_v7  ;;  %v323_v7 = vld [vmem:[%s1564_s9 + $0x170] sm:$0xff]  ;;  %v324_v17 = vld [vmem:[%s1564_s9 + $0x178] sm:$0xff] }
  0x2b   : > { %v385_v36 = vmul.f32 %v1574_v6, %v314_v11  ;;  %v1747_v38 = vpack.c.bf16 %v514_v22, %v513_v14  ;;  %v453_v42 = vadd.f32 %v1581_v9, %v382_v24  ;;  %v454_v43 = vadd.f32 %v1581_v9, %v383_v25 }
  0x2c   : > { %v386_v46 = vmul.f32 %v1574_v6, %v315_v18  ;;  %v516_v48 = vmax.f32 %v452_v29, 0.0  ;;  %v455_v50 = vadd.f32 %v1581_v9, %v384_v31  ;;  %v387_v53 = vmul.f32 %v1574_v6, %v316_v26  ;;  %v325_v26 = vld [vmem:[%s1564_s9 + $0x180] sm:$0xff]  ;;  %v302_v29 = vld [vmem:[%s1564_s9 + $0xc8] sm:$0xff] }
  0x2d   : > { %v456_v52 = vadd.f32 %v1581_v9, %v385_v36  ;;  %v517_v56 = vmax.f32 %v453_v42, 0.0  ;;  %v518_v57 = vmax.f32 %v454_v43, 0.0  ;;  %v388_v60 = vmul.f32 %v1574_v6, %v317_v37 }
  0x2e   : > { %1402 = vmatmul.mubr.bf16.gmra.mrb[4].mxu0 %v1672_v27  ;;  %v457_v59 = vadd.f32 %v1581_v9, %v386_v46  ;;  %v563_v63 = vpack.c.bf16 %v516_v48, %v515_v30  ;;  %v519_v0 = vmax.f32 %v455_v50, 0.0  ;;  %v458_v2 = vadd.f32 %v1581_v9, %v387_v53 }
  0x2f   : > { %1405 = vmatprep.mubr.bf16.mxu0 %v1674_v28  ;;  %v520_v1 = vmax.f32 %v456_v52, 0.0  ;;  %v372_v27 = vmul.f32 %v1574_v6, %v301_v47  ;;  %v564_v8 = vpack.c.bf16 %v518_v57, %v517_v56  ;;  %v389_v10 = vmul.f32 %v1574_v6, %v318_v55 }
  0x30   : > { %v459_v12 = vadd.f32 %v1581_v9, %v388_v60  ;;  %1429 = vmatprep.mubr.bf16.mxu1 %v563_v63  ;;  %v521_v11 = vmax.f32 %v457_v59, 0.0  ;;  %v390_v14 = vmul.f32 %v1574_v6, %v319_v61  ;;  %v391_v15 = vmul.f32 %v1574_v6, %v320_v62  ;;  %v326_v60 = vld [vmem:[%s1564_s9 + $0x188] sm:$0xff]  ;;  %v331_v62 = vld [vmem:[%s1564_s9 + $0x1b0] sm:$0xff] }
  0x31   : > { %v565_v28 = vpack.c.bf16 %v520_v1, %v519_v0  ;;  %1430 = vmatmul.mubr.bf16.vlgmr.msra.gmra.mrb[0].mxu1 %v564_v8  ;;  %v522_v18 = vmax.f32 %v458_v2, 0.0  ;;  %v460_v22 = vadd.f32 %v1581_v9, %v389_v10  ;;  %v392_v24 = vmul.f32 %v1574_v6, %v321_v3  ;;  %v332_v1 = vld [vmem:[%s1564_s9 + $0x1b8] sm:$0xff]  ;;  %v334_v8 = vld [vmem:[%s1564_s9 + $0x1c8] sm:$0xff] }
  0x32   : > { %v393_v25 = vmul.f32 %v1574_v6, %v322_v4  ;;  %v523_v30 = vmax.f32 %v459_v12, 0.0  ;;  %v461_v31 = vadd.f32 %v1581_v9, %v390_v14  ;;  %v462_v36 = vadd.f32 %v1581_v9, %v391_v15  ;;  %v329_v4 = vld [vmem:[%s1564_s9 + $0x1a0] sm:$0xff]  ;;  %v335_v14 = vld [vmem:[%s1564_s9 + $0x1d0] sm:$0xff]  ;;  %v336_v15 = vld [vmem:[%s1564_s9 + $0x1d8] sm:$0xff] }
  0x33   : > { %1433 = vmatprep.mubr.bf16.mxu1 %v565_v28  ;;  %v394_v37 = vmul.f32 %v1574_v6, %v323_v7  ;;  %v524_v42 = vmax.f32 %v460_v22, 0.0  ;;  %v463_v43 = vadd.f32 %v1581_v9, %v392_v24  ;;  %v395_v47 = vmul.f32 %v1574_v6, %v324_v17  ;;  %v330_v7 = vld [vmem:[%s1564_s9 + $0x1a8] sm:$0xff] }
  0x34   : > { %v464_v46 = vadd.f32 %v1581_v9, %v393_v25  ;;  %v503_v48 = vmax.f32 %v1700_v45, 0.0  ;;  %v504_v50 = vmax.f32 %v1706_v49, 0.0  ;;  %v1788_v52 = vadd.f32 %v1581_v9, %v1709_v51  ;;  %v337_v25 = vld [vmem:[%s1564_s9 + $0x1e0] sm:$0xff] }
  0x35   : > { %v396_v53 = vmul.f32 %v1574_v6, %v325_v26  ;;  %v373_v55 = vmul.f32 %v1574_v6, %v302_v29  ;;  %v566_v56 = vpack.c.bf16 %v522_v18, %v521_v11  ;;  %v525_v57 = vmax.f32 %v461_v31, 0.0  ;;  %v338_v26 = vld [vmem:[%s1564_s9 + $0x1e8] sm:$0xff] }
  0x36   : > { %1406 = vmatmul.mubr.bf16.gmra.mrb[8].mxu0 %v1679_v32  ;;  %v526_v59 = vmax.f32 %v462_v36, 0.0  ;;  %v567_v45 = vpack.c.bf16 %v524_v42, %v523_v30  ;;  %v527_v49 = vmax.f32 %v463_v43, 0.0  ;;  %v528_v61 = vmax.f32 %v464_v46, 0.0 }
  0x37   : > { %1409 = vmatprep.mubr.bf16.mxu0 %v1681_v33  ;;  %v1796_v51 = vadd.f32 %v1581_v9, %v394_v37  ;;  %v554_v32 = vpack.c.bf16 %v498_v39, %v497_v34  ;;  %v555_v63 = vpack.c.bf16 %v500_v44, %v499_v40  ;;  %v1811_v33 = vpack.c.bf16 %v502_v58, %v501_v54  ;;  %v327_v34 = vld [vmem:[%s1564_s9 + $0x190] sm:$0xff]  ;;  %v328_v44 = vld [vmem:[%s1564_s9 + $0x198] sm:$0xff] }
  0x38   : > { %v1814_v0 = vadd.f32 %v1581_v9, %v395_v47  ;;  %v505_v16 = vmax.f32 %v1728_v5, 0.0  ;;  %v1819_v19 = vadd.f32 %v1581_v9, %v372_v27  ;;  %v397_v20 = vmul.f32 %v1574_v6, %v326_v60  ;;  %v339_v37 = vld [vmem:[%s1564_s9 + $0x1f0] sm:$0xff] }
  0x39   : > { %v1823_v23 = vadd.f32 %v1581_v9, %v396_v53  ;;  %v1827_v39 = vpack.c.bf16 %v504_v50, %v503_v48  ;;  %v506_v40 = vmax.f32 %v1788_v52, 0.0  ;;  %v1831_v41 = vadd.f32 %v1581_v9, %v373_v55  ;;  %1434 = vmatmul.mubr.bf16.gmra.mrb[4].mxu1 %v566_v56  ;;  %v340_v48 = vld [vmem:[%s1564_s9 + $0x1f8] sm:$0xff] }
  0x3a   : > { %v402_v54 = vmul.f32 %v1574_v6, %v331_v62  ;;  %1437 = vmatprep.mubr.bf16.mxu1 %v567_v45  ;;  %v568_v58 = vpack.c.bf16 %v526_v59, %v525_v57  ;;  %v569_v2 = vpack.c.bf16 %v528_v61, %v527_v49  ;;  %v529_v3 = vmax.f32 %v1796_v51, 0.0 }
  0x3b   : > { %v403_v27 = vmul.f32 %v1574_v6, %v332_v1  ;;  %v530_v10 = vmax.f32 %v1814_v0, 0.0  ;;  %v398_v12 = vmul.f32 %v1574_v6, %v327_v34  ;;  %v404_v11 = vmul.f32 %v1574_v6, %v333_v35 }
  0x3c   : > { %v473_v28 = vadd.f32 %v1581_v9, %v402_v54  ;;  %v468_v17 = vadd.f32 %v1581_v9, %v397_v20  ;;  %v531_v18 = vmax.f32 %v1823_v23, 0.0  ;;  %v399_v22 = vmul.f32 %v1574_v6, %v328_v44 }
  0x3d   : > { %v474_v24 = vadd.f32 %v1581_v9, %v403_v27  ;;  %v400_v29 = vmul.f32 %v1574_v6, %v329_v4  ;;  %v405_v31 = vmul.f32 %v1574_v6, %v334_v8  ;;  %v475_v36 = vadd.f32 %v1581_v9, %v404_v11 }
  0x3e   : > { %1410 = vmatmul.mubr.bf16.gmra.mrb[12].mxu0 %v554_v32  ;;  %v537_v30 = vmax.f32 %v473_v28, 0.0  ;;  %v401_v42 = vmul.f32 %v1574_v6, %v330_v7  ;;  %v406_v46 = vmul.f32 %v1574_v6, %v335_v14  ;;  %v407_v47 = vmul.f32 %v1574_v6, %v336_v15 }
  0x3f   : > { %1413 = vmatprep.mubr.bf16.mxu0 %v555_v63  ;;  %v538_v43 = vmax.f32 %v474_v24, 0.0  ;;  %v476_v50 = vadd.f32 %v1581_v9, %v405_v31  ;;  %v539_v53 = vmax.f32 %v475_v36, 0.0  ;;  %v408_v55 = vmul.f32 %v1574_v6, %v337_v25 }
  0x40   : > { %v409_v56 = vmul.f32 %v1574_v6, %v338_v26  ;;  %v477_v59 = vadd.f32 %v1581_v9, %v406_v46  ;;  %v478_v60 = vadd.f32 %v1581_v9, %v407_v47  ;;  %v410_v45 = vmul.f32 %v1574_v6, %v339_v37 }
  0x41   : > { %v574_v57 = vpack.c.bf16 %v538_v43, %v537_v30  ;;  %1438 = vmatmul.mubr.bf16.gmra.mrb[8].mxu1 %v568_v58  ;;  %v540_v49 = vmax.f32 %v476_v50, 0.0  ;;  %v479_v61 = vadd.f32 %v1581_v9, %v408_v55  ;;  %v411_v62 = vmul.f32 %v1574_v6, %v340_v48 }
  0x42   : > { %v480_v51 = vadd.f32 %v1581_v9, %v409_v56  ;;  %1441 = vmatprep.mubr.bf16.mxu1 %v569_v2  ;;  %v532_v32 = vmax.f32 %v468_v17, 0.0  ;;  %v541_v63 = vmax.f32 %v477_v59, 0.0  ;;  %v542_v0 = vmax.f32 %v478_v60, 0.0 }
  0x43   : > { %v481_v1 = vadd.f32 %v1581_v9, %v410_v45  ;;  %v575_v20 = vpack.c.bf16 %v540_v49, %v539_v53  ;;  %v543_v23 = vmax.f32 %v479_v61, 0.0  ;;  %v482_v35 = vadd.f32 %v1581_v9, %v411_v62 }
  0x44   : > { %v544_v34 = vmax.f32 %v480_v51, 0.0  ;;  %v507_v44 = vmax.f32 %v1819_v19, 0.0  ;;  %v570_v54 = vpack.c.bf16 %v530_v10, %v529_v3  ;;  %v576_v58 = vpack.c.bf16 %v542_v0, %v541_v63 }
  0x45   : > { %v545_v4 = vmax.f32 %v481_v1, 0.0  ;;  %v469_v6 = vadd.f32 %v1581_v9, %v398_v12  ;;  %v470_v2 = vadd.f32 %v1581_v9, %v399_v22  ;;  %v546_v8 = vmax.f32 %v482_v35, 0.0 }
  0x46   : > { %1414 = vmatmul.mubr.bf16.gmra.mrb[16].mxu0 %v1811_v33  ;;  %v577_v27 = vpack.c.bf16 %v544_v34, %v543_v23  ;;  %v508_v7 = vmax.f32 %v1831_v41, 0.0  ;;  %v571_v28 = vpack.c.bf16 %v532_v32, %v531_v18  ;;  %v471_v11 = vadd.f32 %v1581_v9, %v400_v29 }
  0x47   : > { %1417 = vmatprep.mubr.bf16.mxu0 %v1827_v39  ;;  %v472_v19 = vadd.f32 %v1581_v9, %v401_v42  ;;  %v578_v3 = vpack.c.bf16 %v546_v8, %v545_v4  ;;  %v558_v33 = vpack.c.bf16 %v506_v40, %v505_v16  ;;  %v533_v10 = vmax.f32 %v469_v6, 0.0 }
  0x48   : > { %v534_v12 = vmax.f32 %v470_v2, 0.0  ;;  %v559_v14 = vpack.c.bf16 %v508_v7, %v507_v44  ;;  %v535_v15 = vmax.f32 %v471_v11, 0.0 }
  0x49   : > { %1442 = vmatmul.mubr.bf16.gmra.mrb[12].mxu1 %v570_v54  ;;  %v536_v39 = vmax.f32 %v472_v19, 0.0 }
  0x4a   : > { %1445 = vmatprep.mubr.bf16.mxu1 %v571_v28  ;;  %v572_v41 = vpack.c.bf16 %v534_v12, %v533_v10 }
  0x4b   : > { %v573_v17 = vpack.c.bf16 %v536_v39, %v535_v15 }
  0x4e   : > { %1418 = vmatmul.mubr.bf16.gmra.mrb[20].mxu0 %v558_v33 }
  0x4f   : > { %1421 = vmatprep.mubr.bf16.mxu0 %v559_v14 }
  0x51   : > { %1446 = vmatmul.mubr.bf16.gmra.mrb[16].mxu1 %v572_v41 }
  0x52   : > { %1449 = vmatprep.mubr.bf16.mxu1 %v573_v17 }
  0x56   : > { %1422 = vmatmul.mubr.bf16.gmra.mrb[24].mxu0 %v1733_v13 }
  0x57   : > { %1425 = vmatprep.mubr.bf16.mxu0 %v1738_v21 }
  0x59   : > { %1450 = vmatmul.mubr.bf16.gmra.mrb[20].mxu1 %v574_v57 }
  0x5a   : > { %1453 = vmatprep.mubr.bf16.mxu1 %v575_v20 }
  0x5e   : > { %1426 = vmatmul.mubr.bf16.gmra.mrb[28].mxu0 %v1747_v38 }
  0x61   : > { %1454 = vmatmul.mubr.bf16.gmra.mrb[24].mxu1 %v576_v58 }
  0x62   : > { %1457 = vmatprep.mubr.bf16.mxu1 %v577_v27 }
  0x69   : > { %1458 = vmatmul.mubr.bf16.gmra.mrb[28].mxu1 %v578_v3 }
  0xf9   : > { %v1399_v9 = vpop.f32.mrb[0].mxu0 }
  0xfa   : > { %934 = vst [vmem:[%s1891_s29 + $0x10] sm:$0xff] %v1399_v9  ;;  %v677_v5 = vpop.f32.mrb[1].mxu0  ;;  %v1067_v40 = vmul.f32 %v1399_v9, %v1399_v9 }
  0xfb   : > { %932 = vst [vmem:[%s1891_s29] sm:$0xff] %v677_v5  ;;  %v1400_v13 = vpop.f32.mrb[2].mxu0  ;;  %v1065_v38 = vmul.f32 %v677_v5, %v677_v5 }
  0xfc   : > { %935 = vst [vmem:[%s1891_s29 + $0x18] sm:$0xff] %v1400_v13  ;;  %v680_v21 = vpop.f32.mrb[3].mxu0  ;;  %v1068_v24 = vmul.f32 %v1400_v13, %v1400_v13 }
  0xfd   : > { %933 = vst [vmem:[%s1891_s29 + $0x8] sm:$0xff] %v680_v21  ;;  %v996_v52 = vadd.f32 %v680_v21, %v677_v5  ;;  %v1066_v16 = vmul.f32 %v680_v21, %v680_v21 }
  0xff   : > { %v997_v18 = vadd.f32 %v1399_v9, %v996_v52  ;;  %v1129_v22 = vadd.f32 %v1066_v16, %v1065_v38 }
 0x101   : > { %v1130_v25 = vadd.f32 %v1129_v22, %v1067_v40  ;;  %v1403_v26 = vpop.f32.mrb[4].mxu0  ;;  %v998_v29 = vadd.f32 %v1400_v13, %v997_v18 }
 0x102   : > { %938 = vst [vmem:[%s1891_s29 + $0x30] sm:$0xff] %v1403_v26  ;;  %v693_v30 = vpop.f32.mrb[5].mxu0  ;;  %v1071_v55 = vmul.f32 %v1403_v26, %v1403_v26 }
 0x103   : > { %936 = vst [vmem:[%s1891_s29 + $0x20] sm:$0xff] %v693_v30  ;;  %v999_v31 = vadd.f32 %v998_v29, %v693_v30  ;;  %v1069_v36 = vmul.f32 %v693_v30, %v693_v30  ;;  %v1131_v37 = vadd.f32 %v1130_v25, %v1068_v24  ;;  %v1404_v42 = vpop.f32.mrb[6].mxu0 }
 0x104   : > { %939 = vst [vmem:[%s1891_s29 + $0x38] sm:$0xff] %v1404_v42  ;;  %v696_v43 = vpop.f32.mrb[7].mxu0  ;;  %v1901_v50 = vpop.f32.mrb[0].mxu1  ;;  %v1072_v45 = vmul.f32 %v1404_v42, %v1404_v42 }
 0x105   : > { %v1132_v46 = vadd.f32 %v1131_v37, %v1069_v36  ;;  %937 = vst [vmem:[%s1891_s29 + $0x28] sm:$0xff] %v696_v43  ;;  %v1000_v47 = vadd.f32 %v999_v31, %v696_v43  ;;  %v1070_v48 = vmul.f32 %v696_v43, %v696_v43  ;;  %966 = vst [vmem:[%s1891_s29 + $0x110] sm:$0xff] %v1901_v50  ;;  %v1905_v53 = vpop.f32.mrb[1].mxu1 }
 0x106   : > { %964 = vst [vmem:[%s1891_s29 + $0x100] sm:$0xff] %v1905_v53  ;;  %v1909_v59 = vpop.f32.mrb[2].mxu1 }
 0x107   : > { %v1001_v56 = vadd.f32 %v1403_v26, %v1000_v47  ;;  %v1133_v57 = vadd.f32 %v1132_v46, %v1070_v48  ;;  %967 = vst [vmem:[%s1891_s29 + $0x118] sm:$0xff] %v1909_v59  ;;  %v1913_v60 = vpop.f32.mrb[3].mxu1 }
 0x108   : > { %965 = vst [vmem:[%s1891_s29 + $0x108] sm:$0xff] %v1913_v60 }
 0x109   : > { %v1134_v49 = vadd.f32 %v1133_v57, %v1071_v55  ;;  %v1407_v61 = vpop.f32.mrb[8].mxu0  ;;  %v1002_v51 = vadd.f32 %v1404_v42, %v1001_v56 }
 0x10a   : > { %942 = vst [vmem:[%s1891_s29 + $0x50] sm:$0xff] %v1407_v61  ;;  %v709_v62 = vpop.f32.mrb[9].mxu0  ;;  %v1075_v58 = vmul.f32 %v1407_v61, %v1407_v61 }
 0x10b   : > { %940 = vst [vmem:[%s1891_s29 + $0x40] sm:$0xff] %v709_v62  ;;  %v1003_v32 = vadd.f32 %v1002_v51, %v709_v62  ;;  %v1073_v63 = vmul.f32 %v709_v62, %v709_v62  ;;  %v1135_v0 = vadd.f32 %v1134_v49, %v1072_v45  ;;  %v1408_v1 = vpop.f32.mrb[10].mxu0 }
 0x10c   : > { %943 = vst [vmem:[%s1891_s29 + $0x58] sm:$0xff] %v1408_v1  ;;  %v712_v20 = vpop.f32.mrb[11].mxu0  ;;  %v1921_v44 = vpop.f32.mrb[4].mxu1  ;;  %v1076_v8 = vmul.f32 %v1408_v1, %v1408_v1 }
 0x10d   : > { %v1136_v23 = vadd.f32 %v1135_v0, %v1073_v63  ;;  %941 = vst [vmem:[%s1891_s29 + $0x48] sm:$0xff] %v712_v20  ;;  %v1004_v34 = vadd.f32 %v1003_v32, %v712_v20  ;;  %v1074_v35 = vmul.f32 %v712_v20, %v712_v20  ;;  %970 = vst [vmem:[%s1891_s29 + $0x130] sm:$0xff] %v1921_v44  ;;  %v1925_v54 = vpop.f32.mrb[5].mxu1 }
 0x10e   : > { %968 = vst [vmem:[%s1891_s29 + $0x120] sm:$0xff] %v1925_v54  ;;  %v1929_v2 = vpop.f32.mrb[6].mxu1 }
 0x10f   : > { %v1005_v4 = vadd.f32 %v1407_v61, %v1004_v34  ;;  %v1137_v6 = vadd.f32 %v1136_v23, %v1074_v35  ;;  %971 = vst [vmem:[%s1891_s29 + $0x138] sm:$0xff] %v1929_v2  ;;  %v1933_v27 = vpop.f32.mrb[7].mxu1 }
 0x110   : > { %969 = vst [vmem:[%s1891_s29 + $0x128] sm:$0xff] %v1933_v27 }
 0x111   : > { %v1138_v7 = vadd.f32 %v1137_v6, %v1075_v58  ;;  %v1411_v28 = vpop.f32.mrb[12].mxu0  ;;  %v1006_v11 = vadd.f32 %v1408_v1, %v1005_v4 }
 0x112   : > { %946 = vst [vmem:[%s1891_s29 + $0x70] sm:$0xff] %v1411_v28  ;;  %v725_v19 = vpop.f32.mrb[13].mxu0  ;;  %v1079_v5 = vmul.f32 %v1411_v28, %v1411_v28 }
 0x113   : > { %944 = vst [vmem:[%s1891_s29 + $0x60] sm:$0xff] %v725_v19  ;;  %v1007_v3 = vadd.f32 %v1006_v11, %v725_v19  ;;  %v1077_v33 = vmul.f32 %v725_v19, %v725_v19  ;;  %v1139_v10 = vadd.f32 %v1138_v7, %v1076_v8  ;;  %v1412_v12 = vpop.f32.mrb[14].mxu0 }
 0x114   : > { %947 = vst [vmem:[%s1891_s29 + $0x78] sm:$0xff] %v1412_v12  ;;  %v728_v14 = vpop.f32.mrb[15].mxu0  ;;  %v1941_v17 = vpop.f32.mrb[8].mxu1  ;;  %v1080_v16 = vmul.f32 %v1412_v12, %v1412_v12 }
 0x115   : > { %v1140_v15 = vadd.f32 %v1139_v10, %v1077_v33  ;;  %945 = vst [vmem:[%s1891_s29 + $0x68] sm:$0xff] %v728_v14  ;;  %v1008_v39 = vadd.f32 %v1007_v3, %v728_v14  ;;  %v1078_v41 = vmul.f32 %v728_v14, %v728_v14  ;;  %974 = vst [vmem:[%s1891_s29 + $0x150] sm:$0xff] %v1941_v17  ;;  %v1945_v9 = vpop.f32.mrb[9].mxu1 }
 0x116   : > { %972 = vst [vmem:[%s1891_s29 + $0x140] sm:$0xff] %v1945_v9  ;;  %v1949_v38 = vpop.f32.mrb[10].mxu1 }
 0x117   : > { %v1009_v13 = vadd.f32 %v1411_v28, %v1008_v39  ;;  %v1141_v21 = vadd.f32 %v1140_v15, %v1078_v41  ;;  %975 = vst [vmem:[%s1891_s29 + $0x158] sm:$0xff] %v1949_v38  ;;  %v1953_v52 = vpop.f32.mrb[11].mxu1 }
 0x118   : > { %973 = vst [vmem:[%s1891_s29 + $0x148] sm:$0xff] %v1953_v52 }
 0x119   : > { %v1142_v40 = vadd.f32 %v1141_v21, %v1079_v5  ;;  %v1415_v18 = vpop.f32.mrb[16].mxu0  ;;  %v1010_v22 = vadd.f32 %v1412_v12, %v1009_v13 }
 0x11a   : > { %950 = vst [vmem:[%s1891_s29 + $0x90] sm:$0xff] %v1415_v18  ;;  %v741_v24 = vpop.f32.mrb[17].mxu0  ;;  %v1083_v47 = vmul.f32 %v1415_v18, %v1415_v18 }
 0x11b   : > { %948 = vst [vmem:[%s1891_s29 + $0x80] sm:$0xff] %v741_v24  ;;  %v1011_v25 = vadd.f32 %v1010_v22, %v741_v24  ;;  %v1081_v26 = vmul.f32 %v741_v24, %v741_v24  ;;  %v1143_v29 = vadd.f32 %v1142_v40, %v1080_v16  ;;  %v1416_v30 = vpop.f32.mrb[18].mxu0 }
 0x11c   : > { %951 = vst [vmem:[%s1891_s29 + $0x98] sm:$0xff] %v1416_v30  ;;  %v744_v31 = vpop.f32.mrb[19].mxu0  ;;  %v1961_v43 = vpop.f32.mrb[12].mxu1  ;;  %v1084_v45 = vmul.f32 %v1416_v30, %v1416_v30 }
 0x11d   : > { %v1144_v36 = vadd.f32 %v1143_v29, %v1081_v26  ;;  %949 = vst [vmem:[%s1891_s29 + $0x88] sm:$0xff] %v744_v31  ;;  %v1012_v37 = vadd.f32 %v1011_v25, %v744_v31  ;;  %v1082_v42 = vmul.f32 %v744_v31, %v744_v31  ;;  %978 = vst [vmem:[%s1891_s29 + $0x170] sm:$0xff] %v1961_v43  ;;  %v1965_v46 = vpop.f32.mrb[13].mxu1 }
 0x11e   : > { %976 = vst [vmem:[%s1891_s29 + $0x160] sm:$0xff] %v1965_v46  ;;  %v1969_v56 = vpop.f32.mrb[14].mxu1 }
 0x11f   : > { %v1013_v48 = vadd.f32 %v1415_v18, %v1012_v37  ;;  %v1145_v55 = vadd.f32 %v1144_v36, %v1082_v42  ;;  %979 = vst [vmem:[%s1891_s29 + $0x178] sm:$0xff] %v1969_v56  ;;  %v1973_v57 = vpop.f32.mrb[15].mxu1 }
 0x120   : > { %977 = vst [vmem:[%s1891_s29 + $0x168] sm:$0xff] %v1973_v57 }
 0x121   : > { %v1146_v49 = vadd.f32 %v1145_v55, %v1083_v47  ;;  %v1419_v61 = vpop.f32.mrb[20].mxu0  ;;  %v1014_v51 = vadd.f32 %v1416_v30, %v1013_v48 }
 0x122   : > { %954 = vst [vmem:[%s1891_s29 + $0xb0] sm:$0xff] %v1419_v61  ;;  %v757_v62 = vpop.f32.mrb[21].mxu0  ;;  %v1087_v6 = vmul.f32 %v1419_v61, %v1419_v61 }
 0x123   : > { %952 = vst [vmem:[%s1891_s29 + $0xa0] sm:$0xff] %v757_v62  ;;  %v1015_v32 = vadd.f32 %v1014_v51, %v757_v62  ;;  %v1085_v63 = vmul.f32 %v757_v62, %v757_v62  ;;  %v1147_v0 = vadd.f32 %v1146_v49, %v1084_v45  ;;  %v1420_v1 = vpop.f32.mrb[22].mxu0 }
 0x124   : > { %955 = vst [vmem:[%s1891_s29 + $0xb8] sm:$0xff] %v1420_v1  ;;  %v760_v20 = vpop.f32.mrb[23].mxu0  ;;  %v1981_v58 = vpop.f32.mrb[16].mxu1  ;;  %v1088_v19 = vmul.f32 %v1420_v1, %v1420_v1 }
 0x125   : > { %v1148_v23 = vadd.f32 %v1147_v0, %v1085_v63  ;;  %953 = vst [vmem:[%s1891_s29 + $0xa8] sm:$0xff] %v760_v20  ;;  %v1016_v34 = vadd.f32 %v1015_v32, %v760_v20  ;;  %v1086_v35 = vmul.f32 %v760_v20, %v760_v20  ;;  %982 = vst [vmem:[%s1891_s29 + $0x190] sm:$0xff] %v1981_v58  ;;  %v1985_v4 = vpop.f32.mrb[17].mxu1 }
 0x126   : > { %980 = vst [vmem:[%s1891_s29 + $0x180] sm:$0xff] %v1985_v4  ;;  %v1989_v28 = vpop.f32.mrb[18].mxu1 }
 0x127   : > { %v1017_v8 = vadd.f32 %v1419_v61, %v1016_v34  ;;  %v1149_v7 = vadd.f32 %v1148_v23, %v1086_v35  ;;  %983 = vst [vmem:[%s1891_s29 + $0x198] sm:$0xff] %v1989_v28  ;;  %v1993_v11 = vpop.f32.mrb[19].mxu1 }
 0x128   : > { %981 = vst [vmem:[%s1891_s29 + $0x188] sm:$0xff] %v1993_v11 }
 0x129   : > { %v1150_v3 = vadd.f32 %v1149_v7, %v1087_v6  ;;  %v1423_v33 = vpop.f32.mrb[24].mxu0  ;;  %v1018_v10 = vadd.f32 %v1420_v1, %v1017_v8  ;;  %v1097_v7 = vmul.f32 %v1905_v53, %v1905_v53 }
 0x12a   : > { %958 = vst [vmem:[%s1891_s29 + $0xd0] sm:$0xff] %v1423_v33  ;;  %v773_v12 = vpop.f32.mrb[25].mxu0  ;;  %v1091_v22 = vmul.f32 %v1423_v33, %v1423_v33 }
 0x12b   : > { %956 = vst [vmem:[%s1891_s29 + $0xc0] sm:$0xff] %v773_v12  ;;  %v1019_v14 = vadd.f32 %v1018_v10, %v773_v12  ;;  %v1089_v15 = vmul.f32 %v773_v12, %v773_v12  ;;  %v1151_v39 = vadd.f32 %v1150_v3, %v1088_v19  ;;  %v1424_v41 = vpop.f32.mrb[26].mxu0  ;;  %v1098_v12 = vmul.f32 %v1913_v60, %v1913_v60 }
 0x12c   : > { %959 = vst [vmem:[%s1891_s29 + $0xd8] sm:$0xff] %v1424_v41  ;;  %v776_v5 = vpop.f32.mrb[27].mxu0  ;;  %v2001_v40 = vpop.f32.mrb[20].mxu1  ;;  %v1092_v30 = vmul.f32 %v1424_v41, %v1424_v41 }
 0x12d   : > { %v1152_v13 = vadd.f32 %v1151_v39, %v1089_v15  ;;  %957 = vst [vmem:[%s1891_s29 + $0xc8] sm:$0xff] %v776_v5  ;;  %v1020_v21 = vadd.f32 %v1019_v14, %v776_v5  ;;  %v1090_v16 = vmul.f32 %v776_v5, %v776_v5  ;;  %986 = vst [vmem:[%s1891_s29 + $0x1b0] sm:$0xff] %v2001_v40  ;;  %v2005_v18 = vpop.f32.mrb[21].mxu1 }
 0x12e   : > { %984 = vst [vmem:[%s1891_s29 + $0x1a0] sm:$0xff] %v2005_v18  ;;  %v2009_v26 = vpop.f32.mrb[22].mxu1  ;;  %v1099_v39 = vmul.f32 %v1901_v50, %v1901_v50 }
 0x12f   : > { %v1021_v24 = vadd.f32 %v1423_v33, %v1020_v21  ;;  %v1153_v25 = vadd.f32 %v1152_v13, %v1090_v16  ;;  %987 = vst [vmem:[%s1891_s29 + $0x1b8] sm:$0xff] %v2009_v26  ;;  %v2013_v29 = vpop.f32.mrb[23].mxu1 }
 0x130   : > { %985 = vst [vmem:[%s1891_s29 + $0x1a8] sm:$0xff] %v2013_v29 }
 0x131   : > { %v1154_v31 = vadd.f32 %v1153_v25, %v1091_v22  ;;  %v1427_v36 = vpop.f32.mrb[28].mxu0  ;;  %v1022_v37 = vadd.f32 %v1424_v41, %v1021_v24  ;;  %v1101_v22 = vmul.f32 %v1925_v54, %v1925_v54 }
 0x132   : > { %962 = vst [vmem:[%s1891_s29 + $0xf0] sm:$0xff] %v1427_v36  ;;  %v789_v42 = vpop.f32.mrb[29].mxu0  ;;  %v1095_v0 = vmul.f32 %v1427_v36, %v1427_v36 }
 0x133   : > { %960 = vst [vmem:[%s1891_s29 + $0xe0] sm:$0xff] %v789_v42  ;;  %v1023_v47 = vadd.f32 %v1022_v37, %v789_v42  ;;  %v1093_v48 = vmul.f32 %v789_v42, %v789_v42  ;;  %v1155_v55 = vadd.f32 %v1154_v31, %v1092_v30  ;;  %v1428_v45 = vpop.f32.mrb[30].mxu0  ;;  %v1102_v31 = vmul.f32 %v1933_v27, %v1933_v27 }
 0x134   : > { %963 = vst [vmem:[%s1891_s29 + $0xf8] sm:$0xff] %v1428_v45  ;;  %v792_v49 = vpop.f32.mrb[31].mxu0  ;;  %v2021_v32 = vpop.f32.mrb[24].mxu1  ;;  %v1096_v35 = vmul.f32 %v1428_v45, %v1428_v45  ;;  %v1104_v42 = vmul.f32 %v1929_v2, %v1929_v2 }
 0x135   : > { %v1156_v61 = vadd.f32 %v1155_v55, %v1093_v48  ;;  %961 = vst [vmem:[%s1891_s29 + $0xe8] sm:$0xff] %v792_v49  ;;  %v1024_v51 = vadd.f32 %v1023_v47, %v792_v49  ;;  %v1094_v62 = vmul.f32 %v792_v49, %v792_v49  ;;  %990 = vst [vmem:[%s1891_s29 + $0x1d0] sm:$0xff] %v2021_v32  ;;  %v2025_v63 = vpop.f32.mrb[25].mxu1 }
 0x136   : > { %988 = vst [vmem:[%s1891_s29 + $0x1c0] sm:$0xff] %v2025_v63  ;;  %v2029_v23 = vpop.f32.mrb[26].mxu1 }
 0x137   : > { %v1025_v1 = vadd.f32 %v1427_v36, %v1024_v51  ;;  %v1157_v20 = vadd.f32 %v1156_v61, %v1094_v62  ;;  %991 = vst [vmem:[%s1891_s29 + $0x1d8] sm:$0xff] %v2029_v23  ;;  %v2033_v34 = vpop.f32.mrb[27].mxu1  ;;  %v1103_v36 = vmul.f32 %v1921_v44, %v1921_v44  ;;  %v1106_v61 = vmul.f32 %v1953_v52, %v1953_v52 }
 0x138   : > { %989 = vst [vmem:[%s1891_s29 + $0x1c8] sm:$0xff] %v2033_v34 }
 0x139   : > { %v1158_v6 = vadd.f32 %v1157_v20, %v1095_v0  ;;  %v1026_v8 = vadd.f32 %v1428_v45, %v1025_v1 }
 0x13b   : > { %v1027_v19 = vadd.f32 %v1026_v8, %v1905_v53  ;;  %v1159_v3 = vadd.f32 %v1158_v6, %v1096_v35  ;;  %v1110_v8 = vmul.f32 %v1973_v57, %v1973_v57 }
 0x13c   : > { %v2043_v14 = vpop.f32.mrb[28].mxu1 }
 0x13d   : > { %v1160_v33 = vadd.f32 %v1159_v3, %v1097_v7  ;;  %v1028_v10 = vadd.f32 %v1027_v19, %v1913_v60  ;;  %994 = vst [vmem:[%s1891_s29 + $0x1f0] sm:$0xff] %v2043_v14  ;;  %v2047_v15 = vpop.f32.mrb[29].mxu1  ;;  %v1100_v60 = vmul.f32 %v1909_v59, %v1909_v59 }
 0x13e   : > { %992 = vst [vmem:[%s1891_s29 + $0x1e0] sm:$0xff] %v2047_v15  ;;  %v2054_v5 = vpop.f32.mrb[30].mxu1 }
 0x13f   : > { %v1029_v41 = vadd.f32 %v1901_v50, %v1028_v10  ;;  %v1161_v53 = vadd.f32 %v1160_v33, %v1098_v12  ;;  %995 = vst [vmem:[%s1891_s29 + $0x1f8] sm:$0xff] %v2054_v5  ;;  %v2058_v13 = vpop.f32.mrb[31].mxu1 }
 0x140   : > { %993 = vst [vmem:[%s1891_s29 + $0x1e8] sm:$0xff] %v2058_v13 }
 0x141   : > { %v1162_v21 = vadd.f32 %v1161_v53, %v1099_v39  ;;  %v1030_v16 = vadd.f32 %v1909_v59, %v1029_v41  ;;  %v1114_v41 = vmul.f32 %v1993_v11, %v1993_v11 }
 0x143   : > { %v1031_v50 = vadd.f32 %v1030_v16, %v1925_v54  ;;  %v1163_v24 = vadd.f32 %v1162_v21, %v1100_v60  ;;  %v1105_v54 = vmul.f32 %v1945_v9, %v1945_v9 }
 0x145   : > { %v1164_v25 = vadd.f32 %v1163_v24, %v1101_v22  ;;  %v1032_v30 = vadd.f32 %v1031_v50, %v1933_v27 }
 0x147   : > { %v1033_v37 = vadd.f32 %v1921_v44, %v1032_v30  ;;  %v1165_v59 = vadd.f32 %v1164_v25, %v1102_v31  ;;  %v1107_v44 = vmul.f32 %v1941_v17, %v1941_v17  ;;  %v1118_v25 = vmul.f32 %v2013_v29, %v2013_v29 }
 0x149   : > { %v1166_v47 = vadd.f32 %v1165_v59, %v1103_v36  ;;  %v1034_v48 = vadd.f32 %v1929_v2, %v1033_v37  ;;  %v1108_v2 = vmul.f32 %v1949_v38, %v1949_v38 }
 0x14b   : > { %v1035_v55 = vadd.f32 %v1034_v48, %v1945_v9  ;;  %v1167_v45 = vadd.f32 %v1166_v47, %v1104_v42  ;;  %v1109_v9 = vmul.f32 %v1965_v46, %v1965_v46  ;;  %v1122_v48 = vmul.f32 %v2033_v34, %v2033_v34 }
 0x14d   : > { %v1168_v49 = vadd.f32 %v1167_v45, %v1105_v54  ;;  %v1036_v27 = vadd.f32 %v1035_v55, %v1953_v52 }
 0x14f   : > { %v1037_v51 = vadd.f32 %v1941_v17, %v1036_v27  ;;  %v1169_v62 = vadd.f32 %v1168_v49, %v1106_v61  ;;  %v1111_v17 = vmul.f32 %v1961_v43, %v1961_v43  ;;  %v1125_v49 = vmul.f32 %v2047_v15, %v2047_v15 }
 0x151   : > { %v1170_v0 = vadd.f32 %v1169_v62, %v1107_v44  ;;  %v1038_v1 = vadd.f32 %v1949_v38, %v1037_v51  ;;  %v1112_v38 = vmul.f32 %v1969_v56, %v1969_v56  ;;  %v1127_v51 = vmul.f32 %v2043_v14, %v2043_v14 }
 0x153   : > { %v1039_v20 = vadd.f32 %v1038_v1, %v1965_v46  ;;  %v1171_v35 = vadd.f32 %v1170_v0, %v1108_v2  ;;  %v1113_v46 = vmul.f32 %v1985_v4, %v1985_v4 }
 0x155   : > { %v1172_v6 = vadd.f32 %v1171_v35, %v1109_v9  ;;  %v1040_v52 = vadd.f32 %v1039_v20, %v1973_v57 }
 0x157   : > { %v1041_v7 = vadd.f32 %v1961_v43, %v1040_v52  ;;  %v1173_v19 = vadd.f32 %v1172_v6, %v1110_v8  ;;  %v1115_v43 = vmul.f32 %v1981_v58, %v1981_v58 }
 0x159   : > { %v1174_v3 = vadd.f32 %v1173_v19, %v1111_v17  ;;  %v1042_v33 = vadd.f32 %v1969_v56, %v1041_v7  ;;  %v1116_v56 = vmul.f32 %v1989_v28, %v1989_v28 }
 0x15b   : > { %v1043_v10 = vadd.f32 %v1042_v33, %v1985_v4  ;;  %v1175_v12 = vadd.f32 %v1174_v3, %v1112_v38  ;;  %v1117_v4 = vmul.f32 %v2005_v18, %v2005_v18 }
 0x15d   : > { %v1176_v39 = vadd.f32 %v1175_v12, %v1113_v46  ;;  %v1044_v57 = vadd.f32 %v1043_v10, %v1993_v11 }
 0x15f   : > { %v1045_v53 = vadd.f32 %v1981_v58, %v1044_v57  ;;  %v1177_v60 = vadd.f32 %v1176_v39, %v1114_v41  ;;  %v1119_v58 = vmul.f32 %v2001_v40, %v2001_v40 }
 0x161   : > { %v1178_v21 = vadd.f32 %v1177_v60, %v1115_v43  ;;  %v1046_v16 = vadd.f32 %v1989_v28, %v1045_v53  ;;  %v1120_v28 = vmul.f32 %v2009_v26, %v2009_v26 }
 0x163   : > { %v1047_v22 = vadd.f32 %v1046_v16, %v2005_v18  ;;  %v1179_v50 = vadd.f32 %v1178_v21, %v1116_v56  ;;  %v1121_v18 = vmul.f32 %v2025_v63, %v2025_v63 }
 0x165   : > { %v1180_v24 = vadd.f32 %v1179_v50, %v1117_v4  ;;  %v1048_v11 = vadd.f32 %v1047_v22, %v2013_v29 }
 0x167   : > { %v1049_v30 = vadd.f32 %v2001_v40, %v1048_v11  ;;  %v1181_v31 = vadd.f32 %v1180_v24, %v1118_v25  ;;  %v1123_v40 = vmul.f32 %v2021_v32, %v2021_v32 }
 0x169   : > { %v1182_v36 = vadd.f32 %v1181_v31, %v1119_v58  ;;  %v1050_v37 = vadd.f32 %v2009_v26, %v1049_v30  ;;  %v1124_v26 = vmul.f32 %v2029_v23, %v2029_v23 }
 0x16b   : > { %v1051_v59 = vadd.f32 %v1050_v37, %v2025_v63  ;;  %v1183_v42 = vadd.f32 %v1182_v36, %v1120_v28 }
 0x16d   : > { %v1184_v47 = vadd.f32 %v1183_v42, %v1121_v18  ;;  %v1052_v29 = vadd.f32 %v1051_v59, %v2033_v34 }
 0x16f   : > { %v1053_v54 = vadd.f32 %v2021_v32, %v1052_v29  ;;  %v1185_v55 = vadd.f32 %v1184_v47, %v1122_v48  ;;  %v1126_v32 = vmul.f32 %v2058_v13, %v2058_v13 }
 0x171   : > { %v1186_v45 = vadd.f32 %v1185_v55, %v1123_v40  ;;  %v1054_v63 = vadd.f32 %v2029_v23, %v1053_v54  ;;  %v1128_v23 = vmul.f32 %v2054_v5, %v2054_v5 }
 0x173   : > { %v1055_v27 = vadd.f32 %v1054_v63, %v2047_v15  ;;  %v1187_v34 = vadd.f32 %v1186_v45, %v1124_v26 }
 0x175   : > { %v1188_v61 = vadd.f32 %v1187_v34, %v1125_v49  ;;  %v1056_v44 = vadd.f32 %v1055_v27, %v2058_v13 }
 0x177   : > { %v1057_v62 = vadd.f32 %v2043_v14, %v1056_v44  ;;  %v1189_v2 = vadd.f32 %v1188_v61, %v1126_v32 }
 0x179   : > { %v1058_v0 = vadd.f32 %v2054_v5, %v1057_v62  ;;  %v1190_v15 = vadd.f32 %v1189_v2, %v1127_v51 }
 0x17b   : > { %v1059_v1 = vrot.slane %v1058_v0, 4  ;;  %v1191_v9 = vadd.f32 %v1190_v15, %v1128_v23 }
 0x17d   : > { %v1060_v20 = vadd.f32 %v1059_v1, %v1058_v0  ;;  %v1192_v35 = vrot.slane %v1191_v9, 4 }
 0x17f   : > { %v1061_v6 = vrot.slane %v1060_v20, 2  ;;  %v1193_v13 = vadd.f32 %v1192_v35, %v1191_v9 }
 0x181   : > { %v1062_v52 = vadd.f32 %v1061_v6, %v1060_v20  ;;  %v1194_v8 = vrot.slane %v1193_v13, 2 }
 0x183   : > { %v1063_v17 = vrot.slane %v1062_v52, 1  ;;  %v1195_v14 = vadd.f32 %v1194_v8, %v1193_v13 }
 0x185   : > { %v1064_v7 = vadd.f32 %v1063_v17, %v1062_v52  ;;  %v1196_v19 = vrot.slane %v1195_v14, 1 }
 0x187   : > { %v1197_v5 = vadd.f32 %v1196_v19, %v1195_v14  ;;  %1198 = vst [vmem:[%s271_s8] sm:$0xff] %v1064_v7 }
 0x189   : > { %1199 = vst [vmem:[%s275_s11] sm:$0xff] %v1197_v5 }
 0x18a PF: > { %s17_s21 = sadd.s32 1, %s1499_s21  }
 0x18b   : > { %p14_p5 = scmp.ge.s32.totalorder %s17_s21, 4  }
 0x18d   :  { %16 = sbr.rel (!%p14_p5) target bundleno = 1 (0x1), region = 90 }

// kernel: bottleneck_forward.9
= control target key start
LH: loop header
LB: loop body
LE: loop exit
PB: predicated region body
PF: predicated region fallthrough
CT: control target
= control target key end

     0   :  { %s809_s15 = smov 0   ;;  %s1170_s0 = inlined_call_operand.vmem [shape: f32[1024,128], index: 0, kind: input, shape index: {}]   ;;  %s1171_s1 = inlined_call_operand.vmem [shape: f32[1,128], index: 1, kind: input, shape index: {}]   ;;  %s1172_s2 = inlined_call_operand.vmem [shape: f32[1,128], index: 2, kind: input, shape index: {}]   ;;  %s1173_s3 = inlined_call_operand.vmem [shape: f32[1024,128], index: 3, kind: input, shape index: {}]   ;;  %s1174_s4 = inlined_call_operand.vmem [shape: f32[1024,128], index: 4, kind: output, shape index: {}]  }
   0x1 LB: > { %s753_s16 = sadd.s32 4294967295, %s782_s15   ;;  %p757_p0 = scmp.ge.s32.totalorder %s782_s15, 1  ;;  %s782_s15 = sphi %s809_s15, %s14_s15  }
   0x2   : > { %p174_p1 = scmp.lt.s32.totalorder %s782_s15, 3 }
   0x4   : > { %p175_p2 = pnand %p757_p0, %p174_p1 }
   0x5   : > { %s758_s17 = sshll.u32 (!%p175_p2), %s753_s16, 6  ;;  %v822_v0 = vld [vmem:[%s1171_s1] ss:$0 sm:$0xff] (!%p175_p2) }
   0x6   : > { %178 = sbr.rel (%p175_p2) target bundleno = 87 (0x57), region = 36  ;;  %p206_p3 = scmp.lt.s32.totalorder (!%p175_p2), %s758_s17, 127  ;;  %v840_v2 = vld [vmem:[%s1172_s2] ss:$0 sm:$0xff] (!%p175_p2) }
   0xd   : > { %s1176_s17 = smov (!%p206_p3, %s758_s17), 127 }
   0xe   : > { %s817_s18 = sshll.u32 %s1176_s17, 3 }
   0xf   : > { %s828_s23 = scalar_lea.vmem %s1170_s0, %s817_s18  ;;  %s834_s26 = scalar_lea.vmem %s1173_s3, %s817_s18 }
  0x10   : > { %v223_v1 = vld [vmem:[%s828_s23] sm:$0xff]  ;;  %v224_v3 = vld [vmem:[%s828_s23 + $0x8] sm:$0xff]  ;;  %v225_v7 = vld [vmem:[%s828_s23 + $0x10] sm:$0xff]  ;;  %s870_s5 = scalar_lea.vmem %s1174_s4, %s817_s18 }
  0x11   : > { %v294_v4 = vmul.f32 %v822_v0, %v223_v1  ;;  %v429_v5 = vld [vmem:[%s834_s26] sm:$0xff]  ;;  %v295_v6 = vmul.f32 %v822_v0, %v224_v3  ;;  %v430_v8 = vld [vmem:[%s834_s26 + $0x8] sm:$0xff]  ;;  %v296_v9 = vmul.f32 %v822_v0, %v225_v7  ;;  %v226_v10 = vld [vmem:[%s828_s23 + $0x18] sm:$0xff] }
  0x12   : > { %v227_v11 = vld [vmem:[%s828_s23 + $0x20] sm:$0xff]  ;;  %v431_v14 = vld [vmem:[%s834_s26 + $0x10] sm:$0xff]  ;;  %v297_v15 = vmul.f32 %v822_v0, %v226_v10  ;;  %v432_v16 = vld [vmem:[%s834_s26 + $0x18] sm:$0xff] }
  0x13   : > { %v365_v12 = vadd.f32 %v840_v2, %v294_v4  ;;  %v366_v13 = vadd.f32 %v840_v2, %v295_v6  ;;  %v298_v17 = vmul.f32 %v822_v0, %v227_v11  ;;  %v228_v18 = vld [vmem:[%s828_s23 + $0x28] sm:$0xff]  ;;  %v367_v19 = vadd.f32 %v840_v2, %v296_v9  ;;  %v433_v20 = vld [vmem:[%s834_s26 + $0x20] sm:$0xff]  ;;  %v229_v22 = vld [vmem:[%s828_s23 + $0x30] sm:$0xff] }
  0x14   : > { %v299_v21 = vmul.f32 %v822_v0, %v228_v18  ;;  %v230_v23 = vld [vmem:[%s828_s23 + $0x38] sm:$0xff]  ;;  %v368_v26 = vadd.f32 %v840_v2, %v297_v15  ;;  %v434_v28 = vld [vmem:[%s834_s26 + $0x28] sm:$0xff]  ;;  %v300_v31 = vmul.f32 %v822_v0, %v229_v22  ;;  %v231_v33 = vld [vmem:[%s828_s23 + $0x40] sm:$0xff] }
  0x15   : > { %v493_v24 = vadd.f32 %v429_v5, %v365_v12  ;;  %v494_v25 = vadd.f32 %v430_v8, %v366_v13  ;;  %v369_v27 = vadd.f32 %v840_v2, %v298_v17  ;;  %v495_v29 = vadd.f32 %v431_v14, %v367_v19  ;;  %v232_v34 = vld [vmem:[%s828_s23 + $0x48] sm:$0xff]  ;;  %v435_v39 = vld [vmem:[%s834_s26 + $0x30] sm:$0xff]  ;;  %v436_v40 = vld [vmem:[%s834_s26 + $0x38] sm:$0xff] }
  0x16   : > { %v370_v30 = vadd.f32 %v840_v2, %v299_v21  ;;  %v301_v32 = vmul.f32 %v822_v0, %v230_v23  ;;  %v496_v37 = vadd.f32 %v432_v16, %v368_v26  ;;  %v233_v41 = vld [vmem:[%s828_s23 + $0x50] sm:$0xff]  ;;  %v371_v44 = vadd.f32 %v840_v2, %v300_v31  ;;  %v234_v46 = vld [vmem:[%s828_s23 + $0x58] sm:$0xff]  ;;  %v235_v47 = vld [vmem:[%s828_s23 + $0x60] sm:$0xff] }
  0x17   : > { %v557_v35 = vmax.f32 %v493_v24, 0.0  ;;  %v558_v36 = vmax.f32 %v494_v25, 0.0  ;;  %v497_v38 = vadd.f32 %v433_v20, %v369_v27  ;;  %v559_v42 = vmax.f32 %v495_v29, 0.0  ;;  %v236_v52 = vld [vmem:[%s828_s23 + $0x68] sm:$0xff]  ;;  %v437_v56 = vld [vmem:[%s834_s26 + $0x40] sm:$0xff]  ;;  %v439_v61 = vld [vmem:[%s834_s26 + $0x50] sm:$0xff] }
  0x18   : > { %v498_v43 = vadd.f32 %v434_v28, %v370_v30  ;;  %v372_v45 = vadd.f32 %v840_v2, %v301_v32  ;;  %v560_v48 = vmax.f32 %v496_v37, 0.0  ;;  %v302_v50 = vmul.f32 %v822_v0, %v231_v33  ;;  %v438_v57 = vld [vmem:[%s834_s26 + $0x48] sm:$0xff]  ;;  %v237_v1 = vld [vmem:[%s828_s23 + $0x70] sm:$0xff]  ;;  %v238_v3 = vld [vmem:[%s828_s23 + $0x78] sm:$0xff] }
  0x19   : > { %621 = vst [vmem:[%s870_s5] sm:$0xff] %v557_v35  ;;  %622 = vst [vmem:[%s870_s5 + $0x8] sm:$0xff] %v558_v36  ;;  %v561_v49 = vmax.f32 %v497_v38, 0.0  ;;  %v303_v51 = vmul.f32 %v822_v0, %v232_v34  ;;  %v499_v54 = vadd.f32 %v435_v39, %v371_v44  ;;  %v304_v58 = vmul.f32 %v822_v0, %v233_v41  ;;  %v440_v7 = vld [vmem:[%s834_s26 + $0x58] sm:$0xff]  ;;  %v441_v8 = vld [vmem:[%s834_s26 + $0x60] sm:$0xff] }
  0x1a   : > { %623 = vst [vmem:[%s870_s5 + $0x10] sm:$0xff] %v559_v42  ;;  %v562_v53 = vmax.f32 %v498_v43, 0.0  ;;  %v500_v55 = vadd.f32 %v436_v40, %v372_v45  ;;  %624 = vst [vmem:[%s870_s5 + $0x18] sm:$0xff] %v560_v48  ;;  %v373_v59 = vadd.f32 %v840_v2, %v302_v50  ;;  %v305_v62 = vmul.f32 %v822_v0, %v234_v46  ;;  %v442_v14 = vld [vmem:[%s834_s26 + $0x68] sm:$0xff]  ;;  %v239_v19 = vld [vmem:[%s828_s23 + $0x80] sm:$0xff] }
  0x1b   : > { %625 = vst [vmem:[%s870_s5 + $0x20] sm:$0xff] %v561_v49  ;;  %v374_v60 = vadd.f32 %v840_v2, %v303_v51  ;;  %v306_v63 = vmul.f32 %v822_v0, %v235_v47  ;;  %v563_v4 = vmax.f32 %v499_v54, 0.0  ;;  %v375_v6 = vadd.f32 %v840_v2, %v304_v58  ;;  %v240_v20 = vld [vmem:[%s828_s23 + $0x88] sm:$0xff]  ;;  %v443_v25 = vld [vmem:[%s834_s26 + $0x70] sm:$0xff]  ;;  %v444_v26 = vld [vmem:[%s834_s26 + $0x78] sm:$0xff] }
  0x1c   : > { %626 = vst [vmem:[%s870_s5 + $0x28] sm:$0xff] %v562_v53  ;;  %v564_v5 = vmax.f32 %v500_v55, 0.0  ;;  %v307_v9 = vmul.f32 %v822_v0, %v236_v52  ;;  %v501_v10 = vadd.f32 %v437_v56, %v373_v59  ;;  %v376_v12 = vadd.f32 %v840_v2, %v305_v62  ;;  %v241_v27 = vld [vmem:[%s828_s23 + $0x90] sm:$0xff]  ;;  %v242_v32 = vld [vmem:[%s828_s23 + $0x98] sm:$0xff]  ;;  %v243_v33 = vld [vmem:[%s828_s23 + $0xa0] sm:$0xff] }
  0x1d   : > { %v502_v11 = vadd.f32 %v438_v57, %v374_v60  ;;  %v377_v13 = vadd.f32 %v840_v2, %v306_v63  ;;  %627 = vst [vmem:[%s870_s5 + $0x30] sm:$0xff] %v563_v4  ;;  %v503_v15 = vadd.f32 %v439_v61, %v375_v6  ;;  %v308_v17 = vmul.f32 %v822_v0, %v237_v1  ;;  %v244_v38 = vld [vmem:[%s828_s23 + $0xa8] sm:$0xff]  ;;  %v445_v42 = vld [vmem:[%s834_s26 + $0x80] sm:$0xff]  ;;  %v447_v47 = vld [vmem:[%s834_s26 + $0x90] sm:$0xff] }
  0x1e   : > { %628 = vst [vmem:[%s870_s5 + $0x38] sm:$0xff] %v564_v5  ;;  %v378_v16 = vadd.f32 %v840_v2, %v307_v9  ;;  %v309_v18 = vmul.f32 %v822_v0, %v238_v3  ;;  %v565_v21 = vmax.f32 %v501_v10, 0.0  ;;  %v504_v23 = vadd.f32 %v440_v7, %v376_v12  ;;  %v446_v43 = vld [vmem:[%s834_s26 + $0x88] sm:$0xff]  ;;  %v245_v50 = vld [vmem:[%s828_s23 + $0xb0] sm:$0xff]  ;;  %v246_v51 = vld [vmem:[%s828_s23 + $0xb8] sm:$0xff] }
  0x1f   : > { %v566_v22 = vmax.f32 %v502_v11, 0.0  ;;  %v505_v24 = vadd.f32 %v441_v8, %v377_v13  ;;  %v567_v28 = vmax.f32 %v503_v15, 0.0  ;;  %v379_v30 = vadd.f32 %v840_v2, %v308_v17  ;;  %v448_v55 = vld [vmem:[%s834_s26 + $0x98] sm:$0xff]  ;;  %v449_v56 = vld [vmem:[%s834_s26 + $0xa0] sm:$0xff]  ;;  %v450_v62 = vld [vmem:[%s834_s26 + $0xa8] sm:$0xff] }
  0x20   : > { %v506_v29 = vadd.f32 %v442_v14, %v378_v16  ;;  %v380_v31 = vadd.f32 %v840_v2, %v309_v18  ;;  %629 = vst [vmem:[%s870_s5 + $0x40] sm:$0xff] %v565_v21  ;;  %v568_v34 = vmax.f32 %v504_v23, 0.0  ;;  %v310_v36 = vmul.f32 %v822_v0, %v239_v19  ;;  %v247_v5 = vld [vmem:[%s828_s23 + $0xc0] sm:$0xff]  ;;  %v248_v6 = vld [vmem:[%s828_s23 + $0xc8] sm:$0xff]  ;;  %v451_v11 = vld [vmem:[%s834_s26 + $0xb0] sm:$0xff] }
  0x21   : > { %630 = vst [vmem:[%s870_s5 + $0x48] sm:$0xff] %v566_v22  ;;  %v569_v35 = vmax.f32 %v505_v24, 0.0  ;;  %v311_v37 = vmul.f32 %v822_v0, %v240_v20  ;;  %631 = vst [vmem:[%s870_s5 + $0x50] sm:$0xff] %v567_v28  ;;  %v507_v40 = vadd.f32 %v443_v25, %v379_v30  ;;  %v312_v44 = vmul.f32 %v822_v0, %v241_v27  ;;  %v452_v12 = vld [vmem:[%s834_s26 + $0xb8] sm:$0xff]  ;;  %v249_v13 = vld [vmem:[%s828_s23 + $0xd0] sm:$0xff] }
  0x22   : > { %v570_v39 = vmax.f32 %v506_v29, 0.0  ;;  %v508_v41 = vadd.f32 %v444_v26, %v380_v31  ;;  %632 = vst [vmem:[%s870_s5 + $0x58] sm:$0xff] %v568_v34  ;;  %v381_v45 = vadd.f32 %v840_v2, %v310_v36  ;;  %v313_v48 = vmul.f32 %v822_v0, %v242_v32  ;;  %v250_v18 = vld [vmem:[%s828_s23 + $0xd8] sm:$0xff]  ;;  %v251_v19 = vld [vmem:[%s828_s23 + $0xe0] sm:$0xff]  ;;  %v252_v24 = vld [vmem:[%s828_s23 + $0xe8] sm:$0xff] }
  0x23   : > { %633 = vst [vmem:[%s870_s5 + $0x60] sm:$0xff] %v569_v35  ;;  %v382_v46 = vadd.f32 %v840_v2, %v311_v37  ;;  %v314_v49 = vmul.f32 %v822_v0, %v243_v33  ;;  %v571_v52 = vmax.f32 %v507_v40, 0.0  ;;  %v383_v54 = vadd.f32 %v840_v2, %v312_v44  ;;  %v453_v28 = vld [vmem:[%s834_s26 + $0xc0] sm:$0xff]  ;;  %v454_v29 = vld [vmem:[%s834_s26 + $0xc8] sm:$0xff]  ;;  %v455_v33 = vld [vmem:[%s834_s26 + $0xd0] sm:$0xff] }
  0x24   : > { %634 = vst [vmem:[%s870_s5 + $0x68] sm:$0xff] %v570_v39  ;;  %v572_v53 = vmax.f32 %v508_v41, 0.0  ;;  %v315_v57 = vmul.f32 %v822_v0, %v244_v38  ;;  %v509_v58 = vadd.f32 %v445_v42, %v381_v45  ;;  %v384_v60 = vadd.f32 %v840_v2, %v313_v48  ;;  %v253_v36 = vld [vmem:[%s828_s23 + $0xf0] sm:$0xff]  ;;  %v254_v37 = vld [vmem:[%s828_s23 + $0xf8] sm:$0xff]  ;;  %v457_v42 = vld [vmem:[%s834_s26 + $0xe0] sm:$0xff] }
  0x25   : > { %v510_v59 = vadd.f32 %v446_v43, %v382_v46  ;;  %v385_v61 = vadd.f32 %v840_v2, %v314_v49  ;;  %635 = vst [vmem:[%s870_s5 + $0x70] sm:$0xff] %v571_v52  ;;  %v511_v63 = vadd.f32 %v447_v47, %v383_v54  ;;  %v316_v3 = vmul.f32 %v822_v0, %v245_v50  ;;  %v456_v41 = vld [vmem:[%s834_s26 + $0xd8] sm:$0xff]  ;;  %v458_v48 = vld [vmem:[%s834_s26 + $0xe8] sm:$0xff] }
  0x26   : > { %636 = vst [vmem:[%s870_s5 + $0x78] sm:$0xff] %v572_v53  ;;  %v386_v1 = vadd.f32 %v840_v2, %v315_v57  ;;  %v317_v4 = vmul.f32 %v822_v0, %v246_v51  ;;  %v573_v7 = vmax.f32 %v509_v58, 0.0  ;;  %v512_v9 = vadd.f32 %v448_v55, %v384_v60  ;;  %v255_v53 = vld [vmem:[%s828_s23 + $0x100] sm:$0xff]  ;;  %v256_v54 = vld [vmem:[%s828_s23 + $0x108] sm:$0xff]  ;;  %v460_v60 = vld [vmem:[%s834_s26 + $0xf8] sm:$0xff] }
  0x27   : > { %v574_v8 = vmax.f32 %v510_v59, 0.0  ;;  %v513_v10 = vadd.f32 %v449_v56, %v385_v61  ;;  %v575_v14 = vmax.f32 %v511_v63, 0.0  ;;  %v387_v16 = vadd.f32 %v840_v2, %v316_v3  ;;  %v459_v59 = vld [vmem:[%s834_s26 + $0xf0] sm:$0xff] }
  0x28   : > { %v514_v15 = vadd.f32 %v450_v62, %v386_v1  ;;  %v388_v17 = vadd.f32 %v840_v2, %v317_v4  ;;  %637 = vst [vmem:[%s870_s5 + $0x80] sm:$0xff] %v573_v7  ;;  %v576_v20 = vmax.f32 %v512_v9, 0.0  ;;  %v318_v22 = vmul.f32 %v822_v0, %v247_v5  ;;  %v257_v61 = vld [vmem:[%s828_s23 + $0x110] sm:$0xff]  ;;  %v258_v4 = vld [vmem:[%s828_s23 + $0x118] sm:$0xff]  ;;  %v259_v5 = vld [vmem:[%s828_s23 + $0x120] sm:$0xff] }
  0x29   : > { %638 = vst [vmem:[%s870_s5 + $0x88] sm:$0xff] %v574_v8  ;;  %v577_v21 = vmax.f32 %v513_v10, 0.0  ;;  %v319_v23 = vmul.f32 %v822_v0, %v248_v6  ;;  %639 = vst [vmem:[%s870_s5 + $0x90] sm:$0xff] %v575_v14  ;;  %v515_v26 = vadd.f32 %v451_v11, %v387_v16  ;;  %v320_v30 = vmul.f32 %v822_v0, %v249_v13  ;;  %v260_v10 = vld [vmem:[%s828_s23 + $0x128] sm:$0xff]  ;;  %v461_v14 = vld [vmem:[%s834_s26 + $0x100] sm:$0xff] }
  0x2a   : > { %v578_v25 = vmax.f32 %v514_v15, 0.0  ;;  %v516_v27 = vadd.f32 %v452_v12, %v388_v17  ;;  %640 = vst [vmem:[%s870_s5 + $0x98] sm:$0xff] %v576_v20  ;;  %v389_v31 = vadd.f32 %v840_v2, %v318_v22  ;;  %v321_v34 = vmul.f32 %v822_v0, %v250_v18  ;;  %v462_v15 = vld [vmem:[%s834_s26 + $0x108] sm:$0xff]  ;;  %v261_v22 = vld [vmem:[%s828_s23 + $0x130] sm:$0xff] }
  0x2b   : > { %641 = vst [vmem:[%s870_s5 + $0xa0] sm:$0xff] %v577_v21  ;;  %v390_v32 = vadd.f32 %v840_v2, %v319_v23  ;;  %v322_v35 = vmul.f32 %v822_v0, %v251_v19  ;;  %v579_v38 = vmax.f32 %v515_v26, 0.0  ;;  %v391_v40 = vadd.f32 %v840_v2, %v320_v30  ;;  %v463_v19 = vld [vmem:[%s834_s26 + $0x110] sm:$0xff]  ;;  %v262_v23 = vld [vmem:[%s828_s23 + $0x138] sm:$0xff] }
  0x2c   : > { %642 = vst [vmem:[%s870_s5 + $0xa8] sm:$0xff] %v578_v25  ;;  %v580_v39 = vmax.f32 %v516_v27, 0.0  ;;  %v323_v43 = vmul.f32 %v822_v0, %v252_v24  ;;  %v517_v44 = vadd.f32 %v453_v28, %v389_v31  ;;  %v392_v46 = vadd.f32 %v840_v2, %v321_v34  ;;  %v464_v27 = vld [vmem:[%s834_s26 + $0x118] sm:$0xff]  ;;  %v465_v28 = vld [vmem:[%s834_s26 + $0x120] sm:$0xff]  ;;  %v466_v34 = vld [vmem:[%s834_s26 + $0x128] sm:$0xff] }
  0x2d   : > { %v518_v45 = vadd.f32 %v454_v29, %v390_v32  ;;  %v393_v47 = vadd.f32 %v840_v2, %v322_v35  ;;  %643 = vst [vmem:[%s870_s5 + $0xb0] sm:$0xff] %v579_v38  ;;  %v519_v49 = vadd.f32 %v455_v33, %v391_v40  ;;  %v324_v51 = vmul.f32 %v822_v0, %v253_v36  ;;  %v264_v40 = vld [vmem:[%s828_s23 + $0x148] sm:$0xff] }
  0x2e   : > { %644 = vst [vmem:[%s870_s5 + $0xb8] sm:$0xff] %v580_v39  ;;  %v394_v50 = vadd.f32 %v840_v2, %v323_v43  ;;  %v325_v52 = vmul.f32 %v822_v0, %v254_v37  ;;  %v581_v55 = vmax.f32 %v517_v44, 0.0  ;;  %v520_v57 = vadd.f32 %v456_v41, %v392_v46  ;;  %v263_v39 = vld [vmem:[%s828_s23 + $0x140] sm:$0xff]  ;;  %v468_v46 = vld [vmem:[%s834_s26 + $0x138] sm:$0xff] }
  0x2f   : > { %v582_v56 = vmax.f32 %v518_v45, 0.0  ;;  %v521_v58 = vadd.f32 %v457_v42, %v393_v47  ;;  %v583_v62 = vmax.f32 %v519_v49, 0.0  ;;  %v395_v1 = vadd.f32 %v840_v2, %v324_v51  ;;  %v467_v45 = vld [vmem:[%s834_s26 + $0x130] sm:$0xff] }
  0x30   : > { %v522_v63 = vadd.f32 %v458_v48, %v394_v50  ;;  %v396_v3 = vadd.f32 %v840_v2, %v325_v52  ;;  %645 = vst [vmem:[%s870_s5 + $0xc0] sm:$0xff] %v581_v55  ;;  %v584_v6 = vmax.f32 %v520_v57, 0.0  ;;  %v326_v8 = vmul.f32 %v822_v0, %v255_v53  ;;  %v265_v47 = vld [vmem:[%s828_s23 + $0x150] sm:$0xff]  ;;  %v266_v52 = vld [vmem:[%s828_s23 + $0x158] sm:$0xff]  ;;  %v267_v53 = vld [vmem:[%s828_s23 + $0x160] sm:$0xff] }
  0x31   : > { %646 = vst [vmem:[%s870_s5 + $0xc8] sm:$0xff] %v582_v56  ;;  %v585_v7 = vmax.f32 %v521_v58, 0.0  ;;  %v327_v9 = vmul.f32 %v822_v0, %v256_v54  ;;  %647 = vst [vmem:[%s870_s5 + $0xd0] sm:$0xff] %v583_v62  ;;  %v523_v12 = vadd.f32 %v459_v59, %v395_v1  ;;  %v328_v16 = vmul.f32 %v822_v0, %v257_v61  ;;  %v268_v58 = vld [vmem:[%s828_s23 + $0x168] sm:$0xff]  ;;  %v469_v62 = vld [vmem:[%s834_s26 + $0x140] sm:$0xff] }
  0x32   : > { %v586_v11 = vmax.f32 %v522_v63, 0.0  ;;  %v524_v13 = vadd.f32 %v460_v60, %v396_v3  ;;  %648 = vst [vmem:[%s870_s5 + $0xd8] sm:$0xff] %v584_v6  ;;  %v397_v17 = vadd.f32 %v840_v2, %v326_v8  ;;  %v329_v20 = vmul.f32 %v822_v0, %v258_v4  ;;  %v470_v63 = vld [vmem:[%s834_s26 + $0x148] sm:$0xff]  ;;  %v269_v8 = vld [vmem:[%s828_s23 + $0x170] sm:$0xff] }
  0x33   : > { %649 = vst [vmem:[%s870_s5 + $0xe0] sm:$0xff] %v585_v7  ;;  %v398_v18 = vadd.f32 %v840_v2, %v327_v9  ;;  %v330_v21 = vmul.f32 %v822_v0, %v259_v5  ;;  %v587_v24 = vmax.f32 %v523_v12, 0.0  ;;  %v399_v26 = vadd.f32 %v840_v2, %v328_v16  ;;  %v471_v5 = vld [vmem:[%s834_s26 + $0x150] sm:$0xff]  ;;  %v270_v9 = vld [vmem:[%s828_s23 + $0x178] sm:$0xff] }
  0x34   : > { %650 = vst [vmem:[%s870_s5 + $0xe8] sm:$0xff] %v586_v11  ;;  %v588_v25 = vmax.f32 %v524_v13, 0.0  ;;  %v331_v29 = vmul.f32 %v822_v0, %v260_v10  ;;  %v525_v30 = vadd.f32 %v461_v14, %v397_v17  ;;  %v400_v32 = vadd.f32 %v840_v2, %v329_v20  ;;  %v472_v13 = vld [vmem:[%s834_s26 + $0x158] sm:$0xff]  ;;  %v473_v14 = vld [vmem:[%s834_s26 + $0x160] sm:$0xff]  ;;  %v474_v20 = vld [vmem:[%s834_s26 + $0x168] sm:$0xff] }
  0x35   : > { %v526_v31 = vadd.f32 %v462_v15, %v398_v18  ;;  %v401_v33 = vadd.f32 %v840_v2, %v330_v21  ;;  %651 = vst [vmem:[%s870_s5 + $0xf0] sm:$0xff] %v587_v24  ;;  %v527_v35 = vadd.f32 %v463_v19, %v399_v26  ;;  %v332_v37 = vmul.f32 %v822_v0, %v261_v22  ;;  %v272_v26 = vld [vmem:[%s828_s23 + $0x188] sm:$0xff] }
  0x36   : > { %652 = vst [vmem:[%s870_s5 + $0xf8] sm:$0xff] %v588_v25  ;;  %v402_v36 = vadd.f32 %v840_v2, %v331_v29  ;;  %v333_v38 = vmul.f32 %v822_v0, %v262_v23  ;;  %v589_v41 = vmax.f32 %v525_v30, 0.0  ;;  %v528_v43 = vadd.f32 %v464_v27, %v400_v32  ;;  %v271_v25 = vld [vmem:[%s828_s23 + $0x180] sm:$0xff]  ;;  %v476_v32 = vld [vmem:[%s834_s26 + $0x178] sm:$0xff] }
  0x37   : > { %v590_v42 = vmax.f32 %v526_v31, 0.0  ;;  %v529_v44 = vadd.f32 %v465_v28, %v401_v33  ;;  %v591_v48 = vmax.f32 %v527_v35, 0.0  ;;  %v403_v50 = vadd.f32 %v840_v2, %v332_v37  ;;  %v475_v31 = vld [vmem:[%s834_s26 + $0x170] sm:$0xff] }
  0x38   : > { %v530_v49 = vadd.f32 %v466_v34, %v402_v36  ;;  %v404_v51 = vadd.f32 %v840_v2, %v333_v38  ;;  %653 = vst [vmem:[%s870_s5 + $0x100] sm:$0xff] %v589_v41  ;;  %v592_v54 = vmax.f32 %v528_v43, 0.0  ;;  %v334_v56 = vmul.f32 %v822_v0, %v263_v39  ;;  %v273_v33 = vld [vmem:[%s828_s23 + $0x190] sm:$0xff]  ;;  %v274_v38 = vld [vmem:[%s828_s23 + $0x198] sm:$0xff]  ;;  %v275_v39 = vld [vmem:[%s828_s23 + $0x1a0] sm:$0xff] }
  0x39   : > { %654 = vst [vmem:[%s870_s5 + $0x108] sm:$0xff] %v590_v42  ;;  %v593_v55 = vmax.f32 %v529_v44, 0.0  ;;  %v335_v57 = vmul.f32 %v822_v0, %v264_v40  ;;  %655 = vst [vmem:[%s870_s5 + $0x110] sm:$0xff] %v591_v48  ;;  %v531_v60 = vadd.f32 %v467_v45, %v403_v50  ;;  %v336_v1 = vmul.f32 %v822_v0, %v265_v47  ;;  %v276_v44 = vld [vmem:[%s828_s23 + $0x1a8] sm:$0xff]  ;;  %v477_v48 = vld [vmem:[%s834_s26 + $0x180] sm:$0xff] }
  0x3a   : > { %v594_v59 = vmax.f32 %v530_v49, 0.0  ;;  %v532_v61 = vadd.f32 %v468_v46, %v404_v51  ;;  %656 = vst [vmem:[%s870_s5 + $0x118] sm:$0xff] %v592_v54  ;;  %v405_v3 = vadd.f32 %v840_v2, %v334_v56  ;;  %v337_v6 = vmul.f32 %v822_v0, %v266_v52  ;;  %v478_v49 = vld [vmem:[%s834_s26 + $0x188] sm:$0xff]  ;;  %v277_v56 = vld [vmem:[%s828_s23 + $0x1b0] sm:$0xff] }
  0x3b   : > { %657 = vst [vmem:[%s870_s5 + $0x120] sm:$0xff] %v593_v55  ;;  %v406_v4 = vadd.f32 %v840_v2, %v335_v57  ;;  %v338_v7 = vmul.f32 %v822_v0, %v267_v53  ;;  %v595_v10 = vmax.f32 %v531_v60, 0.0  ;;  %v407_v12 = vadd.f32 %v840_v2, %v336_v1  ;;  %v479_v53 = vld [vmem:[%s834_s26 + $0x190] sm:$0xff]  ;;  %v278_v57 = vld [vmem:[%s828_s23 + $0x1b8] sm:$0xff] }
  0x3c   : > { %658 = vst [vmem:[%s870_s5 + $0x128] sm:$0xff] %v594_v59  ;;  %v596_v11 = vmax.f32 %v532_v61, 0.0  ;;  %v339_v15 = vmul.f32 %v822_v0, %v268_v58  ;;  %v533_v16 = vadd.f32 %v469_v62, %v405_v3  ;;  %v408_v18 = vadd.f32 %v840_v2, %v337_v6  ;;  %v480_v61 = vld [vmem:[%s834_s26 + $0x198] sm:$0xff]  ;;  %v481_v62 = vld [vmem:[%s834_s26 + $0x1a0] sm:$0xff]  ;;  %v482_v6 = vld [vmem:[%s834_s26 + $0x1a8] sm:$0xff] }
  0x3d   : > { %v534_v17 = vadd.f32 %v470_v63, %v406_v4  ;;  %v409_v19 = vadd.f32 %v840_v2, %v338_v7  ;;  %659 = vst [vmem:[%s870_s5 + $0x130] sm:$0xff] %v595_v10  ;;  %v535_v21 = vadd.f32 %v471_v5, %v407_v12  ;;  %v340_v23 = vmul.f32 %v822_v0, %v269_v8  ;;  %v280_v12 = vld [vmem:[%s828_s23 + $0x1c8] sm:$0xff] }
  0x3e   : > { %660 = vst [vmem:[%s870_s5 + $0x138] sm:$0xff] %v596_v11  ;;  %v410_v22 = vadd.f32 %v840_v2, %v339_v15  ;;  %v341_v24 = vmul.f32 %v822_v0, %v270_v9  ;;  %v597_v27 = vmax.f32 %v533_v16, 0.0  ;;  %v536_v29 = vadd.f32 %v472_v13, %v408_v18  ;;  %v279_v11 = vld [vmem:[%s828_s23 + $0x1c0] sm:$0xff]  ;;  %v484_v18 = vld [vmem:[%s834_s26 + $0x1b8] sm:$0xff] }
  0x3f   : > { %v598_v28 = vmax.f32 %v534_v17, 0.0  ;;  %v537_v30 = vadd.f32 %v473_v14, %v409_v19  ;;  %v599_v34 = vmax.f32 %v535_v21, 0.0  ;;  %v411_v36 = vadd.f32 %v840_v2, %v340_v23  ;;  %v483_v17 = vld [vmem:[%s834_s26 + $0x1b0] sm:$0xff] }
  0x40   : > { %v538_v35 = vadd.f32 %v474_v20, %v410_v22  ;;  %v412_v37 = vadd.f32 %v840_v2, %v341_v24  ;;  %661 = vst [vmem:[%s870_s5 + $0x140] sm:$0xff] %v597_v27  ;;  %v600_v40 = vmax.f32 %v536_v29, 0.0  ;;  %v342_v42 = vmul.f32 %v822_v0, %v271_v25  ;;  %v281_v19 = vld [vmem:[%s828_s23 + $0x1d0] sm:$0xff]  ;;  %v282_v24 = vld [vmem:[%s828_s23 + $0x1d8] sm:$0xff]  ;;  %v283_v25 = vld [vmem:[%s828_s23 + $0x1e0] sm:$0xff] }
  0x41   : > { %662 = vst [vmem:[%s870_s5 + $0x148] sm:$0xff] %v598_v28  ;;  %v601_v41 = vmax.f32 %v537_v30, 0.0  ;;  %v343_v43 = vmul.f32 %v822_v0, %v272_v26  ;;  %663 = vst [vmem:[%s870_s5 + $0x150] sm:$0xff] %v599_v34  ;;  %v539_v46 = vadd.f32 %v475_v31, %v411_v36  ;;  %v344_v50 = vmul.f32 %v822_v0, %v273_v33  ;;  %v284_v30 = vld [vmem:[%s828_s23 + $0x1e8] sm:$0xff]  ;;  %v485_v34 = vld [vmem:[%s834_s26 + $0x1c0] sm:$0xff] }
  0x42   : > { %v602_v45 = vmax.f32 %v538_v35, 0.0  ;;  %v540_v47 = vadd.f32 %v476_v32, %v412_v37  ;;  %664 = vst [vmem:[%s870_s5 + $0x158] sm:$0xff] %v600_v40  ;;  %v413_v51 = vadd.f32 %v840_v2, %v342_v42  ;;  %v345_v54 = vmul.f32 %v822_v0, %v274_v38  ;;  %v486_v35 = vld [vmem:[%s834_s26 + $0x1c8] sm:$0xff]  ;;  %v285_v42 = vld [vmem:[%s828_s23 + $0x1f0] sm:$0xff] }
  0x43   : > { %665 = vst [vmem:[%s870_s5 + $0x160] sm:$0xff] %v601_v41  ;;  %v414_v52 = vadd.f32 %v840_v2, %v343_v43  ;;  %v346_v55 = vmul.f32 %v822_v0, %v275_v39  ;;  %v603_v58 = vmax.f32 %v539_v46, 0.0  ;;  %v415_v60 = vadd.f32 %v840_v2, %v344_v50  ;;  %v487_v39 = vld [vmem:[%s834_s26 + $0x1d0] sm:$0xff]  ;;  %v286_v43 = vld [vmem:[%s828_s23 + $0x1f8] sm:$0xff] }
  0x44   : > { %666 = vst [vmem:[%s870_s5 + $0x168] sm:$0xff] %v602_v45  ;;  %v604_v59 = vmax.f32 %v540_v47, 0.0  ;;  %v347_v63 = vmul.f32 %v822_v0, %v276_v44  ;;  %v541_v1 = vadd.f32 %v477_v48, %v413_v51  ;;  %v416_v4 = vadd.f32 %v840_v2, %v345_v54  ;;  %v488_v47 = vld [vmem:[%s834_s26 + $0x1d8] sm:$0xff]  ;;  %v489_v48 = vld [vmem:[%s834_s26 + $0x1e0] sm:$0xff]  ;;  %v490_v54 = vld [vmem:[%s834_s26 + $0x1e8] sm:$0xff] }
  0x45   : > { %v542_v3 = vadd.f32 %v478_v49, %v414_v52  ;;  %v417_v5 = vadd.f32 %v840_v2, %v346_v55  ;;  %667 = vst [vmem:[%s870_s5 + $0x170] sm:$0xff] %v603_v58  ;;  %v543_v7 = vadd.f32 %v479_v53, %v415_v60  ;;  %v348_v9 = vmul.f32 %v822_v0, %v277_v56 }
  0x46   : > { %668 = vst [vmem:[%s870_s5 + $0x178] sm:$0xff] %v604_v59  ;;  %v418_v8 = vadd.f32 %v840_v2, %v347_v63  ;;  %v349_v10 = vmul.f32 %v822_v0, %v278_v57  ;;  %v605_v13 = vmax.f32 %v541_v1, 0.0  ;;  %v544_v15 = vadd.f32 %v480_v61, %v416_v4  ;;  %v491_v63 = vld [vmem:[%s834_s26 + $0x1f0] sm:$0xff]  ;;  %v492_v1 = vld [vmem:[%s834_s26 + $0x1f8] sm:$0xff] }
  0x47   : > { %v606_v14 = vmax.f32 %v542_v3, 0.0  ;;  %v545_v16 = vadd.f32 %v481_v62, %v417_v5  ;;  %v607_v20 = vmax.f32 %v543_v7, 0.0  ;;  %v419_v22 = vadd.f32 %v840_v2, %v348_v9 }
  0x48   : > { %v546_v21 = vadd.f32 %v482_v6, %v418_v8  ;;  %v420_v23 = vadd.f32 %v840_v2, %v349_v10  ;;  %669 = vst [vmem:[%s870_s5 + $0x180] sm:$0xff] %v605_v13  ;;  %v608_v26 = vmax.f32 %v544_v15, 0.0  ;;  %v350_v28 = vmul.f32 %v822_v0, %v279_v11 }
  0x49   : > { %670 = vst [vmem:[%s870_s5 + $0x188] sm:$0xff] %v606_v14  ;;  %v609_v27 = vmax.f32 %v545_v16, 0.0  ;;  %v351_v29 = vmul.f32 %v822_v0, %v280_v12  ;;  %671 = vst [vmem:[%s870_s5 + $0x190] sm:$0xff] %v607_v20  ;;  %v547_v32 = vadd.f32 %v483_v17, %v419_v22  ;;  %v352_v36 = vmul.f32 %v822_v0, %v281_v19 }
  0x4a   : > { %v610_v31 = vmax.f32 %v546_v21, 0.0  ;;  %v548_v33 = vadd.f32 %v484_v18, %v420_v23  ;;  %672 = vst [vmem:[%s870_s5 + $0x198] sm:$0xff] %v608_v26  ;;  %v421_v37 = vadd.f32 %v840_v2, %v350_v28  ;;  %v353_v40 = vmul.f32 %v822_v0, %v282_v24 }
  0x4b   : > { %673 = vst [vmem:[%s870_s5 + $0x1a0] sm:$0xff] %v609_v27  ;;  %v422_v38 = vadd.f32 %v840_v2, %v351_v29  ;;  %v354_v41 = vmul.f32 %v822_v0, %v283_v25  ;;  %v611_v44 = vmax.f32 %v547_v32, 0.0  ;;  %v423_v46 = vadd.f32 %v840_v2, %v352_v36 }
  0x4c   : > { %674 = vst [vmem:[%s870_s5 + $0x1a8] sm:$0xff] %v610_v31  ;;  %v612_v45 = vmax.f32 %v548_v33, 0.0  ;;  %v355_v49 = vmul.f32 %v822_v0, %v284_v30  ;;  %v549_v50 = vadd.f32 %v485_v34, %v421_v37  ;;  %v424_v52 = vadd.f32 %v840_v2, %v353_v40 }
  0x4d   : > { %v550_v51 = vadd.f32 %v486_v35, %v422_v38  ;;  %v425_v53 = vadd.f32 %v840_v2, %v354_v41  ;;  %675 = vst [vmem:[%s870_s5 + $0x1b0] sm:$0xff] %v611_v44  ;;  %v551_v55 = vadd.f32 %v487_v39, %v423_v46  ;;  %v356_v57 = vmul.f32 %v822_v0, %v285_v42 }
  0x4e   : > { %676 = vst [vmem:[%s870_s5 + $0x1b8] sm:$0xff] %v612_v45  ;;  %v426_v56 = vadd.f32 %v840_v2, %v355_v49  ;;  %v357_v58 = vmul.f32 %v822_v0, %v286_v43  ;;  %v613_v59 = vmax.f32 %v549_v50, 0.0  ;;  %v552_v61 = vadd.f32 %v488_v47, %v424_v52 }
  0x4f   : > { %v614_v60 = vmax.f32 %v550_v51, 0.0  ;;  %v553_v62 = vadd.f32 %v489_v48, %v425_v53  ;;  %v615_v3 = vmax.f32 %v551_v55, 0.0  ;;  %v427_v5 = vadd.f32 %v840_v2, %v356_v57 }
  0x50   : > { %v554_v4 = vadd.f32 %v490_v54, %v426_v56  ;;  %v428_v6 = vadd.f32 %v840_v2, %v357_v58  ;;  %677 = vst [vmem:[%s870_s5 + $0x1c0] sm:$0xff] %v613_v59  ;;  %v616_v0 = vmax.f32 %v552_v61, 0.0 }
  0x51   : > { %678 = vst [vmem:[%s870_s5 + $0x1c8] sm:$0xff] %v614_v60  ;;  %v617_v7 = vmax.f32 %v553_v62, 0.0  ;;  %679 = vst [vmem:[%s870_s5 + $0x1d0] sm:$0xff] %v615_v3  ;;  %v555_v9 = vadd.f32 %v491_v63, %v427_v5 }
  0x52   : > { %v618_v8 = vmax.f32 %v554_v4, 0.0  ;;  %v556_v10 = vadd.f32 %v492_v1, %v428_v6  ;;  %680 = vst [vmem:[%s870_s5 + $0x1d8] sm:$0xff] %v616_v0 }
  0x53   : > { %681 = vst [vmem:[%s870_s5 + $0x1e0] sm:$0xff] %v617_v7  ;;  %v619_v11 = vmax.f32 %v555_v9, 0.0 }
  0x54   : > { %682 = vst [vmem:[%s870_s5 + $0x1e8] sm:$0xff] %v618_v8  ;;  %v620_v12 = vmax.f32 %v556_v10, 0.0 }
  0x55   : > { %683 = vst [vmem:[%s870_s5 + $0x1f0] sm:$0xff] %v619_v11 }
  0x56   : > { %684 = vst [vmem:[%s870_s5 + $0x1f8] sm:$0xff] %v620_v12 }
  0x57 PF: > { %s14_s15 = sadd.s32 1, %s782_s15  }
  0x58   : > { %p11_p4 = scmp.ge.s32.totalorder %s14_s15, 4  }
  0x5a   :  { %13 = sbr.rel (!%p11_p4) target bundleno = 1 (0x1), region = 69 }

// kernel: bottleneck_forward.7
= control target key start
LH: loop header
LB: loop body
LE: loop exit
PB: predicated region body
PF: predicated region fallthrough
CT: control target
= control target key end

     0   :  { %s7789_s15 = smov 0   ;;  %s8941_s0 = inlined_call_operand.vmem [shape: bf16[4,18,18,128], index: 0, kind: input, shape index: {}]   ;;  %s8942_s1 = inlined_call_operand.vmem [shape: bf16[9,128,128], index: 1, kind: input, shape index: {}]   ;;  %s8943_s2 = inlined_call_operand.vmem [shape: f32[4,16,16,128], index: 2, kind: output, shape index: {0}]   ;;  %s8944_s3 = inlined_call_operand.vmem [shape: f32[32,128], index: 3, kind: output, shape index: {1}]   ;;  %s8945_s4 = inlined_call_operand.vmem [shape: f32[32,128], index: 4, kind: output, shape index: {2}]  }
   0x1 LB: > { %s6038_s16 = sadd.s32 4294967295, %s7762_s15   ;;  %p6042_p0 = scmp.ge.s32.totalorder %s7762_s15, 1  ;;  %s7762_s15 = sphi %s7789_s15, %s15_s15  }
   0x2   : > { %p167_p1 = scmp.lt.s32.totalorder %s7762_s15, 5 }
   0x4   : > { %p168_p2 = pnand %p6042_p0, %p167_p1 }
   0x5   : > { %v7628_v0 = vld [vmem:[%s8942_s1] sm:$0xff] (!%p168_p2)   ;;  %v7630_v2 = vld [vmem:[%s8942_s1 + $0x8] sm:$0xff] (!%p168_p2)   ;;  %p201_p3 = scmp.lt.s32.totalorder (!%p168_p2), %s6038_s16, 3  ;;  %v7632_v4 = vld [vmem:[%s8942_s1 + $0x10] sm:$0xff] (!%p168_p2)   ;;  %vm653_vm0 = vsmask.f32 (!%p168_p2), 3328 }
   0x6   : > { %171 = sbr.rel (%p168_p2) target bundleno = 571 (0x23b), region = 28  ;;  %v7629_v1 = vld [vmem:[%s8942_s1 + $0x100] sm:$0xff] (!%p168_p2)   ;;  %6915 = vmatprep.subr.bf16.mxu1 (!%p168_p2), %v7628_v0  ;;  %v7631_v3 = vld [vmem:[%s8942_s1 + $0x108] sm:$0xff] (!%p168_p2)   ;;  %v7633_v5 = vld [vmem:[%s8942_s1 + $0x110] sm:$0xff] (!%p168_p2)   ;;  %vm654_vm1 = vsmask.f32 (!%p168_p2), 7440 }
   0x7   : > { %7107 = vmatprep.subr.bf16.mxu0 (!%p168_p2), %v7629_v1  ;;  %6916 = vmatpush3.bf16.msra.mxu1 (!%p168_p2), %v7628_v0  ;;  %v7634_v6 = vld [vmem:[%s8942_s1 + $0x18] sm:$0xff] (!%p168_p2)   ;;  %v7636_v8 = vld [vmem:[%s8942_s1 + $0x20] sm:$0xff] (!%p168_p2)   ;;  %v7638_v10 = vld [vmem:[%s8942_s1 + $0x28] sm:$0xff] (!%p168_p2)   ;;  %vm1522_vm3 = vcmask (!%p168_p2), 1042432   ;;  %vm1523_vm4 = vcmask (!%p168_p2), 1046532  }
   0x8   : > { %7108 = vmatpush3.bf16.msra.mxu0 (!%p168_p2), %v7629_v1  ;;  %6917 = vmatprep.subr.bf16.mxu1 (!%p168_p2), %v7630_v2  ;;  %v7635_v7 = vld [vmem:[%s8942_s1 + $0x118] sm:$0xff] (!%p168_p2)   ;;  %v7637_v9 = vld [vmem:[%s8942_s1 + $0x120] sm:$0xff] (!%p168_p2)   ;;  %v7639_v11 = vld [vmem:[%s8942_s1 + $0x128] sm:$0xff] (!%p168_p2)  }
   0x9   : > { %7109 = vmatprep.subr.bf16.mxu0 (!%p168_p2), %v7631_v3  ;;  %v7640_v18 = vld [vmem:[%s8942_s1 + $0x30] sm:$0xff] (!%p168_p2)   ;;  %v7642_v32 = vld [vmem:[%s8942_s1 + $0x38] sm:$0xff] (!%p168_p2)   ;;  %vm7859_vm2 = vmor (!%p168_p2), %vm653_vm0, %vm654_vm1 }
   0xa   : > { %v7641_v24 = vld [vmem:[%s8942_s1 + $0x130] sm:$0xff] (!%p168_p2)   ;;  %v7643_v38 = vld [vmem:[%s8942_s1 + $0x138] sm:$0xff] (!%p168_p2)   ;;  %v7646_v47 = vld [vmem:[%s8942_s1 + $0x40] sm:$0xff] (!%p168_p2)  }
   0xb   : > { %6918 = vmatpush3.bf16.msra.mxu1 (!%p168_p2), %v7630_v2  ;;  %v7647_v52 = vld [vmem:[%s8942_s1 + $0x140] sm:$0xff] (!%p168_p2)   ;;  %vm7959_vm5 = vmor (!%p168_p2), %vm1522_vm3, %vm1523_vm4 }
   0xc   : > { %7110 = vmatpush3.bf16.msra.mxu0 (!%p168_p2), %v7631_v3  ;;  %6919 = vmatprep.subr.bf16.mxu1 (!%p168_p2), %v7632_v4 }
   0xd   : > { %s8951_s16 = smov (!%p201_p3, %s6038_s16), 3  ;;  %7111 = vmatprep.subr.bf16.mxu0 %v7633_v5 }
   0xe   : > { %s7619_s7 = smul.u32 216, %s8951_s16  ;;  %s6046_s22 = sshll.u32 %s8951_s16, 3 }
   0xf   : > { %6920 = vmatpush3.bf16.msra.mxu1 %v7632_v4  ;;  %s214_s25 = scalar_lea.vmem %s8944_s3, %s6046_s22  ;;  %s218_s28 = scalar_lea.vmem %s8945_s4, %s6046_s22 }
  0x10   : > { %7112 = vmatpush3.bf16.msra.mxu0 %v7633_v5  ;;  %6921 = vmatprep.subr.bf16.mxu1 %v7634_v6  ;;  %s7836_s18 = scalar_lea.vmem %s8941_s0, %s7619_s7 }
  0x11   : > { %7113 = vmatprep.subr.bf16.mxu0 %v7635_v7  ;;  %v7644_v12 = vld [vmem:[%s7836_s18] sm:$0xff]   ;;  %v6240_v13 = vld [vmem:[%s7836_s18 + $0xc] sm:$0xf]  ;;  %v6241_v14 = vld [vmem:[%s7836_s18 + $0x10] sm:$0xf] }
  0x12   : > { %6931 = vmatprep.mubr.bf16.mxu1 %v7644_v12  ;;  %v6242_v15 = vld [vmem:[%s7836_s18 + $0x14] sm:$0x1]  ;;  %v2523_v16 = vshrl.u32 %v6240_v13, 16  ;;  %v2526_v17 = vshll.u32 %v6240_v13, 16  ;;  %v2532_v19 = vshll.u32 %v6241_v14, 16  ;;  %v2536_v20 = vshrl.u32 %v6241_v14, 16 }
  0x13   : > { %6922 = vmatpush3.bf16.msra.mxu1 %v7634_v6  ;;  %v2542_v21 = vshll.u32 %v6242_v15, 16  ;;  %v6243_v29 = vld [vmem:[%s7836_s18 + $0x18] sm:$0xf]  ;;  %v6244_v30 = vld [vmem:[%s7836_s18 + $0x1c] sm:$0xf]  ;;  %v7645_v55 = vld [vmem:[%s7836_s18 + $0xc] sm:$0xff]  }
  0x14   : > { %7114 = vmatpush3.bf16.msra.mxu0 %v7635_v7  ;;  %6923 = vmatprep.subr.bf16.mxu1 %v7636_v8  ;;  %v2525_v22 = vrot.slane %v2523_v16, 4  ;;  %v2528_v23 = vrot.slane %v2526_v17, 5  ;;  %v2534_v25 = vrot.slane %v2532_v19, 5  ;;  %v2538_v26 = vrot.slane %v2536_v20, 4  ;;  %v6245_v31 = vld [vmem:[%s7836_s18 + $0x20] sm:$0x1] }
  0x15   : > { %7115 = vmatprep.subr.bf16.mxu0 %v7637_v9  ;;  %v2544_v27 = vrot.slane %v2542_v21, 5  ;;  %v2547_v35 = vshrl.u32 %v6243_v29, 16  ;;  %v2550_v36 = vshll.u32 %v6243_v29, 16  ;;  %v2556_v37 = vshll.u32 %v6244_v30, 16  ;;  %v6246_v53 = vld [vmem:[%s7836_s18 + $0x24] sm:$0xf] }
  0x16   : > { %v2529_v28 = vor.u32 %v2528_v23, %v2525_v22  ;;  %v2539_v34 = vor.u32 %v2538_v26, %v2534_v25  ;;  %v2560_v40 = vshrl.u32 %v6244_v30, 16  ;;  %v2566_v41 = vshll.u32 %v6245_v31, 16  ;;  %v6247_v57 = vld [vmem:[%s7836_s18 + $0x28] sm:$0xf]  ;;  %v6248_v58 = vld [vmem:[%s7836_s18 + $0x2c] sm:$0x1] }
  0x17   : > { %6924 = vmatpush3.bf16.msra.mxu1 %v7636_v8  ;;  %v2549_v43 = vrot.slane %v2547_v35, 4  ;;  %v2552_v44 = vrot.slane %v2550_v36, 5  ;;  %v2558_v45 = vrot.slane %v2556_v37, 5  ;;  %v2571_v59 = vshrl.u32 %v6246_v53, 16  ;;  %v7649_v2 = vld [vmem:[%s7836_s18 + $0x18] sm:$0xff]   ;;  %v7648_v6 = vld [vmem:[%s8942_s1 + $0x148] sm:$0xff]  }
  0x18   : > { %7116 = vmatpush3.bf16.msra.mxu0 %v7637_v9  ;;  %6925 = vmatprep.subr.bf16.mxu1 %v7638_v10  ;;  %v2530_v39 = vrot.slane %v2529_v28, 4  ;;  %v2540_v42 = vrot.slane %v2539_v34, 4  ;;  %v2562_v48 = vrot.slane %v2560_v40, 4  ;;  %v2568_v51 = vrot.slane %v2566_v41, 5  ;;  %v6249_v13 = vld [vmem:[%s7836_s18 + $0x30] sm:$0xf] }
  0x19   : > { %7117 = vmatprep.subr.bf16.mxu0 %v7639_v11  ;;  %v2553_v50 = vor.u32 %v2552_v44, %v2549_v43  ;;  %v2574_v60 = vshll.u32 %v6246_v53, 16  ;;  %v2580_v62 = vshll.u32 %v6247_v57, 16  ;;  %v2584_v63 = vshrl.u32 %v6247_v57, 16  ;;  %v6250_v14 = vld [vmem:[%s7836_s18 + $0x34] sm:$0xf]  ;;  %v7650_v28 = vld [vmem:[%s7836_s18 + $0x24] sm:$0xff]  }
  0x1a   : > { %v2535_v46 = vsel %vm7859_vm2, %v2530_v39, %v2534_v25  ;;  %v2545_v49 = vsel %vm7859_vm2, %v2540_v42, %v2544_v27  ;;  %v2563_v56 = vor.u32 %v2562_v48, %v2558_v45  ;;  %v2590_v0 = vshll.u32 %v6248_v58, 16  ;;  %v6251_v17 = vld [vmem:[%s7836_s18 + $0x38] sm:$0x1]  ;;  %v7652_v31 = vld [vmem:[%s8942_s1 + $0x150] sm:$0xff]   ;;  %v6252_v39 = vld [vmem:[%s7836_s18 + $0x3c] sm:$0xf] }
  0x1b   : > { %6926 = vmatpush3.bf16.msra.mxu1 %v7638_v10  ;;  %v6304_v54 = vcombine.low %v2535_v46, %v2545_v49  ;;  %v2554_v61 = vrot.slane %v2553_v50, 4  ;;  %v2573_v3 = vrot.slane %v2571_v59, 4  ;;  %v2576_v4 = vrot.slane %v2574_v60, 5  ;;  %v7651_v10 = vld [vmem:[%s8942_s1 + $0x48] sm:$0xff]   ;;  %v7654_v36 = vld [vmem:[%s7836_s18 + $0x30] sm:$0xff]  }
  0x1c   : > { %7118 = vmatpush3.bf16.msra.mxu0 %v7639_v11  ;;  %6927 = vmatprep.subr.bf16.mxu1 %v7640_v18  ;;  %v2564_v1 = vrot.slane %v2563_v56, 4  ;;  %v2582_v7 = vrot.slane %v2580_v62, 5  ;;  %v2586_v8 = vrot.slane %v2584_v63, 4  ;;  %v2592_v9 = vrot.slane %v2590_v0, 5  ;;  %v6253_v40 = vld [vmem:[%s7836_s18 + $0x40] sm:$0xf] }
  0x1d   : > { %7119 = vmatprep.subr.bf16.mxu0 %v7641_v24  ;;  %7123 = vmatprep.mubr.bf16.mxu0 %v6304_v54  ;;  %v2559_v5 = vsel %vm7859_vm2, %v2554_v61, %v2558_v45  ;;  %v2577_v12 = vor.u32 %v2576_v4, %v2573_v3  ;;  %v2598_v19 = vshll.u32 %v6249_v13, 16  ;;  %v2604_v21 = vshll.u32 %v6250_v14, 16  ;;  %v6254_v41 = vld [vmem:[%s7836_s18 + $0x44] sm:$0x1]  ;;  %v7656_v54 = vld [vmem:[%s8942_s1 + $0x50] sm:$0xff]  }
  0x1e   : > { %v2569_v11 = vsel %vm7859_vm2, %v2564_v1, %v2568_v51  ;;  %v2587_v16 = vor.u32 %v2586_v8, %v2582_v7  ;;  %v2608_v22 = vshrl.u32 %v6250_v14, 16  ;;  %v2614_v23 = vshll.u32 %v6251_v17, 16  ;;  %v6255_v58 = vld [vmem:[%s7836_s18 + $0x48] sm:$0xf]  ;;  %v6256_v61 = vld [vmem:[%s7836_s18 + $0x4c] sm:$0xf] }
  0x1f   : > { %6928 = vmatpush3.bf16.msra.mxu1 %v7640_v18  ;;  %v6305_v15 = vcombine.low %v2559_v5, %v2569_v11  ;;  %v2595_v18 = vshrl.u32 %v6249_v13, 16  ;;  %v2578_v20 = vrot.slane %v2577_v12, 4  ;;  %v2600_v26 = vrot.slane %v2598_v19, 5  ;;  %v6257_v62 = vld [vmem:[%s7836_s18 + $0x50] sm:$0x1]  ;;  %v7657_v8 = vld [vmem:[%s8942_s1 + $0x160] sm:$0xff]  }
  0x20   : > { %7120 = vmatpush3.bf16.msra.mxu0 %v7641_v24  ;;  %6929 = vmatprep.subr.bf16.mxu1 %v7642_v32  ;;  %v2588_v24 = vrot.slane %v2587_v16, 4  ;;  %v2606_v29 = vrot.slane %v2604_v21, 5  ;;  %v2610_v30 = vrot.slane %v2608_v22, 4  ;;  %v2616_v35 = vrot.slane %v2614_v23, 5  ;;  %v6258_v19 = vld [vmem:[%s7836_s18 + $0x54] sm:$0xf] }
  0x21   : > { %7121 = vmatprep.subr.bf16.mxu0 %v7643_v38  ;;  %v2597_v25 = vrot.slane %v2595_v18, 4  ;;  %v2583_v27 = vsel %vm7859_vm2, %v2578_v20, %v2582_v7  ;;  %v2619_v43 = vshrl.u32 %v6252_v39, 16  ;;  %v2622_v44 = vshll.u32 %v6252_v39, 16  ;;  %v7659_v18 = vld [vmem:[%s7836_s18 + $0x48] sm:$0xff]   ;;  %v6259_v20 = vld [vmem:[%s7836_s18 + $0x58] sm:$0xf] }
  0x22   : > { %v2628_v45 = vshll.u32 %v6253_v40, 16  ;;  %v2632_v48 = vshrl.u32 %v6253_v40, 16  ;;  %v2638_v49 = vshll.u32 %v6254_v41, 16  ;;  %v2643_v63 = vshrl.u32 %v6255_v58, 16  ;;  %v7658_v23 = vld [vmem:[%s8942_s1 + $0x168] sm:$0xff]   ;;  %v7660_v39 = vld [vmem:[%s7836_s18 + $0x54] sm:$0xff]  }
  0x23   : > { %6930 = vmatpush3.bf16.msra.mxu1 %v7642_v32  ;;  %v2593_v32 = vsel %vm7859_vm2, %v2588_v24, %v2592_v9  ;;  %v2601_v34 = vor.u32 %v2600_v26, %v2597_v25  ;;  %v2621_v51 = vrot.slane %v2619_v43, 4  ;;  %v2646_v0 = vshll.u32 %v6255_v58, 16  ;;  %v6260_v24 = vld [vmem:[%s7836_s18 + $0x5c] sm:$0x1]  ;;  %v6261_v43 = vld [vmem:[%s7836_s18 + $0x60] sm:$0xf] }
  0x24   : > { %7122 = vmatpush3.bf16.msra.mxu0 %v7643_v38  ;;  %6963 = vmatprep.subr.bf16.mxu1 %v7646_v47  ;;  %v6306_v37 = vcombine.low %v2583_v27, %v2593_v32  ;;  %v2611_v38 = vor.u32 %v2610_v30, %v2606_v29  ;;  %v2630_v53 = vrot.slane %v2628_v45, 5  ;;  %v2634_v56 = vrot.slane %v2632_v48, 4  ;;  %v7661_v40 = vld [vmem:[%s8942_s1 + $0x58] sm:$0xff]   ;;  %v6263_v45 = vld [vmem:[%s7836_s18 + $0x68] sm:$0x1] }
  0x25   : > { %7155 = vmatprep.subr.bf16.mxu0 %v7647_v52  ;;  %v2602_v42 = vrot.slane %v2601_v34, 4  ;;  %v2640_v57 = vrot.slane %v2638_v49, 5  ;;  %v2656_v3 = vshrl.u32 %v6256_v61, 16  ;;  %v2662_v4 = vshll.u32 %v6257_v62, 16 }
  0x26   : > { %6932 = vmatmul.mubr.bf16.vlgmr.msra.gmra.mrb[0].mxu1 %v7645_v55  ;;  %v2612_v46 = vrot.slane %v2611_v38, 4  ;;  %v2635_v1 = vor.u32 %v2634_v56, %v2630_v53  ;;  %v2648_v7 = vrot.slane %v2646_v0, 5  ;;  %v2667_v25 = vshrl.u32 %v6258_v19, 16  ;;  %v6328_v0 = vld [vmem:[%s7836_s18 + $0xc] sm:$0xe] }
  0x27   : > { %7124 = vmatmul.mubr.bf16.vlgmr.msra.gmra.mrb[0].mxu0 %v6305_v15  ;;  %6964 = vmatpush3.bf16.msra.mxu1 %v7646_v47  ;;  %v7653_v47 = vld [vmem:[%s8942_s1 + $0x158] sm:$0xff]   ;;  %v2607_v50 = vsel %vm7859_vm2, %v2602_v42, %v2606_v29  ;;  %v2658_v12 = vrot.slane %v2656_v3, 4  ;;  %v2664_v17 = vrot.slane %v2662_v4, 5  ;;  %v2670_v26 = vshll.u32 %v6258_v19, 16 }
  0x28   : > { %7156 = vmatpush3.bf16.msra.mxu0 %v7647_v52  ;;  %6935 = vmatprep.mubr.bf16.mxu1 %v7649_v2  ;;  %v2624_v52 = vrot.slane %v2622_v44, 5  ;;  %v2617_v55 = vsel %vm7859_vm2, %v2612_v46, %v2616_v35  ;;  %v2652_v2 = vshll.u32 %v6256_v61, 16  ;;  %v2636_v9 = vrot.slane %v2635_v1, 4  ;;  %v6262_v44 = vld [vmem:[%s7836_s18 + $0x64] sm:$0xf] }
  0x29   : > { %7157 = vmatprep.subr.bf16.mxu0 %v7648_v6  ;;  %6965 = vmatprep.subr.bf16.mxu1 %v7651_v10  ;;  %v6307_v59 = vcombine.low %v2607_v50, %v2617_v55  ;;  %v2680_v29 = vshrl.u32 %v6259_v20, 16  ;;  %v2686_v30 = vshll.u32 %v6260_v24, 16  ;;  %v2669_v32 = vrot.slane %v2667_v25, 4  ;;  %v7662_v50 = vld [vmem:[%s8942_s1 + $0x170] sm:$0xff]  }
  0x2a   : > { %7127 = vmatprep.mubr.bf16.mxu0 %v6306_v37  ;;  %v2625_v60 = vor.u32 %v2624_v52, %v2621_v51  ;;  %v2654_v11 = vrot.slane %v2652_v2, 5  ;;  %v2641_v15 = vsel %vm7859_vm2, %v2636_v9, %v2640_v57  ;;  %v2672_v34 = vrot.slane %v2670_v26, 5 }
  0x2b   : > { %6966 = vmatpush3.bf16.msra.mxu1 %v7651_v10  ;;  %v7655_v10 = vld [vmem:[%s7836_s18 + $0x3c] sm:$0xff]   ;;  %v2682_v37 = vrot.slane %v2680_v29, 4  ;;  %v2688_v38 = vrot.slane %v2686_v30, 5  ;;  %v2694_v48 = vshll.u32 %v6261_v43, 16  ;;  %v2700_v49 = vshll.u32 %v6262_v44, 16 }
  0x2c   : > { %7158 = vmatpush3.bf16.msra.mxu0 %v7648_v6  ;;  %6967 = vmatprep.subr.bf16.mxu1 %v7656_v54  ;;  %v2626_v5 = vrot.slane %v2625_v60, 4  ;;  %v2645_v6 = vrot.slane %v2643_v63, 4  ;;  %v2659_v16 = vor.u32 %v2658_v12, %v2654_v11  ;;  %v2673_v42 = vor.u32 %v2672_v34, %v2669_v32  ;;  %v7663_v60 = vld [vmem:[%s8942_s1 + $0x178] sm:$0xff]   ;;  %v7664_v63 = vld [vmem:[%s7836_s18 + $0x60] sm:$0xff]   ;;  %v6336_v32 = vld [vmem:[%s7836_s18 + $0x2c] sm:$0x1] }
  0x2d   : > { %7159 = vmatprep.subr.bf16.mxu0 %v7652_v31  ;;  %v2704_v52 = vshrl.u32 %v6262_v44, 16  ;;  %v2696_v56 = vrot.slane %v2694_v48, 5  ;;  %v2702_v57 = vrot.slane %v2700_v49, 5  ;;  %v6334_v29 = vld [vmem:[%s7836_s18 + $0x24] sm:$0xe]  ;;  %v7671_v48 = vld [vmem:[%s8942_s1 + $0x188] sm:$0xff]  }
  0x2e   : > { %6936 = vmatmul.mubr.bf16.gmra.mrb[4].mxu1 %v7650_v28  ;;  %v2631_v13 = vsel %vm7859_vm2, %v2626_v5, %v2630_v53  ;;  %v2649_v14 = vor.u32 %v2648_v7, %v2645_v6  ;;  %v2660_v27 = vrot.slane %v2659_v16, 4  ;;  %v2676_v28 = vshll.u32 %v6259_v20, 16  ;;  %v6329_v5 = vld [vmem:[%s7836_s18 + $0x10] sm:$0xf]  ;;  %v6330_v6 = vld [vmem:[%s7836_s18 + $0x14] sm:$0x1] }
  0x2f   : > { %6939 = vmatprep.mubr.bf16.mxu1 %v7654_v36  ;;  %6968 = vmatpush3.bf16.msra.mxu1 %v7656_v54  ;;  %v6308_v21 = vcombine.low %v2631_v13, %v2641_v15  ;;  %v2674_v51 = vrot.slane %v2673_v42, 4  ;;  %v2710_v53 = vshll.u32 %v6263_v45, 16  ;;  %v6376_v7 = vrot.slane %v6328_v0, 9  ;;  %v7667_v13 = vld [vmem:[%s8942_s1 + $0x180] sm:$0xff]   ;;  %v6332_v20 = vld [vmem:[%s7836_s18 + $0x1c] sm:$0xf] }
  0x30   : > { %7160 = vmatpush3.bf16.msra.mxu0 %v7652_v31  ;;  %v2650_v22 = vrot.slane %v2649_v14, 4  ;;  %v2665_v35 = vsel %vm7859_vm2, %v2660_v27, %v2664_v17  ;;  %v2678_v36 = vrot.slane %v2676_v28, 5  ;;  %6969 = vmatprep.subr.bf16.mxu1 %v7661_v40  ;;  %v3390_v9 = vrot.slane %v6329_v5, 5  ;;  %v7665_v17 = vld [vmem:[%s7836_s18 + $0x6c] sm:$0xff]   ;;  %v7669_v42 = vld [vmem:[%s7836_s18 + $0x84] sm:$0xff]  }
  0x31   : > { %7128 = vmatmul.mubr.bf16.gmra.mrb[4].mxu0 %v6307_v59  ;;  %7161 = vmatprep.subr.bf16.mxu0 %v7653_v47  ;;  %v2706_v59 = vrot.slane %v2704_v52, 4  ;;  %v2712_v3 = vrot.slane %v2710_v53, 5  ;;  %v3397_v26 = vrot.slane %v6332_v20, 5  ;;  %v6378_v34 = vrot.slane %v6334_v29, 9  ;;  %v6338_v44 = vld [vmem:[%s7836_s18 + $0x34] sm:$0xf] }
  0x32   : > { %7131 = vmatprep.mubr.bf16.mxu0 %v6308_v21  ;;  %v2655_v31 = vsel %vm7859_vm2, %v2650_v22, %v2654_v11  ;;  %v2683_v46 = vor.u32 %v2682_v37, %v2678_v36  ;;  %v2679_v58 = vsel %vm7859_vm2, %v2674_v51, %v2678_v36  ;;  %v7666_v11 = vld [vmem:[%s8942_s1 + $0x60] sm:$0xff]   ;;  %v3391_v15 = vsel %vm7959_vm5, %v6376_v7, %v3390_v9  ;;  %v6343_v0 = vld [vmem:[%s7836_s18 + $0x48] sm:$0xe]  ;;  %v6344_v5 = vld [vmem:[%s7836_s18 + $0x4c] sm:$0xf] }
  0x33   : > { %v6309_v41 = vcombine.low %v2655_v31, %v2665_v35  ;;  %6970 = vmatpush3.bf16.msra.mxu1 %v7661_v40  ;;  %v2707_v2 = vor.u32 %v2706_v59, %v2702_v57  ;;  %v3392_v16 = vrot.slane %v3390_v9, 4  ;;  %v6333_v21 = vld [vmem:[%s7836_s18 + $0x20] sm:$0x1]  ;;  %v3399_v30 = vrot.slane %v3397_v26, 4  ;;  %v6335_v31 = vld [vmem:[%s7836_s18 + $0x28] sm:$0xf] }
  0x34   : > { %7162 = vmatpush3.bf16.msra.mxu0 %v7653_v47  ;;  %v2691_v47 = vshrl.u32 %v6261_v43, 16  ;;  %v2684_v54 = vrot.slane %v2683_v46, 4  ;;  %6971 = vmatprep.subr.bf16.mxu1 %v7666_v11  ;;  %v3400_v27 = vrot.slane %v6333_v21, 5  ;;  %v3404_v36 = vrot.slane %v6335_v31, 5  ;;  %v6337_v43 = vld [vmem:[%s7836_s18 + $0x30] sm:$0xe] }
  0x35   : > { %7163 = vmatprep.subr.bf16.mxu0 %v7657_v8  ;;  %v2708_v12 = vrot.slane %v2707_v2, 4  ;;  %v3407_v37 = vrot.slane %v6336_v32, 5  ;;  %v6339_v46 = vld [vmem:[%s7836_s18 + $0x38] sm:$0x1]  ;;  %v7674_v59 = vld [vmem:[%s8942_s1 + $0x70] sm:$0xff]   ;;  %v6381_v7 = vrot.slane %v6343_v0, 9 }
  0x36   : > { %6940 = vmatmul.mubr.bf16.gmra.mrb[8].mxu1 %v7655_v10  ;;  %v2693_v55 = vrot.slane %v2691_v47, 4  ;;  %v2689_v61 = vsel %vm7859_vm2, %v2684_v54, %v2688_v38  ;;  %v3393_v10 = vrot.slane %v6330_v6, 5  ;;  %v3401_v38 = vsel %vm7959_vm5, %v3399_v30, %v3400_v27  ;;  %v7672_v54 = vld [vmem:[%s7836_s18 + $0x90] sm:$0xff]   ;;  %v6349_v27 = vld [vmem:[%s7836_s18 + $0x60] sm:$0xe]  ;;  %v7679_v31 = vld [vmem:[%s8942_s1 + $0x198] sm:$0xff]  }
  0x37   : > { %6943 = vmatprep.mubr.bf16.mxu1 %v7659_v18  ;;  %v6310_v1 = vcombine.low %v2679_v58, %v2689_v61  ;;  %v6331_v18 = vld [vmem:[%s7836_s18 + $0x18] sm:$0xe]  ;;  %v2713_v19 = vsel %vm7859_vm2, %v2708_v12, %v2712_v3  ;;  %6972 = vmatpush3.bf16.msra.mxu1 %v7666_v11  ;;  %v3405_v40 = vsel %vm7959_vm5, %v6378_v34, %v3404_v36  ;;  %v3411_v47 = vrot.slane %v6338_v44, 5  ;;  %v7673_v3 = vld [vmem:[%s7836_s18 + $0x9c] sm:$0xff]   ;;  %v6345_v6 = vld [vmem:[%s7836_s18 + $0x50] sm:$0x1] }
  0x38   : > { %7164 = vmatpush3.bf16.msra.mxu0 %v7657_v8  ;;  %v2697_v62 = vor.u32 %v2696_v56, %v2693_v55  ;;  %v6377_v22 = vrot.slane %v6331_v18, 9  ;;  %v3394_v25 = vsel %vm7959_vm5, %v3392_v16, %v3393_v10  ;;  %v3414_v51 = vrot.slane %v6339_v46, 5  ;;  %v6340_v55 = vld [vmem:[%s7836_s18 + $0x3c] sm:$0xe]  ;;  %v6341_v56 = vld [vmem:[%s7836_s18 + $0x40] sm:$0xf] }
  0x39   : > { %7165 = vmatprep.subr.bf16.mxu0 %v7658_v23  ;;  %7132 = vmatmul.mubr.bf16.gmra.mrb[8].mxu0 %v6309_v41  ;;  %v6408_v28 = vcombine.low %v3391_v15, %v3394_v25  ;;  %v3406_v41 = vrot.slane %v3404_v36, 4  ;;  %v3413_v53 = vrot.slane %v3411_v47, 4  ;;  %v6380_v58 = vrot.slane %v6340_v55, 9  ;;  %v7675_v12 = vld [vmem:[%s8942_s1 + $0x190] sm:$0xff]   ;;  %v7676_v15 = vld [vmem:[%s7836_s18 + $0xa8] sm:$0xff]  }
  0x3a   : > { %v2698_v8 = vrot.slane %v2697_v62, 4  ;;  %7135 = vmatprep.mubr.bf16.mxu0 %v6310_v1  ;;  %v3398_v35 = vsel %vm7959_vm5, %v6377_v22, %v3397_v26  ;;  %v3428_v11 = vrot.slane %v6345_v6, 5  ;;  %v6346_v16 = vld [vmem:[%s7836_s18 + $0x54] sm:$0xe]  ;;  %v6348_v18 = vld [vmem:[%s7836_s18 + $0x5c] sm:$0x1] }
  0x3b   : > { %v6409_v45 = vcombine.low %v3398_v35, %v3401_v38  ;;  %v3408_v49 = vsel %vm7959_vm5, %v3406_v41, %v3407_v37  ;;  %v3435_v21 = vrot.slane %v6348_v18, 5  ;;  %v7678_v26 = vld [vmem:[%s8942_s1 + $0x78] sm:$0xff]   ;;  %v6351_v29 = vld [vmem:[%s7836_s18 + $0x68] sm:$0x1]  ;;  %v6383_v30 = vrot.slane %v6349_v27, 9 }
  0x3c   : > { %7166 = vmatpush3.bf16.msra.mxu0 %v7658_v23  ;;  %v2703_v14 = vsel %vm7859_vm2, %v2698_v8, %v2702_v57  ;;  %v7668_v23 = vld [vmem:[%s7836_s18 + $0x78] sm:$0xff]   ;;  %v6410_v52 = vcombine.low %v3405_v40, %v3408_v49  ;;  %v6342_v57 = vld [vmem:[%s7836_s18 + $0x44] sm:$0x1]  ;;  %v3425_v8 = vrot.slane %v6344_v5, 5  ;;  %v3442_v36 = vrot.slane %v6351_v29, 5 }
  0x3d   : > { %7167 = vmatprep.subr.bf16.mxu0 %v7662_v50  ;;  %v6311_v24 = vcombine.low %v2703_v14, %v2713_v19  ;;  %v3421_v61 = vrot.slane %v6342_v57, 5  ;;  %v6382_v19 = vrot.slane %v6346_v16, 9  ;;  %v7677_v34 = vld [vmem:[%s7836_s18 + $0xb4] sm:$0xff]   ;;  %v606_v40 = vld [vmem:[%s7836_s18 + $0x4] sm:$0xf] }
  0x3e   : > { %6944 = vmatmul.mubr.bf16.gmra.mrb[12].mxu1 %v7660_v39  ;;  %v7670_v39 = vld [vmem:[%s8942_s1 + $0x68] sm:$0xff]   ;;  %v3427_v14 = vrot.slane %v3425_v8, 4  ;;  %v3426_v22 = vsel %vm7959_vm5, %v6381_v7, %v3425_v8  ;;  %v670_v49 = vshrl.u32 %v606_v40, 16  ;;  %v609_v5 = vld [vmem:[%s7836_s18 + $0x10] sm:$0xf] }
  0x3f   : > { %6947 = vmatprep.mubr.bf16.mxu1 %v7664_v63  ;;  %6973 = vmatprep.subr.bf16.mxu1 %v7670_v39  ;;  %v3415_v63 = vsel %vm7959_vm5, %v3413_v53, %v3414_v51  ;;  %v607_v41 = vld [vmem:[%s7836_s18 + $0x8] sm:$0x1]  ;;  %v6352_v46 = vld [vmem:[%s7836_s18 + $0x6c] sm:$0xe]  ;;  %v6353_v51 = vld [vmem:[%s7836_s18 + $0x70] sm:$0xf] }
  0x40   : > { %7168 = vmatpush3.bf16.msra.mxu0 %v7662_v50  ;;  %v6379_v50 = vrot.slane %v6337_v43, 9  ;;  %6974 = vmatpush3.bf16.msra.mxu1 %v7670_v39  ;;  %v605_v39 = vld [vmem:[%s7836_s18] sm:$0xf]  ;;  %v3446_v57 = vrot.slane %v6353_v51, 5  ;;  %v610_v6 = vld [vmem:[%s7836_s18 + $0x14] sm:$0x1] }
  0x41   : > { %7169 = vmatprep.subr.bf16.mxu0 %v7663_v60  ;;  %7136 = vmatmul.mubr.bf16.gmra.mrb[12].mxu0 %v6311_v24  ;;  %v657_v44 = vshrl.u32 %v605_v39, 16  ;;  %v6357_v29 = vld [vmem:[%s7836_s18 + $0x80] sm:$0x1] }
  0x42   : > { %7171 = vmatprep.mubr.bf16.mxu0 %v6408_v28  ;;  %v3412_v62 = vsel %vm7959_vm5, %v6379_v50, %v3411_v47  ;;  %6975 = vmatprep.subr.bf16.mxu1 %v7674_v59  ;;  %v6350_v28 = vld [vmem:[%s7836_s18 + $0x64] sm:$0xf]  ;;  %v676_v50 = vshll.u32 %v607_v41, 16  ;;  %v612_v41 = vld [vmem:[%s7836_s18 + $0x1c] sm:$0xf] }
  0x43   : > { %v6411_v9 = vcombine.low %v3412_v62, %v3415_v63  ;;  %v3439_v35 = vrot.slane %v6350_v28, 5  ;;  %v8060_v47 = vld [vmem:[%s8942_s1 + $0x80] sm:$0xff]   ;;  %v608_v63 = vld [vmem:[%s7836_s18 + $0xc] sm:$0xf]  ;;  %v718_v51 = vshrl.u32 %v612_v41, 16 }
  0x44   : > { %7170 = vmatpush3.bf16.msra.mxu0 %v7663_v60  ;;  %v3418_v60 = vrot.slane %v6341_v56, 5  ;;  %6976 = vmatpush3.bf16.msra.mxu1 %v7674_v59  ;;  %v6354_v56 = vld [vmem:[%s7836_s18 + $0x74] sm:$0x1]  ;;  %v678_v62 = vrot.slane %v676_v50, 5  ;;  %v681_v8 = vshrl.u32 %v608_v63, 16 }
  0x45   : > { %7203 = vmatprep.subr.bf16.mxu0 %v7667_v13  ;;  %6977 = vmatprep.subr.bf16.mxu1 %v7678_v26  ;;  %v3441_v43 = vrot.slane %v3439_v35, 4 }
  0x46   : > { %6948 = vmatmul.mubr.bf16.gmra.mrb[16].mxu1 %v7665_v17  ;;  %v3419_v1 = vsel %vm7959_vm5, %v6380_v58, %v3418_v60  ;;  %v3420_v2 = vrot.slane %v3418_v60, 4  ;;  %v6347_v17 = vld [vmem:[%s7836_s18 + $0x58] sm:$0xf]  ;;  %v7681_v58 = vld [vmem:[%s8942_s1 + $0x1a0] sm:$0xff]   ;;  %v683_v18 = vrot.slane %v681_v8, 4 }
  0x47   : > { %6951 = vmatprep.mubr.bf16.mxu1 %v7668_v23  ;;  %v3432_v20 = vrot.slane %v6347_v17, 5  ;;  %v3429_v23 = vsel %vm7959_vm5, %v3427_v14, %v3428_v11  ;;  %v3443_v53 = vsel %vm7959_vm5, %v3441_v43, %v3442_v36  ;;  %v7683_v11 = vld [vmem:[%s8942_s1 + $0x1a8] sm:$0xff]   ;;  %v694_v14 = vshrl.u32 %v609_v5, 16  ;;  %v611_v36 = vld [vmem:[%s7836_s18 + $0x18] sm:$0xf] }
  0x48   : > { %v3422_v10 = vsel %vm7959_vm5, %v3420_v2, %v3421_v61  ;;  %v6413_v37 = vcombine.low %v3426_v22, %v3429_v23  ;;  %6978 = vmatpush3.bf16.msra.mxu1 %v7678_v26  ;;  %v672_v61 = vrot.slane %v670_v49, 4  ;;  %v3448_v2 = vrot.slane %v3446_v57, 4  ;;  %v6356_v26 = vld [vmem:[%s7836_s18 + $0x7c] sm:$0xf] }
  0x49   : > { %7172 = vmatmul.mubr.bf16.vlgmr.msra.gmra.mrb[0].mxu0 %v6409_v45  ;;  %v3433_v24 = vsel %vm7959_vm5, %v6382_v19, %v3432_v20  ;;  %v3434_v25 = vrot.slane %v3432_v20, 4  ;;  %v660_v45 = vshll.u32 %v605_v39, 16  ;;  %7011 = vmatprep.subr.bf16.mxu1 %v8060_v47  ;;  %v6355_v20 = vld [vmem:[%s7836_s18 + $0x78] sm:$0xe] }
  0x4a   : > { %7204 = vmatpush3.bf16.msra.mxu0 %v7667_v13  ;;  %7175 = vmatprep.mubr.bf16.mxu0 %v6410_v52  ;;  %v6412_v13 = vcombine.low %v3419_v1, %v3422_v10  ;;  %v6384_v52 = vrot.slane %v6352_v46, 9  ;;  %v690_v10 = vshll.u32 %v609_v5, 16  ;;  %v714_v46 = vshll.u32 %v612_v41, 16 }
  0x4b   : > { %7205 = vmatprep.subr.bf16.mxu0 %v7671_v48  ;;  %v3436_v32 = vsel %vm7959_vm5, %v3434_v25, %v3435_v21  ;;  %v662_v55 = vrot.slane %v660_v45, 5  ;;  %v7685_v21 = vld [vmem:[%s8942_s1 + $0x1b0] sm:$0xff]   ;;  %v708_v45 = vshll.u32 %v611_v36, 16 }
  0x4c   : > { %v6414_v38 = vcombine.low %v3433_v24, %v3436_v32  ;;  %v3447_v1 = vsel %vm7959_vm5, %v6384_v52, %v3446_v57  ;;  %v692_v23 = vrot.slane %v690_v10, 5  ;;  %v696_v24 = vrot.slane %v694_v14, 4 }
  0x4e   : > { %6952 = vmatmul.mubr.bf16.gmra.mrb[20].mxu1 %v7669_v42  ;;  %7206 = vmatpush3.bf16.msra.mxu0 %v7671_v48  ;;  %v8054_v42 = vsel %vm7959_vm5, %v6383_v30, %v3439_v35  ;;  %v666_v48 = vshll.u32 %v606_v40, 16  ;;  %v6385_v30 = vrot.slane %v6355_v20, 9  ;;  %v3456_v35 = vrot.slane %v6357_v29, 5 }
  0x4f   : > { %6955 = vmatprep.mubr.bf16.mxu1 %v7672_v54  ;;  %7207 = vmatprep.subr.bf16.mxu0 %v7675_v12  ;;  %v659_v54 = vrot.slane %v657_v44, 4  ;;  %v6415_v59 = vcombine.low %v8054_v42, %v3443_v53  ;;  %v613_v42 = vld [vmem:[%s7836_s18 + $0x20] sm:$0x1]  ;;  %v705_v44 = vshrl.u32 %v611_v36, 16  ;;  %v6359_v53 = vld [vmem:[%s7836_s18 + $0x88] sm:$0xf] }
  0x50   : > { %v668_v60 = vrot.slane %v666_v48, 5  ;;  %v6358_v48 = vld [vmem:[%s7836_s18 + $0x84] sm:$0xe]  ;;  %v724_v52 = vshll.u32 %v613_v42, 16 }
  0x51   : > { %7176 = vmatmul.mubr.bf16.gmra.mrb[4].mxu0 %v6411_v9  ;;  %v663_v0 = vor.u32 %v662_v55, %v659_v54  ;;  %v684_v9 = vshll.u32 %v608_v63, 16  ;;  %v6360_v54 = vld [vmem:[%s7836_s18 + $0x8c] sm:$0x1]  ;;  %v707_v57 = vrot.slane %v705_v44, 4  ;;  %v720_v63 = vrot.slane %v718_v51, 4 }
  0x52   : > { %7179 = vmatprep.mubr.bf16.mxu0 %v6412_v13  ;;  %7208 = vmatpush3.bf16.msra.mxu0 %v7675_v12  ;;  %v673_v7 = vor.u32 %v672_v61, %v668_v60  ;;  %v6386_v5 = vrot.slane %v6358_v48, 9  ;;  %v6365_v51 = vld [vmem:[%s7836_s18 + $0xa0] sm:$0xf] }
  0x53   : > { %7209 = vmatprep.subr.bf16.mxu0 %v7679_v31  ;;  %v664_v12 = vrot.slane %v663_v0, 4  ;;  %v686_v19 = vrot.slane %v684_v9, 5  ;;  %v726_v0 = vrot.slane %v724_v52, 5 }
  0x54   : > { %v674_v16 = vrot.slane %v673_v7, 4  ;;  %v3463_v7 = vrot.slane %v6360_v54, 5 }
  0x55   : > { %v669_v22 = vsel %vm7859_vm2, %v664_v12, %v668_v60  ;;  %v687_v28 = vor.u32 %v686_v19, %v683_v18  ;;  %v615_v60 = vld [vmem:[%s7836_s18 + $0x28] sm:$0xf]  ;;  %v7684_v12 = vld [vmem:[%s8942_s1 + $0x90] sm:$0xff]   ;;  %v8124_v18 = vld [vmem:[%s8942_s1 + $0x1c0] sm:$0xff]  }
  0x56   : > { %6956 = vmatmul.mubr.bf16.gmra.mrb[24].mxu1 %v7673_v3  ;;  %7210 = vmatpush3.bf16.msra.mxu0 %v7679_v31  ;;  %v3449_v3 = vrot.slane %v6354_v56, 5  ;;  %v679_v27 = vsel %vm7859_vm2, %v674_v16, %v678_v62  ;;  %v3453_v31 = vrot.slane %v6356_v26, 5  ;;  %v716_v62 = vrot.slane %v714_v46, 5 }
  0x57   : > { %6959 = vmatprep.mubr.bf16.mxu1 %v7676_v15  ;;  %7211 = vmatprep.subr.bf16.mxu0 %v7681_v58  ;;  %v700_v15 = vshll.u32 %v610_v6, 16  ;;  %v6088_v32 = vcombine.low %v669_v22, %v679_v27  ;;  %v3460_v6 = vrot.slane %v6359_v53, 5  ;;  %v742_v16 = vshrl.u32 %v615_v60, 16  ;;  %v6363_v27 = vld [vmem:[%s7836_s18 + $0x98] sm:$0x1] }
  0x58   : > { %v3450_v13 = vsel %vm7959_vm5, %v3448_v2, %v3449_v3  ;;  %v3454_v39 = vsel %vm7959_vm5, %v6385_v30, %v3453_v31  ;;  %v3455_v40 = vrot.slane %v3453_v31, 4  ;;  %v7682_v2 = vld [vmem:[%s8942_s1 + $0x88] sm:$0xff]   ;;  %v721_v8 = vor.u32 %v720_v63, %v716_v62 }
  0x59   : > { %7180 = vmatmul.mubr.bf16.gmra.mrb[8].mxu0 %v6413_v37  ;;  %v6416_v17 = vcombine.low %v3447_v1, %v3450_v13  ;;  %v702_v25 = vrot.slane %v700_v15, 5  ;;  %v7687_v37 = vld [vmem:[%s8942_s1 + $0x1b8] sm:$0xff]   ;;  %v616_v1 = vld [vmem:[%s7836_s18 + $0x2c] sm:$0x1]  ;;  %v3461_v14 = vsel %vm7959_vm5, %v6386_v5, %v3460_v6  ;;  %v3462_v15 = vrot.slane %v3460_v6, 4  ;;  %v7689_v5 = vld [vmem:[%s8942_s1 + $0xa0] sm:$0xff]  }
  0x5a   : > { %7183 = vmatprep.mubr.bf16.mxu0 %v6414_v38  ;;  %7212 = vmatpush3.bf16.msra.mxu0 %v7681_v58  ;;  %v688_v38 = vrot.slane %v687_v28, 4  ;;  %v3457_v50 = vsel %vm7959_vm5, %v3455_v40, %v3456_v35  ;;  %v710_v58 = vrot.slane %v708_v45, 5  ;;  %v722_v19 = vrot.slane %v721_v8, 4  ;;  %v619_v40 = vld [vmem:[%s7836_s18 + $0x38] sm:$0x1] }
  0x5b   : > { %7213 = vmatprep.subr.bf16.mxu0 %v7683_v11  ;;  %v6417_v56 = vcombine.low %v3454_v39, %v3457_v50  ;;  %v748_v26 = vshll.u32 %v616_v1, 16  ;;  %v618_v39 = vld [vmem:[%s7836_s18 + $0x34] sm:$0xf]  ;;  %v3470_v42 = vrot.slane %v6363_v27, 5  ;;  %v6364_v45 = vld [vmem:[%s7836_s18 + $0x9c] sm:$0xe] }
  0x5c   : > { %v693_v49 = vsel %vm7859_vm2, %v688_v38, %v692_v23  ;;  %v711_v3 = vor.u32 %v710_v58, %v707_v57  ;;  %v727_v28 = vsel %vm7859_vm2, %v722_v19, %v726_v0  ;;  %v762_v50 = vshll.u32 %v618_v39, 16 }
  0x5d   : > { %v3474_v8 = vrot.slane %v6365_v51, 5 }
  0x5e   : > { %6960 = vmatmul.mubr.bf16.gmra.mrb[28].mxu1 %v7677_v34  ;;  %v697_v34 = vor.u32 %v696_v24, %v692_v23  ;;  %7214 = vmatpush3.bf16.msra.mxu0 %v7683_v11  ;;  %v738_v11 = vshll.u32 %v615_v60, 16  ;;  %v712_v13 = vrot.slane %v711_v3, 4  ;;  %v3464_v24 = vsel %vm7959_vm5, %v3462_v15, %v3463_v7  ;;  %v622_v3 = vld [vmem:[%s7836_s18 + $0x44] sm:$0x1] }
  0x5f   : > { %7215 = vmatprep.subr.bf16.mxu0 %v7685_v21  ;;  %6979 = vmatprep.mubr.bf16.mxu1 %v6088_v32  ;;  %v6418_v29 = vcombine.low %v3461_v14, %v3464_v24  ;;  %v617_v32 = vld [vmem:[%s7836_s18 + $0x30] sm:$0xf]  ;;  %v772_v60 = vshll.u32 %v619_v40, 16  ;;  %v6388_v7 = vrot.slane %v6364_v45, 9  ;;  %v6367_v14 = vld [vmem:[%s7836_s18 + $0xa8] sm:$0xe] }
  0x60   : > { %v698_v43 = vrot.slane %v697_v34, 4  ;;  %v740_v22 = vrot.slane %v738_v11, 5  ;;  %v717_v23 = vsel %vm7859_vm2, %v712_v13, %v716_v62  ;;  %v7686_v34 = vld [vmem:[%s8942_s1 + $0x98] sm:$0xff]   ;;  %v756_v44 = vshll.u32 %v617_v32, 16  ;;  %v621_v62 = vld [vmem:[%s7836_s18 + $0x40] sm:$0xf] }
  0x61   : > { %7184 = vmatmul.mubr.bf16.gmra.mrb[12].mxu0 %v6415_v59  ;;  %v614_v59 = vld [vmem:[%s7836_s18 + $0x24] sm:$0xf]  ;;  %v6090_v35 = vcombine.low %v717_v23, %v727_v28  ;;  %v774_v6 = vrot.slane %v772_v60, 5  ;;  %v3475_v15 = vsel %vm7959_vm5, %v6388_v7, %v3474_v8  ;;  %v790_v19 = vshrl.u32 %v621_v62, 16  ;;  %v6369_v24 = vld [vmem:[%s7836_s18 + $0xb0] sm:$0x1] }
  0x62   : > { %7187 = vmatprep.mubr.bf16.mxu0 %v6416_v17  ;;  %v703_v55 = vsel %vm7859_vm2, %v698_v43, %v702_v25  ;;  %7216 = vmatpush3.bf16.msra.mxu0 %v7685_v21  ;;  %v729_v9 = vshrl.u32 %v614_v59, 16  ;;  %v732_v10 = vshll.u32 %v614_v59, 16  ;;  %v6361_v17 = vld [vmem:[%s7836_s18 + $0x90] sm:$0xe]  ;;  %v744_v25 = vrot.slane %v742_v16, 4  ;;  %v7701_v7 = vld [vmem:[%s8942_s1 + $0xb8] sm:$0xff]  }
  0x63   : > { %v6089_v61 = vcombine.low %v693_v49, %v703_v55  ;;  %7217 = vmatprep.subr.bf16.mxu0 %v7687_v37  ;;  %v6387_v31 = vrot.slane %v6361_v17, 9  ;;  %v753_v43 = vshrl.u32 %v617_v32, 16  ;;  %v758_v54 = vrot.slane %v756_v44, 5 }
  0x64   : > { %v731_v20 = vrot.slane %v729_v9, 4  ;;  %v734_v21 = vrot.slane %v732_v10, 5  ;;  %v745_v36 = vor.u32 %v744_v25, %v740_v22  ;;  %v766_v55 = vshrl.u32 %v618_v39, 16  ;;  %v7693_v25 = vld [vmem:[%s8942_s1 + $0xa8] sm:$0xff]  }
  0x65   : > { %v755_v53 = vrot.slane %v753_v43, 4  ;;  %v764_v59 = vrot.slane %v762_v50, 5  ;;  %v3476_v16 = vrot.slane %v3474_v8, 4  ;;  %v786_v17 = vshll.u32 %v621_v62, 16 }
  0x66   : > { %6980 = vmatmul.mubr.bf16.vlgmr.msra.gmra.mrb[0].mxu1 %v6089_v61  ;;  %7218 = vmatpush3.bf16.msra.mxu0 %v7687_v37  ;;  %v735_v30 = vor.u32 %v734_v21, %v731_v20  ;;  %v750_v37 = vrot.slane %v748_v26, 5  ;;  %v746_v46 = vrot.slane %v745_v36, 4  ;;  %v620_v61 = vld [vmem:[%s7836_s18 + $0x3c] sm:$0xf]  ;;  %v6368_v20 = vld [vmem:[%s7836_s18 + $0xac] sm:$0xf] }
  0x67   : > { %7012 = vmatpush3.bf16.msra.mxu1 %v8060_v47  ;;  %v6362_v47 = vld [vmem:[%s7836_s18 + $0x94] sm:$0xf]  ;;  %7251 = vmatprep.subr.bf16.mxu0 %v8124_v18  ;;  %v759_v1 = vor.u32 %v758_v54, %v755_v53  ;;  %v780_v13 = vshll.u32 %v620_v61, 16  ;;  %v788_v27 = vrot.slane %v786_v17, 5  ;;  %v792_v28 = vrot.slane %v790_v19, 4 }
  0x68   : > { %7013 = vmatprep.subr.bf16.mxu1 %v7682_v2  ;;  %v3467_v38 = vrot.slane %v6362_v47, 5  ;;  %v736_v41 = vrot.slane %v735_v30, 4  ;;  %6983 = vmatprep.mubr.bf16.mxu1 %v6090_v35  ;;  %v751_v57 = vsel %vm7859_vm2, %v746_v46, %v750_v37  ;;  %v623_v35 = vld [vmem:[%s7836_s18 + $0x48] sm:$0xf]  ;;  %v7697_v36 = vld [vmem:[%s8942_s1 + $0xb0] sm:$0xff]   ;;  %v3481_v40 = vrot.slane %v6368_v20, 5 }
  0x69   : > { %7188 = vmatmul.mubr.bf16.gmra.mrb[16].mxu0 %v6417_v56  ;;  %v6366_v56 = vld [vmem:[%s7836_s18 + $0xa4] sm:$0x1]  ;;  %v760_v10 = vrot.slane %v759_v1, 4  ;;  %v782_v23 = vrot.slane %v780_v13, 5  ;;  %v3484_v44 = vrot.slane %v6369_v24, 5  ;;  %v801_v45 = vshrl.u32 %v623_v35, 16 }
  0x6a   : > { %7191 = vmatprep.mubr.bf16.mxu0 %v6418_v29  ;;  %v3468_v48 = vsel %vm7959_vm5, %v6387_v31, %v3467_v38  ;;  %v3469_v49 = vrot.slane %v3467_v38, 4  ;;  %v741_v52 = vsel %vm7859_vm2, %v736_v41, %v740_v22  ;;  %v3477_v9 = vrot.slane %v6366_v56, 5  ;;  %v624_v41 = vld [vmem:[%s7836_s18 + $0x4c] sm:$0xf]  ;;  %v6371_v53 = vld [vmem:[%s7836_s18 + $0xb8] sm:$0xf] }
  0x6b   : > { %7014 = vmatpush3.bf16.msra.mxu1 %v7682_v2  ;;  %v6091_v63 = vcombine.low %v741_v52, %v751_v57  ;;  %v768_v2 = vrot.slane %v766_v55, 4  ;;  %v765_v21 = vsel %vm7859_vm2, %v760_v10, %v764_v59  ;;  %v796_v29 = vshll.u32 %v622_v3, 16 }
  0x6c   : > { %7015 = vmatprep.subr.bf16.mxu1 %v7684_v12  ;;  %v3471_v58 = vsel %vm7959_vm5, %v3469_v49, %v3470_v42  ;;  %v3478_v26 = vsel %vm7959_vm5, %v3476_v16, %v3477_v9  ;;  %v793_v38 = vor.u32 %v792_v28, %v788_v27  ;;  %v625_v42 = vld [vmem:[%s7836_s18 + $0x50] sm:$0x1]  ;;  %v804_v46 = vshll.u32 %v623_v35, 16  ;;  %v6373_v16 = vld [vmem:[%s7836_s18 + $0xc0] sm:$0xe] }
  0x6d   : > { %v6419_v0 = vcombine.low %v3468_v48, %v3471_v58  ;;  %v769_v11 = vor.u32 %v768_v2, %v764_v59  ;;  %v6420_v31 = vcombine.low %v3475_v15, %v3478_v26  ;;  %v798_v39 = vrot.slane %v796_v29, 5  ;;  %v6370_v48 = vld [vmem:[%s7836_s18 + $0xb4] sm:$0xe]  ;;  %v6372_v58 = vld [vmem:[%s7836_s18 + $0xbc] sm:$0x1] }
  0x6e   : > { %6984 = vmatmul.mubr.bf16.gmra.mrb[4].mxu1 %v6091_v63  ;;  %v794_v49 = vrot.slane %v793_v38, 4  ;;  %v3483_v51 = vrot.slane %v3481_v40, 4  ;;  %v810_v52 = vshll.u32 %v624_v41, 16  ;;  %v803_v55 = vrot.slane %v801_v45, 4  ;;  %v626_v63 = vld [vmem:[%s7836_s18 + $0x54] sm:$0xf] }
  0x6f   : > { %7016 = vmatpush3.bf16.msra.mxu1 %v7684_v12  ;;  %v777_v12 = vshrl.u32 %v620_v61, 16  ;;  %v770_v22 = vrot.slane %v769_v11, 4  ;;  %v806_v56 = vrot.slane %v804_v46, 5  ;;  %v814_v57 = vshrl.u32 %v624_v41, 16  ;;  %v6375_v26 = vld [vmem:[%s7836_s18 + $0xc8] sm:$0x1] }
  0x70   : > { %7017 = vmatprep.subr.bf16.mxu1 %v7686_v34  ;;  %v799_v59 = vsel %vm7859_vm2, %v794_v49, %v798_v39  ;;  %v3485_v60 = vsel %vm7959_vm5, %v3483_v51, %v3484_v44  ;;  %v812_v61 = vrot.slane %v810_v52, 5  ;;  %v820_v62 = vshll.u32 %v625_v42, 16  ;;  %v630_v42 = vld [vmem:[%s7836_s18 + $0x64] sm:$0xf] }
  0x71   : > { %7192 = vmatmul.mubr.bf16.gmra.mrb[20].mxu0 %v6419_v0  ;;  %v779_v47 = vrot.slane %v777_v12, 4  ;;  %v775_v30 = vsel %vm7859_vm2, %v770_v22, %v774_v6  ;;  %v627_v0 = vld [vmem:[%s7836_s18 + $0x58] sm:$0xf]  ;;  %v807_v3 = vor.u32 %v806_v56, %v803_v55  ;;  %v628_v6 = vld [vmem:[%s7836_s18 + $0x5c] sm:$0x1]  ;;  %v6390_v9 = vrot.slane %v6370_v48, 9 }
  0x72   : > { %v6092_v37 = vcombine.low %v765_v21, %v775_v30  ;;  %7195 = vmatprep.mubr.bf16.mxu0 %v6420_v31  ;;  %v822_v8 = vrot.slane %v820_v62, 5  ;;  %v3488_v10 = vrot.slane %v6371_v53, 5  ;;  %v3491_v11 = vrot.slane %v6372_v58, 5  ;;  %v6374_v22 = vld [vmem:[%s7836_s18 + $0xc4] sm:$0xf] }
  0x73   : > { %7018 = vmatpush3.bf16.msra.mxu1 %v7686_v34  ;;  %v783_v32 = vor.u32 %v782_v23, %v779_v47  ;;  %v6389_v34 = vrot.slane %v6367_v14, 9  ;;  %v808_v12 = vrot.slane %v807_v3, 4  ;;  %v825_v14 = vshrl.u32 %v626_v63, 16  ;;  %v632_v58 = vld [vmem:[%s7836_s18 + $0x6c] sm:$0xf] }
  0x74   : > { %7019 = vmatprep.subr.bf16.mxu1 %v7689_v5  ;;  %6987 = vmatprep.mubr.bf16.mxu1 %v6092_v37  ;;  %v828_v15 = vshll.u32 %v626_v63, 16  ;;  %v3489_v17 = vsel %vm7959_vm5, %v6390_v9, %v3488_v10  ;;  %v3490_v19 = vrot.slane %v3488_v10, 4  ;;  %v834_v20 = vshll.u32 %v627_v0, 16  ;;  %v629_v37 = vld [vmem:[%s7836_s18 + $0x60] sm:$0xf] }
  0x75   : > { %v784_v43 = vrot.slane %v783_v32, 4  ;;  %v3482_v50 = vsel %vm7959_vm5, %v6389_v34, %v3481_v40  ;;  %v838_v21 = vshrl.u32 %v627_v0, 16  ;;  %v813_v47 = vsel %vm7859_vm2, %v808_v12, %v812_v61  ;;  %v633_v63 = vld [vmem:[%s7836_s18 + $0x70] sm:$0xf]  ;;  %v634_v0 = vld [vmem:[%s7836_s18 + $0x74] sm:$0x1] }
  0x76   : > { %v6421_v2 = vcombine.low %v3482_v50, %v3485_v60  ;;  %v827_v24 = vrot.slane %v825_v14, 4  ;;  %v3492_v28 = vsel %vm7959_vm5, %v3490_v19, %v3491_v11  ;;  %v836_v29 = vrot.slane %v834_v20, 5 }
  0x77   : > { %7020 = vmatpush3.bf16.msra.mxu1 %v7689_v5  ;;  %v789_v54 = vsel %vm7859_vm2, %v784_v43, %v788_v27  ;;  %v816_v5 = vrot.slane %v814_v57, 4  ;;  %v8205_v27 = vld [vmem:[%s8942_s1 + $0xc0] sm:$0xff]   ;;  %v840_v30 = vrot.slane %v838_v21, 4  ;;  %v844_v31 = vshll.u32 %v628_v6, 16  ;;  %v631_v43 = vld [vmem:[%s7836_s18 + $0x68] sm:$0x1] }
  0x78   : > { %7021 = vmatprep.subr.bf16.mxu1 %v7693_v25  ;;  %v6093_v1 = vcombine.low %v789_v54, %v799_v59  ;;  %v6422_v34 = vcombine.low %v3489_v17, %v3492_v28  ;;  %v3495_v41 = vrot.slane %v6374_v22, 5  ;;  %v3498_v45 = vrot.slane %v6375_v26, 5  ;;  %v7688_v57 = vld [vmem:[%s7836_s18 + $0x18] sm:$0xff]   ;;  %v7690_v22 = vld [vmem:[%s7836_s18 + $0x24] sm:$0xff]   ;;  %v7692_v26 = vld [vmem:[%s7836_s18 + $0x30] sm:$0xff]  }
  0x79   : > { %7196 = vmatmul.mubr.bf16.gmra.mrb[24].mxu0 %v6421_v2  ;;  %v817_v13 = vor.u32 %v816_v5, %v812_v61  ;;  %v841_v39 = vor.u32 %v840_v30, %v836_v29  ;;  %v846_v40 = vrot.slane %v844_v31, 5  ;;  %v849_v46 = vshrl.u32 %v629_v37, 16 }
  0x7a   : > { %6988 = vmatmul.mubr.bf16.gmra.mrb[8].mxu1 %v6093_v1  ;;  %7199 = vmatprep.mubr.bf16.mxu0 %v6422_v34  ;;  %v852_v48 = vshll.u32 %v629_v37, 16  ;;  %v3497_v51 = vrot.slane %v3495_v41, 4  ;;  %v858_v52 = vshll.u32 %v630_v42, 16  ;;  %v862_v56 = vshrl.u32 %v630_v42, 16  ;;  %v638_v37 = vld [vmem:[%s7836_s18 + $0x84] sm:$0xf] }
  0x7b   : > { %7022 = vmatpush3.bf16.msra.mxu1 %v7693_v25  ;;  %v818_v23 = vrot.slane %v817_v13, 4  ;;  %v830_v25 = vrot.slane %v828_v15, 5  ;;  %v842_v49 = vrot.slane %v841_v39, 4  ;;  %v851_v54 = vrot.slane %v849_v46, 4 }
  0x7c   : > { %7023 = vmatprep.subr.bf16.mxu1 %v7697_v36  ;;  %v854_v55 = vrot.slane %v852_v48, 5  ;;  %v3499_v60 = vsel %vm7959_vm5, %v3497_v51, %v3498_v45  ;;  %v860_v61 = vrot.slane %v858_v52, 5  ;;  %v868_v62 = vshll.u32 %v631_v43, 16  ;;  %v639_v43 = vld [vmem:[%s7836_s18 + $0x88] sm:$0xf] }
  0x7d   : > { %v823_v32 = vsel %vm7859_vm2, %v818_v23, %v822_v8  ;;  %v831_v35 = vor.u32 %v830_v25, %v827_v24  ;;  %v847_v59 = vsel %vm7859_vm2, %v842_v49, %v846_v40  ;;  %v864_v5 = vrot.slane %v862_v56, 4  ;;  %v635_v23 = vld [vmem:[%s7836_s18 + $0x78] sm:$0xf]  ;;  %v636_v24 = vld [vmem:[%s7836_s18 + $0x7c] sm:$0xf] }
  0x7e   : > { %v6094_v38 = vcombine.low %v813_v47, %v823_v32  ;;  %v855_v3 = vor.u32 %v854_v55, %v851_v54  ;;  %v870_v6 = vrot.slane %v868_v62, 5  ;;  %v876_v8 = vshll.u32 %v632_v58, 16  ;;  %v637_v25 = vld [vmem:[%s7836_s18 + $0x80] sm:$0x1]  ;;  %v640_v48 = vld [vmem:[%s7836_s18 + $0x8c] sm:$0x1] }
  0x7f   : > { %7024 = vmatpush3.bf16.msra.mxu1 %v7697_v36  ;;  %v6391_v36 = vrot.slane %v6373_v16, 9  ;;  %v832_v44 = vrot.slane %v831_v35, 4  ;;  %v882_v9 = vshll.u32 %v633_v63, 16  ;;  %v865_v11 = vor.u32 %v864_v5, %v860_v61  ;;  %v7699_v54 = vld [vmem:[%s8942_s1 + $0x1d0] sm:$0xff]  }
  0x80   : > { %7025 = vmatprep.subr.bf16.mxu1 %v7701_v7  ;;  %6991 = vmatprep.mubr.bf16.mxu1 %v6094_v38  ;;  %v856_v10 = vrot.slane %v855_v3, 4  ;;  %v886_v12 = vshrl.u32 %v633_v63, 16  ;;  %v892_v13 = vshll.u32 %v634_v0, 16  ;;  %v878_v15 = vrot.slane %v876_v8, 5  ;;  %v7695_v38 = vld [vmem:[%s8942_s1 + $0x1c8] sm:$0xff]   ;;  %v7694_v63 = vld [vmem:[%s7836_s18 + $0x3c] sm:$0xff]  }
  0x81   : > { %v3496_v50 = vsel %vm7959_vm5, %v6391_v36, %v3495_v41  ;;  %v837_v53 = vsel %vm7859_vm2, %v832_v44, %v836_v29  ;;  %v884_v16 = vrot.slane %v882_v9, 5  ;;  %v866_v19 = vrot.slane %v865_v11, 4  ;;  %v7696_v3 = vld [vmem:[%s7836_s18 + $0x48] sm:$0xff]   ;;  %v642_v8 = vld [vmem:[%s7836_s18 + $0x94] sm:$0xf] }
  0x82   : > { %v6095_v1 = vcombine.low %v837_v53, %v847_v59  ;;  %v6423_v2 = vcombine.low %v3496_v50, %v3499_v60  ;;  %v861_v17 = vsel %vm7859_vm2, %v856_v10, %v860_v61  ;;  %v888_v20 = vrot.slane %v886_v12, 4  ;;  %v643_v9 = vld [vmem:[%s7836_s18 + $0x98] sm:$0x1] }
  0x83   : > { %7026 = vmatpush3.bf16.msra.mxu1 %v7701_v7  ;;  %v873_v7 = vshrl.u32 %v632_v58, 16  ;;  %v894_v21 = vrot.slane %v892_v13, 5  ;;  %v871_v28 = vsel %vm7859_vm2, %v866_v19, %v870_v6  ;;  %v897_v30 = vshrl.u32 %v635_v23, 16 }
  0x84   : > { %7059 = vmatprep.subr.bf16.mxu1 %v8205_v27  ;;  %6992 = vmatmul.mubr.bf16.gmra.mrb[12].mxu1 %v6095_v1  ;;  %v889_v29 = vor.u32 %v888_v20, %v884_v16  ;;  %v900_v31 = vshll.u32 %v635_v23, 16  ;;  %v6096_v32 = vcombine.low %v861_v17, %v871_v28  ;;  %v906_v35 = vshll.u32 %v636_v24, 16  ;;  %v644_v20 = vld [vmem:[%s7836_s18 + $0x9c] sm:$0xf] }
  0x85   : > { %7200 = vmatmul.mubr.bf16.gmra.mrb[28].mxu0 %v6423_v2  ;;  %v875_v14 = vrot.slane %v873_v7, 4  ;;  %v910_v36 = vshrl.u32 %v636_v24, 16  ;;  %v899_v40 = vrot.slane %v897_v30, 4  ;;  %v916_v42 = vshll.u32 %v637_v25, 16  ;;  %v641_v2 = vld [vmem:[%s7836_s18 + $0x90] sm:$0xf] }
  0x86   : > { %7219 = vmatprep.mubr.bf16.mxu0 %v7688_v57  ;;  %v890_v39 = vrot.slane %v889_v29, 4  ;;  %v902_v41 = vrot.slane %v900_v31, 5  ;;  %6995 = vmatprep.mubr.bf16.mxu1 %v6096_v32  ;;  %v908_v45 = vrot.slane %v906_v35, 5  ;;  %v921_v49 = vshrl.u32 %v638_v37, 16  ;;  %v645_v24 = vld [vmem:[%s7836_s18 + $0xa0] sm:$0xf] }
  0x87   : > { %v879_v47 = vor.u32 %v878_v15, %v875_v14  ;;  %v912_v46 = vrot.slane %v910_v36, 4  ;;  %v918_v52 = vrot.slane %v916_v42, 5  ;;  %v924_v53 = vshll.u32 %v638_v37, 16  ;;  %v7703_v14 = vld [vmem:[%s8942_s1 + $0x1d8] sm:$0xff]   ;;  %v646_v29 = vld [vmem:[%s7836_s18 + $0xa4] sm:$0x1] }
  0x88   : > { %v895_v50 = vsel %vm7859_vm2, %v890_v39, %v894_v21  ;;  %v903_v51 = vor.u32 %v902_v41, %v899_v40  ;;  %v923_v57 = vrot.slane %v921_v49, 4  ;;  %v930_v58 = vshll.u32 %v639_v43, 16  ;;  %v7707_v36 = vld [vmem:[%s8942_s1 + $0x1e0] sm:$0xff]  }
  0x89   : > { %v880_v34 = vrot.slane %v879_v47, 4  ;;  %v913_v56 = vor.u32 %v912_v46, %v908_v45  ;;  %v926_v60 = vrot.slane %v924_v53, 5  ;;  %v934_v61 = vshrl.u32 %v639_v43, 16  ;;  %v647_v53 = vld [vmem:[%s7836_s18 + $0xa8] sm:$0xf] }
  0x8a   : > { %v904_v59 = vrot.slane %v903_v51, 4  ;;  %v940_v62 = vshll.u32 %v640_v48, 16  ;;  %v932_v1 = vrot.slane %v930_v58, 5  ;;  %v945_v11 = vshrl.u32 %v641_v2, 16  ;;  %v649_v58 = vld [vmem:[%s7836_s18 + $0xb0] sm:$0x1] }
  0x8b   : > { %v885_v44 = vsel %vm7859_vm2, %v880_v34, %v884_v16  ;;  %v914_v0 = vrot.slane %v913_v56, 4  ;;  %v927_v5 = vor.u32 %v926_v60, %v923_v57  ;;  %v936_v6 = vrot.slane %v934_v61, 4 }
  0x8c   : > { %v6097_v55 = vcombine.low %v885_v44, %v895_v50  ;;  %v942_v7 = vrot.slane %v940_v62, 5  ;;  %v948_v12 = vshll.u32 %v641_v2, 16  ;;  %v954_v13 = vshll.u32 %v642_v8, 16  ;;  %v7700_v50 = vld [vmem:[%s7836_s18 + $0x60] sm:$0xff]  }
  0x8d   : > { %7220 = vmatmul.mubr.bf16.vlgmr.msra.gmra.mrb[0].mxu0 %v7690_v22  ;;  %v919_v10 = vsel %vm7859_vm2, %v914_v0, %v918_v52  ;;  %v928_v16 = vrot.slane %v927_v5, 4  ;;  %v937_v17 = vor.u32 %v936_v6, %v932_v1  ;;  %v958_v19 = vshrl.u32 %v642_v8, 16  ;;  %v7711_v0 = vld [vmem:[%s8942_s1 + $0x1e8] sm:$0xff]   ;;  %v650_v5 = vld [vmem:[%s7836_s18 + $0xb4] sm:$0xf] }
  0x8e   : > { %7252 = vmatpush3.bf16.msra.mxu0 %v8124_v18  ;;  %7223 = vmatprep.mubr.bf16.mxu0 %v7692_v26  ;;  %v909_v18 = vsel %vm7859_vm2, %v904_v59, %v908_v45  ;;  %v947_v21 = vrot.slane %v945_v11, 4  ;;  %v950_v22 = vrot.slane %v948_v12, 5  ;;  %v956_v47 = vrot.slane %v954_v13, 5  ;;  %v7698_v45 = vld [vmem:[%s7836_s18 + $0x54] sm:$0xff]  }
  0x8f   : > { %7253 = vmatprep.subr.bf16.mxu0 %v7695_v38  ;;  %6996 = vmatmul.mubr.bf16.gmra.mrb[16].mxu1 %v6097_v55  ;;  %v6098_v15 = vcombine.low %v909_v18, %v919_v10  ;;  %v964_v23 = vshll.u32 %v643_v9, 16  ;;  %v933_v25 = vsel %vm7859_vm2, %v928_v16, %v932_v1  ;;  %v938_v26 = vrot.slane %v937_v17, 4  ;;  %v651_v9 = vld [vmem:[%s7836_s18 + $0xb8] sm:$0xf]  ;;  %v652_v10 = vld [vmem:[%s7836_s18 + $0xbc] sm:$0x1] }
  0x90   : > { %v960_v28 = vrot.slane %v958_v19, 4  ;;  %v969_v30 = vshrl.u32 %v644_v20, 16  ;;  %v951_v31 = vor.u32 %v950_v22, %v947_v21  ;;  %v972_v34 = vshll.u32 %v644_v20, 16 }
  0x91   : > { %6999 = vmatprep.mubr.bf16.mxu1 %v6098_v15  ;;  %v966_v32 = vrot.slane %v964_v23, 5  ;;  %v978_v35 = vshll.u32 %v645_v24, 16  ;;  %v943_v37 = vsel %vm7859_vm2, %v938_v26, %v942_v7  ;;  %v982_v40 = vshrl.u32 %v645_v24, 16  ;;  %v7715_v15 = vld [vmem:[%s8942_s1 + $0x1f0] sm:$0xff]  }
  0x92   : > { %7254 = vmatpush3.bf16.msra.mxu0 %v7695_v38  ;;  %v961_v38 = vor.u32 %v960_v28, %v956_v47  ;;  %v971_v39 = vrot.slane %v969_v30, 4  ;;  %v6099_v41 = vcombine.low %v933_v25, %v943_v37  ;;  %v952_v42 = vrot.slane %v951_v31, 4  ;;  %v7702_v24 = vld [vmem:[%s7836_s18 + $0x6c] sm:$0xff]   ;;  %v1426_v37 = vld [vmem:[%s7836_s18] sm:$0xe] }
  0x93   : > { %7255 = vmatprep.subr.bf16.mxu0 %v7699_v54  ;;  %v974_v43 = vrot.slane %v972_v34, 5  ;;  %v980_v44 = vrot.slane %v978_v35, 5  ;;  %v984_v48 = vrot.slane %v982_v40, 4  ;;  %v988_v49 = vshll.u32 %v646_v29, 16  ;;  %v7704_v29 = vld [vmem:[%s7836_s18 + $0x78] sm:$0xff]  }
  0x94   : > { %v962_v46 = vrot.slane %v961_v38, 4  ;;  %v957_v51 = vsel %vm7859_vm2, %v952_v42, %v956_v47  ;;  %v993_v59 = vshrl.u32 %v647_v53, 16  ;;  %v996_v62 = vshll.u32 %v647_v53, 16  ;;  %v7719_v34 = vld [vmem:[%s8942_s1 + $0x1f8] sm:$0xff]   ;;  %v1427_v38 = vld [vmem:[%s7836_s18 + $0x4] sm:$0xf] }
  0x95   : > { %7224 = vmatmul.mubr.bf16.gmra.mrb[4].mxu0 %v7694_v63  ;;  %v975_v52 = vor.u32 %v974_v43, %v971_v39  ;;  %v985_v56 = vor.u32 %v984_v48, %v980_v44  ;;  %v990_v57 = vrot.slane %v988_v49, 5  ;;  %v1012_v18 = vshll.u32 %v649_v58, 16  ;;  %v1428_v39 = vld [vmem:[%s7836_s18 + $0x8] sm:$0x1]  ;;  %v1429_v48 = vld [vmem:[%s7836_s18 + $0xc] sm:$0xe] }
  0x96   : > { %7227 = vmatprep.mubr.bf16.mxu0 %v7696_v3  ;;  %7256 = vmatpush3.bf16.msra.mxu0 %v7699_v54  ;;  %v648_v54 = vld [vmem:[%s7836_s18 + $0xac] sm:$0xf]  ;;  %v967_v55 = vsel %vm7859_vm2, %v962_v46, %v966_v32  ;;  %v995_v2 = vrot.slane %v993_v59, 4  ;;  %v998_v7 = vrot.slane %v996_v62, 5  ;;  %v1020_v19 = vshll.u32 %v650_v5, 16 }
  0x97   : > { %7257 = vmatprep.subr.bf16.mxu0 %v7703_v14  ;;  %7000 = vmatmul.mubr.bf16.gmra.mrb[20].mxu1 %v6099_v41  ;;  %v6100_v60 = vcombine.low %v957_v51, %v967_v55  ;;  %v976_v61 = vrot.slane %v975_v52, 4  ;;  %v1002_v63 = vshll.u32 %v648_v54, 16  ;;  %v986_v1 = vrot.slane %v985_v56, 4  ;;  %v1430_v49 = vld [vmem:[%s7836_s18 + $0x10] sm:$0xf]  ;;  %v7706_v55 = vld [vmem:[%s7836_s18 + $0x84] sm:$0xff]  }
  0x98   : > { %v1006_v3 = vshrl.u32 %v648_v54, 16  ;;  %v1014_v13 = vrot.slane %v1012_v18, 5  ;;  %v999_v17 = vor.u32 %v998_v7, %v995_v2  ;;  %v1026_v20 = vshll.u32 %v651_v9, 16  ;;  %v1431_v53 = vld [vmem:[%s7836_s18 + $0x14] sm:$0x1]  ;;  %v8315_v56 = vld [vmem:[%s8942_s1 + $0x200] sm:$0xff]  }
  0x99   : > { %7003 = vmatprep.mubr.bf16.mxu1 %v6100_v60  ;;  %v981_v6 = vsel %vm7859_vm2, %v976_v61, %v980_v44  ;;  %v1004_v8 = vrot.slane %v1002_v63, 5  ;;  %v991_v11 = vsel %vm7859_vm2, %v986_v1, %v990_v57  ;;  %v1030_v47 = vshrl.u32 %v651_v9, 16  ;;  %v1432_v1 = vld [vmem:[%s7836_s18 + $0x18] sm:$0xe]  ;;  %v7708_v2 = vld [vmem:[%s7836_s18 + $0x90] sm:$0xff]  }
  0x9a   : > { %7258 = vmatpush3.bf16.msra.mxu0 %v7703_v14  ;;  %v1008_v12 = vrot.slane %v1006_v3, 4  ;;  %v1017_v14 = vshrl.u32 %v650_v5, 16  ;;  %v6101_v16 = vcombine.low %v981_v6, %v991_v11  ;;  %v1036_v23 = vshll.u32 %v652_v10, 16  ;;  %v1433_v3 = vld [vmem:[%s7836_s18 + $0x1c] sm:$0xf] }
  0x9b   : > { %7259 = vmatprep.subr.bf16.mxu0 %v7707_v36  ;;  %v1000_v25 = vrot.slane %v999_v17, 4  ;;  %v1022_v26 = vrot.slane %v1020_v19, 5  ;;  %v1028_v28 = vrot.slane %v1026_v20, 5  ;;  %v1032_v31 = vrot.slane %v1030_v47, 4  ;;  %v1434_v18 = vld [vmem:[%s7836_s18 + $0x20] sm:$0x1] }
  0x9c   : > { %v1009_v21 = vor.u32 %v1008_v12, %v1004_v8  ;;  %v1019_v22 = vrot.slane %v1017_v14, 4  ;;  %v1038_v32 = vrot.slane %v1036_v23, 5  ;;  %v6112_v42 = vrot.slane %v1426_v37, 9  ;;  %v1435_v10 = vld [vmem:[%s7836_s18 + $0x24] sm:$0xe]  ;;  %v7710_v47 = vld [vmem:[%s7836_s18 + $0x9c] sm:$0xff]  }
  0x9d   : > { %7228 = vmatmul.mubr.bf16.gmra.mrb[8].mxu0 %v7698_v45  ;;  %v1005_v35 = vsel %vm7859_vm2, %v1000_v25, %v1004_v8  ;;  %v1033_v41 = vor.u32 %v1032_v31, %v1028_v28  ;;  %v1527_v43 = vrot.slane %v1427_v38, 5  ;;  %v1530_v46 = vrot.slane %v1428_v39, 5  ;;  %v1436_v11 = vld [vmem:[%s7836_s18 + $0x28] sm:$0xf]  ;;  %v1437_v12 = vld [vmem:[%s7836_s18 + $0x2c] sm:$0x1] }
  0x9e   : > { %7231 = vmatprep.mubr.bf16.mxu0 %v7700_v50  ;;  %7260 = vmatpush3.bf16.msra.mxu0 %v7707_v36  ;;  %v1010_v30 = vrot.slane %v1009_v21, 4  ;;  %v1023_v36 = vor.u32 %v1022_v26, %v1019_v22  ;;  %v6113_v54 = vrot.slane %v1429_v48, 9  ;;  %v1534_v58 = vrot.slane %v1430_v49, 5  ;;  %v7709_v22 = vld [vmem:[%s8942_s1 + $0xc8] sm:$0xff]   ;;  %v1439_v25 = vld [vmem:[%s7836_s18 + $0x34] sm:$0xf] }
  0x9f   : > { %7261 = vmatprep.subr.bf16.mxu0 %v7711_v0  ;;  %7004 = vmatmul.mubr.bf16.gmra.mrb[24].mxu1 %v6101_v16  ;;  %v1034_v50 = vrot.slane %v1033_v41, 4  ;;  %v1528_v51 = vsel %vm7959_vm5, %v6112_v42, %v1527_v43  ;;  %v1529_v52 = vrot.slane %v1527_v43, 4  ;;  %v1537_v59 = vrot.slane %v1431_v53, 5  ;;  %v1440_v26 = vld [vmem:[%s7836_s18 + $0x38] sm:$0x1]  ;;  %v7712_v31 = vld [vmem:[%s7836_s18 + $0xa8] sm:$0xff]  }
  0xa0   : > { %v1015_v40 = vsel %vm7859_vm2, %v1010_v30, %v1014_v13  ;;  %v1024_v45 = vrot.slane %v1023_v36, 4  ;;  %v6114_v5 = vrot.slane %v1432_v1, 9  ;;  %v1541_v6 = vrot.slane %v1433_v3, 5  ;;  %v1443_v36 = vld [vmem:[%s7836_s18 + $0x44] sm:$0x1]  ;;  %v7714_v48 = vld [vmem:[%s7836_s18 + $0xb4] sm:$0xff]  }
  0xa1   : > { %v6102_v44 = vcombine.low %v1005_v35, %v1015_v40  ;;  %v1039_v60 = vsel %vm7859_vm2, %v1034_v50, %v1038_v32  ;;  %v1531_v61 = vsel %vm7959_vm5, %v1529_v52, %v1530_v46  ;;  %v1544_v7 = vrot.slane %v1434_v18, 5  ;;  %v1441_v32 = vld [vmem:[%s7836_s18 + $0x3c] sm:$0xe]  ;;  %v1442_v35 = vld [vmem:[%s7836_s18 + $0x40] sm:$0xf]  ;;  %v7713_v40 = vld [vmem:[%s8942_s1 + $0xd0] sm:$0xff]  }
  0xa2   : > { %7262 = vmatpush3.bf16.msra.mxu0 %v7711_v0  ;;  %v1029_v57 = vsel %vm7859_vm2, %v1024_v45, %v1028_v28  ;;  %v6144_v63 = vcombine.low %v1528_v51, %v1531_v61  ;;  %v1536_v0 = vrot.slane %v1534_v58, 4  ;;  %v1535_v8 = vsel %vm7959_vm5, %v6113_v54, %v1534_v58  ;;  %v1445_v49 = vld [vmem:[%s7836_s18 + $0x4c] sm:$0xf]  ;;  %v1446_v50 = vld [vmem:[%s7836_s18 + $0x50] sm:$0x1]  ;;  %v7717_v52 = vld [vmem:[%s8942_s1 + $0xd8] sm:$0xff]  }
  0xa3   : > { %7263 = vmatprep.subr.bf16.mxu0 %v7715_v15  ;;  %7007 = vmatprep.mubr.bf16.mxu1 %v6102_v44  ;;  %v6103_v62 = vcombine.low %v1029_v57, %v1039_v60  ;;  %v1542_v13 = vsel %vm7959_vm5, %v6114_v5, %v1541_v6  ;;  %v1543_v14 = vrot.slane %v1541_v6, 4  ;;  %v6115_v16 = vrot.slane %v1435_v10, 9  ;;  %v1444_v44 = vld [vmem:[%s7836_s18 + $0x48] sm:$0xe]  ;;  %v1447_v57 = vld [vmem:[%s7836_s18 + $0x54] sm:$0xe] }
  0xa4   : > { %v1538_v9 = vsel %vm7959_vm5, %v1536_v0, %v1537_v59  ;;  %v1551_v21 = vrot.slane %v1437_v12, 5  ;;  %v1558_v30 = vrot.slane %v1440_v26, 5  ;;  %v1562_v39 = vrot.slane %v1442_v35, 5  ;;  %v1448_v58 = vld [vmem:[%s7836_s18 + $0x58] sm:$0xf]  ;;  %v7716_v61 = vld [vmem:[%s7836_s18 + $0xc0] sm:$0xff]  }
  0xa5   : > { %7232 = vmatmul.mubr.bf16.gmra.mrb[12].mxu0 %v7702_v24  ;;  %v6145_v17 = vcombine.low %v1535_v8, %v1538_v9  ;;  %v1545_v19 = vsel %vm7959_vm5, %v1543_v14, %v1544_v7  ;;  %v1438_v24 = vld [vmem:[%s7836_s18 + $0x30] sm:$0xe]  ;;  %v6117_v42 = vrot.slane %v1441_v32, 9  ;;  %v1565_v43 = vrot.slane %v1443_v36, 5  ;;  %v1449_v59 = vld [vmem:[%s7836_s18 + $0x5c] sm:$0x1] }
  0xa6   : > { %7235 = vmatprep.mubr.bf16.mxu0 %v7704_v29  ;;  %7264 = vmatpush3.bf16.msra.mxu0 %v7715_v15  ;;  %v1548_v15 = vrot.slane %v1436_v11, 5  ;;  %v6146_v23 = vcombine.low %v1542_v13, %v1545_v19  ;;  %v6116_v28 = vrot.slane %v1438_v24, 9  ;;  %v1555_v29 = vrot.slane %v1439_v25, 5  ;;  %v7720_v6 = vld [vmem:[%s8942_s1 + $0xe0] sm:$0xff]   ;;  %v1452_v11 = vld [vmem:[%s7836_s18 + $0x68] sm:$0x1] }
  0xa7   : > { %7265 = vmatprep.subr.bf16.mxu0 %v7719_v34  ;;  %7008 = vmatmul.mubr.bf16.gmra.mrb[28].mxu1 %v6103_v62  ;;  %v1564_v46 = vrot.slane %v1562_v39, 4  ;;  %v6118_v51 = vrot.slane %v1444_v44, 9  ;;  %v1569_v54 = vrot.slane %v1445_v49, 5  ;;  %v6119_v62 = vrot.slane %v1447_v57, 9  ;;  %v1450_v7 = vld [vmem:[%s7836_s18 + $0x60] sm:$0xe] }
  0xa8   : > { %7027 = vmatprep.mubr.bf16.mxu1 %v6144_v63  ;;  %v1550_v20 = vrot.slane %v1548_v15, 4  ;;  %v1549_v37 = vsel %vm7959_vm5, %v6115_v16, %v1548_v15  ;;  %v1576_v63 = vrot.slane %v1448_v58, 5  ;;  %v1563_v0 = vsel %vm7959_vm5, %v6117_v42, %v1562_v39  ;;  %v1451_v8 = vld [vmem:[%s7836_s18 + $0x64] sm:$0xf]  ;;  %v6504_v13 = vld [vmem:[%s7836_s18 + $0x18] sm:$0xf] }
  0xa9   : > { %v1571_v60 = vrot.slane %v1569_v54, 4  ;;  %v1566_v1 = vsel %vm7959_vm5, %v1564_v46, %v1565_v43  ;;  %v1570_v3 = vsel %vm7959_vm5, %v6118_v51, %v1569_v54  ;;  %v1583_v12 = vrot.slane %v1451_v8, 5  ;;  %v7718_v16 = vld [vmem:[%s7836_s18 + $0xcc] sm:$0xff]   ;;  %v6505_v19 = vld [vmem:[%s7836_s18 + $0x1c] sm:$0xf] }
  0xaa   : > { %7266 = vmatpush3.bf16.msra.mxu0 %v7719_v34  ;;  %v1557_v34 = vrot.slane %v1555_v29, 4  ;;  %v1552_v38 = vsel %vm7959_vm5, %v1550_v20, %v1551_v21  ;;  %v1578_v5 = vrot.slane %v1576_v63, 4  ;;  %v6149_v9 = vcombine.low %v1563_v0, %v1566_v1  ;;  %v6506_v20 = vld [vmem:[%s7836_s18 + $0x20] sm:$0x1]  ;;  %v1453_v26 = vld [vmem:[%s7836_s18 + $0x6c] sm:$0xe] }
  0xab   : > { %7299 = vmatprep.subr.bf16.mxu0 %v8315_v56  ;;  %v6147_v45 = vcombine.low %v1549_v37, %v1552_v38  ;;  %v8388_v10 = vsel %vm7959_vm5, %v6119_v62, %v1576_v63  ;;  %v4386_v21 = vshrl.u32 %v6504_v13, 16  ;;  %v4389_v24 = vshll.u32 %v6504_v13, 16  ;;  %v1455_v36 = vld [vmem:[%s7836_s18 + $0x74] sm:$0x1]  ;;  %v6507_v46 = vld [vmem:[%s7836_s18 + $0x24] sm:$0xf] }
  0xac   : > { %v1559_v41 = vsel %vm7959_vm5, %v1557_v34, %v1558_v30  ;;  %v4395_v25 = vshll.u32 %v6505_v19, 16  ;;  %v4405_v30 = vshll.u32 %v6506_v20, 16  ;;  %v6121_v32 = vrot.slane %v1453_v26, 9  ;;  %v6509_v51 = vld [vmem:[%s7836_s18 + $0x2c] sm:$0x1] }
  0xad   : > { %7236 = vmatmul.mubr.bf16.gmra.mrb[16].mxu0 %v7706_v55  ;;  %v1572_v55 = vrot.slane %v1446_v50, 5  ;;  %v4391_v34 = vrot.slane %v4389_v24, 5  ;;  %v6508_v50 = vld [vmem:[%s7836_s18 + $0x28] sm:$0xf]  ;;  %v1458_v8 = vld [vmem:[%s7836_s18 + $0x80] sm:$0x1] }
  0xae   : > { %7239 = vmatprep.mubr.bf16.mxu0 %v7708_v2  ;;  %v1579_v2 = vrot.slane %v1449_v59, 5  ;;  %v4397_v35 = vrot.slane %v4395_v25, 5  ;;  %v4407_v44 = vrot.slane %v4405_v30, 5  ;;  %v4419_v57 = vshll.u32 %v6508_v50, 16  ;;  %v6512_v20 = vld [vmem:[%s7836_s18 + $0x38] sm:$0x1] }
  0xaf   : > { %7028 = vmatmul.mubr.bf16.vlgmr.msra.gmra.mrb[0].mxu1 %v6145_v17  ;;  %v1573_v18 = vsel %vm7959_vm5, %v1571_v60, %v1572_v55  ;;  %v6120_v17 = vrot.slane %v1450_v7, 9  ;;  %v4423_v58 = vshrl.u32 %v6508_v50, 16  ;;  %v1457_v7 = vld [vmem:[%s7836_s18 + $0x7c] sm:$0xf]  ;;  %v1459_v26 = vld [vmem:[%s7836_s18 + $0x84] sm:$0xe] }
  0xb0   : > { %7060 = vmatpush3.bf16.msra.mxu1 %v8205_v27  ;;  %7031 = vmatprep.mubr.bf16.mxu1 %v6146_v23  ;;  %v1556_v27 = vsel %vm7959_vm5, %v6116_v28, %v1555_v29  ;;  %v6150_v14 = vcombine.low %v1570_v3, %v1573_v18  ;;  %v8394_v15 = vsel %vm7959_vm5, %v1578_v5, %v1579_v2  ;;  %v1586_v23 = vrot.slane %v1452_v11, 5  ;;  %v1456_v3 = vld [vmem:[%s7836_s18 + $0x78] sm:$0xe] }
  0xb1   : > { %7061 = vmatprep.subr.bf16.mxu1 %v7709_v22  ;;  %v6148_v53 = vcombine.low %v1556_v27, %v1559_v41  ;;  %v4388_v28 = vrot.slane %v4386_v21, 4  ;;  %v4399_v29 = vshrl.u32 %v6505_v19, 16  ;;  %v6151_v38 = vcombine.low %v8388_v10, %v8394_v15  ;;  %v7724_v41 = vld [vmem:[%s8942_s1 + $0xf0] sm:$0xff]   ;;  %v7726_v10 = vld [vmem:[%s8942_s1 + $0xf8] sm:$0xff]  }
  0xb2   : > { %v1584_v39 = vsel %vm7959_vm5, %v6120_v17, %v1583_v12  ;;  %v1593_v27 = vrot.slane %v1455_v36, 5  ;;  %v4421_v0 = vrot.slane %v4419_v57, 5  ;;  %v4425_v1 = vrot.slane %v4423_v58, 4  ;;  %v6510_v15 = vld [vmem:[%s7836_s18 + $0x30] sm:$0xf] }
  0xb3   : > { %v4392_v43 = vor.u32 %v4391_v34, %v4388_v28  ;;  %v4429_v2 = vshll.u32 %v6509_v51, 16  ;;  %v1600_v19 = vrot.slane %v1458_v8, 5  ;;  %v4434_v21 = vshrl.u32 %v6510_v15, 16 }
  0xb4   : > { %7062 = vmatpush3.bf16.msra.mxu1 %v7709_v22  ;;  %v7722_v22 = vld [vmem:[%s8942_s1 + $0xe8] sm:$0xff]  }
  0xb5   : > { %7240 = vmatmul.mubr.bf16.gmra.mrb[20].mxu0 %v7710_v47  ;;  %7063 = vmatprep.subr.bf16.mxu1 %v7713_v40  ;;  %v1585_v47 = vrot.slane %v1583_v12, 4  ;;  %v4393_v54 = vrot.slane %v4392_v43, 4  ;;  %v4426_v12 = vor.u32 %v4425_v1, %v4421_v0  ;;  %v4431_v13 = vrot.slane %v4429_v2, 5  ;;  %v6513_v43 = vld [vmem:[%s7836_s18 + $0x3c] sm:$0xf] }
  0xb6   : > { %7243 = vmatprep.mubr.bf16.mxu0 %v7712_v31  ;;  %v1454_v31 = vld [vmem:[%s7836_s18 + $0x70] sm:$0xf] }
  0xb7   : > { %7032 = vmatmul.mubr.bf16.gmra.mrb[4].mxu1 %v6147_v45  ;;  %v1590_v37 = vrot.slane %v1454_v31, 5  ;;  %v1587_v42 = vsel %vm7959_vm5, %v1585_v47, %v1586_v23  ;;  %v4398_v63 = vsel %vm7859_vm2, %v4393_v54, %v4397_v35  ;;  %v4427_v47 = vrot.slane %v4426_v12, 4  ;;  %v7727_v12 = vld [vmem:[%s8942_s1 + $0x218] sm:$0xff]  }
  0xb8   : > { %7035 = vmatprep.mubr.bf16.mxu1 %v6148_v53  ;;  %7064 = vmatpush3.bf16.msra.mxu1 %v7713_v40  ;;  %v4401_v40 = vrot.slane %v4399_v29, 4  ;;  %v4413_v53 = vshll.u32 %v6507_v46, 16  ;;  %v6152_v59 = vcombine.low %v1584_v39, %v1587_v42  ;;  %v4436_v29 = vrot.slane %v4434_v21, 4 }
  0xb9   : > { %7065 = vmatprep.subr.bf16.mxu1 %v7717_v52  ;;  %v1592_v45 = vrot.slane %v1590_v37, 4  ;;  %v8417_v49 = vsel %vm7959_vm5, %v6121_v32, %v1590_v37  ;;  %v1460_v32 = vld [vmem:[%s7836_s18 + $0x88] sm:$0xf]  ;;  %v4432_v34 = vsel %vm7859_vm2, %v4427_v47, %v4431_v13  ;;  %v4453_v37 = vshll.u32 %v6512_v20, 16 }
  0xba   : > { %v4415_v62 = vrot.slane %v4413_v53, 5  ;;  %v4458_v53 = vshrl.u32 %v6513_v43, 16  ;;  %v4461_v54 = vshll.u32 %v6513_v43, 16 }
  0xbb   : > { %v8423_v55 = vsel %vm7959_vm5, %v1592_v45, %v1593_v27  ;;  %v6123_v45 = vrot.slane %v1459_v26, 9 }
  0xbc   : > { %7066 = vmatpush3.bf16.msra.mxu1 %v7717_v52  ;;  %v4410_v52 = vshrl.u32 %v6507_v46, 16  ;;  %v6153_v5 = vcombine.low %v8417_v49, %v8423_v55  ;;  %v1604_v46 = vrot.slane %v1460_v32, 5  ;;  %v6514_v49 = vld [vmem:[%s7836_s18 + $0x40] sm:$0xf] }
  0xbd   : > { %7244 = vmatmul.mubr.bf16.gmra.mrb[24].mxu0 %v7714_v48  ;;  %7067 = vmatprep.subr.bf16.mxu1 %v7720_v6  ;;  %v4402_v48 = vor.u32 %v4401_v40, %v4397_v35  ;;  %v4467_v58 = vshll.u32 %v6514_v49, 16 }
  0xbe   : > { %7247 = vmatprep.mubr.bf16.mxu0 %v7716_v61  ;;  %v4412_v61 = vrot.slane %v4410_v52, 4  ;;  %v6515_v52 = vld [vmem:[%s7836_s18 + $0x44] sm:$0x1]  ;;  %v1605_v55 = vsel %vm7959_vm5, %v6123_v45, %v1604_v46  ;;  %v1606_v57 = vrot.slane %v1604_v46, 4 }
  0xbf   : > { %7036 = vmatmul.mubr.bf16.gmra.mrb[8].mxu1 %v6149_v9  ;;  %v4403_v60 = vrot.slane %v4402_v48, 4  ;;  %v6122_v9 = vrot.slane %v1456_v3, 9  ;;  %v4469_v2 = vrot.slane %v4467_v58, 5  ;;  %v7730_v45 = vld [vmem:[%s8942_s1 + $0x220] sm:$0xff]  }
  0xc0   : > { %7039 = vmatprep.mubr.bf16.mxu1 %v6150_v14  ;;  %7068 = vmatpush3.bf16.msra.mxu1 %v7720_v6  ;;  %v4416_v6 = vor.u32 %v4415_v62, %v4412_v61  ;;  %v1597_v14 = vrot.slane %v1457_v7, 5  ;;  %v4460_v62 = vrot.slane %v4458_v53, 4 }
  0xc1   : > { %7069 = vmatprep.subr.bf16.mxu1 %v7722_v22  ;;  %v4408_v18 = vsel %vm7859_vm2, %v4403_v60, %v4407_v44  ;;  %v4455_v44 = vrot.slane %v4453_v37, 5  ;;  %v8463_v60 = vld [vmem:[%s8942_s1 + $0x100] sm:$0xff]  }
  0xc2   : > { %v6568_v11 = vcombine.low %v4398_v63, %v4408_v18  ;;  %v4417_v17 = vrot.slane %v4416_v6, 4  ;;  %v1598_v23 = vsel %vm7959_vm5, %v6122_v9, %v1597_v14  ;;  %v1599_v24 = vrot.slane %v1597_v14, 4  ;;  %v1463_v9 = vld [vmem:[%s7836_s18 + $0x94] sm:$0xf] }
  0xc3   : > { %v4463_v63 = vrot.slane %v4461_v54, 5  ;;  %v4477_v18 = vshll.u32 %v6515_v52, 16  ;;  %v6521_v54 = vld [vmem:[%s7836_s18 + $0x5c] sm:$0x1] }
  0xc4   : > { %7070 = vmatpush3.bf16.msra.mxu1 %v7722_v22  ;;  %v4437_v22 = vshll.u32 %v6510_v15, 16  ;;  %v4422_v28 = vsel %vm7859_vm2, %v4417_v17, %v4421_v0  ;;  %v1601_v35 = vsel %vm7959_vm5, %v1599_v24, %v1600_v19  ;;  %v7725_v0 = vld [vmem:[%s8942_s1 + $0x210] sm:$0xff]   ;;  %v6516_v17 = vld [vmem:[%s7836_s18 + $0x48] sm:$0xf]  ;;  %v6517_v19 = vld [vmem:[%s7836_s18 + $0x4c] sm:$0xf] }
  0xc5   : > { %7248 = vmatmul.mubr.bf16.gmra.mrb[28].mxu0 %v7718_v16  ;;  %7071 = vmatprep.subr.bf16.mxu1 %v7724_v41  ;;  %v6511_v16 = vld [vmem:[%s7836_s18 + $0x34] sm:$0xf]  ;;  %v6569_v39 = vcombine.low %v4422_v28, %v4432_v34  ;;  %v6154_v40 = vcombine.low %v1598_v23, %v1601_v35  ;;  %v4464_v8 = vor.u32 %v4463_v63, %v4460_v62  ;;  %v4479_v15 = vrot.slane %v4477_v18, 5  ;;  %v1466_v35 = vld [vmem:[%s7836_s18 + $0xa0] sm:$0xf] }
  0xc6   : > { %7267 = vmatprep.mubr.bf16.mxu0 %v6568_v11  ;;  %v4443_v25 = vshll.u32 %v6511_v16, 16  ;;  %v4439_v30 = vrot.slane %v4437_v22, 5  ;;  %v4447_v31 = vshrl.u32 %v6511_v16, 16  ;;  %v1611_v16 = vrot.slane %v1463_v9, 5  ;;  %v6518_v22 = vld [vmem:[%s7836_s18 + $0x50] sm:$0x1] }
  0xc7   : > { %7040 = vmatmul.mubr.bf16.gmra.mrb[12].mxu1 %v6151_v38  ;;  %v1461_v38 = vld [vmem:[%s7836_s18 + $0x8c] sm:$0x1]  ;;  %v4465_v20 = vrot.slane %v4464_v8, 4  ;;  %v4482_v47 = vshrl.u32 %v6516_v17, 16  ;;  %v4485_v23 = vshll.u32 %v6516_v17, 16  ;;  %v4491_v28 = vshll.u32 %v6517_v19, 16 }
  0xc8   : > { %7043 = vmatprep.mubr.bf16.mxu1 %v6152_v59  ;;  %7072 = vmatpush3.bf16.msra.mxu1 %v7724_v41  ;;  %v4445_v36 = vrot.slane %v4443_v25, 5  ;;  %v4440_v27 = vor.u32 %v4439_v30, %v4436_v29  ;;  %v4449_v42 = vrot.slane %v4447_v31, 4  ;;  %v7723_v41 = vld [vmem:[%s8942_s1 + $0x208] sm:$0xff]   ;;  %v1607_v48 = vrot.slane %v1461_v38, 5  ;;  %v1465_v29 = vld [vmem:[%s7836_s18 + $0x9c] sm:$0xe] }
  0xc9   : > { %7073 = vmatprep.subr.bf16.mxu1 %v7726_v10  ;;  %v4471_v59 = vshrl.u32 %v6514_v49, 16  ;;  %v1613_v26 = vrot.slane %v1611_v16, 4  ;;  %v4470_v30 = vsel %vm7859_vm2, %v4465_v20, %v4469_v2  ;;  %v4484_v31 = vrot.slane %v4482_v47, 4  ;;  %v6522_v20 = vld [vmem:[%s7836_s18 + $0x60] sm:$0xf] }
  0xca   : > { %v4441_v50 = vrot.slane %v4440_v27, 4  ;;  %v4450_v51 = vor.u32 %v4449_v42, %v4445_v36  ;;  %v1608_v1 = vsel %vm7959_vm5, %v1606_v57, %v1607_v48  ;;  %v4487_v32 = vrot.slane %v4485_v23, 5  ;;  %v6524_v23 = vld [vmem:[%s7836_s18 + $0x68] sm:$0x1] }
  0xcb   : > { %v4473_v3 = vrot.slane %v4471_v59, 4  ;;  %v6155_v7 = vcombine.low %v1605_v55, %v1608_v1  ;;  %v4495_v34 = vshrl.u32 %v6517_v19, 16  ;;  %v4493_v38 = vrot.slane %v4491_v28, 5 }
  0xcc   : > { %7074 = vmatpush3.bf16.msra.mxu1 %v7726_v10  ;;  %v4446_v61 = vsel %vm7859_vm2, %v4441_v50, %v4445_v36  ;;  %v1464_v10 = vld [vmem:[%s7836_s18 + $0x98] sm:$0x1]  ;;  %v4488_v43 = vor.u32 %v4487_v32, %v4484_v31  ;;  %v6125_v48 = vrot.slane %v1465_v29, 9  ;;  %v1618_v49 = vrot.slane %v1466_v35, 5  ;;  %v1471_v31 = vld [vmem:[%s7836_s18 + $0xb4] sm:$0xe] }
  0xcd   : > { %7268 = vmatmul.mubr.bf16.vlgmr.msra.gmra.mrb[0].mxu0 %v6569_v39  ;;  %7347 = vmatprep.subr.bf16.mxu1 %v8463_v60  ;;  %v4474_v14 = vor.u32 %v4473_v3, %v4469_v2  ;;  %v1614_v21 = vrot.slane %v1464_v10, 5  ;;  %v4501_v39 = vshll.u32 %v6518_v22, 16  ;;  %v7733_v2 = vld [vmem:[%s8942_s1 + $0x228] sm:$0xff]  }
  0xce   : > { %7300 = vmatpush3.bf16.msra.mxu0 %v8315_v56  ;;  %v4451_v56 = vrot.slane %v4450_v51, 4  ;;  %v6520_v51 = vld [vmem:[%s7836_s18 + $0x58] sm:$0xf]  ;;  %v4489_v52 = vrot.slane %v4488_v43, 4  ;;  %v1619_v58 = vsel %vm7959_vm5, %v6125_v48, %v1618_v49  ;;  %v1620_v59 = vrot.slane %v1618_v49, 4 }
  0xcf   : > { %7044 = vmatmul.mubr.bf16.gmra.mrb[16].mxu1 %v6153_v5  ;;  %7301 = vmatprep.subr.bf16.mxu0 %v7723_v41  ;;  %v1462_v5 = vld [vmem:[%s7836_s18 + $0x90] sm:$0xe]  ;;  %v4475_v24 = vrot.slane %v4474_v14, 4  ;;  %v1615_v37 = vsel %vm7959_vm5, %v1613_v26, %v1614_v21  ;;  %v4503_v46 = vrot.slane %v4501_v39, 5  ;;  %v6523_v21 = vld [vmem:[%s7836_s18 + $0x64] sm:$0xf] }
  0xd0   : > { %7047 = vmatprep.mubr.bf16.mxu1 %v6154_v40  ;;  %v4456_v6 = vsel %vm7859_vm2, %v4451_v56, %v4455_v44  ;;  %v6124_v11 = vrot.slane %v1462_v5, 9  ;;  %v1467_v40 = vld [vmem:[%s7836_s18 + $0xa4] sm:$0x1]  ;;  %v6519_v44 = vld [vmem:[%s7836_s18 + $0x54] sm:$0xf]  ;;  %v4519_v56 = vshrl.u32 %v6520_v51, 16  ;;  %v4494_v62 = vsel %vm7859_vm2, %v4489_v52, %v4493_v38 }
  0xd1   : > { %v6570_v13 = vcombine.low %v4446_v61, %v4456_v6  ;;  %v4480_v36 = vsel %vm7859_vm2, %v4475_v24, %v4479_v15  ;;  %v1621_v50 = vrot.slane %v1467_v40, 5  ;;  %v4506_v55 = vshrl.u32 %v6519_v44, 16  ;;  %v7736_v14 = vld [vmem:[%s8942_s1 + $0x230] sm:$0xff]   ;;  %v7739_v48 = vld [vmem:[%s8942_s1 + $0x238] sm:$0xff]  }
  0xd2   : > { %7302 = vmatpush3.bf16.msra.mxu0 %v7723_v41  ;;  %v1612_v25 = vsel %vm7959_vm5, %v6124_v11, %v1611_v16  ;;  %v6571_v27 = vcombine.low %v4470_v30, %v4480_v36  ;;  %v4497_v41 = vrot.slane %v4495_v34, 4  ;;  %v4509_v57 = vshll.u32 %v6519_v44, 16  ;;  %v1469_v11 = vld [vmem:[%s7836_s18 + $0xac] sm:$0xf] }
  0xd3   : > { %7303 = vmatprep.subr.bf16.mxu0 %v7725_v0  ;;  %7271 = vmatprep.mubr.bf16.mxu0 %v6570_v13  ;;  %v6156_v42 = vcombine.low %v1612_v25, %v1615_v37  ;;  %v4515_v61 = vshll.u32 %v6520_v51, 16  ;;  %v1622_v3 = vsel %vm7959_vm5, %v1620_v59, %v1621_v50  ;;  %v4521_v5 = vrot.slane %v4519_v56, 4  ;;  %v1472_v37 = vld [vmem:[%s7836_s18 + $0xb8] sm:$0xf] }
  0xd4   : > { %v4498_v53 = vor.u32 %v4497_v41, %v4493_v38  ;;  %v4511_v1 = vrot.slane %v4509_v57, 5  ;;  %v4525_v6 = vshll.u32 %v6521_v54, 16  ;;  %v6157_v9 = vcombine.low %v1619_v58, %v1622_v3  ;;  %v6527_v57 = vld [vmem:[%s7836_s18 + $0x74] sm:$0x1] }
  0xd5   : > { %7272 = vmatmul.mubr.bf16.gmra.mrb[4].mxu0 %v6571_v27  ;;  %v4517_v18 = vrot.slane %v4515_v61, 5  ;;  %v1625_v19 = vrot.slane %v1469_v11, 5  ;;  %v4530_v24 = vshrl.u32 %v6522_v20, 16  ;;  %v4533_v25 = vshll.u32 %v6522_v20, 16 }
  0xd6   : > { %7304 = vmatpush3.bf16.msra.mxu0 %v7725_v0  ;;  %v4499_v63 = vrot.slane %v4498_v53, 4  ;;  %v4508_v0 = vrot.slane %v4506_v55, 4  ;;  %v4527_v17 = vrot.slane %v4525_v6, 5  ;;  %v4539_v30 = vshll.u32 %v6523_v21, 16  ;;  %v6526_v53 = vld [vmem:[%s7836_s18 + $0x70] sm:$0xf] }
  0xd7   : > { %7048 = vmatmul.mubr.bf16.gmra.mrb[20].mxu1 %v6155_v7  ;;  %7305 = vmatprep.subr.bf16.mxu0 %v7727_v12  ;;  %v1468_v7 = vld [vmem:[%s7836_s18 + $0xa8] sm:$0xe]  ;;  %v4522_v16 = vor.u32 %v4521_v5, %v4517_v18  ;;  %v1627_v29 = vrot.slane %v1625_v19, 4  ;;  %v4532_v34 = vrot.slane %v4530_v24, 4  ;;  %v4535_v35 = vrot.slane %v4533_v25, 5 }
  0xd8   : > { %7051 = vmatprep.mubr.bf16.mxu1 %v6156_v42  ;;  %v4504_v8 = vsel %vm7859_vm2, %v4499_v63, %v4503_v46  ;;  %v4512_v10 = vor.u32 %v4511_v1, %v4508_v0  ;;  %v6126_v13 = vrot.slane %v1468_v7, 9  ;;  %v4543_v36 = vshrl.u32 %v6523_v21, 16  ;;  %v1473_v42 = vld [vmem:[%s7836_s18 + $0xbc] sm:$0x1]  ;;  %v6525_v46 = vld [vmem:[%s7836_s18 + $0x6c] sm:$0xf] }
  0xd9   : > { %v6572_v15 = vcombine.low %v4494_v62, %v4504_v8  ;;  %v4523_v26 = vrot.slane %v4522_v16, 4  ;;  %v4541_v40 = vrot.slane %v4539_v30, 5  ;;  %v4549_v27 = vshll.u32 %v6524_v23, 16  ;;  %v7728_v8 = vld [vmem:[%s7836_s18 + $0xc] sm:$0xff]  }
  0xda   : > { %7306 = vmatpush3.bf16.msra.mxu0 %v7727_v12  ;;  %v1470_v12 = vld [vmem:[%s7836_s18 + $0xb0] sm:$0x1]  ;;  %v4513_v22 = vrot.slane %v4512_v10, 4  ;;  %v1626_v28 = vsel %vm7959_vm5, %v6126_v13, %v1625_v19  ;;  %v4536_v44 = vor.u32 %v4535_v35, %v4532_v34  ;;  %v6127_v50 = vrot.slane %v1471_v31, 9  ;;  %v6529_v13 = vld [vmem:[%s7836_s18 + $0x7c] sm:$0xf] }
  0xdb   : > { %7307 = vmatprep.subr.bf16.mxu0 %v7730_v45  ;;  %v1628_v47 = vrot.slane %v1470_v12, 5  ;;  %7275 = vmatprep.mubr.bf16.mxu0 %v6572_v15  ;;  %v4528_v38 = vsel %vm7859_vm2, %v4523_v26, %v4527_v17  ;;  %v4551_v49 = vrot.slane %v4549_v27, 5  ;;  %v1632_v51 = vrot.slane %v1472_v37, 5  ;;  %v6528_v12 = vld [vmem:[%s7836_s18 + $0x78] sm:$0xf] }
  0xdc   : > { %v4518_v32 = vsel %vm7859_vm2, %v4513_v22, %v4517_v18  ;;  %v1635_v52 = vrot.slane %v1473_v42, 5  ;;  %v4537_v54 = vrot.slane %v4536_v44, 4  ;;  %v4554_v58 = vshrl.u32 %v6525_v46, 16  ;;  %v6530_v17 = vld [vmem:[%s7836_s18 + $0x80] sm:$0x1] }
  0xdd   : > { %v1629_v39 = vsel %vm7959_vm5, %v1627_v29, %v1628_v47  ;;  %v6573_v43 = vcombine.low %v4518_v32, %v4528_v38  ;;  %v4557_v59 = vshll.u32 %v6525_v46, 16  ;;  %v1633_v61 = vsel %vm7959_vm5, %v6127_v50, %v1632_v51  ;;  %v6531_v26 = vld [vmem:[%s7836_s18 + $0x84] sm:$0xf]  ;;  %v6532_v32 = vld [vmem:[%s7836_s18 + $0x88] sm:$0xf] }
  0xde   : > { %7308 = vmatpush3.bf16.msra.mxu0 %v7730_v45  ;;  %v6158_v41 = vcombine.low %v1626_v28, %v1629_v39  ;;  %v4545_v45 = vrot.slane %v4543_v36, 4  ;;  %v1634_v56 = vrot.slane %v1632_v51, 4  ;;  %v4563_v62 = vshll.u32 %v6526_v53, 16  ;;  %v7729_v36 = vld [vmem:[%s7836_s18 + $0x18] sm:$0xff]   ;;  %v6533_v37 = vld [vmem:[%s7836_s18 + $0x8c] sm:$0x1] }
  0xdf   : > { %7052 = vmatmul.mubr.bf16.gmra.mrb[24].mxu1 %v6157_v9  ;;  %7309 = vmatprep.subr.bf16.mxu0 %v7733_v2  ;;  %v4567_v63 = vshrl.u32 %v6526_v53, 16  ;;  %v4542_v0 = vsel %vm7859_vm2, %v4537_v54, %v4541_v40  ;;  %v4559_v3 = vrot.slane %v4557_v59, 5  ;;  %v4573_v7 = vshll.u32 %v6527_v57, 16  ;;  %v6535_v57 = vld [vmem:[%s7836_s18 + $0x94] sm:$0xf] }
  0xe0   : > { %7276 = vmatmul.mubr.bf16.gmra.mrb[8].mxu0 %v6573_v43  ;;  %7055 = vmatprep.mubr.bf16.mxu1 %v6158_v41  ;;  %v4546_v55 = vor.u32 %v4545_v45, %v4541_v40  ;;  %v1636_v18 = vsel %vm7959_vm5, %v1634_v56, %v1635_v52  ;;  %v4565_v5 = vrot.slane %v4563_v62, 5  ;;  %v4578_v19 = vshrl.u32 %v6528_v12, 16  ;;  %v7731_v41 = vld [vmem:[%s7836_s18 + $0x24] sm:$0xff]  }
  0xe1   : > { %v4569_v6 = vrot.slane %v4567_v63, 4  ;;  %v6159_v10 = vcombine.low %v1633_v61, %v1636_v18  ;;  %v4575_v16 = vrot.slane %v4573_v7, 5  ;;  %v4581_v21 = vshll.u32 %v6528_v12, 16  ;;  %v6536_v61 = vld [vmem:[%s7836_s18 + $0x98] sm:$0x1] }
  0xe2   : > { %7310 = vmatpush3.bf16.msra.mxu0 %v7733_v2  ;;  %v4547_v1 = vrot.slane %v4546_v55, 4  ;;  %v4556_v2 = vrot.slane %v4554_v58, 4  ;;  %v4587_v22 = vshll.u32 %v6529_v13, 16  ;;  %v4591_v47 = vshrl.u32 %v6529_v13, 16  ;;  %v6534_v55 = vld [vmem:[%s7836_s18 + $0x90] sm:$0xf] }
  0xe3   : > { %7311 = vmatprep.subr.bf16.mxu0 %v7736_v14  ;;  %v4570_v15 = vor.u32 %v4569_v6, %v4565_v5  ;;  %v4580_v24 = vrot.slane %v4578_v19, 4  ;;  %v4597_v25 = vshll.u32 %v6530_v17, 16  ;;  %v4583_v29 = vrot.slane %v4581_v21, 5  ;;  %v6539_v12 = vld [vmem:[%s7836_s18 + $0xa4] sm:$0x1]  ;;  %v7732_v17 = vld [vmem:[%s7836_s18 + $0x30] sm:$0xff]  }
  0xe4   : > { %v4552_v9 = vsel %vm7859_vm2, %v4547_v1, %v4551_v49  ;;  %v4560_v11 = vor.u32 %v4559_v3, %v4556_v2  ;;  %v4589_v30 = vrot.slane %v4587_v22, 5  ;;  %v4593_v31 = vrot.slane %v4591_v47, 4  ;;  %v6537_v3 = vld [vmem:[%s7836_s18 + $0x9c] sm:$0xf] }
  0xe5   : > { %v4571_v23 = vrot.slane %v4570_v15, 4  ;;  %v4599_v35 = vrot.slane %v4597_v25, 5  ;;  %v4602_v38 = vshrl.u32 %v6531_v26, 16  ;;  %v4605_v39 = vshll.u32 %v6531_v26, 16 }
  0xe6   : > { %7312 = vmatpush3.bf16.msra.mxu0 %v7736_v14  ;;  %v6574_v14 = vcombine.low %v4542_v0, %v4552_v9  ;;  %v4561_v20 = vrot.slane %v4560_v11, 4  ;;  %v4584_v27 = vor.u32 %v4583_v29, %v4580_v24  ;;  %v4594_v42 = vor.u32 %v4593_v31, %v4589_v30  ;;  %v6538_v9 = vld [vmem:[%s7836_s18 + $0xa0] sm:$0xf]  ;;  %v7750_v29 = vld [vmem:[%s8942_s1 + $0x110] sm:$0xff]  }
  0xe7   : > { %7313 = vmatprep.subr.bf16.mxu0 %v7739_v48  ;;  %7056 = vmatmul.mubr.bf16.gmra.mrb[28].mxu1 %v6159_v10  ;;  %v4576_v34 = vsel %vm7859_vm2, %v4571_v23, %v4575_v16  ;;  %v4611_v43 = vshll.u32 %v6532_v32, 16  ;;  %v4604_v44 = vrot.slane %v4602_v38, 4  ;;  %v4607_v45 = vrot.slane %v4605_v39, 5  ;;  %v7734_v23 = vld [vmem:[%s7836_s18 + $0x3c] sm:$0xff]   ;;  %v6541_v38 = vld [vmem:[%s7836_s18 + $0xac] sm:$0xf] }
  0xe8   : > { %7279 = vmatprep.mubr.bf16.mxu0 %v6574_v14  ;;  %7075 = vmatprep.mubr.bf16.mxu1 %v7728_v8  ;;  %v4566_v28 = vsel %vm7859_vm2, %v4561_v20, %v4565_v5  ;;  %v4615_v46 = vshrl.u32 %v6532_v32, 16  ;;  %v4585_v49 = vrot.slane %v4584_v27, 4  ;;  %v4595_v50 = vrot.slane %v4594_v42, 4  ;;  %v7749_v8 = vld [vmem:[%s8942_s1 + $0x108] sm:$0xff]   ;;  %v6542_v39 = vld [vmem:[%s7836_s18 + $0xb0] sm:$0x1] }
  0xe9   : > { %v6575_v40 = vcombine.low %v4566_v28, %v4576_v34  ;;  %v4613_v51 = vrot.slane %v4611_v43, 5  ;;  %v4608_v52 = vor.u32 %v4607_v45, %v4604_v44  ;;  %v4626_v56 = vshrl.u32 %v6534_v55, 16  ;;  %v6540_v34 = vld [vmem:[%s7836_s18 + $0xa8] sm:$0xf] }
  0xea   : > { %7314 = vmatpush3.bf16.msra.mxu0 %v7739_v48  ;;  %v4621_v48 = vshll.u32 %v6533_v37, 16  ;;  %v4617_v53 = vrot.slane %v4615_v46, 4  ;;  %v4590_v58 = vsel %vm7859_vm2, %v4585_v49, %v4589_v30  ;;  %v4600_v59 = vsel %vm7859_vm2, %v4595_v50, %v4599_v35  ;;  %v7735_v49 = vld [vmem:[%s7836_s18 + $0x48] sm:$0xff]   ;;  %v7751_v50 = vld [vmem:[%s8942_s1 + $0x118] sm:$0xff]  }
  0xeb   : > { %7280 = vmatmul.mubr.bf16.gmra.mrb[12].mxu0 %v6575_v40  ;;  %v4629_v62 = vshll.u32 %v6534_v55, 16  ;;  %v6576_v63 = vcombine.low %v4590_v58, %v4600_v59  ;;  %v4609_v0 = vrot.slane %v4608_v52, 4  ;;  %v4635_v2 = vshll.u32 %v6535_v57, 16  ;;  %v6543_v55 = vld [vmem:[%s7836_s18 + $0xb4] sm:$0xf] }
  0xec   : > { %v4623_v54 = vrot.slane %v4621_v48, 5  ;;  %v4618_v1 = vor.u32 %v4617_v53, %v4613_v51  ;;  %v4628_v18 = vrot.slane %v4626_v56, 4  ;;  %v4639_v6 = vshrl.u32 %v6535_v57, 16  ;;  %v7737_v57 = vld [vmem:[%s7836_s18 + $0x54] sm:$0xff]  }
  0xed   : > { %v4631_v5 = vrot.slane %v4629_v62, 5  ;;  %v4645_v7 = vshll.u32 %v6536_v61, 16  ;;  %7283 = vmatprep.mubr.bf16.mxu0 %v6576_v63  ;;  %v4614_v10 = vsel %vm7859_vm2, %v4609_v0, %v4613_v51  ;;  %v4637_v11 = vrot.slane %v4635_v2, 5  ;;  %v6544_v56 = vld [vmem:[%s7836_s18 + $0xb8] sm:$0xf] }
  0xee   : > { %v4650_v13 = vshrl.u32 %v6537_v3, 16  ;;  %v4641_v15 = vrot.slane %v4639_v6, 4  ;;  %v4653_v19 = vshll.u32 %v6537_v3, 16  ;;  %v4659_v22 = vshll.u32 %v6538_v9, 16  ;;  %v6545_v62 = vld [vmem:[%s7836_s18 + $0xbc] sm:$0x1] }
  0xef   : > { %7076 = vmatmul.mubr.bf16.vlgmr.msra.gmra.mrb[0].mxu1 %v7729_v36  ;;  %v4632_v14 = vor.u32 %v4631_v5, %v4628_v18  ;;  %v4647_v16 = vrot.slane %v4645_v7, 5  ;;  %v4663_v47 = vshrl.u32 %v6538_v9, 16  ;;  %v4669_v32 = vshll.u32 %v6539_v12, 16  ;;  %v7752_v7 = vld [vmem:[%s8942_s1 + $0x120] sm:$0xff]  }
  0xf0   : > { %7355 = vmatpush3.bf16.msra.mxu1 %v8463_v60  ;;  %7079 = vmatprep.mubr.bf16.mxu1 %v7731_v41  ;;  %v4619_v60 = vrot.slane %v4618_v1, 4  ;;  %v4652_v21 = vrot.slane %v4650_v13, 4  ;;  %v4642_v26 = vor.u32 %v4641_v15, %v4637_v11  ;;  %v4655_v28 = vrot.slane %v4653_v19, 5  ;;  %v6547_v15 = vld [vmem:[%s7836_s18 + $0xc4] sm:$0xf] }
  0xf1   : > { %7348 = vmatprep.subr.bf16.mxu1 %v7749_v8  ;;  %v4633_v25 = vrot.slane %v4632_v14, 4  ;;  %v4661_v30 = vrot.slane %v4659_v22, 5  ;;  %v4665_v31 = vrot.slane %v4663_v47, 4  ;;  %v4674_v40 = vshrl.u32 %v6540_v34, 16 }
  0xf2   : > { %v4624_v20 = vsel %vm7859_vm2, %v4619_v60, %v4623_v54  ;;  %v4643_v36 = vrot.slane %v4642_v26, 4  ;;  %v4656_v37 = vor.u32 %v4655_v28, %v4652_v21  ;;  %v4671_v42 = vrot.slane %v4669_v32, 5  ;;  %v6548_v21 = vld [vmem:[%s7836_s18 + $0xc8] sm:$0x1]  ;;  %v7738_v26 = vld [vmem:[%s7836_s18 + $0x60] sm:$0xff]  }
  0xf3   : > { %v6577_v24 = vcombine.low %v4614_v10, %v4624_v20  ;;  %v4638_v35 = vsel %vm7859_vm2, %v4633_v25, %v4637_v11  ;;  %v4666_v27 = vor.u32 %v4665_v31, %v4661_v30  ;;  %v4677_v43 = vshll.u32 %v6540_v34, 16  ;;  %v6546_v11 = vld [vmem:[%s7836_s18 + $0xc0] sm:$0xf]  ;;  %v7753_v28 = vld [vmem:[%s8942_s1 + $0x128] sm:$0xff]  }
  0xf4   : > { %7356 = vmatpush3.bf16.msra.mxu1 %v7749_v8  ;;  %v4683_v41 = vshll.u32 %v6541_v38, 16  ;;  %v4648_v44 = vsel %vm7859_vm2, %v4643_v36, %v4647_v16  ;;  %v4657_v45 = vrot.slane %v4656_v37, 4  ;;  %v4676_v46 = vrot.slane %v4674_v40, 4  ;;  %v6549_v34 = vld [vmem:[%s7836_s18 + $0xcc] sm:$0xf] }
  0xf5   : > { %7349 = vmatprep.subr.bf16.mxu1 %v7750_v29  ;;  %7284 = vmatmul.mubr.bf16.gmra.mrb[16].mxu0 %v6577_v24  ;;  %v4687_v48 = vshrl.u32 %v6541_v38, 16  ;;  %v6578_v51 = vcombine.low %v4638_v35, %v4648_v44  ;;  %v4667_v52 = vrot.slane %v4666_v27, 4  ;;  %v4679_v53 = vrot.slane %v4677_v43, 5  ;;  %v6550_v35 = vld [vmem:[%s7836_s18 + $0xd0] sm:$0xf] }
  0xf6   : > { %v4685_v54 = vrot.slane %v4683_v41, 5  ;;  %v4662_v58 = vsel %vm7859_vm2, %v4657_v45, %v4661_v30  ;;  %v4693_v61 = vshll.u32 %v6542_v39, 16  ;;  %v4698_v1 = vshrl.u32 %v6543_v55, 16  ;;  %v7740_v36 = vld [vmem:[%s7836_s18 + $0x6c] sm:$0xff]   ;;  %v6551_v40 = vld [vmem:[%s7836_s18 + $0xd4] sm:$0x1] }
  0xf7   : > { %7080 = vmatmul.mubr.bf16.gmra.mrb[4].mxu1 %v7732_v17  ;;  %v4689_v59 = vrot.slane %v4687_v48, 4  ;;  %7287 = vmatprep.mubr.bf16.mxu0 %v6578_v51  ;;  %v4672_v63 = vsel %vm7859_vm2, %v4667_v52, %v4671_v42  ;;  %v4680_v0 = vor.u32 %v4679_v53, %v4676_v46  ;;  %v4701_v2 = vshll.u32 %v6543_v55, 16 }
  0xf8   : > { %7083 = vmatprep.mubr.bf16.mxu1 %v7734_v23  ;;  %7357 = vmatpush3.bf16.msra.mxu1 %v7750_v29  ;;  %v6579_v3 = vcombine.low %v4662_v58, %v4672_v63  ;;  %v4695_v5 = vrot.slane %v4693_v61, 5  ;;  %v4707_v6 = vshll.u32 %v6544_v56, 16  ;;  %v4700_v9 = vrot.slane %v4698_v1, 4  ;;  %v6592_v61 = vld [vmem:[%s7836_s18 + $0x18] sm:$0xe] }
  0xf9   : > { %7350 = vmatprep.subr.bf16.mxu1 %v7751_v50  ;;  %v4690_v18 = vor.u32 %v4689_v59, %v4685_v54  ;;  %v4681_v8 = vrot.slane %v4680_v0, 4  ;;  %v4703_v10 = vrot.slane %v4701_v2, 5  ;;  %v4711_v60 = vshrl.u32 %v6544_v56, 16  ;;  %v6593_v56 = vld [vmem:[%s7836_s18 + $0x1c] sm:$0xf] }
  0xfa   : > { %v4709_v13 = vrot.slane %v4707_v6, 5  ;;  %v4717_v14 = vshll.u32 %v6545_v62, 16  ;;  %v4722_v16 = vshrl.u32 %v6546_v11, 16  ;;  %v4725_v22 = vshll.u32 %v6546_v11, 16  ;;  %v6594_v0 = vld [vmem:[%s7836_s18 + $0x20] sm:$0x1] }
  0xfb   : > { %v4691_v12 = vrot.slane %v4690_v18, 4  ;;  %v4686_v17 = vsel %vm7859_vm2, %v4681_v8, %v4685_v54  ;;  %v4704_v19 = vor.u32 %v4703_v10, %v4700_v9  ;;  %v4713_v20 = vrot.slane %v4711_v60, 4  ;;  %v7741_v6 = vld [vmem:[%s7836_s18 + $0x78] sm:$0xff]   ;;  %v6595_v60 = vld [vmem:[%s7836_s18 + $0x24] sm:$0xe] }
  0xfc   : > { %7358 = vmatpush3.bf16.msra.mxu1 %v7751_v50  ;;  %v4719_v23 = vrot.slane %v4717_v14, 5  ;;  %v4724_v24 = vrot.slane %v4722_v16, 4  ;;  %v4731_v25 = vshll.u32 %v6547_v15, 16  ;;  %v4727_v32 = vrot.slane %v4725_v22, 5  ;;  %v7754_v50 = vld [vmem:[%s8942_s1 + $0x130] sm:$0xff]   ;;  %v7742_v16 = vld [vmem:[%s7836_s18 + $0x84] sm:$0xff]  }
  0xfd   : > { %7351 = vmatprep.subr.bf16.mxu1 %v7752_v7  ;;  %7288 = vmatmul.mubr.bf16.gmra.mrb[20].mxu0 %v6579_v3  ;;  %v4696_v47 = vsel %vm7859_vm2, %v4691_v12, %v4695_v5  ;;  %v4705_v30 = vrot.slane %v4704_v19, 4  ;;  %v4714_v31 = vor.u32 %v4713_v20, %v4709_v13  ;;  %v4735_v38 = vshrl.u32 %v6547_v15, 16  ;;  %v6596_v11 = vld [vmem:[%s7836_s18 + $0x28] sm:$0xf]  ;;  %v6597_v15 = vld [vmem:[%s7836_s18 + $0x2c] sm:$0x1] }
  0xfe   : > { %v6580_v29 = vcombine.low %v4686_v17, %v4696_v47  ;;  %v4733_v37 = vrot.slane %v4731_v25, 5  ;;  %v4741_v39 = vshll.u32 %v6548_v21, 16  ;;  %v4746_v27 = vshrl.u32 %v6549_v34, 16  ;;  %v6598_v22 = vld [vmem:[%s7836_s18 + $0x30] sm:$0xe] }
  0xff   : > { %7084 = vmatmul.mubr.bf16.gmra.mrb[8].mxu1 %v7735_v49  ;;  %v4710_v42 = vsel %vm7859_vm2, %v4705_v30, %v4709_v13  ;;  %v4715_v43 = vrot.slane %v4714_v31, 4  ;;  %v4728_v41 = vor.u32 %v4727_v32, %v4724_v24  ;;  %v4749_v44 = vshll.u32 %v6549_v34, 16  ;;  %v6599_v25 = vld [vmem:[%s7836_s18 + $0x34] sm:$0xf] }
 0x100   : > { %7087 = vmatprep.mubr.bf16.mxu1 %v7737_v57  ;;  %7359 = vmatpush3.bf16.msra.mxu1 %v7752_v7  ;;  %v4737_v45 = vrot.slane %v4735_v38, 4  ;;  %v4743_v46 = vrot.slane %v4741_v39, 5  ;;  %v4748_v48 = vrot.slane %v4746_v27, 4  ;;  %v4755_v49 = vshll.u32 %v6550_v35, 16  ;;  %v7755_v7 = vld [vmem:[%s8942_s1 + $0x138] sm:$0xff]  }
 0x101   : > { %7352 = vmatprep.subr.bf16.mxu1 %v7753_v28  ;;  %7291 = vmatprep.mubr.bf16.mxu0 %v6580_v29  ;;  %v4720_v51 = vsel %vm7859_vm2, %v4715_v43, %v4719_v23  ;;  %v4729_v52 = vrot.slane %v4728_v41, 4  ;;  %v4751_v53 = vrot.slane %v4749_v44, 5  ;;  %v4759_v54 = vshrl.u32 %v6550_v35, 16  ;;  %v6603_v38 = vld [vmem:[%s7836_s18 + $0x44] sm:$0x1] }
 0x102   : > { %v6581_v55 = vcombine.low %v4710_v42, %v4720_v51  ;;  %v4738_v57 = vor.u32 %v4737_v45, %v4733_v37  ;;  %v4757_v58 = vrot.slane %v4755_v49, 5  ;;  %v4765_v59 = vshll.u32 %v6551_v40, 16  ;;  %v7743_v42 = vld [vmem:[%s7836_s18 + $0x90] sm:$0xff]   ;;  %v6604_v41 = vld [vmem:[%s7836_s18 + $0x48] sm:$0xe] }
 0x103   : > { %v4752_v62 = vor.u32 %v4751_v53, %v4748_v48  ;;  %v4761_v63 = vrot.slane %v4759_v54, 4  ;;  %v6640_v1 = vrot.slane %v6592_v61, 9  ;;  %v4734_v2 = vsel %vm7859_vm2, %v4729_v52, %v4733_v37  ;;  %v6602_v37 = vld [vmem:[%s7836_s18 + $0x40] sm:$0xf]  ;;  %v6605_v49 = vld [vmem:[%s7836_s18 + $0x4c] sm:$0xf] }
 0x104   : > { %7360 = vmatpush3.bf16.msra.mxu1 %v7753_v28  ;;  %v4739_v3 = vrot.slane %v4738_v57, 4  ;;  %v5253_v18 = vrot.slane %v6593_v56, 5  ;;  %v5256_v5 = vrot.slane %v6594_v0, 5  ;;  %v4767_v10 = vrot.slane %v4765_v59, 5  ;;  %v7744_v48 = vld [vmem:[%s7836_s18 + $0x9c] sm:$0xff]  }
 0x105   : > { %7353 = vmatprep.subr.bf16.mxu1 %v7754_v50  ;;  %7292 = vmatmul.mubr.bf16.gmra.mrb[24].mxu0 %v6581_v55  ;;  %v4753_v8 = vrot.slane %v4752_v62, 4  ;;  %v4762_v9 = vor.u32 %v4761_v63, %v4757_v58  ;;  %v5260_v21 = vrot.slane %v6596_v11, 5  ;;  %v6641_v23 = vrot.slane %v6595_v60, 9  ;;  %v6607_v57 = vld [vmem:[%s7836_s18 + $0x54] sm:$0xe] }
 0x106   : > { %v4744_v12 = vsel %vm7859_vm2, %v4739_v3, %v4743_v46  ;;  %v5254_v13 = vsel %vm7959_vm5, %v6640_v1, %v5253_v18  ;;  %v5255_v14 = vrot.slane %v5253_v18, 4  ;;  %v5263_v24 = vrot.slane %v6597_v15, 5  ;;  %v6609_v59 = vld [vmem:[%s7836_s18 + $0x5c] sm:$0x1]  ;;  %v6610_v18 = vld [vmem:[%s7836_s18 + $0x60] sm:$0xe] }
 0x107   : > { %7088 = vmatmul.mubr.bf16.gmra.mrb[12].mxu1 %v7738_v26  ;;  %v6582_v17 = vcombine.low %v4734_v2, %v4744_v12  ;;  %v4758_v19 = vsel %vm7859_vm2, %v4753_v8, %v4757_v58  ;;  %v4763_v20 = vrot.slane %v4762_v9, 4  ;;  %v6600_v26 = vld [vmem:[%s7836_s18 + $0x38] sm:$0x1]  ;;  %v5262_v30 = vrot.slane %v5260_v21, 4  ;;  %v6612_v8 = vld [vmem:[%s7836_s18 + $0x68] sm:$0x1] }
 0x108   : > { %7091 = vmatprep.mubr.bf16.mxu1 %v7740_v36  ;;  %7361 = vmatpush3.bf16.msra.mxu1 %v7754_v50  ;;  %v5257_v47 = vsel %vm7959_vm5, %v5255_v14, %v5256_v5  ;;  %v6642_v31 = vrot.slane %v6598_v22, 9  ;;  %v5267_v34 = vrot.slane %v6599_v25, 5  ;;  %v5270_v35 = vrot.slane %v6600_v26, 5  ;;  %v6601_v36 = vld [vmem:[%s7836_s18 + $0x3c] sm:$0xe]  ;;  %v7745_v15 = vld [vmem:[%s7836_s18 + $0xa8] sm:$0xff]  }
 0x109   : > { %7354 = vmatprep.subr.bf16.mxu1 %v7755_v7  ;;  %7295 = vmatprep.mubr.bf16.mxu0 %v6582_v17  ;;  %v4768_v28 = vsel %vm7859_vm2, %v4763_v20, %v4767_v10  ;;  %v6672_v29 = vcombine.low %v5254_v13, %v5257_v47  ;;  %v6643_v39 = vrot.slane %v6601_v36, 9  ;;  %v5274_v40 = vrot.slane %v6602_v37, 5  ;;  %v6606_v50 = vld [vmem:[%s7836_s18 + $0x50] sm:$0x1]  ;;  %v6608_v58 = vld [vmem:[%s7836_s18 + $0x58] sm:$0xf] }
 0x10a   : > { %v6583_v32 = vcombine.low %v4758_v19, %v4768_v28  ;;  %v5269_v27 = vrot.slane %v5267_v34, 4  ;;  %v5277_v43 = vrot.slane %v6603_v38, 5  ;;  %v5261_v44 = vsel %vm7959_vm5, %v6641_v23, %v5260_v21  ;;  %v6611_v5 = vld [vmem:[%s7836_s18 + $0x64] sm:$0xf]  ;;  %v6613_v13 = vld [vmem:[%s7836_s18 + $0x6c] sm:$0xe] }
 0x10b   : > { %v5264_v45 = vsel %vm7959_vm5, %v5262_v30, %v5263_v24  ;;  %v5276_v46 = vrot.slane %v5274_v40, 4  ;;  %v6644_v51 = vrot.slane %v6604_v41, 9  ;;  %v5268_v52 = vsel %vm7959_vm5, %v6642_v31, %v5267_v34  ;;  %v6614_v19 = vld [vmem:[%s7836_s18 + $0x70] sm:$0xf]  ;;  %v6615_v20 = vld [vmem:[%s7836_s18 + $0x74] sm:$0x1] }
 0x10c   : > { %7362 = vmatpush3.bf16.msra.mxu1 %v7755_v7  ;;  %v5271_v53 = vsel %vm7959_vm5, %v5269_v27, %v5270_v35  ;;  %v5281_v54 = vrot.slane %v6605_v49, 5  ;;  %v5284_v55 = vrot.slane %v6606_v50, 5  ;;  %v6673_v61 = vcombine.low %v5261_v44, %v5264_v45  ;;  %v7746_v23 = vld [vmem:[%s7836_s18 + $0xb4] sm:$0xff]   ;;  %v6264_v26 = vld [vmem:[%s7836_s18 + $0x6c] sm:$0xf] }
 0x10d   : > { %7296 = vmatmul.mubr.bf16.gmra.mrb[28].mxu0 %v6583_v32  ;;  %v8673_v56 = vsel %vm7959_vm5, %v6643_v39, %v5274_v40  ;;  %v6645_v63 = vrot.slane %v6607_v57, 9  ;;  %v6674_v0 = vcombine.low %v5268_v52, %v5271_v53  ;;  %v8677_v1 = vsel %vm7959_vm5, %v5276_v46, %v5277_v43  ;;  %v6265_v28 = vld [vmem:[%s7836_s18 + $0x70] sm:$0xf]  ;;  %v6266_v31 = vld [vmem:[%s7836_s18 + $0x74] sm:$0x1] }
 0x10e   : > { %7315 = vmatprep.mubr.bf16.mxu0 %v6672_v29  ;;  %v5283_v62 = vrot.slane %v5281_v54, 4  ;;  %v5288_v2 = vrot.slane %v6608_v58, 5  ;;  %v5291_v3 = vrot.slane %v6609_v59, 5  ;;  %v6646_v9 = vrot.slane %v6610_v18, 9  ;;  %v6616_v35 = vld [vmem:[%s7836_s18 + $0x78] sm:$0xe] }
 0x10f   : > { %7092 = vmatmul.mubr.bf16.gmra.mrb[16].mxu1 %v7741_v6  ;;  %v8683_v6 = vsel %vm7959_vm5, %v6644_v51, %v5281_v54  ;;  %v5295_v10 = vrot.slane %v6611_v5, 5  ;;  %v5298_v12 = vrot.slane %v6612_v8, 5  ;;  %v6675_v14 = vcombine.low %v8673_v56, %v8677_v1  ;;  %v6617_v40 = vld [vmem:[%s7836_s18 + $0x7c] sm:$0xf]  ;;  %v6618_v27 = vld [vmem:[%s7836_s18 + $0x80] sm:$0x1] }
 0x110   : > { %7095 = vmatprep.mubr.bf16.mxu1 %v7742_v16  ;;  %v8687_v7 = vsel %vm7959_vm5, %v5283_v62, %v5284_v55  ;;  %v8692_v60 = vsel %vm7959_vm5, %v6645_v63, %v5288_v2  ;;  %v5290_v11 = vrot.slane %v5288_v2, 4  ;;  %v6647_v21 = vrot.slane %v6613_v13, 9  ;;  %v6267_v45 = vld [vmem:[%s7836_s18 + $0x78] sm:$0xf]  ;;  %v6268_v51 = vld [vmem:[%s7836_s18 + $0x7c] sm:$0xf] }
 0x111   : > { %v8700_v16 = vsel %vm7959_vm5, %v6646_v9, %v5295_v10  ;;  %v5297_v17 = vrot.slane %v5295_v10, 4  ;;  %v6676_v22 = vcombine.low %v8683_v6, %v8687_v7  ;;  %v5302_v24 = vrot.slane %v6614_v19, 5  ;;  %v6269_v57 = vld [vmem:[%s7836_s18 + $0x80] sm:$0x1]  ;;  %v6619_v62 = vld [vmem:[%s7836_s18 + $0x84] sm:$0xe] }
 0x112   : > { %v8708_v47 = vsel %vm7959_vm5, %v5290_v11, %v5291_v3  ;;  %v5305_v25 = vrot.slane %v6615_v20, 5  ;;  %v2715_v32 = vshrl.u32 %v6264_v26, 16  ;;  %v2718_v34 = vshll.u32 %v6264_v26, 16  ;;  %v6620_v3 = vld [vmem:[%s7836_s18 + $0x88] sm:$0xf]  ;;  %v7747_v9 = vld [vmem:[%s7836_s18 + $0xc0] sm:$0xff]  }
 0x113   : > { %v6677_v29 = vcombine.low %v8692_v60, %v8708_v47  ;;  %v8717_v30 = vsel %vm7959_vm5, %v5297_v17, %v5298_v12  ;;  %v8725_v37 = vsel %vm7959_vm5, %v6647_v21, %v5302_v24  ;;  %v5304_v38 = vrot.slane %v5302_v24, 4  ;;  %v6621_v8 = vld [vmem:[%s7836_s18 + $0x8c] sm:$0x1]  ;;  %v6271_v21 = vld [vmem:[%s7836_s18 + $0x88] sm:$0xf] }
 0x114   : > { %v6678_v36 = vcombine.low %v8700_v16, %v8717_v30  ;;  %v2724_v39 = vshll.u32 %v6265_v28, 16  ;;  %v2720_v43 = vrot.slane %v2718_v34, 5  ;;  %v2728_v41 = vshrl.u32 %v6265_v28, 16 }
 0x115   : > { %7316 = vmatmul.mubr.bf16.vlgmr.msra.gmra.mrb[0].mxu0 %v6673_v61  ;;  %v2734_v44 = vshll.u32 %v6266_v31, 16  ;;  %v8732_v46 = vsel %vm7959_vm5, %v5304_v38, %v5305_v25  ;;  %v6648_v49 = vrot.slane %v6616_v35, 9  ;;  %v5309_v50 = vrot.slane %v6617_v40, 5  ;;  %v6272_v31 = vld [vmem:[%s7836_s18 + $0x8c] sm:$0x1] }
 0x116   : > { %7319 = vmatprep.mubr.bf16.mxu0 %v6674_v0  ;;  %v6679_v52 = vcombine.low %v8725_v37, %v8732_v46  ;;  %v2730_v54 = vrot.slane %v2728_v41, 4  ;;  %v5312_v61 = vrot.slane %v6618_v27, 5  ;;  %v2739_v56 = vshrl.u32 %v6267_v45, 16  ;;  %v6622_v27 = vld [vmem:[%s7836_s18 + $0x90] sm:$0xe] }
 0x117   : > { %7096 = vmatmul.mubr.bf16.gmra.mrb[20].mxu1 %v7743_v42  ;;  %v2717_v42 = vrot.slane %v2715_v32, 4  ;;  %v2736_v55 = vrot.slane %v2734_v44, 5  ;;  %v8740_v58 = vsel %vm7959_vm5, %v6648_v49, %v5309_v50  ;;  %v5311_v59 = vrot.slane %v5309_v50, 4 }
 0x118   : > { %7099 = vmatprep.mubr.bf16.mxu1 %v7744_v48  ;;  %v2726_v48 = vrot.slane %v2724_v39, 5  ;;  %v2742_v1 = vshll.u32 %v6267_v45, 16  ;;  %v2748_v2 = vshll.u32 %v6268_v51, 16  ;;  %v2741_v5 = vrot.slane %v2739_v56, 4  ;;  %v6623_v45 = vld [vmem:[%s7836_s18 + $0x94] sm:$0xf] }
 0x119   : > { %v2721_v53 = vor.u32 %v2720_v43, %v2717_v42  ;;  %v8746_v18 = vsel %vm7959_vm5, %v5311_v59, %v5312_v61  ;;  %v2752_v6 = vshrl.u32 %v6268_v51, 16  ;;  %v2758_v7 = vshll.u32 %v6269_v57, 16  ;;  %v6274_v57 = vld [vmem:[%s7836_s18 + $0x94] sm:$0xf] }
 0x11a   : > { %v2731_v0 = vor.u32 %v2730_v54, %v2726_v48  ;;  %v6680_v12 = vcombine.low %v8740_v58, %v8746_v18  ;;  %v2744_v13 = vrot.slane %v2742_v1, 5  ;;  %v6649_v20 = vrot.slane %v6619_v62, 9  ;;  %v6273_v54 = vld [vmem:[%s7836_s18 + $0x90] sm:$0xf]  ;;  %v6625_v1 = vld [vmem:[%s7836_s18 + $0x9c] sm:$0xe] }
 0x11b   : > { %v2722_v63 = vrot.slane %v2721_v53, 4  ;;  %v2754_v17 = vrot.slane %v2752_v6, 4  ;;  %v2760_v19 = vrot.slane %v2758_v7, 5  ;;  %v5316_v24 = vrot.slane %v6620_v3, 5  ;;  %v6624_v53 = vld [vmem:[%s7836_s18 + $0x98] sm:$0x1] }
 0x11c   : > { %v2732_v11 = vrot.slane %v2731_v0, 4  ;;  %v5319_v25 = vrot.slane %v6621_v8, 5  ;;  %v2772_v40 = vshll.u32 %v6271_v21, 16  ;;  %v2776_v44 = vshrl.u32 %v6271_v21, 16  ;;  %v6626_v7 = vld [vmem:[%s7836_s18 + $0xa0] sm:$0xf] }
 0x11d   : > { %7320 = vmatmul.mubr.bf16.gmra.mrb[4].mxu0 %v6675_v14  ;;  %v2727_v10 = vsel %vm7859_vm2, %v2722_v63, %v2726_v48  ;;  %v6270_v14 = vld [vmem:[%s7836_s18 + $0x84] sm:$0xf]  ;;  %v8761_v38 = vsel %vm7959_vm5, %v6649_v20, %v5316_v24  ;;  %v5318_v39 = vrot.slane %v5316_v24, 4  ;;  %v2782_v51 = vshll.u32 %v6272_v31, 16  ;;  %v6275_v63 = vld [vmem:[%s7836_s18 + $0x98] sm:$0x1] }
 0x11e   : > { %7323 = vmatprep.mubr.bf16.mxu0 %v6676_v22  ;;  %v2737_v22 = vsel %vm7859_vm2, %v2732_v11, %v2736_v55  ;;  %v2763_v32 = vshrl.u32 %v6270_v14, 16  ;;  %v2766_v34 = vshll.u32 %v6270_v14, 16  ;;  %v2774_v50 = vrot.slane %v2772_v40, 5  ;;  %v6276_v20 = vld [vmem:[%s7836_s18 + $0x9c] sm:$0xf] }
 0x11f   : > { %7100 = vmatmul.mubr.bf16.gmra.mrb[24].mxu1 %v7745_v15  ;;  %v2750_v15 = vrot.slane %v2748_v2, 5  ;;  %v6312_v26 = vcombine.low %v2727_v10, %v2737_v22  ;;  %v8772_v49 = vsel %vm7959_vm5, %v5318_v39, %v5319_v25  ;;  %v2778_v55 = vrot.slane %v2776_v44, 4  ;;  %v6277_v25 = vld [vmem:[%s7836_s18 + $0xa0] sm:$0xf]  ;;  %v6278_v39 = vld [vmem:[%s7836_s18 + $0xa4] sm:$0x1] }
 0x120   : > { %7103 = vmatprep.mubr.bf16.mxu1 %v7746_v23  ;;  %v2745_v23 = vor.u32 %v2744_v13, %v2741_v5  ;;  %v2765_v43 = vrot.slane %v2763_v32, 4  ;;  %v2768_v41 = vrot.slane %v2766_v34, 5  ;;  %v6681_v47 = vcombine.low %v8761_v38, %v8772_v49  ;;  %v6627_v13 = vld [vmem:[%s7836_s18 + $0xa4] sm:$0x1]  ;;  %v6629_v44 = vld [vmem:[%s7836_s18 + $0xac] sm:$0xf] }
 0x121   : > { %v2755_v28 = vor.u32 %v2754_v17, %v2750_v15  ;;  %v2784_v61 = vrot.slane %v2782_v51, 5  ;;  %v6650_v56 = vrot.slane %v6622_v27, 9  ;;  %v5323_v62 = vrot.slane %v6623_v45, 5 }
 0x122   : > { %v2746_v35 = vrot.slane %v2745_v23, 4  ;;  %v2779_v16 = vor.u32 %v2778_v55, %v2774_v50  ;;  %v5326_v30 = vrot.slane %v6624_v53, 5  ;;  %v2790_v5 = vshll.u32 %v6273_v54, 16  ;;  %v6630_v53 = vld [vmem:[%s7836_s18 + $0xb0] sm:$0x1] }
 0x123   : > { %v2756_v42 = vrot.slane %v2755_v28, 4  ;;  %v8788_v2 = vsel %vm7959_vm5, %v6650_v56, %v5323_v62  ;;  %v5325_v3 = vrot.slane %v5323_v62, 4  ;;  %v2796_v6 = vshll.u32 %v6274_v57, 16 }
 0x124   : > { %v2751_v48 = vsel %vm7859_vm2, %v2746_v35, %v2750_v15  ;;  %v2800_v11 = vshrl.u32 %v6274_v57, 16  ;;  %v2792_v15 = vrot.slane %v2790_v5, 5  ;;  %v6651_v24 = vrot.slane %v6625_v1, 9 }
 0x125   : > { %7324 = vmatmul.mubr.bf16.gmra.mrb[8].mxu0 %v6677_v29  ;;  %v2761_v60 = vsel %vm7859_vm2, %v2756_v42, %v2760_v19  ;;  %v2769_v29 = vor.u32 %v2768_v41, %v2765_v43  ;;  %v5327_v14 = vsel %vm7959_vm5, %v5325_v3, %v5326_v30  ;;  %v2798_v17 = vrot.slane %v2796_v6, 5  ;;  %v6628_v43 = vld [vmem:[%s7836_s18 + $0xa8] sm:$0xe] }
 0x126   : > { %7327 = vmatprep.mubr.bf16.mxu0 %v6678_v36  ;;  %v6313_v59 = vcombine.low %v2751_v48, %v2761_v60  ;;  %v2787_v36 = vshrl.u32 %v6273_v54, 16  ;;  %v2806_v19 = vshll.u32 %v6275_v63, 16  ;;  %v6682_v22 = vcombine.low %v8788_v2, %v5327_v14  ;;  %v6279_v54 = vld [vmem:[%s7836_s18 + $0xa8] sm:$0xf]  ;;  %v6631_v2 = vld [vmem:[%s7836_s18 + $0xb4] sm:$0xe] }
 0x127   : > { %7104 = vmatmul.mubr.bf16.gmra.mrb[28].mxu1 %v7747_v9  ;;  %v2770_v0 = vrot.slane %v2769_v29, 4  ;;  %v2780_v9 = vrot.slane %v2779_v16, 4  ;;  %v2802_v23 = vrot.slane %v2800_v11, 4  ;;  %v5330_v32 = vrot.slane %v6626_v7, 5  ;;  %v6633_v14 = vld [vmem:[%s7836_s18 + $0xbc] sm:$0x1] }
 0x128   : > { %7139 = vmatprep.mubr.bf16.mxu1 %v6312_v26  ;;  %v2789_v10 = vrot.slane %v2787_v36, 4  ;;  %v2808_v31 = vrot.slane %v2806_v19, 5  ;;  %v5333_v35 = vrot.slane %v6627_v13, 5  ;;  %v2811_v40 = vshrl.u32 %v6276_v20, 16 }
 0x129   : > { %v2775_v8 = vsel %vm7859_vm2, %v2770_v0, %v2774_v50  ;;  %v2785_v21 = vsel %vm7859_vm2, %v2780_v9, %v2784_v61  ;;  %v2803_v34 = vor.u32 %v2802_v23, %v2798_v17  ;;  %v2814_v27 = vshll.u32 %v6276_v20, 16  ;;  %v6281_v0 = vld [vmem:[%s7836_s18 + $0xb0] sm:$0x1]  ;;  %v6283_v23 = vld [vmem:[%s7836_s18 + $0xb8] sm:$0xf] }
 0x12a   : > { %v6314_v26 = vcombine.low %v2775_v8, %v2785_v21  ;;  %v2793_v28 = vor.u32 %v2792_v15, %v2789_v10  ;;  %v8810_v46 = vsel %vm7959_vm5, %v6651_v24, %v5330_v32  ;;  %v2820_v42 = vshll.u32 %v6277_v25, 16  ;;  %v6632_v8 = vld [vmem:[%s7836_s18 + $0xb8] sm:$0xf] }
 0x12b   : > { %v2804_v58 = vrot.slane %v2803_v34, 4  ;;  %v2813_v18 = vrot.slane %v2811_v40, 4  ;;  %v2824_v41 = vshrl.u32 %v6277_v25, 16  ;;  %v2830_v51 = vshll.u32 %v6278_v39, 16  ;;  %v6284_v34 = vld [vmem:[%s7836_s18 + $0xbc] sm:$0x1] }
 0x12c   : > { %v2794_v37 = vrot.slane %v2793_v28, 4  ;;  %v2822_v50 = vrot.slane %v2820_v42, 5  ;;  %v6652_v62 = vrot.slane %v6628_v43, 9  ;;  %v5337_v63 = vrot.slane %v6629_v44, 5 }
 0x12d   : > { %7328 = vmatmul.mubr.bf16.gmra.mrb[12].mxu0 %v6679_v52  ;;  %v5332_v52 = vrot.slane %v5330_v32, 4  ;;  %v2809_v60 = vsel %vm7859_vm2, %v2804_v58, %v2808_v31  ;;  %v2826_v57 = vrot.slane %v2824_v41, 4  ;;  %v2832_v56 = vrot.slane %v2830_v51, 5  ;;  %v6285_v51 = vld [vmem:[%s7836_s18 + $0xc0] sm:$0xf] }
 0x12e   : > { %7331 = vmatprep.mubr.bf16.mxu0 %v6680_v12  ;;  %v2816_v12 = vrot.slane %v2814_v27, 5  ;;  %v2799_v45 = vsel %vm7859_vm2, %v2794_v37, %v2798_v17  ;;  %v5340_v36 = vrot.slane %v6630_v53, 5  ;;  %v2835_v1 = vshrl.u32 %v6279_v54, 16  ;;  %v6282_v17 = vld [vmem:[%s7836_s18 + $0xb4] sm:$0xf] }
 0x12f   : > { %7140 = vmatmul.mubr.bf16.vlgmr.msra.gmra.mrb[16].mxu1 %v6313_v59  ;;  %v8818_v48 = vsel %vm7959_vm5, %v5332_v52, %v5333_v35  ;;  %v6280_v59 = vld [vmem:[%s7836_s18 + $0xac] sm:$0xf]  ;;  %v6315_v61 = vcombine.low %v2799_v45, %v2809_v60  ;;  %v2827_v30 = vor.u32 %v2826_v57, %v2822_v50  ;;  %v5338_v3 = vsel %vm7959_vm5, %v6652_v62, %v5337_v63  ;;  %v6634_v52 = vld [vmem:[%s7836_s18 + $0xc0] sm:$0xe] }
 0x130   : > { %7143 = vmatprep.mubr.bf16.mxu1 %v6314_v26  ;;  %v6683_v29 = vcombine.low %v8810_v46, %v8818_v48  ;;  %v2817_v55 = vor.u32 %v2816_v12, %v2813_v18  ;;  %v5339_v5 = vrot.slane %v5337_v63, 4  ;;  %v2838_v6 = vshll.u32 %v6279_v54, 16  ;;  %v6635_v12 = vld [vmem:[%s7836_s18 + $0xc4] sm:$0xf] }
 0x131   : > { %v2844_v7 = vshll.u32 %v6280_v59, 16  ;;  %v2828_v10 = vrot.slane %v2827_v30, 4  ;;  %v2837_v11 = vrot.slane %v2835_v1, 4  ;;  %v2848_v13 = vshrl.u32 %v6280_v59, 16 }
 0x132   : > { %v2818_v16 = vrot.slane %v2817_v55, 4  ;;  %v5341_v38 = vsel %vm7959_vm5, %v5339_v5, %v5340_v36  ;;  %v2840_v49 = vrot.slane %v2838_v6, 5  ;;  %v2854_v15 = vshll.u32 %v6281_v0, 16  ;;  %v6637_v5 = vld [vmem:[%s7836_s18 + $0xcc] sm:$0xe] }
 0x133   : > { %v2833_v19 = vsel %vm7859_vm2, %v2828_v10, %v2832_v56  ;;  %v6684_v20 = vcombine.low %v5338_v3, %v5341_v38  ;;  %v2850_v21 = vrot.slane %v2848_v13, 4  ;;  %v5344_v28 = vrot.slane %v6632_v8, 5  ;;  %v6638_v10 = vld [vmem:[%s7836_s18 + $0xd0] sm:$0xf] }
 0x134   : > { %v2823_v9 = vsel %vm7859_vm2, %v2818_v16, %v2822_v50  ;;  %v2841_v25 = vor.u32 %v2840_v49, %v2837_v11  ;;  %v2856_v26 = vrot.slane %v2854_v15, 5  ;;  %v5347_v32 = vrot.slane %v6633_v14, 5  ;;  %v6636_v50 = vld [vmem:[%s7836_s18 + $0xc8] sm:$0x1]  ;;  %v6639_v49 = vld [vmem:[%s7836_s18 + $0xd4] sm:$0x1] }
 0x135   : > { %7332 = vmatmul.mubr.bf16.gmra.mrb[16].mxu0 %v6681_v47  ;;  %v2846_v47 = vrot.slane %v2844_v7, 5  ;;  %v6316_v24 = vcombine.low %v2823_v9, %v2833_v19  ;;  %v2859_v35 = vshrl.u32 %v6282_v17, 16  ;;  %v2862_v39 = vshll.u32 %v6282_v17, 16  ;;  %v6287_v16 = vld [vmem:[%s7836_s18 + $0xc8] sm:$0x1] }
 0x136   : > { %7335 = vmatprep.mubr.bf16.mxu0 %v6682_v22  ;;  %v6653_v22 = vrot.slane %v6631_v2, 9  ;;  %v2842_v40 = vrot.slane %v2841_v25, 4  ;;  %v5346_v37 = vrot.slane %v5344_v28, 4  ;;  %v2868_v46 = vshll.u32 %v6283_v23, 16 }
 0x137   : > { %7144 = vmatmul.mubr.bf16.gmra.mrb[20].mxu1 %v6315_v61  ;;  %v2851_v31 = vor.u32 %v2850_v21, %v2846_v47  ;;  %v2861_v43 = vrot.slane %v2859_v35, 4  ;;  %v2864_v58 = vrot.slane %v2862_v39, 5  ;;  %v2872_v18 = vshrl.u32 %v6283_v23, 16 }
 0x138   : > { %7147 = vmatprep.mubr.bf16.mxu1 %v6316_v24  ;;  %v5345_v27 = vsel %vm7959_vm5, %v6653_v22, %v5344_v28  ;;  %v2847_v41 = vsel %vm7859_vm2, %v2842_v40, %v2846_v47  ;;  %v5348_v44 = vsel %vm7959_vm5, %v5346_v37, %v5347_v32  ;;  %v2870_v45 = vrot.slane %v2868_v46, 5 }
 0x139   : > { %v2852_v42 = vrot.slane %v2851_v31, 4  ;;  %v2878_v48 = vshll.u32 %v6284_v34, 16  ;;  %v6685_v54 = vcombine.low %v5345_v27, %v5348_v44  ;;  %v2865_v60 = vor.u32 %v2864_v58, %v2861_v43 }
 0x13a   : > { %v2874_v55 = vrot.slane %v2872_v18, 4  ;;  %v6654_v61 = vrot.slane %v6634_v52, 9  ;;  %v5351_v56 = vrot.slane %v6635_v12, 5  ;;  %v5354_v0 = vrot.slane %v6636_v50, 5 }
 0x13b   : > { %v2857_v53 = vsel %vm7859_vm2, %v2852_v42, %v2856_v26  ;;  %v2880_v59 = vrot.slane %v2878_v48, 5  ;;  %v2866_v62 = vrot.slane %v2865_v60, 4  ;;  %v2883_v30 = vshrl.u32 %v6285_v51, 16 }
 0x13c   : > { %v6317_v57 = vcombine.low %v2847_v41, %v2857_v53  ;;  %v2875_v63 = vor.u32 %v2874_v55, %v2870_v45  ;;  %v5352_v36 = vsel %vm7959_vm5, %v6654_v61, %v5351_v56  ;;  %v5353_v1 = vrot.slane %v5351_v56, 4 }
 0x13d   : > { %7336 = vmatmul.mubr.bf16.gmra.mrb[20].mxu0 %v6683_v29  ;;  %v6286_v29 = vld [vmem:[%s7836_s18 + $0xc4] sm:$0xf]  ;;  %v2886_v2 = vshll.u32 %v6285_v51, 16  ;;  %v2871_v6 = vsel %vm7859_vm2, %v2866_v62, %v2870_v45  ;;  %v2885_v8 = vrot.slane %v2883_v30, 4  ;;  %v2902_v38 = vshll.u32 %v6287_v16, 16  ;;  %s6698_s18 = sshll.u32 %s8951_s16, 8 }
 0x13e   : > { %7339 = vmatprep.mubr.bf16.mxu0 %v6684_v20  ;;  %v2892_v3 = vshll.u32 %v6286_v29, 16  ;;  %v2876_v7 = vrot.slane %v2875_v63, 4  ;;  %v2896_v9 = vshrl.u32 %v6286_v29, 16  ;;  %v5355_v11 = vsel %vm7959_vm5, %v5353_v1, %v5354_v0  ;;  %s8892_s21 = scalar_lea.vmem %s8943_s2, %s6698_s18 }
 0x13f   : > { %7148 = vmatmul.mubr.bf16.gmra.mrb[24].mxu1 %v6317_v57  ;;  %v2888_v13 = vrot.slane %v2886_v2, 5  ;;  %v6686_v15 = vcombine.low %v5352_v36, %v5355_v11  ;;  %v6655_v19 = vrot.slane %v6637_v5, 9  ;;  %v5358_v22 = vrot.slane %v6638_v10, 5 }
 0x140   : > { %v2894_v14 = vrot.slane %v2892_v3, 5  ;;  %v2881_v47 = vsel %vm7859_vm2, %v2876_v7, %v2880_v59  ;;  %v2898_v17 = vrot.slane %v2896_v9, 4  ;;  %v2904_v24 = vrot.slane %v2902_v38, 5 }
 0x141   : > { %v6318_v20 = vcombine.low %v2871_v6, %v2881_v47  ;;  %v2889_v21 = vor.u32 %v2888_v13, %v2885_v8  ;;  %v5361_v25 = vrot.slane %v6639_v49, 5  ;;  %v5359_v28 = vsel %vm7959_vm5, %v6655_v19, %v5358_v22 }
 0x142   : > { %v2899_v23 = vor.u32 %v2898_v17, %v2894_v14  ;;  %v5360_v31 = vrot.slane %v5358_v22, 4 }
 0x143   : > { %7151 = vmatprep.mubr.bf16.mxu1 %v6318_v20  ;;  %v2890_v26 = vrot.slane %v2889_v21, 4 }
 0x144   : > { %v2900_v32 = vrot.slane %v2899_v23, 4  ;;  %v5362_v35 = vsel %vm7959_vm5, %v5360_v31, %v5361_v25 }
 0x145   : > { %7340 = vmatmul.mubr.bf16.gmra.mrb[24].mxu0 %v6685_v54  ;;  %v2895_v34 = vsel %vm7859_vm2, %v2890_v26, %v2894_v14  ;;  %v6687_v40 = vcombine.low %v5359_v28, %v5362_v35 }
 0x146   : > { %7343 = vmatprep.mubr.bf16.mxu0 %v6686_v15  ;;  %v2905_v39 = vsel %vm7859_vm2, %v2900_v32, %v2904_v24 }
 0x147   : > { %v6319_v27 = vcombine.low %v2895_v34, %v2905_v39 }
 0x149   : > { %7152 = vmatmul.mubr.bf16.gmra.mrb[28].mxu1 %v6319_v27 }
 0x14d   : > { %7344 = vmatmul.mubr.bf16.gmra.mrb[28].mxu0 %v6687_v40 }
 0x1c2   : > { %v7077_v37 = vpop.f32.mrb[0].mxu1 }
 0x1c3   : > { %v2251_v46 = vpop.f32.mrb[1].mxu1 }
 0x1c4   : > { %v7078_v52 = vpop.f32.mrb[2].mxu1 }
 0x1c5   : > { %v2254_v42 = vpop.f32.mrb[3].mxu1 }
 0x1ca   : > { %v7081_v43 = vpop.f32.mrb[4].mxu1 }
 0x1cb   : > { %v2267_v58 = vpop.f32.mrb[5].mxu1 }
 0x1cc   : > { %v7082_v18 = vpop.f32.mrb[6].mxu1 }
 0x1cd   : > { %v2270_v12 = vpop.f32.mrb[7].mxu1 }
 0x1d2   : > { %v7085_v41 = vpop.f32.mrb[8].mxu1 }
 0x1d3   : > { %v2283_v44 = vpop.f32.mrb[9].mxu1 }
 0x1d4   : > { %v7086_v4 = vpop.f32.mrb[10].mxu1 }
 0x1d5   : > { %v8878_v45 = vpop.f32.mrb[11].mxu1 }
 0x1da   : > { %v8880_v33 = vpop.f32.mrb[12].mxu1 }
 0x1db   : > { %v8882_v48 = vpop.f32.mrb[13].mxu1 }
 0x1dc   : > { %v8884_v50 = vpop.f32.mrb[14].mxu1 }
 0x1dd   : > { %v8886_v51 = vpop.f32.mrb[15].mxu1 }
 0x1e8   : > { %v7317_v53 = vpop.f32.mrb[0].mxu0 }
 0x1e9   : > { %v7363_v54 = vadd.f32 %v7317_v53, %v7077_v37  ;;  %v5526_v60 = vpop.f32.mrb[1].mxu0 }
 0x1ea   : > { %v7364_v55 = vadd.f32 %v5526_v60, %v2251_v46  ;;  %v7318_v29 = vpop.f32.mrb[2].mxu0 }
 0x1eb   : > { %5783 = vst [vmem:[%s8892_s21 + $0x10] sm:$0xff] %v7363_v54  ;;  %v7365_v57 = vadd.f32 %v7318_v29, %v7078_v52  ;;  %v5529_v59 = vpop.f32.mrb[3].mxu0  ;;  %v5852_v0 = vmul.f32 %v7363_v54, %v7363_v54 }
 0x1ec   : > { %5781 = vst [vmem:[%s8892_s21] sm:$0xff] %v7364_v55  ;;  %v7366_v61 = vadd.f32 %v5529_v59, %v2254_v42  ;;  %v5850_v56 = vmul.f32 %v7364_v55, %v7364_v55 }
 0x1ed   : > { %5784 = vst [vmem:[%s8892_s21 + $0x18] sm:$0xff] %v7365_v57  ;;  %v5853_v3 = vmul.f32 %v7365_v57, %v7365_v57 }
 0x1ee   : > { %5782 = vst [vmem:[%s8892_s21 + $0x8] sm:$0xff] %v7366_v61  ;;  %v5813_v62 = vadd.f32 %v7366_v61, %v7364_v55  ;;  %v5851_v63 = vmul.f32 %v7366_v61, %v7366_v61 }
 0x1f0   : > { %v5814_v16 = vadd.f32 %v7363_v54, %v5813_v62  ;;  %v5882_v30 = vadd.f32 %v5851_v63, %v5850_v56  ;;  %v7321_v36 = vpop.f32.mrb[4].mxu0 }
 0x1f1   : > { %v7367_v1 = vadd.f32 %v7321_v36, %v7081_v43  ;;  %v5542_v2 = vpop.f32.mrb[5].mxu0 }
 0x1f2   : > { %v5883_v5 = vadd.f32 %v5882_v30, %v5852_v0  ;;  %v7368_v6 = vadd.f32 %v5542_v2, %v2267_v58  ;;  %v5815_v7 = vadd.f32 %v7365_v57, %v5814_v16  ;;  %v7322_v8 = vpop.f32.mrb[6].mxu0 }
 0x1f3   : > { %5787 = vst [vmem:[%s8892_s21 + $0x30] sm:$0xff] %v7367_v1  ;;  %v7369_v9 = vadd.f32 %v7322_v8, %v7082_v18  ;;  %v5545_v10 = vpop.f32.mrb[7].mxu0  ;;  %v5856_v17 = vmul.f32 %v7367_v1, %v7367_v1 }
 0x1f4   : > { %5785 = vst [vmem:[%s8892_s21 + $0x20] sm:$0xff] %v7368_v6  ;;  %v5816_v11 = vadd.f32 %v7368_v6, %v5815_v7  ;;  %v5854_v13 = vmul.f32 %v7368_v6, %v7368_v6  ;;  %v5884_v14 = vadd.f32 %v5883_v5, %v5853_v3  ;;  %v7370_v38 = vadd.f32 %v5545_v10, %v2270_v12 }
 0x1f5   : > { %5788 = vst [vmem:[%s8892_s21 + $0x38] sm:$0xff] %v7369_v9  ;;  %v5857_v24 = vmul.f32 %v7369_v9, %v7369_v9 }
 0x1f6   : > { %v5885_v49 = vadd.f32 %v5884_v14, %v5854_v13  ;;  %5786 = vst [vmem:[%s8892_s21 + $0x28] sm:$0xff] %v7370_v38  ;;  %v5817_v47 = vadd.f32 %v7370_v38, %v5816_v11  ;;  %v5855_v15 = vmul.f32 %v7370_v38, %v7370_v38 }
 0x1f8   : > { %v5818_v19 = vadd.f32 %v7367_v1, %v5817_v47  ;;  %v5886_v20 = vadd.f32 %v5885_v49, %v5855_v15  ;;  %v7325_v21 = vpop.f32.mrb[8].mxu0 }
 0x1f9   : > { %v7371_v22 = vadd.f32 %v7325_v21, %v7085_v41  ;;  %v5558_v23 = vpop.f32.mrb[9].mxu0 }
 0x1fa   : > { %v5887_v25 = vadd.f32 %v5886_v20, %v5856_v17  ;;  %v7372_v26 = vadd.f32 %v5558_v23, %v2283_v44  ;;  %v5819_v28 = vadd.f32 %v7369_v9, %v5818_v19  ;;  %v7326_v31 = vpop.f32.mrb[10].mxu0 }
 0x1fb   : > { %5791 = vst [vmem:[%s8892_s21 + $0x50] sm:$0xff] %v7371_v22  ;;  %v7373_v32 = vadd.f32 %v7326_v31, %v7086_v4  ;;  %v5561_v34 = vpop.f32.mrb[11].mxu0  ;;  %v5860_v58 = vmul.f32 %v7371_v22, %v7371_v22 }
 0x1fc   : > { %5789 = vst [vmem:[%s8892_s21 + $0x40] sm:$0xff] %v7372_v26  ;;  %v5820_v35 = vadd.f32 %v7372_v26, %v5819_v28  ;;  %v5858_v39 = vmul.f32 %v7372_v26, %v7372_v26  ;;  %v5888_v40 = vadd.f32 %v5887_v25, %v5857_v24  ;;  %v7374_v27 = vadd.f32 %v5561_v34, %v8878_v45 }
 0x1fd   : > { %5792 = vst [vmem:[%s8892_s21 + $0x58] sm:$0xff] %v7373_v32  ;;  %v5861_v45 = vmul.f32 %v7373_v32, %v7373_v32 }
 0x1fe   : > { %v5889_v37 = vadd.f32 %v5888_v40, %v5858_v39  ;;  %5790 = vst [vmem:[%s8892_s21 + $0x48] sm:$0xff] %v7374_v27  ;;  %v5821_v46 = vadd.f32 %v7374_v27, %v5820_v35  ;;  %v5859_v52 = vmul.f32 %v7374_v27, %v7374_v27 }
 0x200   : > { %v5822_v18 = vadd.f32 %v7371_v22, %v5821_v46  ;;  %v5890_v12 = vadd.f32 %v5889_v37, %v5859_v52  ;;  %v7329_v41 = vpop.f32.mrb[12].mxu0 }
 0x201   : > { %v7375_v4 = vadd.f32 %v7329_v41, %v8880_v33  ;;  %v5574_v53 = vpop.f32.mrb[13].mxu0 }
 0x202   : > { %v7141_v42 = vpop.f32.mrb[16].mxu1  ;;  %v5891_v60 = vadd.f32 %v5890_v12, %v5860_v58  ;;  %v7376_v55 = vadd.f32 %v5574_v53, %v8882_v48  ;;  %v5823_v29 = vadd.f32 %v7373_v32, %v5822_v18  ;;  %v7330_v57 = vpop.f32.mrb[14].mxu0 }
 0x203   : > { %v3133_v43 = vpop.f32.mrb[17].mxu1  ;;  %5795 = vst [vmem:[%s8892_s21 + $0x70] sm:$0xff] %v7375_v4  ;;  %v7377_v59 = vadd.f32 %v7330_v57, %v8884_v50  ;;  %v5577_v61 = vpop.f32.mrb[15].mxu0  ;;  %v5864_v36 = vmul.f32 %v7375_v4, %v7375_v4 }
 0x204   : > { %v7142_v44 = vpop.f32.mrb[18].mxu1  ;;  %5793 = vst [vmem:[%s8892_s21 + $0x60] sm:$0xff] %v7376_v55  ;;  %v5824_v56 = vadd.f32 %v7376_v55, %v5823_v29  ;;  %v5862_v62 = vmul.f32 %v7376_v55, %v7376_v55  ;;  %v5892_v63 = vadd.f32 %v5891_v60, %v5861_v45  ;;  %v7378_v33 = vadd.f32 %v5577_v61, %v8886_v51 }
 0x205   : > { %v3136_v54 = vpop.f32.mrb[19].mxu1  ;;  %5796 = vst [vmem:[%s8892_s21 + $0x78] sm:$0xff] %v7377_v59  ;;  %v5865_v7 = vmul.f32 %v7377_v59, %v7377_v59 }
 0x206   : > { %v5893_v0 = vadd.f32 %v5892_v63, %v5862_v62  ;;  %5794 = vst [vmem:[%s8892_s21 + $0x68] sm:$0xff] %v7378_v33  ;;  %v5825_v16 = vadd.f32 %v7378_v33, %v5824_v56  ;;  %v5863_v30 = vmul.f32 %v7378_v33, %v7378_v33 }
 0x208   : > { %v5826_v48 = vadd.f32 %v7375_v4, %v5825_v16  ;;  %v5894_v1 = vadd.f32 %v5893_v0, %v5863_v30  ;;  %v7333_v2 = vpop.f32.mrb[16].mxu0 }
 0x209   : > { %v7379_v50 = vadd.f32 %v7333_v2, %v7141_v42  ;;  %v5590_v5 = vpop.f32.mrb[17].mxu0 }
 0x20a   : > { %v7145_v3 = vpop.f32.mrb[20].mxu1  ;;  %v5895_v8 = vadd.f32 %v5894_v1, %v5864_v36  ;;  %v7380_v51 = vadd.f32 %v5590_v5, %v3133_v43  ;;  %v5827_v9 = vadd.f32 %v7377_v59, %v5826_v48  ;;  %v7334_v10 = vpop.f32.mrb[18].mxu0 }
 0x20b   : > { %v3149_v6 = vpop.f32.mrb[21].mxu1  ;;  %5799 = vst [vmem:[%s8892_s21 + $0x90] sm:$0xff] %v7379_v50  ;;  %v7381_v13 = vadd.f32 %v7334_v10, %v7142_v44  ;;  %v5593_v14 = vpop.f32.mrb[19].mxu0  ;;  %v5868_v22 = vmul.f32 %v7379_v50, %v7379_v50 }
 0x20c   : > { %v7146_v11 = vpop.f32.mrb[22].mxu1  ;;  %5797 = vst [vmem:[%s8892_s21 + $0x80] sm:$0xff] %v7380_v51  ;;  %v5828_v49 = vadd.f32 %v7380_v51, %v5827_v9  ;;  %v5866_v47 = vmul.f32 %v7380_v51, %v7380_v51  ;;  %v5896_v15 = vadd.f32 %v5895_v8, %v5865_v7  ;;  %v7382_v17 = vadd.f32 %v5593_v14, %v3136_v54 }
 0x20d   : > { %v3152_v38 = vpop.f32.mrb[23].mxu1  ;;  %5800 = vst [vmem:[%s8892_s21 + $0x98] sm:$0xff] %v7381_v13  ;;  %v5869_v31 = vmul.f32 %v7381_v13, %v7381_v13 }
 0x20e   : > { %v5897_v19 = vadd.f32 %v5896_v15, %v5866_v47  ;;  %5798 = vst [vmem:[%s8892_s21 + $0x88] sm:$0xff] %v7382_v17  ;;  %v5829_v20 = vadd.f32 %v7382_v17, %v5828_v49  ;;  %v5867_v21 = vmul.f32 %v7382_v17, %v7382_v17 }
 0x210   : > { %v5830_v23 = vadd.f32 %v7379_v50, %v5829_v20  ;;  %v5898_v24 = vadd.f32 %v5897_v19, %v5867_v21  ;;  %v7337_v25 = vpop.f32.mrb[20].mxu0 }
 0x211   : > { %v7383_v26 = vadd.f32 %v7337_v25, %v7145_v3  ;;  %v5606_v28 = vpop.f32.mrb[21].mxu0 }
 0x212   : > { %v5899_v32 = vadd.f32 %v5898_v24, %v5868_v22  ;;  %v7384_v34 = vadd.f32 %v5606_v28, %v3149_v6  ;;  %v5831_v35 = vadd.f32 %v7381_v13, %v5830_v23  ;;  %v7338_v39 = vpop.f32.mrb[22].mxu0  ;;  %v7149_v43 = vpop.f32.mrb[24].mxu1 }
 0x213   : > { %5803 = vst [vmem:[%s8892_s21 + $0xb0] sm:$0xff] %v7383_v26  ;;  %v7385_v40 = vadd.f32 %v7338_v39, %v7146_v11  ;;  %v5609_v27 = vpop.f32.mrb[23].mxu0  ;;  %v3165_v58 = vpop.f32.mrb[25].mxu1  ;;  %v5872_v53 = vmul.f32 %v7383_v26, %v7383_v26 }
 0x214   : > { %5801 = vst [vmem:[%s8892_s21 + $0xa0] sm:$0xff] %v7384_v34  ;;  %v5832_v37 = vadd.f32 %v7384_v34, %v5831_v35  ;;  %v5870_v46 = vmul.f32 %v7384_v34, %v7384_v34  ;;  %v5900_v52 = vadd.f32 %v5899_v32, %v5869_v31  ;;  %v7386_v42 = vadd.f32 %v5609_v27, %v3152_v38  ;;  %v7150_v44 = vpop.f32.mrb[26].mxu1 }
 0x215   : > { %5804 = vst [vmem:[%s8892_s21 + $0xb8] sm:$0xff] %v7385_v40  ;;  %v3168_v4 = vpop.f32.mrb[27].mxu1  ;;  %v5873_v57 = vmul.f32 %v7385_v40, %v7385_v40 }
 0x216   : > { %v5901_v18 = vadd.f32 %v5900_v52, %v5870_v46  ;;  %5802 = vst [vmem:[%s8892_s21 + $0xa8] sm:$0xff] %v7386_v42  ;;  %v5833_v12 = vadd.f32 %v7386_v42, %v5832_v37  ;;  %v5871_v41 = vmul.f32 %v7386_v42, %v7386_v42 }
 0x218   : > { %v5834_v54 = vadd.f32 %v7383_v26, %v5833_v12  ;;  %v5902_v45 = vadd.f32 %v5901_v18, %v5871_v41  ;;  %v7341_v60 = vpop.f32.mrb[24].mxu0 }
 0x219   : > { %v7387_v55 = vadd.f32 %v7341_v60, %v7149_v43  ;;  %v5622_v29 = vpop.f32.mrb[25].mxu0 }
 0x21a   : > { %v5903_v59 = vadd.f32 %v5902_v45, %v5872_v53  ;;  %v7388_v61 = vadd.f32 %v5622_v29, %v3165_v58  ;;  %v5835_v56 = vadd.f32 %v7385_v40, %v5834_v54  ;;  %v7342_v62 = vpop.f32.mrb[26].mxu0 }
 0x21b   : > { %5807 = vst [vmem:[%s8892_s21 + $0xd0] sm:$0xff] %v7387_v55  ;;  %v7389_v63 = vadd.f32 %v7342_v62, %v7150_v44  ;;  %v5625_v33 = vpop.f32.mrb[27].mxu0  ;;  %v5876_v3 = vmul.f32 %v7387_v55, %v7387_v55 }
 0x21c   : > { %5805 = vst [vmem:[%s8892_s21 + $0xc0] sm:$0xff] %v7388_v61  ;;  %v5836_v0 = vadd.f32 %v7388_v61, %v5835_v56  ;;  %v5874_v16 = vmul.f32 %v7388_v61, %v7388_v61  ;;  %v5904_v30 = vadd.f32 %v5903_v59, %v5873_v57  ;;  %v7390_v36 = vadd.f32 %v5625_v33, %v3168_v4  ;;  %v7153_v6 = vpop.f32.mrb[28].mxu1 }
 0x21d   : > { %5808 = vst [vmem:[%s8892_s21 + $0xd8] sm:$0xff] %v7389_v63  ;;  %v3181_v51 = vpop.f32.mrb[29].mxu1  ;;  %v5877_v10 = vmul.f32 %v7389_v63, %v7389_v63 }
 0x21e   : > { %v5905_v48 = vadd.f32 %v5904_v30, %v5874_v16  ;;  %5806 = vst [vmem:[%s8892_s21 + $0xc8] sm:$0xff] %v7390_v36  ;;  %v5837_v1 = vadd.f32 %v7390_v36, %v5836_v0  ;;  %v5875_v2 = vmul.f32 %v7390_v36, %v7390_v36  ;;  %v7154_v38 = vpop.f32.mrb[30].mxu1 }
 0x21f   : > { %v3184_v15 = vpop.f32.mrb[31].mxu1 }
 0x220   : > { %v5838_v50 = vadd.f32 %v7387_v55, %v5837_v1  ;;  %v5906_v5 = vadd.f32 %v5905_v48, %v5875_v2  ;;  %v7345_v7 = vpop.f32.mrb[28].mxu0 }
 0x221   : > { %v7391_v8 = vadd.f32 %v7345_v7, %v7153_v6  ;;  %v5638_v9 = vpop.f32.mrb[29].mxu0 }
 0x222   : > { %v5907_v11 = vadd.f32 %v5906_v5, %v5876_v3  ;;  %v7392_v13 = vadd.f32 %v5638_v9, %v3181_v51  ;;  %v5839_v14 = vadd.f32 %v7389_v63, %v5838_v50  ;;  %v7346_v49 = vpop.f32.mrb[30].mxu0 }
 0x223   : > { %5811 = vst [vmem:[%s8892_s21 + $0xf0] sm:$0xff] %v7391_v8  ;;  %v7393_v47 = vadd.f32 %v7346_v49, %v7154_v38  ;;  %v5641_v17 = vpop.f32.mrb[31].mxu0  ;;  %v5880_v26 = vmul.f32 %v7391_v8, %v7391_v8 }
 0x224   : > { %5809 = vst [vmem:[%s8892_s21 + $0xe0] sm:$0xff] %v7392_v13  ;;  %v5840_v19 = vadd.f32 %v7392_v13, %v5839_v14  ;;  %v5878_v20 = vmul.f32 %v7392_v13, %v7392_v13  ;;  %v5908_v21 = vadd.f32 %v5907_v11, %v5877_v10  ;;  %v7394_v22 = vadd.f32 %v5641_v17, %v3184_v15 }
 0x225   : > { %5812 = vst [vmem:[%s8892_s21 + $0xf8] sm:$0xff] %v7393_v47  ;;  %v5881_v32 = vmul.f32 %v7393_v47, %v7393_v47 }
 0x226   : > { %v5909_v23 = vadd.f32 %v5908_v21, %v5878_v20  ;;  %5810 = vst [vmem:[%s8892_s21 + $0xe8] sm:$0xff] %v7394_v22  ;;  %v5841_v24 = vadd.f32 %v7394_v22, %v5840_v19  ;;  %v5879_v25 = vmul.f32 %v7394_v22, %v7394_v22 }
 0x228   : > { %v5842_v28 = vadd.f32 %v7391_v8, %v5841_v24  ;;  %v5910_v31 = vadd.f32 %v5909_v23, %v5879_v25 }
 0x22a   : > { %v5843_v34 = vadd.f32 %v7393_v47, %v5842_v28  ;;  %v5911_v35 = vadd.f32 %v5910_v31, %v5880_v26 }
 0x22c   : > { %v5844_v39 = vrot.slane %v5843_v34, 4  ;;  %v5912_v40 = vadd.f32 %v5911_v35, %v5881_v32 }
 0x22e   : > { %v5845_v27 = vadd.f32 %v5844_v39, %v5843_v34  ;;  %v5913_v37 = vrot.slane %v5912_v40, 4 }
 0x230   : > { %v5846_v46 = vrot.slane %v5845_v27, 2  ;;  %v5914_v52 = vadd.f32 %v5913_v37, %v5912_v40 }
 0x232   : > { %v5847_v42 = vadd.f32 %v5846_v46, %v5845_v27  ;;  %v5915_v43 = vrot.slane %v5914_v52, 2 }
 0x234   : > { %v5848_v58 = vrot.slane %v5847_v42, 1  ;;  %v5916_v18 = vadd.f32 %v5915_v43, %v5914_v52 }
 0x236   : > { %v5849_v12 = vadd.f32 %v5848_v58, %v5847_v42  ;;  %v5917_v41 = vrot.slane %v5916_v18, 1 }
 0x238   : > { %v5918_v44 = vadd.f32 %v5917_v41, %v5916_v18  ;;  %5919 = vst [vmem:[%s214_s25] sm:$0xff] %v5849_v12 }
 0x23a   : > { %5920 = vst [vmem:[%s218_s28] sm:$0xff] %v5918_v44 }
 0x23b PF: > { %s15_s15 = sadd.s32 1, %s7762_s15  }
 0x23c   : > { %p12_p4 = scmp.ge.s32.totalorder %s15_s15, 6  }
 0x23e   :  { %14 = sbr.rel (!%p12_p4) target bundleno = 1 (0x1), region = 92 }

</bundles_post_ra>
